<compile_context>
chip_gen: v7x
topology: tpu7x:2x2x1
jax: 0.10.0
libtpu: 0.0.40
codegen_flags: <defaults>
</compile_context>

<pallas_src>
import functools

import jax
import jax.numpy as jnp
import numpy as np
from jax.experimental import pallas as pl
from jax.experimental.pallas import tpu as pltpu


# -----------------------------------------------------------------------------
# Pallas kernel: TB molecules per grid step, full WLN depth unrolled.
# -----------------------------------------------------------------------------
def wln_kernel(
    atom_f_ref,     # (TB*N,  A)   f32
    bond_f_ref,     # (TB*Nb, Bf)  f32
    side_ref,       # (TB*NM, 4)   int32 [atom_idx, bond_idx, nei_mask, 0]
    mask_atom_ref,  # (TB*N,  1)   f32
    w1_ref,         # (A, H)
    w_loop_ref,     # (H, 2H)   [w_nei_a | w_atom_s]
    w_bond_ref,     # (Bf, 2H)  [w_nei_b | w2b]
    b_nei_ref,      # (1, H)
    w_atom_n_ref,   # (H, H)
    b_atom_ref,     # (1, H)
    w_fin_ref,      # (H, 2H)   [w2a | w2]
    out_ref,        # (TB*N, H)
    *,
    depth: int,
    maxnb: int,
):
    f32 = jnp.float32
    TBN = atom_f_ref.shape[0]
    TBNb = bond_f_ref.shape[0]
    TBNM = side_ref.shape[0]
    H = w1_ref.shape[1]

    # ---- hoisted ref reads / broadcasts (once, not per depth iteration) ------
    w1 = w1_ref[...]
    w_loop = w_loop_ref[...]
    w_bond = w_bond_ref[...]
    b_nei = b_nei_ref[...]
    w_atom_n = w_atom_n_ref[...]
    b_atom_full = jnp.broadcast_to(b_atom_ref[...], (TBN, H))
    w_fin = w_fin_ref[...]

    side = side_ref[...]
    ag = side[:, 0:1]                     # (TBNM, 1) int32  block-local atom row
    bg = side[:, 1:2]                     # (TBNM, 1) int32  block-local bond row
    mnei = side[:, 2:3].astype(f32)       # (TBNM, 1) f32    neighbor mask
    matom = mask_atom_ref[...]            # (TBN, 1)  f32    atom mask

    # ---- fc1 (no bias) + relu -------------------------------------------------
    atom_feats = jnp.maximum(
        jnp.dot(atom_f_ref[...], w1, preferred_element_type=f32), 0.0
    )  # (TBN, H)

    # ---- one-hot gather matrices (exact row gathers, built once per step) -----
    col_b = jax.lax.broadcasted_iota(jnp.int32, (TBNM, TBNb), 1)
    oh_bond = (col_b == bg).astype(f32)                                   # (TBNM, TBNb)
    col_a = jax.lax.broadcasted_iota(jnp.int32, (TBNM, TBN), 1)
    oh_atom = (col_a == ag).astype(f32)                                   # (TBNM, TBN)

    # ---- loop-invariant bond terms: project-then-gather, fused RHS, hoisted ---
    bond_pw = jnp.dot(bond_f_ref[...], w_bond, preferred_element_type=f32)   # (TBNb, 2H)
    bond_proj = jnp.dot(oh_bond, bond_pw, preferred_element_type=f32)        # (TBNM, 2H)
    bn_final = bond_proj[:, H:]                                              # bondnei @ w2b
    if depth > 1:
        bond_contrib = bond_proj[:, :H] + b_nei                              # bondnei @ w_nei_b + b

    # ---- neighbor-sum pooling: block rows are (neighbor, molecule, atom) ------
    # ordered, so the maxnb-way sum is maxnb sublane-aligned slice adds (VPU),
    # replacing the old (TBN,TBNM)@(TBNM,H) pool matmul entirely.
    def pool_sum(x):                                   # (TBNM, H) -> (TBN, H)
        s = x[0:TBN, :]
        for j in range(1, maxnb):
            s = s + x[j * TBN:(j + 1) * TBN, :]
        return s

    # ---- graph-conv iterations (project-then-gather, fused RHS) ---------------
    # NOTE: for much larger depth, switch to lax.fori_loop to bound live ranges.
    for _ in range(depth - 1):
        proj = jnp.dot(atom_feats, w_loop, preferred_element_type=f32)       # (TBN, 2H)
        atomnei = jnp.dot(oh_atom, proj[:, :H], preferred_element_type=f32)  # (TBNM, H)
        nei = jnp.maximum(atomnei + bond_contrib, 0.0) * mnei
        nei_sum = pool_sum(nei)                                              # (TBN, H)
        atom_feats = jnp.maximum(
            proj[:, H:]
            + jnp.dot(nei_sum, w_atom_n, preferred_element_type=f32)
            + b_atom_full,
            0.0,
        )

    # ---- final iteration --------------------------------------------------------
    projf = jnp.dot(atom_feats, w_fin, preferred_element_type=f32)           # (TBN, 2H)
    an = jnp.dot(oh_atom, projf[:, :H], preferred_element_type=f32)          # (TBNM, H)
    nei_sum = pool_sum(an * bn_final * mnei)                                 # (TBN, H)
    out_ref[...] = projf[:, H:] * nei_sum * matom


# -----------------------------------------------------------------------------
# Wrapper
# -----------------------------------------------------------------------------
def _ceil_to(x, m):
    return ((x + m - 1) // m) * m


def wln_forward(atom_feats, bond_feats, atom_graph, bond_graph,
                num_nbs, n_atoms, mask_neis, mask_atoms, params, depth,
                batch_block=8):
    # num_nbs / n_atoms are accepted for interface fidelity but (as in the
    # PyTorch forward) not used directly — the masks carry that information.
    del num_nbs, n_atoms
    B, N, A = atom_feats.shape
    _, Nb, Bf = bond_feats.shape
    MAXNB = atom_graph.shape[-1]
    H = params["w1"].shape[1]

    # ---- choose molecules per grid step; keep >=2 steps so v7x's 2 TCs both work
    TB = max(1, min(batch_block, B))
    if B > 1 and TB >= B:
        TB = (B + 1) // 2
    Bp = _ceil_to(B, TB)

    # ---- pad N / Nb to multiples of 8 so block rows obey the (8,128) rule ------
    Np = _ceil_to(N, 8)
    Nbp = _ceil_to(Nb, 8)
    NM = Np * MAXNB

    def pad_to(x, shape):
        return jnp.pad(x, [(0, t - s) for s, t in zip(x.shape, shape)])

    atom_feats = pad_to(atom_feats.astype(jnp.float32), (Bp, Np, A))
    bond_feats = pad_to(bond_feats.astype(jnp.float32), (Bp, Nbp, Bf))
    atom_graph = pad_to(atom_graph.astype(jnp.int32), (Bp, Np, MAXNB))
    bond_graph = pad_to(bond_graph.astype(jnp.int32), (Bp, Np, MAXNB))
    mask_neis = pad_to(mask_neis.astype(jnp.int32), (Bp, Np, MAXNB))
    mask_atoms = pad_to(mask_atoms.astype(jnp.float32), (Bp, Np))

    # ---- block-local flattened row offsets + neighbor-major block reordering ---
    loc = jnp.arange(Bp, dtype=jnp.int32) % TB
    ag = atom_graph + (loc * Np)[:, None, None]
    bg = bond_graph + (loc * Nbp)[:, None, None]

    def block_reorder(x):   # (Bp, Np, MAXNB) -> (Bp*NM,) in (block, nbr, mol, atom) order
        x = x.reshape(Bp // TB, TB, Np, MAXNB)
        x = jnp.transpose(x, (0, 3, 1, 2))
        return x.reshape(Bp * NM)

    # lane-pack the three per-neighbor side inputs into one int32 slab
    side = jnp.stack(
        [block_reorder(ag), block_reorder(bg), block_reorder(mask_neis),
         jnp.zeros((Bp * NM,), jnp.int32)], axis=-1)                  # (Bp*NM, 4)

    af = atom_feats.reshape(Bp * Np, A)
    bf = bond_feats.reshape(Bp * Nbp, Bf)
    matom = mask_atoms.reshape(Bp * Np, 1)

    # ---- fuse shared-LHS weights along the lane axis ----------------------------
    w_nei = params["w_nei"]            # (H+Bf, H)
    w_atom = params["w_atom"]          # (2H, H)
    w_loop = jnp.concatenate([w_nei[:H], w_atom[:H]], axis=1)         # (H, 2H)
    w_bond = jnp.concatenate([w_nei[H:], params["w2b"]], axis=1)      # (Bf, 2H)
    w_fin = jnp.concatenate([params["w2a"], params["w2"]], axis=1)    # (H, 2H)
    w_atom_n = w_atom[H:]                                             # (H, H)

    rowblk = lambda rows, cols: pl.BlockSpec((rows, cols), lambda i: (i, 0))
    shared = lambda shape: pl.BlockSpec(shape, lambda i: (0, 0))

    kernel = functools.partial(wln_kernel, depth=depth, maxnb=MAXNB)

    out_flat = pl.pallas_call(
        kernel,
        out_shape=jax.ShapeDtypeStruct((Bp * Np, H), jnp.float32),
        grid_spec=pltpu.PrefetchScalarGridSpec(
            num_scalar_prefetch=0,
            grid=(Bp // TB,),
            in_specs=[
                rowblk(TB * Np, A),         # atom feats
                rowblk(TB * Nbp, Bf),       # bond feats
                rowblk(TB * NM, 4),         # packed [atom idx, bond idx, nei mask, 0]
                rowblk(TB * Np, 1),         # atom mask
                shared((A, H)),             # w1
                shared((H, 2 * H)),         # [w_nei_a | w_atom_s]
                shared((Bf, 2 * H)),        # [w_nei_b | w2b]
                shared((1, H)),             # b_nei
                shared((H, H)),             # w_atom (neighbor part)
                shared((1, H)),             # b_atom
                shared((H, 2 * H)),         # [w2a | w2]
            ],
            out_specs=rowblk(TB * Np, H),
        ),
        compiler_params=pltpu.CompilerParams(
            dimension_semantics=("parallel",)),
    )(
        af, bf, side, matom,
        params["w1"], w_loop, w_bond, params["b_nei"],
        w_atom_n, params["b_atom"], w_fin,
    )
    return out_flat.reshape(Bp, Np, H)[:B, :N]


# -----------------------------------------------------------------------------
# Pure-JAX reference (mirrors the PyTorch forward)
# -----------------------------------------------------------------------------
def wln_reference(atom_feats, bond_feats, atom_graph, bond_graph,
                  mask_neis, mask_atoms, p, depth):
    af = jax.nn.relu(atom_feats @ p["w1"])
    bondnei = jax.vmap(lambda x, g: x[g])(bond_feats, bond_graph)
    local = None
    for d in range(depth):
        atomnei = jax.vmap(lambda x, g: x[g])(af, atom_graph)
        if d + 1 == depth:
            an = atomnei @ p["w2a"]
            bn = bondnei @ p["w2b"]
            nei = jnp.where(mask_neis[..., None], an * bn, 0.0).sum(-2)
            self_f = af @ p["w2"]
            local = jnp.where(mask_atoms[..., None], self_f * nei, 0.0)
        else:
            nei = jax.nn.relu(
                jnp.concatenate([atomnei, bondnei], -1) @ p["w_nei"]
                + p["b_nei"][0])
            nei = jnp.where(mask_neis[..., None], nei, 0.0).sum(-2)
            af = jax.nn.relu(
                jnp.concatenate([af, nei], -1) @ p["w_atom"] + p["b_atom"][0])
    return local


# -----------------------------------------------------------------------------
# Main
# -----------------------------------------------------------------------------
if __name__ == "__main__":
    B, N, MAXNB = 16, 16, 4
    A, Bf, H = 16, 8, 32          # afeats_size, bfeats_size, hidden_size
    Nb = 20                        # number of bonds per molecule
    DEPTH = 3
    TB = 8                         # molecules per grid step -> grid of 2 steps

    key = jax.random.PRNGKey(0)
    ks = jax.random.split(key, 16)

    params = {
        "w1":     jax.random.normal(ks[0], (A, H), jnp.float32) * 0.2,
        "w_nei":  jax.random.normal(ks[1], (H + Bf, H), jnp.float32) * 0.2,
        "b_nei":  jax.random.normal(ks[2], (1, H), jnp.float32) * 0.1,
        "w_atom": jax.random.normal(ks[3], (2 * H, H), jnp.float32) * 0.2,
        "b_atom": jax.random.normal(ks[4], (1, H), jnp.float32) * 0.1,
        "w2a":    jax.random.normal(ks[5], (H, H), jnp.float32) * 0.2,
        "w2b":    jax.random.normal(ks[6], (Bf, H), jnp.float32) * 0.2,
        "w2":     jax.random.normal(ks[7], (H, H), jnp.float32) * 0.2,
    }

    atom_feats = jax.random.normal(ks[8], (B, N, A), jnp.float32)
    bond_feats = jax.random.normal(ks[9], (B, Nb, Bf), jnp.float32)
    atom_graph = jax.random.randint(ks[10], (B, N, MAXNB), 0, N, jnp.int32)
    bond_graph = jax.random.randint(ks[11], (B, N, MAXNB), 0, Nb, jnp.int32)
    num_nbs = jax.random.randint(ks[12], (B, N), 1, MAXNB + 1, jnp.int32)
    n_atoms = jax.random.randint(ks[13], (B,), N // 2, N + 1, jnp.int32)

    mask_neis = (jnp.arange(MAXNB)[None, None, :] < num_nbs[..., None])   # (B,N,MAXNB)
    mask_atoms = (jnp.arange(N)[None, :] < n_atoms[:, None])              # (B,N)

    out = wln_forward(atom_feats, bond_feats, atom_graph, bond_graph,
                      num_nbs, n_atoms, mask_neis, mask_atoms, params, DEPTH,
                      batch_block=TB)
    out = jax.block_until_ready(out)

    ref = wln_reference(atom_feats, bond_feats, atom_graph, bond_graph,
                        mask_neis, mask_atoms, params, DEPTH)
    np.testing.assert_allclose(np.asarray(out), np.asarray(ref),
                               rtol=2e-4, atol=2e-4)

    print("KERNEL_OK")
</pallas_src>

<mosaic_0001>
module attributes {stable_mosaic.version = 11 : i64} {
  func.func @wln_kernel(%arg0: i32, %arg1: memref<128x16xf32, #tpu.memory_space<vmem>>, %arg2: memref<192x8xf32, #tpu.memory_space<vmem>>, %arg3: memref<512x4xi32, #tpu.memory_space<vmem>>, %arg4: memref<128x1xf32, #tpu.memory_space<vmem>>, %arg5: memref<16x32xf32, #tpu.memory_space<vmem>>, %arg6: memref<32x64xf32, #tpu.memory_space<vmem>>, %arg7: memref<8x64xf32, #tpu.memory_space<vmem>>, %arg8: memref<1x32xf32, #tpu.memory_space<vmem>>, %arg9: memref<32x32xf32, #tpu.memory_space<vmem>>, %arg10: memref<1x32xf32, #tpu.memory_space<vmem>>, %arg11: memref<32x64xf32, #tpu.memory_space<vmem>>, %arg12: memref<128x32xf32, #tpu.memory_space<vmem>>) attributes {dimension_semantics = [#tpu.dimension_semantics<parallel>], iteration_bounds = array<i64: 2>, scalar_prefetch = 0 : i64, scratch_operands = 0 : i64, tpu.core_type = #tpu.core_type<tc>, window_params = [{transform_indices = @transform_0, window_bounds = array<i64: 128, 16>}, {transform_indices = @transform_1, window_bounds = array<i64: 192, 8>}, {transform_indices = @transform_2, window_bounds = array<i64: 512, 4>}, {transform_indices = @transform_3, window_bounds = array<i64: 128, 1>}, {pipeline_mode = #tpu.pipeline_mode<synchronous>, transform_indices = @transform_4, window_bounds = array<i64: 16, 32>}, {pipeline_mode = #tpu.pipeline_mode<synchronous>, transform_indices = @transform_5, window_bounds = array<i64: 32, 64>}, {pipeline_mode = #tpu.pipeline_mode<synchronous>, transform_indices = @transform_6, window_bounds = array<i64: 8, 64>}, {pipeline_mode = #tpu.pipeline_mode<synchronous>, transform_indices = @transform_7, window_bounds = array<i64: 1, 32>}, {pipeline_mode = #tpu.pipeline_mode<synchronous>, transform_indices = @transform_8, window_bounds = array<i64: 32, 32>}, {pipeline_mode = #tpu.pipeline_mode<synchronous>, transform_indices = @transform_9, window_bounds = array<i64: 1, 32>}, {pipeline_mode = #tpu.pipeline_mode<synchronous>, transform_indices = @transform_10, window_bounds = array<i64: 32, 64>}, {transform_indices = @transform_11, window_bounds = array<i64: 128, 32>}]} {
    %c0 = arith.constant 0 : index
    %c0_0 = arith.constant 0 : index
    %0 = vector.load %arg5[%c0, %c0_0] : memref<16x32xf32, #tpu.memory_space<vmem>>, vector<16x32xf32>
    %c0_1 = arith.constant 0 : index
    %c0_2 = arith.constant 0 : index
    %1 = vector.load %arg6[%c0_1, %c0_2] : memref<32x64xf32, #tpu.memory_space<vmem>>, vector<32x64xf32>
    %c0_3 = arith.constant 0 : index
    %c0_4 = arith.constant 0 : index
    %2 = vector.load %arg7[%c0_3, %c0_4] : memref<8x64xf32, #tpu.memory_space<vmem>>, vector<8x64xf32>
    %c0_5 = arith.constant 0 : index
    %c0_6 = arith.constant 0 : index
    %3 = vector.load %arg8[%c0_5, %c0_6] : memref<1x32xf32, #tpu.memory_space<vmem>>, vector<1x32xf32>
    %c0_7 = arith.constant 0 : index
    %c0_8 = arith.constant 0 : index
    %4 = vector.load %arg9[%c0_7, %c0_8] : memref<32x32xf32, #tpu.memory_space<vmem>>, vector<32x32xf32>
    %c0_9 = arith.constant 0 : index
    %c0_10 = arith.constant 0 : index
    %5 = vector.load %arg10[%c0_9, %c0_10] : memref<1x32xf32, #tpu.memory_space<vmem>>, vector<1x32xf32>
    %6 = vector.shape_cast %5 : vector<1x32xf32> to vector<1x32xf32>
    %7 = vector.broadcast %6 : vector<1x32xf32> to vector<128x32xf32>
    %c0_11 = arith.constant 0 : index
    %c0_12 = arith.constant 0 : index
    %8 = vector.load %arg11[%c0_11, %c0_12] : memref<32x64xf32, #tpu.memory_space<vmem>>, vector<32x64xf32>
    %c0_13 = arith.constant 0 : index
    %c0_14 = arith.constant 0 : index
    %9 = vector.load %arg3[%c0_13, %c0_14] : memref<512x4xi32, #tpu.memory_space<vmem>>, vector<512x4xi32>
    %10 = vector.extract_strided_slice %9 {offsets = [0, 0], sizes = [512, 1], strides = [1, 1]} : vector<512x4xi32> to vector<512x1xi32>
    %11 = vector.extract_strided_slice %9 {offsets = [0, 1], sizes = [512, 1], strides = [1, 1]} : vector<512x4xi32> to vector<512x1xi32>
    %12 = vector.extract_strided_slice %9 {offsets = [0, 2], sizes = [512, 1], strides = [1, 1]} : vector<512x4xi32> to vector<512x1xi32>
    %13 = arith.sitofp %12 : vector<512x1xi32> to vector<512x1xf32>
    %c0_15 = arith.constant 0 : index
    %c0_16 = arith.constant 0 : index
    %14 = vector.load %arg4[%c0_15, %c0_16] : memref<128x1xf32, #tpu.memory_space<vmem>>, vector<128x1xf32>
    %c0_17 = arith.constant 0 : index
    %c0_18 = arith.constant 0 : index
    %15 = vector.load %arg1[%c0_17, %c0_18] : memref<128x16xf32, #tpu.memory_space<vmem>>, vector<128x16xf32>
    %cst = arith.constant dense<0.000000e+00> : vector<128x32xf32>
    %16 = tpu.matmul %15, %0, %cst {dimension_numbers = #tpu.dot_dimension_numbers<[1], [0], [0], [1], [0, 0, 1, 1], [], []>} : vector<128x16xf32>, vector<16x32xf32>, vector<128x32xf32> -> vector<128x32xf32>
    %cst_19 = arith.constant 0.000000e+00 : f32
    %17 = vector.broadcast %cst_19 : f32 to vector<128x32xf32>
    %18 = arith.maximumf %16, %17 : vector<128x32xf32>
    %19 = tpu.iota {dimensions = array<i32: 1>} : vector<512x192xi32>
    %20 = vector.broadcast %11 : vector<512x1xi32> to vector<512x192xi32>
    %21 = arith.cmpi eq, %19, %20 : vector<512x192xi32>
    %22 = arith.extui %21 : vector<512x192xi1> to vector<512x192xi32>
    %23 = arith.sitofp %22 : vector<512x192xi32> to vector<512x192xf32>
    %24 = tpu.iota {dimensions = array<i32: 1>} : vector<512x128xi32>
    %25 = vector.broadcast %10 : vector<512x1xi32> to vector<512x128xi32>
    %26 = arith.cmpi eq, %24, %25 : vector<512x128xi32>
    %27 = arith.extui %26 : vector<512x128xi1> to vector<512x128xi32>
    %28 = arith.sitofp %27 : vector<512x128xi32> to vector<512x128xf32>
    %c0_20 = arith.constant 0 : index
    %c0_21 = arith.constant 0 : index
    %29 = vector.load %arg2[%c0_20, %c0_21] : memref<192x8xf32, #tpu.memory_space<vmem>>, vector<192x8xf32>
    %cst_22 = arith.constant dense<0.000000e+00> : vector<192x64xf32>
    %30 = tpu.matmul %29, %2, %cst_22 {dimension_numbers = #tpu.dot_dimension_numbers<[1], [0], [0], [1], [0, 0, 1, 1], [], []>} : vector<192x8xf32>, vector<8x64xf32>, vector<192x64xf32> -> vector<192x64xf32>
    %cst_23 = arith.constant dense<0.000000e+00> : vector<512x64xf32>
    %31 = tpu.matmul %23, %30, %cst_23 {dimension_numbers = #tpu.dot_dimension_numbers<[1], [0], [0], [1], [0, 0, 1, 1], [], []>} : vector<512x192xf32>, vector<192x64xf32>, vector<512x64xf32> -> vector<512x64xf32>
    %32 = vector.extract_strided_slice %31 {offsets = [0, 32], sizes = [512, 32], strides = [1, 1]} : vector<512x64xf32> to vector<512x32xf32>
    %33 = vector.extract_strided_slice %31 {offsets = [0, 0], sizes = [512, 32], strides = [1, 1]} : vector<512x64xf32> to vector<512x32xf32>
    %34 = vector.broadcast %3 : vector<1x32xf32> to vector<512x32xf32>
    %35 = arith.addf %33, %34 : vector<512x32xf32>
    %cst_24 = arith.constant dense<0.000000e+00> : vector<128x64xf32>
    %36 = tpu.matmul %18, %1, %cst_24 {dimension_numbers = #tpu.dot_dimension_numbers<[1], [0], [0], [1], [0, 0, 1, 1], [], []>} : vector<128x32xf32>, vector<32x64xf32>, vector<128x64xf32> -> vector<128x64xf32>
    %37 = vector.extract_strided_slice %36 {offsets = [0, 0], sizes = [128, 32], strides = [1, 1]} : vector<128x64xf32> to vector<128x32xf32>
    %cst_25 = arith.constant dense<0.000000e+00> : vector<512x32xf32>
    %38 = tpu.matmul %28, %37, %cst_25 {dimension_numbers = #tpu.dot_dimension_numbers<[1], [0], [0], [1], [0, 0, 1, 1], [], []>} : vector<512x128xf32>, vector<128x32xf32>, vector<512x32xf32> -> vector<512x32xf32>
    %39 = arith.addf %38, %35 : vector<512x32xf32>
    %cst_26 = arith.constant 0.000000e+00 : f32
    %40 = vector.broadcast %cst_26 : f32 to vector<512x32xf32>
    %41 = arith.maximumf %39, %40 : vector<512x32xf32>
    %42 = vector.broadcast %13 : vector<512x1xf32> to vector<512x32xf32>
    %43 = arith.mulf %41, %42 : vector<512x32xf32>
    %44 = vector.extract_strided_slice %43 {offsets = [0, 0], sizes = [128, 32], strides = [1, 1]} : vector<512x32xf32> to vector<128x32xf32>
    %45 = vector.extract_strided_slice %43 {offsets = [128, 0], sizes = [128, 32], strides = [1, 1]} : vector<512x32xf32> to vector<128x32xf32>
    %46 = arith.addf %44, %45 : vector<128x32xf32>
    %47 = vector.extract_strided_slice %43 {offsets = [256, 0], sizes = [128, 32], strides = [1, 1]} : vector<512x32xf32> to vector<128x32xf32>
    %48 = arith.addf %46, %47 : vector<128x32xf32>
    %49 = vector.extract_strided_slice %43 {offsets = [384, 0], sizes = [128, 32], strides = [1, 1]} : vector<512x32xf32> to vector<128x32xf32>
    %50 = arith.addf %48, %49 : vector<128x32xf32>
    %51 = vector.extract_strided_slice %36 {offsets = [0, 32], sizes = [128, 32], strides = [1, 1]} : vector<128x64xf32> to vector<128x32xf32>
    %cst_27 = arith.constant dense<0.000000e+00> : vector<128x32xf32>
    %52 = tpu.matmul %50, %4, %cst_27 {dimension_numbers = #tpu.dot_dimension_numbers<[1], [0], [0], [1], [0, 0, 1, 1], [], []>} : vector<128x32xf32>, vector<32x32xf32>, vector<128x32xf32> -> vector<128x32xf32>
    %53 = arith.addf %51, %52 : vector<128x32xf32>
    %54 = arith.addf %53, %7 : vector<128x32xf32>
    %cst_28 = arith.constant 0.000000e+00 : f32
    %55 = vector.broadcast %cst_28 : f32 to vector<128x32xf32>
    %56 = arith.maximumf %54, %55 : vector<128x32xf32>
    %cst_29 = arith.constant dense<0.000000e+00> : vector<128x64xf32>
    %57 = tpu.matmul %56, %1, %cst_29 {dimension_numbers = #tpu.dot_dimension_numbers<[1], [0], [0], [1], [0, 0, 1, 1], [], []>} : vector<128x32xf32>, vector<32x64xf32>, vector<128x64xf32> -> vector<128x64xf32>
    %58 = vector.extract_strided_slice %57 {offsets = [0, 0], sizes = [128, 32], strides = [1, 1]} : vector<128x64xf32> to vector<128x32xf32>
    %cst_30 = arith.constant dense<0.000000e+00> : vector<512x32xf32>
    %59 = tpu.matmul %28, %58, %cst_30 {dimension_numbers = #tpu.dot_dimension_numbers<[1], [0], [0], [1], [0, 0, 1, 1], [], []>} : vector<512x128xf32>, vector<128x32xf32>, vector<512x32xf32> -> vector<512x32xf32>
    %60 = arith.addf %59, %35 : vector<512x32xf32>
    %cst_31 = arith.constant 0.000000e+00 : f32
    %61 = vector.broadcast %cst_31 : f32 to vector<512x32xf32>
    %62 = arith.maximumf %60, %61 : vector<512x32xf32>
    %63 = vector.broadcast %13 : vector<512x1xf32> to vector<512x32xf32>
    %64 = arith.mulf %62, %63 : vector<512x32xf32>
    %65 = vector.extract_strided_slice %64 {offsets = [0, 0], sizes = [128, 32], strides = [1, 1]} : vector<512x32xf32> to vector<128x32xf32>
    %66 = vector.extract_strided_slice %64 {offsets = [128, 0], sizes = [128, 32], strides = [1, 1]} : vector<512x32xf32> to vector<128x32xf32>
    %67 = arith.addf %65, %66 : vector<128x32xf32>
    %68 = vector.extract_strided_slice %64 {offsets = [256, 0], sizes = [128, 32], strides = [1, 1]} : vector<512x32xf32> to vector<128x32xf32>
    %69 = arith.addf %67, %68 : vector<128x32xf32>
    %70 = vector.extract_strided_slice %64 {offsets = [384, 0], sizes = [128, 32], strides = [1, 1]} : vector<512x32xf32> to vector<128x32xf32>
    %71 = arith.addf %69, %70 : vector<128x32xf32>
    %72 = vector.extract_strided_slice %57 {offsets = [0, 32], sizes = [128, 32], strides = [1, 1]} : vector<128x64xf32> to vector<128x32xf32>
    %cst_32 = arith.constant dense<0.000000e+00> : vector<128x32xf32>
    %73 = tpu.matmul %71, %4, %cst_32 {dimension_numbers = #tpu.dot_dimension_numbers<[1], [0], [0], [1], [0, 0, 1, 1], [], []>} : vector<128x32xf32>, vector<32x32xf32>, vector<128x32xf32> -> vector<128x32xf32>
    %74 = arith.addf %72, %73 : vector<128x32xf32>
    %75 = arith.addf %74, %7 : vector<128x32xf32>
    %cst_33 = arith.constant 0.000000e+00 : f32
    %76 = vector.broadcast %cst_33 : f32 to vector<128x32xf32>
    %77 = arith.maximumf %75, %76 : vector<128x32xf32>
    %cst_34 = arith.constant dense<0.000000e+00> : vector<128x64xf32>
    %78 = tpu.matmul %77, %8, %cst_34 {dimension_numbers = #tpu.dot_dimension_numbers<[1], [0], [0], [1], [0, 0, 1, 1], [], []>} : vector<128x32xf32>, vector<32x64xf32>, vector<128x64xf32> -> vector<128x64xf32>
    %79 = vector.extract_strided_slice %78 {offsets = [0, 0], sizes = [128, 32], strides = [1, 1]} : vector<128x64xf32> to vector<128x32xf32>
    %cst_35 = arith.constant dense<0.000000e+00> : vector<512x32xf32>
    %80 = tpu.matmul %28, %79, %cst_35 {dimension_numbers = #tpu.dot_dimension_numbers<[1], [0], [0], [1], [0, 0, 1, 1], [], []>} : vector<512x128xf32>, vector<128x32xf32>, vector<512x32xf32> -> vector<512x32xf32>
    %81 = arith.mulf %80, %32 : vector<512x32xf32>
    %82 = vector.broadcast %13 : vector<512x1xf32> to vector<512x32xf32>
    %83 = arith.mulf %81, %82 : vector<512x32xf32>
    %84 = vector.extract_strided_slice %83 {offsets = [0, 0], sizes = [128, 32], strides = [1, 1]} : vector<512x32xf32> to vector<128x32xf32>
    %85 = vector.extract_strided_slice %83 {offsets = [128, 0], sizes = [128, 32], strides = [1, 1]} : vector<512x32xf32> to vector<128x32xf32>
    %86 = arith.addf %84, %85 : vector<128x32xf32>
    %87 = vector.extract_strided_slice %83 {offsets = [256, 0], sizes = [128, 32], strides = [1, 1]} : vector<512x32xf32> to vector<128x32xf32>
    %88 = arith.addf %86, %87 : vector<128x32xf32>
    %89 = vector.extract_strided_slice %83 {offsets = [384, 0], sizes = [128, 32], strides = [1, 1]} : vector<512x32xf32> to vector<128x32xf32>
    %90 = arith.addf %88, %89 : vector<128x32xf32>
    %91 = vector.extract_strided_slice %78 {offsets = [0, 32], sizes = [128, 32], strides = [1, 1]} : vector<128x64xf32> to vector<128x32xf32>
    %92 = arith.mulf %91, %90 : vector<128x32xf32>
    %93 = vector.broadcast %14 : vector<128x1xf32> to vector<128x32xf32>
    %94 = arith.mulf %92, %93 : vector<128x32xf32>
    %c0_36 = arith.constant 0 : index
    %c0_37 = arith.constant 0 : index
    %95 = vector.load %arg12[%c0_36, %c0_37] : memref<128x32xf32, #tpu.memory_space<vmem>>, vector<128x32xf32>
    tpu.vector_store %arg12[%c0_36, %c0_37], %94 {strides = array<i32>} : memref<128x32xf32, #tpu.memory_space<vmem>>, vector<128x32xf32>,
    return
  }
  func.func @transform_0(%arg0: i32) -> (i32, i32) {
    %c0_i32 = arith.constant 0 : i32
    %c0_i32_0 = arith.constant 0 : i32
    return %arg0, %c0_i32 : i32, i32
  }
  func.func @transform_1(%arg0: i32) -> (i32, i32) {
    %c0_i32 = arith.constant 0 : i32
    %c0_i32_0 = arith.constant 0 : i32
    return %arg0, %c0_i32 : i32, i32
  }
  func.func @transform_2(%arg0: i32) -> (i32, i32) {
    %c0_i32 = arith.constant 0 : i32
    %c0_i32_0 = arith.constant 0 : i32
    return %arg0, %c0_i32 : i32, i32
  }
  func.func @transform_3(%arg0: i32) -> (i32, i32) {
    %c0_i32 = arith.constant 0 : i32
    %c0_i32_0 = arith.constant 0 : i32
    return %arg0, %c0_i32 : i32, i32
  }
  func.func @transform_4(%arg0: i32) -> (i32, i32) {
    %c0_i32 = arith.constant 0 : i32
    %c0_i32_0 = arith.constant 0 : i32
    %c0_i32_1 = arith.constant 0 : i32
    return %c0_i32, %c0_i32_0 : i32, i32
  }
  func.func @transform_5(%arg0: i32) -> (i32, i32) {
    %c0_i32 = arith.constant 0 : i32
    %c0_i32_0 = arith.constant 0 : i32
    %c0_i32_1 = arith.constant 0 : i32
    return %c0_i32, %c0_i32_0 : i32, i32
  }
  func.func @transform_6(%arg0: i32) -> (i32, i32) {
    %c0_i32 = arith.constant 0 : i32
    %c0_i32_0 = arith.constant 0 : i32
    %c0_i32_1 = arith.constant 0 : i32
    return %c0_i32, %c0_i32_0 : i32, i32
  }
  func.func @transform_7(%arg0: i32) -> (i32, i32) {
    %c0_i32 = arith.constant 0 : i32
    %c0_i32_0 = arith.constant 0 : i32
    %c0_i32_1 = arith.constant 0 : i32
    return %c0_i32, %c0_i32_0 : i32, i32
  }
  func.func @transform_8(%arg0: i32) -> (i32, i32) {
    %c0_i32 = arith.constant 0 : i32
    %c0_i32_0 = arith.constant 0 : i32
    %c0_i32_1 = arith.constant 0 : i32
    return %c0_i32, %c0_i32_0 : i32, i32
  }
  func.func @transform_9(%arg0: i32) -> (i32, i32) {
    %c0_i32 = arith.constant 0 : i32
    %c0_i32_0 = arith.constant 0 : i32
    %c0_i32_1 = arith.constant 0 : i32
    return %c0_i32, %c0_i32_0 : i32, i32
  }
  func.func @transform_10(%arg0: i32) -> (i32, i32) {
    %c0_i32 = arith.constant 0 : i32
    %c0_i32_0 = arith.constant 0 : i32
    %c0_i32_1 = arith.constant 0 : i32
    return %c0_i32, %c0_i32_0 : i32, i32
  }
  func.func @transform_11(%arg0: i32) -> (i32, i32) {
    %c0_i32 = arith.constant 0 : i32
    %c0_i32_0 = arith.constant 0 : i32
    return %arg0, %c0_i32 : i32, i32
  }
}

</mosaic_0001>

<bundles_post_ra>
// kernel: tpu_custom_call.1
= control target key start
LH: loop header
LB: loop body
LE: loop exit
PB: predicated region body
PF: predicated region fallthrough
CT: control target
= control target key end

     0   :  { %s8611_s17 = smov 0   ;;  %s12725_s0 = inlined_call_operand.vmem [shape: f32[256,16], index: 0, kind: input, shape index: {}]   ;;  %s12726_s1 = inlined_call_operand.vmem [shape: f32[384,8], index: 1, kind: input, shape index: {}]   ;;  %s12727_s2 = inlined_call_operand.vmem [shape: s32[1024,4], index: 2, kind: input, shape index: {}]   ;;  %s12728_s3 = inlined_call_operand.vmem [shape: f32[256,1], index: 3, kind: input, shape index: {}]   ;;  %s12729_s4 = inlined_call_operand.vmem [shape: f32[16,32], index: 4, kind: input, shape index: {}]   ;;  %s12730_s5 = inlined_call_operand.vmem [shape: f32[32,64], index: 5, kind: input, shape index: {}]   ;;  %s12731_s6 = inlined_call_operand.vmem [shape: f32[8,64], index: 6, kind: input, shape index: {}]   ;;  %s12732_s7 = inlined_call_operand.vmem [shape: f32[1,32], index: 7, kind: input, shape index: {}]   ;;  %s12733_s8 = inlined_call_operand.vmem [shape: f32[32,32], index: 8, kind: input, shape index: {}]   ;;  %s12734_s9 = inlined_call_operand.vmem [shape: f32[1,32], index: 9, kind: input, shape index: {}]   ;;  %s12735_s10 = inlined_call_operand.vmem [shape: f32[32,64], index: 10, kind: input, shape index: {}]   ;;  %s12736_s11 = inlined_call_operand.vmem [shape: f32[256,32], index: 11, kind: output, shape index: {}]  }
   0x1 LB: > { %s8617_s18 = sadd.s32 4294967295, %s8541_s17   ;;  %p6609_p0 = scmp.ge.s32.totalorder %s8541_s17, 1  ;;  %s8541_s17 = sphi %s8611_s17, %s21_s17  }
   0x2   : > { %p371_p1 = scmp.lt.s32.totalorder %s8541_s17, 3 }
   0x4   : > { %p372_p2 = pnand %p6609_p0, %p371_p1 }
   0x6   : > { %375 = sbr.rel (%p372_p2) target bundleno = 3043 (0xbe3), region = 64 }
   0xd   : > { %v456_v0 = vld [vmem:[%s12729_s4] sm:$0xff]  ;;  %v457_v1 = vld [vmem:[%s12729_s4 + $0x8] sm:$0xff]  ;;  %s6610_s23 = sshll.u32 %s8617_s18, 4  ;;  %s432_s26 = smul.u32 24, %s8617_s18  ;;  %v12743_v5 = vmov 1   ;;  %vm638_vm0 = vcmask 130048  }
   0xe   : > { %v462_v2 = vld [vmem:[%s12731_s6] sm:$0xff]  ;;  %v8248_v3 = vpack.c.bf16 %v457_v1, %v456_v0  ;;  %p427_p3 = scmp.lt.s32.totalorder %s6610_s23, 31  ;;  %8457 = vset.pattern.permute.xlu1 %v12743_v5  ;;  %s6613_s29 = sshll.u32 %s8617_s18, 6  ;;  %v459_v6 = vld [vmem:[%s12730_s5 + $0x8] sm:$0xff]  ;;  %8456 = vset.pattern.permute.xlu0 %v12743_v5  ;;  %vm1835_vm1 = vcmask 64512   ;;  %vm2093_vm2 = vcmask 523264  }
   0xf   : > { %7666 = vmatprep.subr.mxu1 %v462_v2  ;;  %v458_v4 = vld [vmem:[%s12730_s5] sm:$0xff]  ;;  %p433_p4 = scmp.lt.s32.totalorder %s432_s26, 47  ;;  %p8645_p5 = scmp.lt.s32.totalorder %s6613_s29, 127  ;;  %vm2741_vm4 = vcmask 261120  }
  0x10   : > { %7667 = vmatpush3.msra.mxu1 %v462_v2  ;;  %8249 = vmatprep.subr.bf16.mxu0 %v8248_v3  ;;  %s14152_s23 = smov (!%p427_p3, %s6610_s23), 31  ;;  %v8641_v7 = vpack.c.bf16 %v459_v6, %v458_v4  ;;  %s8549_s24 = smov 32  }
  0x11   : > { %8251 = vmatpush3.bf16.msra.mxu0 %v8248_v3  ;;  %s14154_s26 = smov (!%p433_p4, %s432_s26), 47  ;;  %s8643_s13 = sshll.u32 %s14152_s23, 3 }
  0x12   : > { %13194 = vst [vmem:[#allocation2_spill] sm:$0xff] %v8641_v7  ;;  %8289 = vmatprep.subr.bf16.mxu0 %v8641_v7  ;;  %s8654_s18 = scalar_lea.vmem %s12725_s0, %s8643_s13  ;;  %s6612_s19 = sshll.u32 %s14154_s26, 3 }
  0x13   : > { %v622_v8 = vld [vmem:[%s8654_s18] sm:$0xff]  ;;  %v623_v9 = vld [vmem:[%s8654_s18 + $0x8] sm:$0xff]  ;;  %s8661_s22 = scalar_lea.vmem %s12726_s1, %s6612_s19  ;;  %v624_v10 = vld [vmem:[%s8654_s18 + $0x10] sm:$0xff]  ;;  %s14156_s29 = smov (!%p8645_p5, %s6613_s29), 127 }
  0x14   : > { %7642 = vmatprep.mubr.msk.f32.mxu0 %vm638_vm0, %v622_v8  ;;  %v1811_v11 = vld [vmem:[%s8661_s22] sm:$0xff]  ;;  %v1812_v12 = vld [vmem:[%s8661_s22 + $0x8] sm:$0xff]  ;;  %v1813_v13 = vld [vmem:[%s8661_s22 + $0x10] sm:$0xff]  ;;  %s6614_s23 = sshll.u32 %s14156_s29, 3  ;;  %s8550_s27 = smov 96  }
  0x15   : > { %7643 = vmatmul.mubr.msk.f32.vlgmr.msra.gmra.mrb[0].mxu0 %vm638_vm0, %v623_v9  ;;  %7668 = vmatprep.mubr.msk.f32.mxu1 %vm1835_vm1, %v1811_v11  ;;  %v625_v14 = vld [vmem:[%s8654_s18 + $0x18] sm:$0xff]  ;;  %v626_v16 = vld [vmem:[%s8654_s18 + $0x20] sm:$0xff]  ;;  %v627_v18 = vld [vmem:[%s8654_s18 + $0x28] sm:$0xff]  ;;  %s8692_s26 = scalar_lea.vmem %s12727_s2, %s6614_s23  ;;  %s12302_s21 = scalar_lea.vmem %s12728_s3, %s8643_s13 }
  0x16   : > { %7669 = vmatmul.mubr.msk.f32.vlgmr.msra.gmra.mrb[0].mxu1 %vm1835_vm1, %v1812_v12  ;;  %7645 = vmatprep.mubr.msk.f32.mxu0 %vm638_vm0, %v624_v10  ;;  %v1814_v15 = vld [vmem:[%s8661_s22 + $0x18] sm:$0xff]  ;;  %v1815_v17 = vld [vmem:[%s8661_s22 + $0x20] sm:$0xff]  ;;  %v1816_v19 = vld [vmem:[%s8661_s22 + $0x28] sm:$0xff] }
  0x17   : > { %7671 = vmatprep.mubr.msk.f32.mxu1 %vm1835_vm1, %v1813_v13  ;;  %8291 = vmatpush3.bf16.msra.mxu0 %v8641_v7  ;;  %v628_v20 = vld [vmem:[%s8654_s18 + $0x30] sm:$0xff]  ;;  %v629_v22 = vld [vmem:[%s8654_s18 + $0x38] sm:$0xff]  ;;  %v630_v24 = vld [vmem:[%s8654_s18 + $0x40] sm:$0xff] }
  0x18   : > { %v1817_v21 = vld [vmem:[%s8661_s22 + $0x30] sm:$0xff]  ;;  %v1818_v23 = vld [vmem:[%s8661_s22 + $0x38] sm:$0xff]  ;;  %v1819_v25 = vld [vmem:[%s8661_s22 + $0x40] sm:$0xff] }
  0x19   : > { %7646 = vmatmul.mubr.msk.f32.gmra.mrb[2].mxu0 %vm638_vm0, %v625_v14  ;;  %v8702_v26 = vld [vmem:[%s8692_s26 + $0x10] sm:$0xff]  ;;  %v631_v27 = vld [vmem:[%s8654_s18 + $0x48] sm:$0xff]  ;;  %v8710_v28 = vld [vmem:[%s8692_s26 + $0x18] sm:$0xff] }
  0x1a   : > { %7672 = vmatmul.mubr.msk.f32.gmra.mrb[2].mxu1 %vm1835_vm1, %v1814_v15  ;;  %7648 = vmatprep.mubr.msk.f32.mxu0 %vm638_vm0, %v626_v16  ;;  %v1820_v29 = vld [vmem:[%s8661_s22 + $0x48] sm:$0xff]  ;;  %v632_v30 = vld [vmem:[%s8654_s18 + $0x50] sm:$0xff]  ;;  %v8716_v31 = vld [vmem:[%s8692_s26] sm:$0xff] }
  0x1b   : > { %7674 = vmatprep.mubr.msk.f32.mxu1 %vm1835_vm1, %v1815_v17  ;;  %858 = vperm.xlu1 %8457, %v8702_v26   ;;  %v1821_v32 = vld [vmem:[%s8661_s22 + $0x50] sm:$0xff]  ;;  %v8723_v33 = vld [vmem:[%s8692_s26 + $0x8] sm:$0xff]  ;;  %v633_v34 = vld [vmem:[%s8654_s18 + $0x58] sm:$0xff] }
  0x1c   : > { %852 = vperm.xlu0 %8456, %v8716_v31   ;;  %v8729_v35 = vld [vmem:[%s8692_s26 + $0x28] sm:$0xff]  ;;  %v1822_v36 = vld [vmem:[%s8661_s22 + $0x58] sm:$0xff]  ;;  %v634_v37 = vld [vmem:[%s8654_s18 + $0x60] sm:$0xff] }
  0x1d   : > { %7649 = vmatmul.mubr.msk.f32.gmra.mrb[4].mxu0 %vm638_vm0, %v627_v18  ;;  %v1823_v38 = vld [vmem:[%s8661_s22 + $0x60] sm:$0xff]  ;;  %v635_v40 = vld [vmem:[%s8654_s18 + $0x68] sm:$0xff]  ;;  %v8745_v41 = vld [vmem:[%s8692_s26 + $0x38] sm:$0xff]  ;;  %v12739_v18 = vmov 0  }
  0x1e   : > { %7675 = vmatmul.mubr.msk.f32.gmra.mrb[4].mxu1 %vm1835_vm1, %v1816_v19  ;;  %7651 = vmatprep.mubr.msk.f32.mxu0 %vm638_vm0, %v628_v20  ;;  %v8739_v39 = vld [vmem:[%s8692_s26 + $0x20] sm:$0xff]  ;;  %v1824_v42 = vld [vmem:[%s8661_s22 + $0x68] sm:$0xff]  ;;  %v636_v43 = vld [vmem:[%s8654_s18 + $0x70] sm:$0xff] }
  0x1f   : > { %7677 = vmatprep.mubr.msk.f32.mxu1 %vm1835_vm1, %v1817_v21  ;;  %861 = vperm.xlu1 %8457, %v8710_v28   ;;  %v1825_v44 = vld [vmem:[%s8661_s22 + $0x70] sm:$0xff]  ;;  %v637_v46 = vld [vmem:[%s8654_s18 + $0x78] sm:$0xff]  ;;  %v8761_v47 = vld [vmem:[%s8692_s26 + $0x48] sm:$0xff] }
  0x20   : > { %855 = vperm.xlu0 %8456, %v8723_v33   ;;  %v8755_v45 = vld [vmem:[%s8692_s26 + $0x30] sm:$0xff]  ;;  %v1826_v48 = vld [vmem:[%s8661_s22 + $0x78] sm:$0xff]  ;;  %v1827_v49 = vld [vmem:[%s8661_s22 + $0x80] sm:$0xff] }
  0x21   : > { %7652 = vmatmul.mubr.msk.f32.gmra.mrb[6].mxu0 %vm638_vm0, %v629_v22  ;;  %v8770_v50 = vld [vmem:[%s8692_s26 + $0x40] sm:$0xff]  ;;  %v8774_v51 = vld [vmem:[%s8692_s26 + $0x58] sm:$0xff]  ;;  %v1828_v52 = vld [vmem:[%s8661_s22 + $0x88] sm:$0xff] }
  0x22   : > { %7678 = vmatmul.mubr.msk.f32.gmra.mrb[6].mxu1 %vm1835_vm1, %v1818_v23  ;;  %7654 = vmatprep.mubr.msk.f32.mxu0 %vm638_vm0, %v630_v24  ;;  %v1829_v53 = vld [vmem:[%s8661_s22 + $0x90] sm:$0xff]  ;;  %v8786_v55 = vld [vmem:[%s8692_s26 + $0x68] sm:$0xff]  ;;  %v1830_v56 = vld [vmem:[%s8661_s22 + $0x98] sm:$0xff] }
  0x23   : > { %7680 = vmatprep.mubr.msk.f32.mxu1 %vm1835_vm1, %v1819_v25  ;;  %867 = vperm.xlu1 %8457, %v8729_v35   ;;  %v8782_v54 = vld [vmem:[%s8692_s26 + $0x50] sm:$0xff]  ;;  %v1831_v57 = vld [vmem:[%s8661_s22 + $0xa0] sm:$0xff]  ;;  %v8798_v59 = vld [vmem:[%s8692_s26 + $0x78] sm:$0xff] }
  0x24   : > { %864 = vperm.xlu0 %8456, %v8739_v39   ;;  %v8794_v58 = vld [vmem:[%s8692_s26 + $0x60] sm:$0xff]  ;;  %v1832_v60 = vld [vmem:[%s8661_s22 + $0xa8] sm:$0xff]  ;;  %v1833_v61 = vld [vmem:[%s8661_s22 + $0xb0] sm:$0xff] }
  0x25   : > { %7655 = vmatmul.mubr.msk.f32.gmra.mrb[8].mxu0 %vm638_vm0, %v631_v27  ;;  %v8806_v62 = vld [vmem:[%s8692_s26 + $0x70] sm:$0xff]  ;;  %v8810_v63 = vld [vmem:[%s8692_s26 + $0x88] sm:$0xff]  ;;  %v1834_v0 = vld [vmem:[%s8661_s22 + $0xb8] sm:$0xff] }
  0x26   : > { %7681 = vmatmul.mubr.msk.f32.gmra.mrb[8].mxu1 %vm1835_vm1, %v1820_v29  ;;  %7657 = vmatprep.mubr.msk.f32.mxu0 %vm638_vm0, %v632_v30  ;;  %v8817_v1 = vld [vmem:[%s8692_s26 + $0x80] sm:$0xff]  ;;  %v8821_v2 = vld [vmem:[%s8692_s26 + $0x98] sm:$0xff]  ;;  %v8826_v3 = vld [vmem:[%s8692_s26 + $0x90] sm:$0xff]  ;;  %v12748_v29 = vmov 0.0|0.0  }
  0x27   : > { %7683 = vmatprep.mubr.msk.f32.mxu1 %vm1835_vm1, %v1821_v32  ;;  %873 = vperm.xlu1 %8457, %v8745_v41   ;;  %v8829_v4 = vld [vmem:[%s8692_s26 + $0xa8] sm:$0xff]  ;;  %v8834_v6 = vld [vmem:[%s8692_s26 + $0xa0] sm:$0xff]  ;;  %v8837_v8 = vld [vmem:[%s8692_s26 + $0xb8] sm:$0xff] }
  0x28   : > { %870 = vperm.xlu0 %8456, %v8755_v45   ;;  %v8842_v9 = vld [vmem:[%s8692_s26 + $0xb0] sm:$0xff]  ;;  %v8845_v10 = vld [vmem:[%s8692_s26 + $0xc8] sm:$0xff]  ;;  %v8850_v11 = vld [vmem:[%s8692_s26 + $0xc0] sm:$0xff]  ;;  %8252 = vmatprep.subr.bf16.mxu1 %v12748_v29 }
  0x29   : > { %7658 = vmatmul.mubr.msk.f32.gmra.mrb[10].mxu0 %vm638_vm0, %v633_v34  ;;  %v8853_v12 = vld [vmem:[%s8692_s26 + $0xd8] sm:$0xff]  ;;  %v8858_v13 = vld [vmem:[%s8692_s26 + $0xd0] sm:$0xff]  ;;  %v8861_v14 = vld [vmem:[%s8692_s26 + $0xe8] sm:$0xff] }
  0x2a   : > { %7684 = vmatmul.mubr.msk.f32.gmra.mrb[10].mxu1 %vm1835_vm1, %v1822_v36  ;;  %7660 = vmatprep.mubr.msk.f32.mxu0 %vm638_vm0, %v634_v37  ;;  %v8866_v15 = vld [vmem:[%s8692_s26 + $0xe0] sm:$0xff]  ;;  %v8869_v16 = vld [vmem:[%s8692_s26 + $0xf8] sm:$0xff]  ;;  %v8874_v17 = vld [vmem:[%s8692_s26 + $0xf0] sm:$0xff] }
  0x2b   : > { %7686 = vmatprep.mubr.msk.f32.mxu1 %vm1835_vm1, %v1823_v38  ;;  %879 = vperm.xlu1 %8457, %v8761_v47   ;;  %v8879_v19 = vld [vmem:[%s8692_s26 + $0x100] sm:$0xff]  ;;  %v8883_v20 = vld [vmem:[%s8692_s26 + $0x108] sm:$0xff]  ;;  %v8887_v21 = vld [vmem:[%s8692_s26 + $0x118] sm:$0xff] }
  0x2c   : > { %876 = vperm.xlu0 %8456, %v8770_v50   ;;  %v460_v22 = vld [vmem:[%s12730_s5 + $0x10] sm:$0xff]  ;;  %v461_v23 = vld [vmem:[%s12730_s5 + $0x18] sm:$0xff]  ;;  %v8901_v25 = vld [vmem:[%s8692_s26 + $0x120] sm:$0xff] }
  0x2d   : > { %7661 = vmatmul.mubr.msk.f32.gmra.mrb[12].mxu0 %vm638_vm0, %v635_v40  ;;  %v8897_v24 = vpack.c.bf16 %v461_v23, %v460_v22  ;;  %v8909_v27 = vld [vmem:[%s8692_s26 + $0x138] sm:$0xff]  ;;  %v8913_v30 = vld [vmem:[%s8692_s26 + $0x110] sm:$0xff]  ;;  %v8919_v32 = vld [vmem:[%s8692_s26 + $0x140] sm:$0xff] }
  0x2e   : > { %7687 = vmatmul.mubr.msk.f32.gmra.mrb[12].mxu1 %vm1835_vm1, %v1824_v42  ;;  %7663 = vmatprep.mubr.msk.f32.mxu0 %vm638_vm0, %v636_v43  ;;  %v8929_v34 = vld [vmem:[%s8692_s26 + $0x160] sm:$0xff]  ;;  %v8938_v36 = vld [vmem:[%s8692_s26 + $0x128] sm:$0xff]  ;;  %v12737_v42 = vmov 0.0  }
  0x2f   : > { %7689 = vmatprep.mubr.msk.f32.mxu1 %vm1835_vm1, %v1825_v44  ;;  %885 = vperm.xlu1 %8457, %v8774_v51   ;;  %13196 = vst [vmem:[#allocation3_spill] sm:$0xff] %v8897_v24 }
  0x30   : > { %882 = vperm.xlu0 %8456, %v8782_v54   ;;  %8293 = vmatprep.subr.bf16.mxu0 %v8897_v24 }
  0x31   : > { %7664 = vmatmul.mubr.msk.f32.gmra.mrb[14].mxu0 %vm638_vm0, %v637_v46  ;;  %v8992_v46 = vld [vmem:[%s8692_s26 + $0x150] sm:$0xff] }
  0x32   : > { %7690 = vmatmul.mubr.msk.f32.gmra.mrb[14].mxu1 %vm1835_vm1, %v1826_v48  ;;  %8295 = vmatpush3.bf16.msra.mxu0 %v8897_v24 }
  0x33   : > { %7692 = vmatprep.mubr.msk.f32.mxu1 %vm1835_vm1, %v1827_v49  ;;  %891 = vperm.xlu1 %8457, %v8786_v55  }
  0x34   : > { %888 = vperm.xlu0 %8456, %v8794_v58  }
  0x36   : > { %7693 = vmatmul.mubr.msk.f32.gmra.mrb[16].mxu1 %vm1835_vm1, %v1828_v52 }
  0x37   : > { %7695 = vmatprep.mubr.msk.f32.mxu1 %vm1835_vm1, %v1829_v53  ;;  %897 = vperm.xlu1 %8457, %v8798_v59   ;;  %v9019_v53 = vld [vmem:[%s8692_s26 + $0x168] sm:$0xff] }
  0x38   : > { %894 = vperm.xlu0 %8456, %v8806_v62  }
  0x3a   : > { %7696 = vmatmul.mubr.msk.f32.gmra.mrb[18].mxu1 %vm1835_vm1, %v1830_v56  ;;  %v9032_v56 = vld [vmem:[%s8692_s26 + $0x170] sm:$0xff] }
  0x3b   : > { %7698 = vmatprep.mubr.msk.f32.mxu1 %vm1835_vm1, %v1831_v57  ;;  %903 = vperm.xlu1 %8457, %v8810_v63  }
  0x3c   : > { %900 = vperm.xlu0 %8456, %v8817_v1  }
  0x3e   : > { %7699 = vmatmul.mubr.msk.f32.gmra.mrb[20].mxu1 %vm1835_vm1, %v1832_v60 }
  0x3f   : > { %7701 = vmatprep.mubr.msk.f32.mxu1 %vm1835_vm1, %v1833_v61  ;;  %909 = vperm.xlu1 %8457, %v8821_v2  }
  0x40   : > { %906 = vperm.xlu0 %8456, %v8826_v3  }
  0x42   : > { %7702 = vmatmul.mubr.msk.f32.gmra.mrb[22].mxu1 %vm1835_vm1, %v1834_v0 }
  0x43   : > { %915 = vperm.xlu1 %8457, %v8829_v4  }
  0x44   : > { %912 = vperm.xlu0 %8456, %v8834_v6  }
  0x47   : > { %921 = vperm.xlu1 %8457, %v8837_v8  }
  0x48   : > { %918 = vperm.xlu0 %8456, %v8842_v9  }
  0x4b   : > { %927 = vperm.xlu1 %8457, %v8845_v10  }
  0x4c   : > { %924 = vperm.xlu0 %8456, %v8850_v11  }
  0x4f   : > { %933 = vperm.xlu1 %8457, %v8853_v12  }
  0x50   : > { %930 = vperm.xlu0 %8456, %v8858_v13  }
  0x53   : > { %939 = vperm.xlu1 %8457, %v8861_v14  }
  0x54   : > { %936 = vperm.xlu0 %8456, %v8866_v15  }
  0x57   : > { %945 = vperm.xlu1 %8457, %v8869_v16  }
  0x58   : > { %942 = vperm.xlu0 %8456, %v8874_v17  }
  0x5b   : > { %8458 = vset.pattern.permute.xlu1 %v12739_v18 }
  0x5c   : > { %1428 = vperm.xlu1 %8458, %v8716_v31   ;;  %948 = vperm.xlu0 %8456, %v8879_v19  }
  0x60   : > { %8459 = vset.pattern.permute.xlu1 %v12743_v5  ;;  %957 = vperm.xlu0 %8456, %v8887_v21  }
  0x61   : > { %951 = vperm.xlu1 %8459, %v8883_v20  }
  0x64   : > { %960 = vperm.xlu0 %8456, %v8901_v25  }
  0x65   : > { %8460 = vset.pattern.permute.xlu1 %v12739_v18 }
  0x66   : > { %1434 = vperm.xlu1 %8460, %v8702_v26   ;;  %v8924_v26 = vld [vmem:[%s8692_s26 + $0x158] sm:$0xff] }
  0x68   : > { %969 = vperm.xlu0 %8456, %v8909_v27  }
  0x6a   : > { %8461 = vset.pattern.permute.xlu1 %v12743_v5 }
  0x6b   : > { %954 = vperm.xlu1 %8461, %v8913_v30  }
  0x6c   : > { %972 = vperm.xlu0 %8456, %v8919_v32  }
  0x6f   : > { %8462 = vset.pattern.permute.xlu1 %v12739_v18 }
  0x70   : > { %1443 = vperm.xlu1 %8462, %v8729_v35   ;;  %981 = vperm.xlu0 %8456, %v8924_v26   ;;  %v8948_v35 = vld [vmem:[%s8692_s26 + $0x130] sm:$0xff] }
  0x74   : > { %1446 = vperm.xlu1 %8462, %v8755_v45   ;;  %984 = vperm.xlu0 %8456, %v8929_v34  }
  0x78   : > { %1449 = vperm.xlu1 %8462, %v8745_v41   ;;  %8471 = vset.pattern.permute.xlu0 %v12739_v18  ;;  %v8974_v41 = vld [vmem:[%s8692_s26 + $0x148] sm:$0xff] }
  0x79   : > { %1431 = vperm.xlu0 %8471, %v8723_v33   ;;  %13198 = vst [vmem:[#allocation5_spill] sm:$0xff] %v8974_v41 }
  0x7c   : > { %1452 = vperm.xlu1 %8462, %v8770_v50  }
  0x7d   : > { %1437 = vperm.xlu0 %8471, %v8710_v28   ;;  %v848_v28 = vlaneseq }
  0x7f   : > { %v8958_v33 = vand.u32 127, %v848_v28 }
  0x80   : > { %8463 = vset.pattern.permute.xlu1 %v12743_v5 }
  0x81   : > { %963 = vperm.xlu1 %8463, %v8938_v36   ;;  %1440 = vperm.xlu0 %8471, %v8739_v39   ;;  %13197 = vst [vmem:[#allocation4_spill] sm:$0xff] %v8958_v33  ;;  %v8963_v37 = vadd.s32 128, %v8958_v33 }
  0x85   : > { %8464 = vset.pattern.permute.xlu1 %v12739_v18  ;;  %1455 = vperm.xlu0 %8471, %v8761_v47  }
  0x86   : > { %1458 = vperm.xlu1 %8464, %v8782_v54  }
  0x89   : > { %1461 = vperm.xlu0 %8471, %v8774_v51  }
  0x8a   : > { %8465 = vset.pattern.permute.xlu1 %v12743_v5 }
  0x8b   : > { %966 = vperm.xlu1 %8465, %v8948_v35  }
  0x8d   : > { %1464 = vperm.xlu0 %8471, %v8794_v58  }
  0x8f   : > { %8466 = vset.pattern.permute.xlu1 %v12739_v18 }
  0x90   : > { %1467 = vperm.xlu1 %8466, %v8786_v55  }
  0x91   : > { %1479 = vperm.xlu0 %8471, %v8810_v63  }
  0x94   : > { %1470 = vperm.xlu1 %8466, %v8806_v62  }
  0x95   : > { %1485 = vperm.xlu0 %8471, %v8821_v2   ;;  %v9054_v2 = vld [vmem:[%s8692_s26 + $0x178] sm:$0xff] }
  0x98   : > { %1473 = vperm.xlu1 %8466, %v8798_v59  }
  0x99   : > { %1488 = vperm.xlu0 %8471, %v8834_v6  }
  0x9a   : > { %v8965_v38 = vpop.permute.xlu1 %858 }
  0x9b   : > { %v8969_v39 = vpop.permute.xlu0 %852  ;;  %vm1048_vm8 = vcmp.eq.s32.totalorder %v8963_v37, %v8965_v38  ;;  %vm1047_vm11 = vcmp.eq.s32.totalorder %v8958_v33, %v8965_v38  ;;  %v9230_v38 = vld [vmem:[%s8692_s26 + $0x1c8] sm:$0xff] }
  0x9c   : > { %1476 = vperm.xlu1 %8466, %v8817_v1   ;;  %vm1044_vm3 = vcmp.eq.s32.totalorder %v8963_v37, %v8969_v39  ;;  %vm1043_vm7 = vcmp.eq.s32.totalorder %v8958_v33, %v8969_v39 }
  0x9d   : > { %v6637_v43 = vsel %vm1044_vm3, 1.0, %v12737_v42  ;;  %1503 = vperm.xlu0 %8471, %v8845_v10   ;;  %v9068_v10 = vld [vmem:[%s8692_s26 + $0x188] sm:$0xff]  ;;  %v9086_v42 = vld [vmem:[%s8692_s26 + $0x190] sm:$0xff] }
  0x9e   : > { %v8971_v40 = vpop.permute.xlu1 %861  ;;  %6852 = vmatprep.mubr.msk.f32.mxu1 %vm2093_vm2, %v6637_v43 }
  0x9f   : > { %v9034_v57 = vpop.permute.xlu0 %855  ;;  %vm1050_vm10 = vcmp.eq.s32.totalorder %v8963_v37, %v8971_v40  ;;  %vm1049_vm13 = vcmp.eq.s32.totalorder %v8958_v33, %v8971_v40 }
  0xa0   : > { %8467 = vset.pattern.permute.xlu1 %v12743_v5  ;;  %vm1046_vm6 = vcmp.eq.s32.totalorder %v8963_v37, %v9034_v57  ;;  %vm1045_vm9 = vcmp.eq.s32.totalorder %v8958_v33, %v9034_v57 }
  0xa1   : > { %975 = vperm.xlu1 %8467, %v8974_v41   ;;  %1509 = vperm.xlu0 %8471, %v8853_v12  }
  0xa2   : > { %v8983_v44 = vpop.permute.xlu1 %867 }
  0xa3   : > { %v9043_v60 = vpop.permute.xlu0 %864  ;;  %vm1054_vm14 = vcmp.eq.s32.totalorder %v8963_v37, %v8983_v44  ;;  %vm1053_vm1 = vcmp.eq.s32.totalorder %v8958_v33, %v8983_v44 }
  0xa4   : > { %vm1052_vm12 = vcmp.eq.s32.totalorder %v8963_v37, %v9043_v60  ;;  %vm1051_vm15 = vcmp.eq.s32.totalorder %v8958_v33, %v9043_v60 }
  0xa5   : > { %8468 = vset.pattern.permute.xlu1 %v12739_v18  ;;  %1512 = vperm.xlu0 %8471, %v8866_v15  }
  0xa6   : > { %v8987_v45 = vpop.permute.xlu1 %873  ;;  %1482 = vperm.xlu1 %8468, %v8826_v3  }
  0xa7   : > { %v9049_v62 = vpop.permute.xlu0 %870  ;;  %vm1058_vm3 = vcmp.eq.s32.totalorder %v8963_v37, %v8987_v45 }
  0xa8   : > { %vm1056_vm0 = vcmp.eq.s32.totalorder %v8963_v37, %v9049_v62 }
  0xa9   : > { %1527 = vperm.xlu0 %8471, %v8883_v20  }
  0xaa   : > { %v8994_v47 = vpop.permute.xlu1 %879  ;;  %8469 = vset.pattern.permute.xlu1 %v12743_v5 }
  0xab   : > { %978 = vperm.xlu1 %8469, %v8992_v46  }
  0xad   : > { %1533 = vperm.xlu0 %8471, %v8887_v21  }
  0xae   : > { %v8999_v48 = vpop.permute.xlu1 %885 }
  0xaf   : > { %8470 = vset.pattern.permute.xlu1 %v12739_v18 }
  0xb0   : > { %1491 = vperm.xlu1 %8470, %v8829_v4  }
  0xb1   : > { %1536 = vperm.xlu0 %8471, %v8901_v25  }
  0xb2   : > { %v9004_v49 = vpop.permute.xlu1 %891 }
  0xb4   : > { %1494 = vperm.xlu1 %8470, %v8842_v9   ;;  %v9063_v9 = vpop.permute.xlu0 %876 }
  0xb5   : > { %1551 = vperm.xlu0 %8471, %v8974_v41  }
  0xb6   : > { %v9008_v50 = vpop.permute.xlu1 %897 }
  0xb8   : > { %1497 = vperm.xlu1 %8470, %v8837_v8   ;;  %v9061_v8 = vld [vmem:[%s8692_s26 + $0x180] sm:$0xff] }
  0xb9   : > { %1557 = vperm.xlu0 %8471, %v8924_v26  }
  0xba   : > { %v9012_v51 = vpop.permute.xlu1 %903 }
  0xbc   : > { %1500 = vperm.xlu1 %8470, %v8850_v11  }
  0xbd   : > { %1560 = vperm.xlu0 %8471, %v8929_v34  }
  0xbe   : > { %v9016_v52 = vpop.permute.xlu1 %909 }
  0xc0   : > { %8472 = vset.pattern.permute.xlu1 %v12743_v5 }
  0xc1   : > { %987 = vperm.xlu1 %8472, %v9019_v53   ;;  %8483 = vset.pattern.permute.xlu0 %v12743_v5 }
  0xc2   : > { %v9024_v54 = vpop.permute.xlu1 %915  ;;  %993 = vperm.xlu0 %8483, %v9054_v2  }
  0xc5   : > { %8473 = vset.pattern.permute.xlu1 %v12739_v18 }
  0xc6   : > { %v9028_v55 = vpop.permute.xlu1 %921  ;;  %1506 = vperm.xlu1 %8473, %v8858_v13   ;;  %996 = vperm.xlu0 %8483, %v9061_v8   ;;  %v9074_v13 = vpop.permute.xlu0 %882 }
  0xca   : > { %v9036_v58 = vpop.permute.xlu1 %927  ;;  %8474 = vset.pattern.permute.xlu1 %v12743_v5 }
  0xcb   : > { %990 = vperm.xlu1 %8474, %v9032_v56  }
  0xce   : > { %v9040_v59 = vpop.permute.xlu1 %933 }
  0xcf   : > { %8475 = vset.pattern.permute.xlu1 %v12739_v18 }
  0xd0   : > { %1515 = vperm.xlu1 %8475, %v8861_v14  }
  0xd2   : > { %v9046_v61 = vpop.permute.xlu1 %939 }
  0xd4   : > { %1518 = vperm.xlu1 %8475, %v8874_v17  }
  0xd6   : > { %v9051_v0 = vpop.permute.xlu1 %945 }
  0xd7   : > { %13199 = vst [vmem:[#allocation6_spill] sm:$0xff] %v9051_v0 }
  0xd8   : > { %1521 = vperm.xlu1 %8475, %v8869_v16  }
  0xdb   : > { %v9058_v4 = vpop.permute.xlu1 %1428 }
  0xdc   : > { %13200 = vst [vmem:[#allocation7_spill] sm:$0xff] %v9058_v4  ;;  %1524 = vperm.xlu1 %8475, %v8879_v19   ;;  %vm1619_vm5 = vcmp.eq.s32.totalorder %v8958_v33, %v9058_v4 }
  0xe0   : > { %8476 = vset.pattern.permute.xlu1 %v12743_v5  ;;  %v9071_v11 = vpop.permute.xlu1 %951 }
  0xe1   : > { %13201 = vst [vmem:[#allocation8_spill] sm:$0xff] %v9071_v11  ;;  %999 = vperm.xlu1 %8476, %v9068_v10  }
  0xe5   : > { %8477 = vset.pattern.permute.xlu1 %v12739_v18  ;;  %v9077_v25 = vpop.permute.xlu1 %1434 }
  0xe6   : > { %13202 = vst [vmem:[#allocation9_spill] sm:$0xff] %v9077_v25  ;;  %1530 = vperm.xlu1 %8477, %v8913_v30  }
  0xe8   : > { %v7644_v12 = vpop.f32.mrb[0].mxu0 }
  0xe9   : > { %v753_v14 = vpop.f32.mrb[1].mxu0  ;;  %v7670_v15 = vpop.f32.mrb[0].mxu1  ;;  %v833_v22 = vmax.f32 %v7644_v12, 0.0 }
  0xea   : > { %v832_v16 = vmax.f32 %v753_v14, 0.0  ;;  %v1974_v17 = vpop.f32.mrb[1].mxu1  ;;  %v9083_v12 = vpop.permute.xlu0 %888  ;;  %8478 = vset.pattern.permute.xlu1 %v12743_v5 }
  0xeb   : > { %v8253_v23 = vpack.c.bf16 %v7670_v15, %v1974_v17  ;;  %1002 = vperm.xlu1 %8478, %v9086_v42  }
  0xec   : > { %v7647_v26 = vpop.f32.mrb[2].mxu0  ;;  %7712 = vmatprep.mubr.msk.f32.mxu0 %vm2741_vm4, %v832_v16  ;;  %v9090_v16 = vpop.permute.xlu1 %954 }
  0xed   : > { %v763_v34 = vpop.f32.mrb[3].mxu0  ;;  %v7673_v28 = vpop.f32.mrb[2].mxu1  ;;  %8254 = vmatpush1.bf16.msra.mxu1 %v8253_v23  ;;  %7713 = vmatmul.mubr.msk.f32.vlgmr.msra.gmra.mrb[16].mxu0 %vm2741_vm4, %v833_v22  ;;  %v835_v15 = vmax.f32 %v7647_v26, 0.0  ;;  %13203 = vst [vmem:[#allocation10_spill] sm:$0xff] %v9090_v16  ;;  %v13206_v16 = vmov 0.0|0.0  }
  0xee   : > { %v834_v43 = vmax.f32 %v763_v34, 0.0  ;;  %v1984_v14 = vpop.f32.mrb[3].mxu1  ;;  %8255 = vmatprep.subr.bf16.mxu1 %v12748_v29 }
  0xef   : > { %v8256_v17 = vpack.c.bf16 %v7673_v28, %v1984_v14 }
  0xf0   : > { %v7650_v18 = vpop.f32.mrb[4].mxu0  ;;  %7715 = vmatprep.mubr.msk.f32.mxu0 %vm2741_vm4, %v834_v43  ;;  %v9096_v43 = vpop.permute.xlu0 %894 }
  0xf1   : > { %v773_v23 = vpop.f32.mrb[5].mxu0  ;;  %v7676_v24 = vpop.f32.mrb[4].mxu1  ;;  %8257 = vmatpush1.bf16.msra.mxu1 %v8256_v17  ;;  %7716 = vmatmul.mubr.msk.f32.gmra.mrb[18].mxu0 %vm2741_vm4, %v835_v15  ;;  %v837_v26 = vmax.f32 %v7650_v18, 0.0 }
  0xf2   : > { %v836_v22 = vmax.f32 %v773_v23, 0.0  ;;  %v1994_v34 = vpop.f32.mrb[5].mxu1  ;;  %8258 = vmatprep.subr.bf16.mxu1 %v12748_v29  ;;  %v13204_v23 = vmov 0   ;;  %v9101_v25 = vpop.permute.xlu1 %1443 }
  0xf3   : > { %v8259_v28 = vpack.c.bf16 %v7676_v24, %v1994_v34  ;;  %8479 = vset.pattern.permute.xlu1 %v13204_v23  ;;  %13205 = vst [vmem:[#allocation11_spill] sm:$0xff] %v9101_v25  ;;  %v9106_v34 = vld [vmem:[%s8692_s26 + $0x198] sm:$0xff] }
  0xf4   : > { %v7653_v14 = vpop.f32.mrb[6].mxu0  ;;  %7718 = vmatprep.mubr.msk.f32.mxu0 %vm2741_vm4, %v836_v22  ;;  %1539 = vperm.xlu1 %8479, %v8938_v36  }
  0xf5   : > { %v783_v5 = vpop.f32.mrb[7].mxu0  ;;  %v7679_v7 = vpop.f32.mrb[6].mxu1  ;;  %8260 = vmatpush1.bf16.msra.mxu1 %v8259_v28  ;;  %7719 = vmatmul.mubr.msk.f32.gmra.mrb[20].mxu0 %vm2741_vm4, %v837_v26  ;;  %v839_v18 = vmax.f32 %v7653_v14, 0.0 }
  0xf6   : > { %v838_v15 = vmax.f32 %v783_v5, 0.0  ;;  %v2004_v17 = vpop.f32.mrb[7].mxu1  ;;  %8261 = vmatprep.subr.bf16.mxu1 %v12748_v29  ;;  %v9110_v25 = vpop.permute.xlu1 %1446  ;;  %1005 = vperm.xlu0 %8483, %v9106_v34  }
  0xf7   : > { %v8262_v24 = vpack.c.bf16 %v7679_v7, %v2004_v17  ;;  %13207 = vst [vmem:[#allocation12_spill] sm:$0xff] %v9110_v25  ;;  %v9115_v17 = vpop.permute.xlu0 %900 }
  0xf8   : > { %v7656_v22 = vpop.f32.mrb[8].mxu0  ;;  %7721 = vmatprep.mubr.msk.f32.mxu0 %vm2741_vm4, %v838_v15  ;;  %1542 = vperm.xlu1 %8479, %v8948_v35  }
  0xf9   : > { %v793_v28 = vpop.f32.mrb[9].mxu0  ;;  %v7682_v26 = vpop.f32.mrb[8].mxu1  ;;  %8263 = vmatpush1.bf16.msra.mxu1 %v8262_v24  ;;  %7722 = vmatmul.mubr.msk.f32.gmra.mrb[22].mxu0 %vm2741_vm4, %v839_v18  ;;  %v841_v7 = vmax.f32 %v7656_v22, 0.0  ;;  %v9118_v24 = vld [vmem:[%s8692_s26 + $0x1a0] sm:$0xff] }
  0xfa   : > { %v840_v5 = vmax.f32 %v793_v28, 0.0  ;;  %v2014_v29 = vpop.f32.mrb[9].mxu1  ;;  %8264 = vmatprep.subr.bf16.mxu1 %v13206_v16  ;;  %v9122_v22 = vpop.permute.xlu1 %1449  ;;  %1008 = vperm.xlu0 %8483, %v9118_v24  }
  0xfb   : > { %v8265_v14 = vpack.c.bf16 %v7682_v26, %v2014_v29  ;;  %13208 = vst [vmem:[#allocation13_spill] sm:$0xff] %v9122_v22 }
  0xfc   : > { %v7659_v15 = vpop.f32.mrb[10].mxu0  ;;  %7724 = vmatprep.mubr.msk.f32.mxu0 %vm2741_vm4, %v840_v5  ;;  %1545 = vperm.xlu1 %8479, %v8909_v27  }
  0xfd   : > { %v803_v18 = vpop.f32.mrb[11].mxu0  ;;  %v7685_v28 = vpop.f32.mrb[10].mxu1  ;;  %8266 = vmatpush1.bf16.msra.mxu1 %v8265_v14  ;;  %7725 = vmatmul.mubr.msk.f32.gmra.mrb[24].mxu0 %vm2741_vm4, %v841_v7  ;;  %v843_v29 = vmax.f32 %v7659_v15, 0.0 }
  0xfe   : > { %v842_v11 = vmax.f32 %v803_v18, 0.0  ;;  %v2024_v25 = vpop.f32.mrb[11].mxu1  ;;  %8267 = vmatprep.subr.bf16.mxu1 %v13206_v16  ;;  %v9129_v18 = vpop.permute.xlu1 %1452 }
  0xff   : > { %v8268_v35 = vpack.c.bf16 %v7685_v28, %v2024_v25  ;;  %13209 = vst [vmem:[#allocation14_spill] sm:$0xff] %v9129_v18 }
 0x100   : > { %v7662_v26 = vpop.f32.mrb[12].mxu0  ;;  %7727 = vmatprep.mubr.msk.f32.mxu0 %vm2741_vm4, %v842_v11  ;;  %1548 = vperm.xlu1 %8479, %v8919_v32   ;;  %v9133_v11 = vpop.permute.xlu0 %906 }
 0x101   : > { %v813_v5 = vpop.f32.mrb[13].mxu0  ;;  %v7688_v0 = vpop.f32.mrb[12].mxu1  ;;  %8269 = vmatpush1.bf16.msra.mxu1 %v8268_v35  ;;  %7728 = vmatmul.mubr.msk.f32.gmra.mrb[26].mxu0 %vm2741_vm4, %v843_v29  ;;  %v845_v22 = vmax.f32 %v7662_v26, 0.0  ;;  %v9137_v29 = vld [vmem:[%s8692_s26 + $0x1a8] sm:$0xff] }
 0x102   : > { %v844_v7 = vmax.f32 %v813_v5, 0.0  ;;  %v2034_v14 = vpop.f32.mrb[13].mxu1  ;;  %8270 = vmatprep.subr.bf16.mxu1 %v13206_v16 }
 0x103   : > { %v8271_v15 = vpack.c.bf16 %v7688_v0, %v2034_v14  ;;  %v9140_v0 = vpop.permute.xlu1 %963 }
 0x104   : > { %v7665_v25 = vpop.f32.mrb[14].mxu0  ;;  %7730 = vmatprep.mubr.msk.f32.mxu0 %vm2741_vm4, %v844_v7  ;;  %13210 = vst [vmem:[#allocation15_spill] sm:$0xff] %v9140_v0  ;;  %v13211_v7 = vmov 1   ;;  %v9188_v0 = vld [vmem:[%s8692_s26 + $0x1d8] sm:$0xff] }
 0x105   : > { %v823_v28 = vpop.f32.mrb[15].mxu0  ;;  %v7691_v35 = vpop.f32.mrb[14].mxu1  ;;  %8272 = vmatpush1.bf16.msra.mxu1 %v8271_v15  ;;  %7731 = vmatmul.mubr.msk.f32.gmra.mrb[28].mxu0 %vm2741_vm4, %v845_v22  ;;  %v847_v32 = vmax.f32 %v7665_v25, 0.0  ;;  %v9148_v22 = vld [vmem:[%s8692_s26 + $0x1b8] sm:$0xff] }
 0x106   : > { %v846_v5 = vmax.f32 %v823_v28, 0.0  ;;  %v2044_v41 = vpop.f32.mrb[15].mxu1  ;;  %8273 = vmatprep.subr.bf16.mxu1 %v13206_v16  ;;  %8480 = vset.pattern.permute.xlu1 %v13211_v7  ;;  %v9156_v28 = vpop.permute.xlu0 %912 }
 0x107   : > { %v8274_v26 = vpack.c.bf16 %v7691_v35, %v2044_v41  ;;  %1011 = vperm.xlu1 %8480, %v9137_v29   ;;  %v12759_v41 = vmov 1.0   ;;  %v9158_v35 = vpop.permute.xlu1 %1458  ;;  %1017 = vperm.xlu0 %8483, %v9148_v22  }
 0x108   : > { %7733 = vmatprep.mubr.msk.f32.mxu0 %vm2741_vm4, %v846_v5  ;;  %13212 = vst [vmem:[#allocation16_spill] sm:$0xff] %v9158_v35  ;;  %v9163_v5 = vld [vmem:[%s8692_s26 + $0x1c0] sm:$0xff] }
 0x109   : > { %v7694_v14 = vpop.f32.mrb[16].mxu1  ;;  %8275 = vmatpush1.bf16.msra.mxu1 %v8274_v26  ;;  %7734 = vmatmul.mubr.msk.f32.gmra.mrb[30].mxu0 %vm2741_vm4, %v847_v32 }
 0x10a   : > { %v2054_v15 = vpop.f32.mrb[17].mxu1  ;;  %8276 = vmatprep.subr.bf16.mxu1 %v13206_v16  ;;  %7768 = vmatprep.mubr.msk.f32.mxu0 %vm1619_vm5, %v12759_v41  ;;  %v9168_v41 = vld [vmem:[%s8692_s26 + $0x1b0] sm:$0xff]  ;;  %v9173_v35 = vpop.permute.xlu0 %918 }
 0x10b   : > { %v8277_v25 = vpack.c.bf16 %v7694_v14, %v2054_v15  ;;  %8481 = vset.pattern.permute.xlu1 %v13204_v23  ;;  %1020 = vperm.xlu0 %8483, %v9163_v5   ;;  %v9171_v14 = vpop.permute.xlu1 %966 }
 0x10c   : > { %1554 = vperm.xlu1 %8481, %v8992_v46   ;;  %13213 = vst [vmem:[#allocation17_spill] sm:$0xff] %v9171_v14 }
 0x10d   : > { %v7697_v32 = vpop.f32.mrb[18].mxu1  ;;  %8278 = vmatpush1.bf16.msra.mxu1 %v8277_v25 }
 0x10e   : > { %v2064_v26 = vpop.f32.mrb[19].mxu1  ;;  %8279 = vmatprep.subr.bf16.mxu1 %v13206_v16  ;;  %v9184_v14 = vpop.permute.xlu0 %924 }
 0x10f   : > { %v8280_v4 = vpack.c.bf16 %v7697_v32, %v2064_v26  ;;  %1029 = vperm.xlu0 %8483, %v9188_v0  }
 0x110   : > { %8482 = vset.pattern.permute.xlu1 %v13211_v7 }
 0x111   : > { %v7700_v15 = vpop.f32.mrb[20].mxu1  ;;  %8281 = vmatpush1.bf16.msra.mxu1 %v8280_v4  ;;  %1014 = vperm.xlu1 %8482, %v9168_v41   ;;  %v9180_v4 = vpop.permute.xlu1 %1467 }
 0x112   : > { %v2074_v25 = vpop.f32.mrb[21].mxu1  ;;  %8282 = vmatprep.subr.bf16.mxu1 %v13206_v16  ;;  %13214 = vst [vmem:[#allocation18_spill] sm:$0xff] %v9180_v4  ;;  %v9206_v39 = vpop.permute.xlu0 %930 }
 0x113   : > { %v8283_v46 = vpack.c.bf16 %v7700_v15, %v2074_v25  ;;  %v13216_v25 = vmov 1.0  }
 0x115   : > { %v7703_v32 = vpop.f32.mrb[22].mxu1  ;;  %8284 = vmatpush1.bf16.msra.mxu1 %v8283_v46  ;;  %8484 = vset.pattern.permute.xlu1 %v13204_v23  ;;  %v9198_v46 = vpop.permute.xlu1 %1470 }
 0x116   : > { %v2084_v26 = vpop.f32.mrb[23].mxu1  ;;  %8285 = vmatprep.subr.bf16.mxu1 %v13206_v16  ;;  %1563 = vperm.xlu1 %8484, %v9019_v53   ;;  %v13215_v16 = vmov 0.0   ;;  %13217 = vst [vmem:[#allocation19_spill] sm:$0xff] %v9198_v46  ;;  %v9201_v53 = vld [vmem:[%s8692_s26 + $0x1e0] sm:$0xff] }
 0x117   : > { %v8286_v18 = vpack.c.bf16 %v7703_v32, %v2084_v26  ;;  %v6639_v15 = vsel %vm1046_vm6, 1.0, %v13215_v16  ;;  %1032 = vperm.xlu0 %8483, %v9201_v53   ;;  %v9224_v32 = vpop.permute.xlu0 %936  ;;  %v6647_v40 = vsel %vm1054_vm14, 1.0, %v13215_v16  ;;  %vm1055_vm6 = vcmp.eq.s32.totalorder %v8958_v33, %v9049_v62 }
 0x118   : > { %v6651_v44 = vsel %vm1058_vm3, 1.0, %v13215_v16  ;;  %vm1063_vm14 = vcmp.eq.s32.totalorder %v8958_v33, %v9074_v13  ;;  %vm1067_vm3 = vcmp.eq.s32.totalorder %v8958_v33, %v9083_v12 }
 0x119   : > { %8287 = vmatpush1.bf16.msra.mxu1 %v8286_v18  ;;  %v6641_v18 = vsel %vm1048_vm8, 1.0, %v13215_v16  ;;  %v9219_v57 = vpop.permute.xlu1 %1473  ;;  %vm1057_vm8 = vcmp.eq.s32.totalorder %v8958_v33, %v8987_v45 }
 0x11a   : > { %1566 = vperm.xlu1 %8484, %v9032_v56   ;;  %v6643_v56 = vsel %vm1050_vm10, 1.0, %v13215_v16  ;;  %13218 = vst [vmem:[#allocation20_spill] sm:$0xff] %v9219_v57  ;;  %vm1059_vm10 = vcmp.eq.s32.totalorder %v8958_v33, %v9063_v9 }
 0x11b   : > { %8489 = vset.pattern.permute.xlu0 %v13204_v23 }
 0x11c   : > { %6853 = vmatmul.mubr.msk.f32.vlgmr.msra.gmra.mrb[24].mxu1 %vm1043_vm7, %v13216_v25  ;;  %1575 = vperm.xlu0 %8489, %v9068_v10   ;;  %vm1060_vm7 = vcmp.eq.s32.totalorder %v8963_v37, %v9063_v9 }
 0x11d   : > { %6854 = vmatprep.mubr.msk.f32.mxu1 %vm2093_vm2, %v6639_v15  ;;  %v9239_v26 = vpop.permute.xlu1 %1476  ;;  %v9246_v15 = vpop.permute.xlu0 %942  ;;  %v6653_v62 = vsel %vm1060_vm7, 1.0, %v13215_v16  ;;  %vm1069_vm7 = vcmp.eq.s32.totalorder %v8958_v33, %v9004_v49 }
 0x11e   : > { %1569 = vperm.xlu1 %8484, %v9054_v2   ;;  %v6645_v2 = vsel %vm1052_vm12, 1.0, %v13215_v16  ;;  %13219 = vst [vmem:[#allocation21_spill] sm:$0xff] %v9239_v26  ;;  %vm1061_vm12 = vcmp.eq.s32.totalorder %v8958_v33, %v8994_v47  ;;  %v542_v26 = vcvt.s32.f32 %v8716_v31  ;;  %v8548_v31 = vmov 2  }
 0x120   : > { %6855 = vmatmul.mubr.msk.f32.gmra.mrb[26].mxu1 %vm1045_vm9, %v13216_v25  ;;  %1581 = vperm.xlu0 %8489, %v9106_v34   ;;  %vm1062_vm9 = vcmp.eq.s32.totalorder %v8963_v37, %v8994_v47 }
 0x121   : > { %6856 = vmatprep.mubr.msk.f32.mxu1 %vm2093_vm2, %v6641_v18  ;;  %v6649_v18 = vsel %vm1056_vm0, 1.0, %v13215_v16  ;;  %v9257_v60 = vpop.permute.xlu1 %975  ;;  %vm1065_vm0 = vcmp.eq.s32.totalorder %v8958_v33, %v8999_v48 }
 0x122   : > { %1572 = vperm.xlu1 %8484, %v9061_v8  }
 0x124   : > { %6857 = vmatmul.mubr.msk.f32.gmra.mrb[28].mxu1 %vm1047_vm11, %v13216_v25  ;;  %1584 = vperm.xlu0 %8489, %v9118_v24   ;;  %vm1064_vm11 = vcmp.eq.s32.totalorder %v8963_v37, %v9074_v13  ;;  %v9336_v13 = vld [vmem:[%s8692_s26 + $0x1e8] sm:$0xff] }
 0x125   : > { %6858 = vmatprep.mubr.msk.f32.mxu1 %vm2093_vm2, %v6643_v56  ;;  %v9262_v56 = vpop.permute.xlu0 %948  ;;  %v6657_v9 = vsel %vm1064_vm11, 1.0, %v13215_v16  ;;  %vm1073_vm11 = vcmp.eq.s32.totalorder %v8958_v33, %v9008_v50 }
 0x126   : > { %8485 = vset.pattern.permute.xlu1 %v13211_v7 }
 0x127   : > { %1023 = vperm.xlu1 %8485, %v9230_v38  }
 0x128   : > { %6859 = vmatmul.mubr.msk.f32.gmra.mrb[30].mxu1 %vm1049_vm13, %v13216_v25  ;;  %1599 = vperm.xlu0 %8489, %v9230_v38   ;;  %vm1066_vm13 = vcmp.eq.s32.totalorder %v8963_v37, %v8999_v48 }
 0x129   : > { %6860 = vmatprep.mubr.msk.f32.mxu1 %vm2093_vm2, %v6645_v2  ;;  %v9265_v2 = vld [vmem:[%s8692_s26 + $0x1d0] sm:$0xff]  ;;  %v6659_v47 = vsel %vm1066_vm13, 1.0, %v13215_v16  ;;  %vm1075_vm13 = vcmp.eq.s32.totalorder %v8958_v33, %v9115_v17 }
 0x12b   : > { %8486 = vset.pattern.permute.xlu1 %v13204_v23 }
 0x12c   : > { %6861 = vmatmul.mubr.msk.f32.gmra.mrb[32].mxu1 %vm1051_vm15, %v13216_v25  ;;  %1578 = vperm.xlu1 %8486, %v9086_v42   ;;  %vm1068_vm15 = vcmp.eq.s32.totalorder %v8963_v37, %v9083_v12 }
 0x12d   : > { %6862 = vmatprep.mubr.msk.f32.mxu1 %vm2093_vm2, %v6647_v40  ;;  %1605 = vperm.xlu0 %8489, %v9188_v0   ;;  %v9280_v40 = vpop.permute.xlu1 %1482 }
 0x12e   : > { %13220 = vst [vmem:[#allocation22_spill] sm:$0xff] %v9280_v40  ;;  %v6655_v40 = vsel %vm1062_vm9, 1.0, %v13215_v16  ;;  %vm1071_vm9 = vcmp.eq.s32.totalorder %v8958_v33, %v9096_v43 }
 0x130   : > { %6863 = vmatmul.mubr.msk.f32.gmra.mrb[34].mxu1 %vm1053_vm1, %v13216_v25  ;;  %8487 = vset.pattern.permute.xlu1 %v13211_v7  ;;  %vm1070_vm1 = vcmp.eq.s32.totalorder %v8963_v37, %v9004_v49 }
 0x131   : > { %6864 = vmatprep.mubr.msk.f32.mxu1 %vm2093_vm2, %v6649_v18  ;;  %1026 = vperm.xlu1 %8487, %v9265_v2   ;;  %v9283_v18 = vpop.permute.xlu0 %957  ;;  %v6663_v48 = vsel %vm1070_vm1, 1.0, %v13215_v16  ;;  %vm1079_vm1 = vcmp.eq.s32.totalorder %v8958_v33, %v9133_v11 }
 0x132   : > { %1608 = vperm.xlu0 %8489, %v9201_v53  }
 0x134   : > { %6865 = vmatmul.mubr.msk.f32.gmra.mrb[36].mxu1 %vm1055_vm6, %v13216_v25  ;;  %vm1072_vm6 = vcmp.eq.s32.totalorder %v8963_v37, %v9096_v43  ;;  %v591_v43 = vcvt.s32.f32 %v9068_v10  ;;  %v577_v10 = vcvt.s32.f32 %v8887_v21 }
 0x135   : > { %6866 = vmatprep.mubr.msk.f32.mxu1 %vm2093_vm2, %v6651_v44  ;;  %8488 = vset.pattern.permute.xlu1 %v13204_v23  ;;  %v9297_v44 = vpop.permute.xlu1 %978  ;;  %v9302_v45 = vpop.permute.xlu0 %960  ;;  %v6665_v12 = vsel %vm1072_vm6, 1.0, %v13215_v16  ;;  %vm1081_vm6 = vcmp.eq.s32.totalorder %v8958_v33, %v9016_v52 }
 0x136   : > { %1587 = vperm.xlu1 %8488, %v9137_v29   ;;  %8494 = vset.pattern.permute.xlu0 %v13211_v7 }
 0x138   : > { %6867 = vmatmul.mubr.msk.f32.gmra.mrb[38].mxu1 %vm1057_vm8, %v13216_v25  ;;  %vm1074_vm8 = vcmp.eq.s32.totalorder %v8963_v37, %v9008_v50 }
 0x139   : > { %6868 = vmatprep.mubr.msk.f32.mxu1 %vm2093_vm2, %v6653_v62  ;;  %v9309_v62 = vld [vmem:[%s8692_s26 + $0x1f8] sm:$0xff]  ;;  %v9318_v57 = vpop.permute.xlu1 %1491 }
 0x13a   : > { %1590 = vperm.xlu1 %8488, %v9168_v41   ;;  %1041 = vperm.xlu0 %8494, %v9309_v62   ;;  %13221 = vst [vmem:[#allocation23_spill] sm:$0xff] %v9318_v57  ;;  %v6661_v57 = vsel %vm1068_vm15, 1.0, %v13215_v16  ;;  %vm1077_vm15 = vcmp.eq.s32.totalorder %v8958_v33, %v9012_v51 }
 0x13c   : > { %6869 = vmatmul.mubr.msk.f32.gmra.mrb[40].mxu1 %vm1059_vm10, %v13216_v25  ;;  %vm1076_vm10 = vcmp.eq.s32.totalorder %v8963_v37, %v9115_v17 }
 0x13d   : > { %6870 = vmatprep.mubr.msk.f32.mxu1 %vm2093_vm2, %v6655_v40  ;;  %v9325_v40 = vpop.permute.xlu0 %969  ;;  %v9339_v46 = vpop.permute.xlu1 %1494 }
 0x13e   : > { %1593 = vperm.xlu1 %8488, %v9148_v22   ;;  %8495 = vset.pattern.permute.xlu0 %v8548_v31  ;;  %13222 = vst [vmem:[#allocation24_spill] sm:$0xff] %v9339_v46 }
 0x13f   : > { %3386 = vperm.xlu0 %8495, %v542_v26  }
 0x140   : > { %6871 = vmatmul.mubr.msk.f32.gmra.mrb[42].mxu1 %vm1061_vm12, %v13216_v25  ;;  %vm1078_vm12 = vcmp.eq.s32.totalorder %v8963_v37, %v9012_v51  ;;  %v8501_v51 = vld [vmem:[%s8692_s26 + $0x8] sm:$0xff] }
 0x141   : > { %6872 = vmatprep.mubr.msk.f32.mxu1 %vm2093_vm2, %v6657_v9  ;;  %v559_v9 = vcvt.s32.f32 %v8810_v63  ;;  %v9343_v4 = vpop.permute.xlu0 %972  ;;  %v575_v63 = vcvt.s32.f32 %v8883_v20  ;;  %v9359_v26 = vpop.permute.xlu1 %1497  ;;  %v560_v20 = vcvt.s32.f32 %v8826_v3  ;;  %v8499_v3 = vld [vmem:[%s8692_s26 + $0x18] sm:$0xff]  ;;  %v6671_v50 = vsel %vm1078_vm12, 1.0, %v13215_v16 }
 0x142   : > { %1596 = vperm.xlu1 %8488, %v9163_v5   ;;  %13223 = vst [vmem:[#allocation25_spill] sm:$0xff] %v9359_v26  ;;  %vm1087_vm12 = vcmp.eq.s32.totalorder %v8958_v33, %v9173_v35 }
 0x143   : > { %3471 = vperm.xlu0 %8495, %v559_v9   ;;  %v545_v9 = vcvt.s32.f32 %v8499_v3 }
 0x144   : > { %6873 = vmatmul.mubr.msk.f32.gmra.mrb[44].mxu1 %vm1063_vm14, %v13216_v25  ;;  %vm1080_vm14 = vcmp.eq.s32.totalorder %v8963_v37, %v9133_v11  ;;  %v593_v11 = vcvt.s32.f32 %v9106_v34  ;;  %v579_v34 = vcvt.s32.f32 %v8938_v36  ;;  %v8503_v36 = vld [vmem:[%s8692_s26 + $0xb0] sm:$0xff] }
 0x145   : > { %6874 = vmatprep.mubr.msk.f32.mxu1 %vm2093_vm2, %v6659_v47  ;;  %v9370_v47 = vld [vmem:[%s8692_s26 + $0x1f0] sm:$0xff]  ;;  %v6673_v21 = vsel %vm1080_vm14, 1.0, %v13215_v16  ;;  %vm1089_vm14 = vcmp.eq.s32.totalorder %v8958_v33, %v9028_v55 }
 0x146   : > { %8490 = vset.pattern.permute.xlu1 %v13211_v7 }
 0x147   : > { %1035 = vperm.xlu1 %8490, %v9336_v13   ;;  %3551 = vperm.xlu0 %8495, %v575_v63   ;;  %v9381_v63 = vpop.permute.xlu1 %1500 }
 0x148   : > { %6875 = vmatmul.mubr.msk.f32.gmra.mrb[46].mxu1 %vm1065_vm0, %v13216_v25  ;;  %13224 = vst [vmem:[#allocation26_spill] sm:$0xff] %v9381_v63  ;;  %vm1082_vm0 = vcmp.eq.s32.totalorder %v8963_v37, %v9016_v52 }
 0x149   : > { %6876 = vmatprep.mubr.msk.f32.mxu1 %vm2093_vm2, %v6661_v57  ;;  %v9362_v57 = vpop.permute.xlu0 %981 }
 0x14b   : > { %8491 = vset.pattern.permute.xlu1 %v13204_v23  ;;  %3476 = vperm.xlu0 %8495, %v560_v20  }
 0x14c   : > { %6877 = vmatmul.mubr.msk.f32.gmra.mrb[48].mxu1 %vm1067_vm3, %v13216_v25  ;;  %1602 = vperm.xlu1 %8491, %v9265_v2   ;;  %vm1084_vm3 = vcmp.eq.s32.totalorder %v8963_v37, %v9156_v28 }
 0x14d   : > { %6878 = vmatprep.mubr.msk.f32.mxu1 %vm2093_vm2, %v6663_v48  ;;  %v9385_v49 = vpop.permute.xlu0 %984  ;;  %v6667_v48 = vsel %vm1074_vm8, 1.0, %v13215_v16  ;;  %vm1083_vm8 = vcmp.eq.s32.totalorder %v8958_v33, %v9156_v28 }
 0x14f   : > { %3401 = vperm.xlu0 %8495, %v545_v9   ;;  %v562_v9 = vcvt.s32.f32 %v8834_v6  ;;  %v8500_v6 = vld [vmem:[%s8692_s26 + $0x28] sm:$0xff] }
 0x150   : > { %6879 = vmatmul.mubr.msk.f32.gmra.mrb[50].mxu1 %vm1069_vm7, %v13216_v25  ;;  %8492 = vset.pattern.permute.xlu1 %v13211_v7  ;;  %v6669_v7 = vsel %vm1076_vm10, 1.0, %v13215_v16  ;;  %vm1086_vm7 = vcmp.eq.s32.totalorder %v8963_v37, %v9024_v54  ;;  %vm1085_vm10 = vcmp.eq.s32.totalorder %v8958_v33, %v9024_v54  ;;  %v8505_v54 = vld [vmem:[%s8692_s26 + $0x98] sm:$0xff] }
 0x151   : > { %6880 = vmatprep.mubr.msk.f32.mxu1 %vm2093_vm2, %v6665_v12  ;;  %1038 = vperm.xlu1 %8492, %v9370_v47   ;;  %v9395_v20 = vpop.permute.xlu0 %1431  ;;  %v9399_v12 = vpop.permute.xlu1 %987 }
 0x152   : > { %13225 = vst [vmem:[#allocation27_spill] sm:$0xff] %v9395_v20 }
 0x153   : > { %3631 = vperm.xlu0 %8495, %v591_v43   ;;  %v547_v43 = vcvt.s32.f32 %v8500_v6  ;;  %v6679_v6 = vsel %vm1086_vm7, 1.0, %v13215_v16  ;;  %vm1095_vm7 = vcmp.eq.s32.totalorder %v8958_v33, %v9206_v39 }
 0x154   : > { %6881 = vmatmul.mubr.msk.f32.gmra.mrb[52].mxu1 %vm1071_vm9, %v13216_v25  ;;  %vm1088_vm9 = vcmp.eq.s32.totalorder %v8963_v37, %v9173_v35  ;;  %v576_v35 = vcvt.s32.f32 %v8913_v30  ;;  %v8506_v30 = vld [vmem:[%s8692_s26 + $0x20] sm:$0xff] }
 0x155   : > { %6882 = vmatprep.mubr.msk.f32.mxu1 %vm2093_vm2, %v6667_v48  ;;  %8493 = vset.pattern.permute.xlu1 %v13204_v23  ;;  %v9413_v3 = vpop.permute.xlu0 %1437  ;;  %v9417_v17 = vpop.permute.xlu1 %1506  ;;  %v558_v48 = vcvt.s32.f32 %v8817_v1  ;;  %v6675_v1 = vsel %vm1082_vm0, 1.0, %v13215_v16  ;;  %vm1091_vm0 = vcmp.eq.s32.totalorder %v8958_v33, %v9184_v14 }
 0x156   : > { %1611 = vperm.xlu1 %8493, %v9336_v13   ;;  %13226 = vst [vmem:[#allocation28_spill] sm:$0xff] %v9413_v3  ;;  %13227 = vst [vmem:[#allocation29_spill] sm:$0xff] %v9417_v17 }
 0x157   : > { %3561 = vperm.xlu0 %8495, %v577_v10   ;;  %v543_v10 = vcvt.s32.f32 %v8501_v51  ;;  %v590_v51 = vcvt.s32.f32 %v9061_v8  ;;  %v561_v8 = vcvt.s32.f32 %v8505_v54  ;;  %v8508_v54 = vld [vmem:[%s8692_s26 + $0x48] sm:$0xff] }
 0x158   : > { %6883 = vmatmul.mubr.msk.f32.gmra.mrb[54].mxu1 %vm1073_vm11, %v13216_v25  ;;  %vm1090_vm11 = vcmp.eq.s32.totalorder %v8963_v37, %v9028_v55 }
 0x159   : > { %6884 = vmatprep.mubr.msk.f32.mxu1 %vm2093_vm2, %v6669_v7  ;;  %v9430_v7 = vpop.permute.xlu0 %1440 }
 0x15a   : > { %1614 = vperm.xlu1 %8493, %v9370_v47   ;;  %13228 = vst [vmem:[#allocation30_spill] sm:$0xff] %v9430_v7 }
 0x15b   : > { %3486 = vperm.xlu0 %8495, %v562_v9   ;;  %v6677_v9 = vsel %vm1084_vm3, 1.0, %v13215_v16  ;;  %vm1093_vm3 = vcmp.eq.s32.totalorder %v8958_v33, %v9036_v58 }
 0x15c   : > { %6885 = vmatmul.mubr.msk.f32.gmra.mrb[56].mxu1 %vm1075_vm13, %v13216_v25  ;;  %vm1092_vm13 = vcmp.eq.s32.totalorder %v8963_v37, %v9184_v14 }
 0x15d   : > { %6886 = vmatprep.mubr.msk.f32.mxu1 %vm2093_vm2, %v6671_v50  ;;  %v9436_v50 = vpop.permute.xlu1 %990 }
 0x15e   : > { %1617 = vperm.xlu1 %8493, %v9309_v62  }
 0x15f   : > { %3411 = vperm.xlu0 %8495, %v547_v43   ;;  %v564_v43 = vcvt.s32.f32 %v8503_v36  ;;  %v546_v36 = vcvt.s32.f32 %v8506_v30 }
 0x160   : > { %6887 = vmatmul.mubr.msk.f32.gmra.mrb[58].mxu1 %vm1077_vm15, %v13216_v25  ;;  %vm1094_vm15 = vcmp.eq.s32.totalorder %v8963_v37, %v9036_v58 }
 0x161   : > { %6888 = vmatprep.mubr.msk.f32.mxu1 %vm2093_vm2, %v6673_v21  ;;  %v9450_v21 = vpop.permute.xlu0 %1455 }
 0x162   : > { %8496 = vset.pattern.permute.xlu1 %v8548_v31  ;;  %v574_v31 = vcvt.s32.f32 %v8879_v19  ;;  %13229 = vst [vmem:[#allocation31_spill] sm:$0xff] %v9450_v21  ;;  %v8502_v19 = vld [vmem:[%s8692_s26 + $0x10] sm:$0xff] }
 0x163   : > { %3466 = vperm.xlu1 %8496, %v558_v48   ;;  %v9453_v48 = vpop.permute.xlu1 %1515  ;;  %3641 = vperm.xlu0 %8495, %v593_v11   ;;  %v544_v52 = vcvt.s32.f32 %v8502_v19  ;;  %v8504_v11 = vld [vmem:[%s8692_s26 + $0x38] sm:$0xff]  ;;  %v595_v19 = vcvt.s32.f32 %v9137_v29  ;;  %v581_v29 = vcvt.s32.f32 %v8909_v27  ;;  %v8507_v27 = vld [vmem:[%s8692_s26 + $0xc0] sm:$0xff] }
 0x164   : > { %6889 = vmatmul.mubr.msk.f32.gmra.mrb[60].mxu1 %vm1079_vm1, %v13216_v25  ;;  %13230 = vst [vmem:[#allocation32_spill] sm:$0xff] %v9453_v48  ;;  %vm1096_vm1 = vcmp.eq.s32.totalorder %v8963_v37, %v9206_v39  ;;  %v566_v14 = vcvt.s32.f32 %v8507_v27 }
 0x165   : > { %6890 = vmatprep.mubr.msk.f32.mxu1 %vm2093_vm2, %v6675_v1  ;;  %v9466_v28 = vpop.permute.xlu0 %1461 }
 0x166   : > { %13231 = vst [vmem:[#allocation33_spill] sm:$0xff] %v9466_v28 }
 0x167   : > { %3391 = vperm.xlu1 %8496, %v543_v10   ;;  %3571 = vperm.xlu0 %8495, %v579_v34   ;;  %v6681_v10 = vsel %vm1088_vm9, 1.0, %v13215_v16  ;;  %v9471_v1 = vpop.permute.xlu1 %1518  ;;  %vm1097_vm9 = vcmp.eq.s32.totalorder %v8958_v33, %v9040_v59 }
 0x168   : > { %6891 = vmatmul.mubr.msk.f32.gmra.mrb[62].mxu1 %vm1081_vm6, %v13216_v25  ;;  %13232 = vst [vmem:[#allocation34_spill] sm:$0xff] %v9471_v1  ;;  %vm1098_vm6 = vcmp.eq.s32.totalorder %v8963_v37, %v9040_v59  ;;  %v8511_v59 = vld [vmem:[%s8692_s26 + $0x30] sm:$0xff] }
 0x169   : > { %6892 = vmatprep.mubr.msk.f32.mxu1 %vm2093_vm2, %v6677_v9  ;;  %v6683_v9 = vsel %vm1090_vm11, 1.0, %v13215_v16  ;;  %v9485_v34 = vpop.permute.xlu0 %1464  ;;  %vm1099_vm11 = vcmp.eq.s32.totalorder %v8958_v33, %v9224_v32  ;;  %v548_v27 = vcvt.s32.f32 %v8511_v59 }
 0x16a   : > { %13233 = vst [vmem:[#allocation35_spill] sm:$0xff] %v9485_v34 }
 0x16b   : > { %3546 = vperm.xlu1 %8496, %v574_v31   ;;  %v549_v31 = vcvt.s32.f32 %v8504_v11  ;;  %3496 = vperm.xlu0 %8495, %v564_v43   ;;  %v6687_v43 = vsel %vm1094_vm15, 1.0, %v13215_v16  ;;  %v6689_v11 = vsel %vm1096_vm1, 1.0, %v13215_v16  ;;  %vm1103_vm15 = vcmp.eq.s32.totalorder %v8958_v33, %v9246_v15 }
 0x16c   : > { %6893 = vmatmul.mubr.msk.f32.gmra.mrb[64].mxu1 %vm1083_vm8, %v13216_v25  ;;  %vm1100_vm8 = vcmp.eq.s32.totalorder %v8963_v37, %v9224_v32  ;;  %v594_v32 = vcvt.s32.f32 %v9118_v24  ;;  %v8514_v24 = vld [vmem:[%s8692_s26 + $0xb8] sm:$0xff] }
 0x16d   : > { %6894 = vmatprep.mubr.msk.f32.mxu1 %vm2093_vm2, %v6679_v6  ;;  %v6685_v6 = vsel %vm1092_vm13, 1.0, %v13215_v16  ;;  %v9501_v55 = vpop.permute.xlu0 %1479  ;;  %v6693_v30 = vsel %vm1100_vm8, 1.0, %v13215_v16  ;;  %vm1101_vm13 = vcmp.eq.s32.totalorder %v8958_v33, %v9046_v61 }
 0x16e   : > { %13235 = vst [vmem:[#allocation37_spill] sm:$0xff] %v9501_v55 }
 0x16f   : > { %3396 = vperm.xlu1 %8496, %v544_v52   ;;  %v9488_v52 = vpop.permute.xlu1 %1521  ;;  %3421 = vperm.xlu0 %8495, %v549_v31  }
 0x170   : > { %6895 = vmatmul.mubr.msk.f32.gmra.mrb[66].mxu1 %vm1085_vm10, %v13216_v25  ;;  %13234 = vst [vmem:[#allocation36_spill] sm:$0xff] %v9488_v52  ;;  %vm1102_vm10 = vcmp.eq.s32.totalorder %v8963_v37, %v9046_v61 }
 0x171   : > { %6896 = vmatprep.mubr.msk.f32.mxu1 %vm2093_vm2, %v6681_v10  ;;  %v592_v10 = vcvt.s32.f32 %v9086_v42  ;;  %v9520_v31 = vpop.permute.xlu0 %1485  ;;  %v8509_v42 = vld [vmem:[%s8692_s26 + $0xa8] sm:$0xff] }
 0x172   : > { %13237 = vst [vmem:[#allocation39_spill] sm:$0xff] %v9520_v31  ;;  %v563_v58 = vcvt.s32.f32 %v8509_v42 }
 0x173   : > { %3626 = vperm.xlu1 %8496, %v590_v51   ;;  %3651 = vperm.xlu0 %8495, %v595_v19   ;;  %v9506_v51 = vpop.permute.xlu1 %1524  ;;  %v6691_v19 = vsel %vm1098_vm6, 1.0, %v13215_v16  ;;  %vm1107_vm6 = vcmp.eq.s32.totalorder %v8958_v33, %v9262_v56 }
 0x174   : > { %6897 = vmatmul.mubr.msk.f32.gmra.mrb[68].mxu1 %vm1087_vm12, %v13216_v25  ;;  %13236 = vst [vmem:[#allocation38_spill] sm:$0xff] %v9506_v51  ;;  %vm1104_vm12 = vcmp.eq.s32.totalorder %v8963_v37, %v9246_v15  ;;  %v8515_v15 = vld [vmem:[%s8692_s26 + $0x130] sm:$0xff] }
 0x175   : > { %6898 = vmatprep.mubr.msk.f32.mxu1 %vm2093_vm2, %v6683_v9  ;;  %v9536_v39 = vpop.permute.xlu0 %1488  ;;  %v6697_v42 = vsel %vm1104_vm12, 1.0, %v13215_v16  ;;  %vm1113_vm12 = vcmp.eq.s32.totalorder %v8958_v33, %v9283_v18 }
 0x176   : > { %13238 = vst [vmem:[#allocation40_spill] sm:$0xff] %v9536_v39 }
 0x177   : > { %3481 = vperm.xlu1 %8496, %v561_v8   ;;  %3581 = vperm.xlu0 %8495, %v581_v29   ;;  %v551_v8 = vcvt.s32.f32 %v8508_v54  ;;  %v9523_v9 = vpop.permute.xlu1 %999 }
 0x178   : > { %6899 = vmatmul.mubr.msk.f32.gmra.mrb[70].mxu1 %vm1089_vm14, %v13216_v25 }
 0x179   : > { %6900 = vmatprep.mubr.msk.f32.mxu1 %vm2093_vm2, %v6685_v6  ;;  %v8510_v6 = vld [vmem:[%s8692_s26 + $0x120] sm:$0xff] }
 0x17a   : > { %v578_v29 = vcvt.s32.f32 %v8510_v6  ;;  %v565_v6 = vcvt.s32.f32 %v8514_v24 }
 0x17b   : > { %3556 = vperm.xlu1 %8496, %v576_v35   ;;  %3506 = vperm.xlu0 %8495, %v566_v14   ;;  %v597_v35 = vcvt.s32.f32 %v9148_v22  ;;  %v13240_v22 = vld [vmem:[#allocation5_spill] sm:$0xff]  ;;  %v6695_v14 = vsel %vm1102_vm10, 1.0, %v13215_v16 }
 0x17c   : > { %6901 = vmatmul.mubr.msk.f32.gmra.mrb[72].mxu1 %vm1091_vm0, %v13216_v25  ;;  %vm1108_vm0 = vcmp.eq.s32.totalorder %v8963_v37, %v9262_v56 }
 0x17d   : > { %6902 = vmatprep.mubr.msk.f32.mxu1 %vm2093_vm2, %v6687_v43  ;;  %v583_v43 = vcvt.s32.f32 %v13240_v22  ;;  %v599_v22 = vcvt.s32.f32 %v9230_v38  ;;  %v6701_v59 = vsel %vm1108_vm0, 1.0, %v13215_v16  ;;  %v8516_v38 = vld [vmem:[%s8692_s26 + $0x158] sm:$0xff] }
 0x17f   : > { %3406 = vperm.xlu1 %8496, %v546_v36   ;;  %3431 = vperm.xlu0 %8495, %v551_v8   ;;  %v9541_v36 = vpop.permute.xlu1 %1530 }
 0x180   : > { %6903 = vmatmul.mubr.msk.f32.gmra.mrb[74].mxu1 %vm1093_vm3, %v13216_v25  ;;  %13239 = vst [vmem:[#allocation41_spill] sm:$0xff] %v9541_v36 }
 0x181   : > { %6904 = vmatprep.mubr.msk.f32.mxu1 %vm2093_vm2, %v6689_v11  ;;  %v8512_v11 = vld [vmem:[%s8692_s26 + $0xd0] sm:$0xff] }
 0x182   : > { %v568_v54 = vcvt.s32.f32 %v8512_v11  ;;  %v585_v11 = vcvt.s32.f32 %v8516_v38 }
 0x183   : > { %3636 = vperm.xlu1 %8496, %v592_v10   ;;  %3661 = vperm.xlu0 %8495, %v597_v35   ;;  %v9555_v10 = vpop.permute.xlu0 %1503  ;;  %v9558_v8 = vpop.permute.xlu1 %1002 }
 0x184   : > { %6905 = vmatmul.mubr.msk.f32.gmra.mrb[76].mxu1 %vm1095_vm7, %v13216_v25  ;;  %13241 = vst [vmem:[#allocation5_spill] sm:$0xff] %v9555_v10 }
 0x185   : > { %6906 = vmatprep.mubr.msk.f32.mxu1 %vm2093_vm2, %v6691_v19  ;;  %v8513_v19 = vld [vmem:[%s8692_s26 + $0x58] sm:$0xff] }
 0x186   : > { %v553_v35 = vcvt.s32.f32 %v8513_v19  ;;  %v13248_v19 = vld [vmem:[#allocation10_spill] sm:$0xff] }
 0x187   : > { %3491 = vperm.xlu1 %8496, %v563_v58   ;;  %3591 = vperm.xlu0 %8495, %v583_v43   ;;  %v13242_v58 = vld [vmem:[#allocation6_spill] sm:$0xff]  ;;  %v9571_v61 = vpop.permute.xlu0 %1509  ;;  %v580_v43 = vcvt.s32.f32 %v8515_v15  ;;  %vm1112_vm7 = vcmp.eq.s32.totalorder %v8963_v37, %v13248_v19  ;;  %v8519_v15 = vld [vmem:[%s8692_s26 + $0x68] sm:$0xff]  ;;  %vm1111_vm10 = vcmp.eq.s32.totalorder %v8958_v33, %v13248_v19 }
 0x188   : > { %6907 = vmatmul.mubr.msk.f32.gmra.mrb[78].mxu1 %vm1097_vm9, %v13216_v25  ;;  %vm1106_vm14 = vcmp.eq.s32.totalorder %v8963_v37, %v13242_v58  ;;  %13243 = vst [vmem:[#allocation6_spill] sm:$0xff] %v9571_v61  ;;  %vm1105_vm1 = vcmp.eq.s32.totalorder %v8958_v33, %v13242_v58  ;;  %vm1114_vm9 = vcmp.eq.s32.totalorder %v8963_v37, %v9283_v18 }
 0x189   : > { %6908 = vmatprep.mubr.msk.f32.mxu1 %vm2093_vm2, %v6693_v30  ;;  %v9576_v30 = vpop.permute.xlu1 %1539 }
 0x18a   : > { %13244 = vst [vmem:[#allocation42_spill] sm:$0xff] %v9576_v30 }
 0x18b   : > { %3566 = vperm.xlu1 %8496, %v578_v29   ;;  %3516 = vperm.xlu0 %8495, %v568_v54   ;;  %v6699_v29 = vsel %vm1106_vm14, 1.0, %v13215_v16  ;;  %vm1115_vm14 = vcmp.eq.s32.totalorder %v8958_v33, %v9302_v45 }
 0x18c   : > { %6909 = vmatmul.mubr.msk.f32.gmra.mrb[80].mxu1 %vm1099_vm11, %v13216_v25  ;;  %vm1116_vm11 = vcmp.eq.s32.totalorder %v8963_v37, %v9302_v45 }
 0x18d   : > { %6910 = vmatprep.mubr.msk.f32.mxu1 %vm2093_vm2, %v6695_v14  ;;  %v9590_v14 = vpop.permute.xlu0 %1512  ;;  %v9593_v54 = vpop.permute.xlu1 %1542  ;;  %v6709_v19 = vsel %vm1116_vm11, 1.0, %v13215_v16  ;;  %vm1125_vm11 = vcmp.eq.s32.totalorder %v8958_v33, %v9257_v60 }
 0x18e   : > { %13247 = vst [vmem:[#allocation43_spill] sm:$0xff] %v9593_v54 }
 0x18f   : > { %3416 = vperm.xlu1 %8496, %v548_v27   ;;  %3441 = vperm.xlu0 %8495, %v553_v35   ;;  %v13245_v27 = vld [vmem:[#allocation8_spill] sm:$0xff]  ;;  %v8518_v35 = vld [vmem:[%s8692_s26 + $0xe0] sm:$0xff] }
 0x190   : > { %6911 = vmatmul.mubr.msk.f32.gmra.mrb[82].mxu1 %vm1101_vm13, %v13216_v25  ;;  %vm1110_vm3 = vcmp.eq.s32.totalorder %v8963_v37, %v13245_v27  ;;  %13246 = vst [vmem:[#allocation8_spill] sm:$0xff] %v9590_v14  ;;  %v570_v24 = vcvt.s32.f32 %v8518_v35  ;;  %vm1109_vm8 = vcmp.eq.s32.totalorder %v8958_v33, %v13245_v27  ;;  %v6707_v27 = vsel %vm1114_vm9, 1.0, %v13215_v16  ;;  %v13253_v35 = vld [vmem:[#allocation15_spill] sm:$0xff] }
 0x191   : > { %6912 = vmatprep.mubr.msk.f32.mxu1 %vm2093_vm2, %v6697_v42  ;;  %v6703_v58 = vsel %vm1110_vm3, 1.0, %v13215_v16  ;;  %v9606_v56 = vpop.permute.xlu0 %1527  ;;  %vm1118_vm13 = vcmp.eq.s32.totalorder %v8963_v37, %v13253_v35  ;;  %vm1117_vm0 = vcmp.eq.s32.totalorder %v8958_v33, %v13253_v35  ;;  %vm1123_vm9 = vcmp.eq.s32.totalorder %v8958_v33, %v9343_v4 }
 0x192   : > { %13249 = vst [vmem:[#allocation10_spill] sm:$0xff] %v9606_v56 }
 0x193   : > { %3646 = vperm.xlu1 %8496, %v594_v32   ;;  %3671 = vperm.xlu0 %8495, %v599_v22   ;;  %v8517_v32 = vld [vmem:[%s8692_s26 + $0x40] sm:$0xff]  ;;  %v9611_v22 = vpop.permute.xlu1 %1545 }
 0x194   : > { %6913 = vmatmul.mubr.msk.f32.gmra.mrb[84].mxu1 %vm1103_vm15, %v13216_v25  ;;  %v550_v42 = vcvt.s32.f32 %v8517_v32  ;;  %13250 = vst [vmem:[#allocation44_spill] sm:$0xff] %v9611_v22 }
 0x195   : > { %6914 = vmatprep.mubr.msk.f32.mxu1 %vm2093_vm2, %v6699_v29  ;;  %v6705_v29 = vsel %vm1112_vm7, 1.0, %v13215_v16  ;;  %v9625_v38 = vpop.permute.xlu0 %1533  ;;  %vm1121_vm7 = vcmp.eq.s32.totalorder %v8958_v33, %v9325_v40 }
 0x196   : > { %13251 = vst [vmem:[#allocation45_spill] sm:$0xff] %v9625_v38 }
 0x197   : > { %3501 = vperm.xlu1 %8496, %v565_v6   ;;  %3601 = vperm.xlu0 %8495, %v585_v11   ;;  %v596_v6 = vcvt.s32.f32 %v9168_v41  ;;  %v8520_v41 = vld [vmem:[%s8692_s26 + $0xc8] sm:$0xff]  ;;  %v601_v11 = vcvt.s32.f32 %v9188_v0  ;;  %v9628_v32 = vpop.permute.xlu1 %1548 }
 0x198   : > { %6915 = vmatmul.mubr.msk.f32.gmra.mrb[86].mxu1 %vm1105_vm1, %v13216_v25  ;;  %13252 = vst [vmem:[#allocation46_spill] sm:$0xff] %v9628_v32  ;;  %v8522_v0 = vld [vmem:[%s8692_s26 + $0x168] sm:$0xff]  ;;  %vm1122_vm1 = vcmp.eq.s32.totalorder %v8963_v37, %v9325_v40  ;;  %v8529_v40 = vld [vmem:[%s8692_s26 + $0x60] sm:$0xff] }
 0x199   : > { %6916 = vmatprep.mubr.msk.f32.mxu1 %vm2093_vm2, %v6701_v59  ;;  %v567_v59 = vcvt.s32.f32 %v8520_v41  ;;  %v9641_v18 = vpop.permute.xlu0 %1536  ;;  %v13255_v41 = vld [vmem:[#allocation17_spill] sm:$0xff] }
 0x19a   : > { %13254 = vst [vmem:[#allocation15_spill] sm:$0xff] %v9641_v18  ;;  %vm1120_vm15 = vcmp.eq.s32.totalorder %v8963_v37, %v13255_v41  ;;  %vm1119_vm3 = vcmp.eq.s32.totalorder %v8958_v33, %v13255_v41 }
 0x19b   : > { %3576 = vperm.xlu1 %8496, %v580_v43   ;;  %v555_v43 = vcvt.s32.f32 %v8519_v15  ;;  %3526 = vperm.xlu0 %8495, %v570_v24   ;;  %v587_v24 = vcvt.s32.f32 %v8522_v0  ;;  %v6711_v15 = vsel %vm1118_vm13, 1.0, %v13215_v16  ;;  %vm1127_vm13 = vcmp.eq.s32.totalorder %v8958_v33, %v9297_v44 }
 0x19c   : > { %6917 = vmatmul.mubr.msk.f32.gmra.mrb[88].mxu1 %vm1107_vm6, %v13216_v25  ;;  %vm1124_vm6 = vcmp.eq.s32.totalorder %v8963_v37, %v9343_v4 }
 0x19d   : > { %6918 = vmatprep.mubr.msk.f32.mxu1 %vm2093_vm2, %v6703_v58 }
 0x19f   : > { %3426 = vperm.xlu1 %8496, %v550_v42   ;;  %3451 = vperm.xlu0 %8495, %v555_v43   ;;  %v8521_v42 = vld [vmem:[%s8692_s26 + $0x140] sm:$0xff]  ;;  %v9646_v43 = vpop.permute.xlu1 %1011 }
 0x1a0   : > { %6919 = vmatmul.mubr.msk.f32.gmra.mrb[90].mxu1 %vm1109_vm8, %v13216_v25  ;;  %v582_v58 = vcvt.s32.f32 %v8521_v42  ;;  %v9660_v42 = vpop.permute.xlu0 %1551  ;;  %vm1126_vm8 = vcmp.eq.s32.totalorder %v8963_v37, %v9257_v60 }
 0x1a1   : > { %6920 = vmatprep.mubr.msk.f32.mxu1 %vm2093_vm2, %v6705_v29  ;;  %13256 = vst [vmem:[#allocation17_spill] sm:$0xff] %v9660_v42 }
 0x1a3   : > { %3656 = vperm.xlu1 %8496, %v596_v6   ;;  %3681 = vperm.xlu0 %8495, %v601_v11   ;;  %v8523_v6 = vld [vmem:[%s8692_s26 + $0x50] sm:$0xff]  ;;  %v6713_v11 = vsel %vm1120_vm15, 1.0, %v13215_v16  ;;  %v9663_v0 = vpop.permute.xlu1 %1554  ;;  %vm1134_vm15 = vcmp.eq.s32.totalorder %v8963_v37, %v9399_v12 }
 0x1a4   : > { %6921 = vmatmul.mubr.msk.f32.gmra.mrb[92].mxu1 %vm1111_vm10, %v13216_v25  ;;  %v552_v29 = vcvt.s32.f32 %v8523_v6  ;;  %13257 = vst [vmem:[#allocation47_spill] sm:$0xff] %v9663_v0  ;;  %v603_v6 = vcvt.s32.f32 %v9336_v13  ;;  %v8528_v13 = vld [vmem:[%s8692_s26 + $0x178] sm:$0xff]  ;;  %vm1128_vm10 = vcmp.eq.s32.totalorder %v8963_v37, %v9297_v44 }
 0x1a5   : > { %6922 = vmatprep.mubr.msk.f32.mxu1 %vm2093_vm2, %v6707_v27  ;;  %v598_v27 = vcvt.s32.f32 %v9163_v5  ;;  %v8526_v5 = vld [vmem:[%s8692_s26 + $0xd8] sm:$0xff] }
 0x1a6   : > { %v569_v35 = vcvt.s32.f32 %v8526_v5  ;;  %v605_v5 = vcvt.s32.f32 %v9309_v62 }
 0x1a7   : > { %3511 = vperm.xlu1 %8496, %v567_v59   ;;  %v8524_v59 = vld [vmem:[%s8692_s26 + $0xf0] sm:$0xff]  ;;  %3611 = vperm.xlu0 %8495, %v587_v24   ;;  %v6715_v24 = vsel %vm1122_vm1, 1.0, %v13215_v16  ;;  %vm1136_vm1 = vcmp.eq.s32.totalorder %v8963_v37, %v9436_v50 }
 0x1a8   : > { %6923 = vmatmul.mubr.msk.f32.gmra.mrb[94].mxu1 %vm1113_vm12, %v13216_v25  ;;  %v572_v45 = vcvt.s32.f32 %v8524_v59  ;;  %v6717_v59 = vsel %vm1124_vm6, 1.0, %v13215_v16  ;;  %vm1130_vm12 = vcmp.eq.s32.totalorder %v8963_v37, %v9362_v57  ;;  %vm1133_vm6 = vcmp.eq.s32.totalorder %v8958_v33, %v9399_v12 }
 0x1a9   : > { %6924 = vmatprep.mubr.msk.f32.mxu1 %vm2093_vm2, %v6709_v19 }
 0x1ab   : > { %3586 = vperm.xlu1 %8496, %v582_v58   ;;  %v8525_v58 = vld [vmem:[%s8692_s26 + $0x78] sm:$0xff]  ;;  %3536 = vperm.xlu0 %8495, %v572_v45   ;;  %v9681_v45 = vpop.permute.xlu1 %1014 }
 0x1ac   : > { %6925 = vmatmul.mubr.msk.f32.gmra.mrb[96].mxu1 %vm1115_vm14, %v13216_v25  ;;  %v557_v19 = vcvt.s32.f32 %v8525_v58  ;;  %v6719_v58 = vsel %vm1126_vm8, 1.0, %v13215_v16  ;;  %vm1132_vm14 = vcmp.eq.s32.totalorder %v8963_v37, %v9385_v49  ;;  %vm1135_vm8 = vcmp.eq.s32.totalorder %v8958_v33, %v9436_v50  ;;  %v8533_v50 = vld [vmem:[%s8692_s26 + $0xf8] sm:$0xff] }
 0x1ad   : > { %6926 = vmatprep.mubr.msk.f32.mxu1 %vm2093_vm2, %v6711_v15  ;;  %v8527_v15 = vld [vmem:[%s8692_s26 + $0x150] sm:$0xff] }
 0x1ae   : > { %v584_v41 = vcvt.s32.f32 %v8527_v15  ;;  %v600_v15 = vcvt.s32.f32 %v9265_v2 }
 0x1af   : > { %3436 = vperm.xlu1 %8496, %v552_v29   ;;  %3461 = vperm.xlu0 %8495, %v557_v19   ;;  %v9676_v29 = vpop.permute.xlu0 %1557 }
 0x1b0   : > { %6927 = vmatmul.mubr.msk.f32.gmra.mrb[98].mxu1 %vm1117_vm0, %v13216_v25  ;;  %13258 = vst [vmem:[#allocation48_spill] sm:$0xff] %v9676_v29  ;;  %vm1129_vm0 = vcmp.eq.s32.totalorder %v8958_v33, %v9362_v57 }
 0x1b1   : > { %6928 = vmatprep.mubr.msk.f32.mxu1 %vm2093_vm2, %v6713_v11  ;;  %v554_v11 = vcvt.s32.f32 %v8529_v40 }
 0x1b3   : > { %3666 = vperm.xlu1 %8496, %v598_v27   ;;  %v589_v27 = vcvt.s32.f32 %v8528_v13  ;;  %3691 = vperm.xlu0 %8495, %v603_v6   ;;  %v9695_v19 = vpop.permute.xlu0 %1560 }
 0x1b4   : > { %6929 = vmatmul.mubr.msk.f32.gmra.mrb[100].mxu1 %vm1119_vm3, %v13216_v25  ;;  %13259 = vst [vmem:[#allocation49_spill] sm:$0xff] %v9695_v19  ;;  %vm1131_vm3 = vcmp.eq.s32.totalorder %v8958_v33, %v9385_v49 }
 0x1b5   : > { %6930 = vmatprep.mubr.msk.f32.mxu1 %vm2093_vm2, %v6715_v24  ;;  %v6721_v24 = vsel %vm1128_vm10, 1.0, %v13215_v16 }
 0x1b7   : > { %3521 = vperm.xlu1 %8496, %v569_v35   ;;  %v9698_v35 = vpop.permute.xlu1 %1563  ;;  %3621 = vperm.xlu0 %8495, %v589_v27   ;;  %v9711_v6 = vpop.permute.xlu0 %993  ;;  %v8530_v27 = vld [vmem:[%s8692_s26 + $0xe8] sm:$0xff] }
 0x1b8   : > { %6931 = vmatmul.mubr.msk.f32.gmra.mrb[102].mxu1 %vm1121_vm7, %v13216_v25  ;;  %13260 = vst [vmem:[#allocation50_spill] sm:$0xff] %v9698_v35  ;;  %v571_v44 = vcvt.s32.f32 %v8530_v27  ;;  %vm1138_vm7 = vcmp.eq.s32.totalorder %v8963_v37, %v9711_v6  ;;  %vm1137_vm10 = vcmp.eq.s32.totalorder %v8958_v33, %v9711_v6 }
 0x1b9   : > { %6932 = vmatprep.mubr.msk.f32.mxu1 %vm2093_vm2, %v6717_v59  ;;  %v6723_v59 = vsel %vm1130_vm12, 1.0, %v13215_v16 }
 0x1bb   : > { %3596 = vperm.xlu1 %8496, %v584_v41   ;;  %3701 = vperm.xlu0 %8495, %v605_v5   ;;  %v9722_v13 = vpop.permute.xlu1 %1566  ;;  %v6725_v5 = vsel %vm1132_vm14, 1.0, %v13215_v16  ;;  %vm1141_vm14 = vcmp.eq.s32.totalorder %v8958_v33, %v9523_v9 }
 0x1bc   : > { %6933 = vmatmul.mubr.msk.f32.gmra.mrb[104].mxu1 %vm1123_vm9, %v13216_v25  ;;  %13264 = vst [vmem:[#allocation54_spill] sm:$0xff] %v9722_v13 }
 0x1bd   : > { %6934 = vmatprep.mubr.msk.f32.mxu1 %vm2093_vm2, %v6719_v58 }
 0x1bf   : > { %3446 = vperm.xlu1 %8496, %v554_v11   ;;  %8497 = vset.pattern.permute.xlu0 %v13204_v23  ;;  %v9737_v11 = vpop.permute.xlu0 %996  ;;  %v9750_v27 = vpop.permute.xlu1 %1569 }
 0x1c0   : > { %6935 = vmatmul.mubr.msk.f32.gmra.mrb[106].mxu1 %vm1125_vm11, %v13216_v25  ;;  %v9703_v4 = vpop.f32.mrb[16].mxu0  ;;  %13268 = vst [vmem:[#allocation58_spill] sm:$0xff] %v9750_v27  ;;  %vm1140_vm9 = vcmp.eq.s32.totalorder %v8963_v37, %v9737_v11  ;;  %vm1142_vm11 = vcmp.eq.s32.totalorder %v8963_v37, %v9523_v9  ;;  %vm1139_vm12 = vcmp.eq.s32.totalorder %v8958_v33, %v9737_v11 }
 0x1c1   : > { %13261 = vst [vmem:[#allocation51_spill] sm:$0xff] %v9703_v4  ;;  %6936 = vmatprep.mubr.msk.f32.mxu1 %vm2093_vm2, %v6721_v24  ;;  %v9709_v62 = vpop.f32.mrb[17].mxu0 }
 0x1c2   : > { %13262 = vst [vmem:[#allocation52_spill] sm:$0xff] %v9709_v62  ;;  %v8296_v60 = vpack.c.bf16 %v9703_v4, %v9709_v62  ;;  %v465_v4 = vld [vmem:[%s12733_s8 + $0x8] sm:$0xff] }
 0x1c3   : > { %3676 = vperm.xlu1 %8496, %v600_v15   ;;  %v8531_v15 = vld [vmem:[%s8692_s26 + $0x160] sm:$0xff] }
 0x1c4   : > { %6937 = vmatmul.mubr.msk.f32.gmra.mrb[108].mxu1 %vm1127_vm13, %v13216_v25  ;;  %v9719_v41 = vpop.f32.mrb[18].mxu0  ;;  %8297 = vmatprep.subr.bf16.mxu0 %v8296_v60  ;;  %vm1144_vm13 = vcmp.eq.s32.totalorder %v8963_v37, %v9558_v8 }
 0x1c5   : > { %13263 = vst [vmem:[#allocation53_spill] sm:$0xff] %v9719_v41  ;;  %6938 = vmatprep.mubr.msk.f32.mxu1 %vm2093_vm2, %v6723_v59  ;;  %v9727_v2 = vpop.f32.mrb[19].mxu0  ;;  %8299 = vmatpush3.bf16.msra.mxu0 %v8296_v60  ;;  %v586_v60 = vcvt.s32.f32 %v8531_v15  ;;  %v6727_v59 = vsel %vm1134_vm15, 1.0, %v13215_v16 }
 0x1c6   : > { %13265 = vst [vmem:[#allocation55_spill] sm:$0xff] %v9727_v2  ;;  %v8300_v40 = vpack.c.bf16 %v9719_v41, %v9727_v2  ;;  %v6729_v41 = vsel %vm1136_vm1, 1.0, %v13215_v16  ;;  %vm1620_vm1 = vcmp.eq.s32.totalorder %v8958_v33, %v9395_v20  ;;  %v13303_v20 = vld [vmem:[#allocation21_spill] sm:$0xff] }
 0x1c7   : > { %3531 = vperm.xlu1 %8496, %v571_v44  }
 0x1c8   : > { %6939 = vmatmul.mubr.msk.f32.gmra.mrb[110].mxu1 %vm1129_vm0, %v13216_v25  ;;  %v9740_v58 = vpop.f32.mrb[20].mxu0  ;;  %8301 = vmatprep.subr.bf16.mxu0 %v8300_v40  ;;  %vm1143_vm0 = vcmp.eq.s32.totalorder %v8958_v33, %v9558_v8 }
 0x1c9   : > { %13266 = vst [vmem:[#allocation56_spill] sm:$0xff] %v9740_v58  ;;  %6940 = vmatprep.mubr.msk.f32.mxu1 %vm2093_vm2, %v6725_v5  ;;  %v9744_v24 = vpop.f32.mrb[21].mxu0  ;;  %8303 = vmatpush3.bf16.msra.mxu0 %v8300_v40  ;;  %v9756_v5 = vpop.permute.xlu0 %1005 }
 0x1ca   : > { %13267 = vst [vmem:[#allocation57_spill] sm:$0xff] %v9744_v24  ;;  %v8304_v57 = vpack.c.bf16 %v9740_v58, %v9744_v24  ;;  %v8532_v58 = vld [vmem:[%s8692_s26 + $0x70] sm:$0xff]  ;;  %vm1146_vm15 = vcmp.eq.s32.totalorder %v8963_v37, %v9756_v5 }
 0x1cb   : > { %v556_v44 = vcvt.s32.f32 %v8532_v58  ;;  %3606 = vperm.xlu1 %8496, %v586_v60   ;;  %v602_v60 = vcvt.s32.f32 %v9201_v53 }
 0x1cc   : > { %6941 = vmatmul.mubr.msk.f32.gmra.mrb[112].mxu1 %vm1131_vm3, %v13216_v25  ;;  %v9759_v40 = vpop.f32.mrb[22].mxu0  ;;  %8305 = vmatprep.subr.bf16.mxu0 %v8304_v57 }
 0x1cd   : > { %13269 = vst [vmem:[#allocation59_spill] sm:$0xff] %v9759_v40  ;;  %6942 = vmatprep.mubr.msk.f32.mxu1 %vm2093_vm2, %v6727_v59  ;;  %v9762_v15 = vpop.f32.mrb[23].mxu0  ;;  %8307 = vmatpush3.bf16.msra.mxu0 %v8304_v57  ;;  %v9775_v57 = vpop.permute.xlu1 %1572 }
 0x1ce   : > { %13270 = vst [vmem:[#allocation60_spill] sm:$0xff] %v9762_v15  ;;  %v8308_v24 = vpack.c.bf16 %v9759_v40, %v9762_v15  ;;  %13272 = vst [vmem:[#allocation62_spill] sm:$0xff] %v9775_v57  ;;  %v9782_v12 = vpop.permute.xlu0 %1008  ;;  %v6731_v40 = vsel %vm1138_vm7, 1.0, %v13215_v16  ;;  %vm1145_vm7 = vcmp.eq.s32.totalorder %v8958_v33, %v9756_v5 }
 0x1cf   : > { %3456 = vperm.xlu1 %8496, %v556_v44   ;;  %v573_v44 = vcvt.s32.f32 %v8533_v50  ;;  %vm1148_vm3 = vcmp.eq.s32.totalorder %v8963_v37, %v9782_v12 }
 0x1d0   : > { %6943 = vmatmul.mubr.msk.f32.gmra.mrb[114].mxu1 %vm1133_vm6, %v13216_v25  ;;  %v9773_v49 = vpop.f32.mrb[24].mxu0  ;;  %8309 = vmatprep.subr.bf16.mxu0 %v8308_v24  ;;  %v6741_v8 = vsel %vm1148_vm3, 1.0, %v13215_v16 }
 0x1d1   : > { %13271 = vst [vmem:[#allocation61_spill] sm:$0xff] %v9773_v49  ;;  %v9777_v58 = vpop.f32.mrb[25].mxu0  ;;  %8311 = vmatpush3.bf16.msra.mxu0 %v8308_v24  ;;  %6944 = vmatprep.mubr.msk.f32.mxu1 %vm2093_vm2, %v6729_v41  ;;  %v9804_v15 = vpop.permute.xlu1 %1023 }
 0x1d2   : > { %13273 = vst [vmem:[#allocation63_spill] sm:$0xff] %v9777_v58  ;;  %v8312_v59 = vpack.c.bf16 %v9773_v49, %v9777_v58  ;;  %v9798_v53 = vpop.permute.xlu0 %1017  ;;  %v6733_v58 = vsel %vm1140_vm9, 1.0, %v13215_v16  ;;  %vm1150_vm9 = vcmp.eq.s32.totalorder %v8963_v37, %v9646_v43 }
 0x1d3   : > { %3686 = vperm.xlu1 %8496, %v602_v60   ;;  %vm1154_vm3 = vcmp.eq.s32.totalorder %v8963_v37, %v9798_v53 }
 0x1d4   : > { %v9790_v24 = vpop.f32.mrb[26].mxu0  ;;  %8313 = vmatprep.subr.bf16.mxu0 %v8312_v59  ;;  %6945 = vmatmul.mubr.msk.f32.gmra.mrb[116].mxu1 %vm1135_vm8, %v13216_v25  ;;  %vm13129_vm8 = vcmp.eq.s32.totalorder %v8958_v33, %v9413_v3 }
 0x1d5   : > { %13274 = vst [vmem:[#allocation64_spill] sm:$0xff] %v9790_v24  ;;  %v9793_v41 = vpop.f32.mrb[27].mxu0  ;;  %8315 = vmatpush3.bf16.msra.mxu0 %v8312_v59  ;;  %6946 = vmatprep.mubr.msk.f32.mxu1 %vm2093_vm2, %v6731_v40  ;;  %v8534_v59 = vld [vmem:[%s8692_s26 + $0x170] sm:$0xff] }
 0x1d6   : > { %13275 = vst [vmem:[#allocation65_spill] sm:$0xff] %v9793_v41  ;;  %v8316_v49 = vpack.c.bf16 %v9790_v24, %v9793_v41  ;;  %v588_v50 = vcvt.s32.f32 %v8534_v59  ;;  %v6735_v24 = vsel %vm1142_vm11, 1.0, %v13215_v16  ;;  %v9822_v41 = vpop.permute.xlu0 %1020  ;;  %v6737_v59 = vsel %vm1144_vm13, 1.0, %v13215_v16 }
 0x1d7   : > { %3541 = vperm.xlu1 %8496, %v573_v44   ;;  %vm1147_vm11 = vcmp.eq.s32.totalorder %v8958_v33, %v9782_v12  ;;  %vm1152_vm13 = vcmp.eq.s32.totalorder %v8963_v37, %v9681_v45 }
 0x1d8   : > { %v9808_v40 = vpop.f32.mrb[28].mxu0  ;;  %8317 = vmatprep.subr.bf16.mxu0 %v8316_v49  ;;  %6947 = vmatmul.mubr.msk.f32.gmra.mrb[118].mxu1 %vm1137_vm10, %v13216_v25  ;;  %vm13130_vm10 = vcmp.eq.s32.totalorder %v8958_v33, %v9430_v7  ;;  %v13289_v7 = vld [vmem:[#allocation14_spill] sm:$0xff] }
 0x1d9   : > { %13276 = vst [vmem:[#allocation66_spill] sm:$0xff] %v9808_v40  ;;  %v9811_v6 = vpop.f32.mrb[29].mxu0  ;;  %8319 = vmatpush3.bf16.msra.mxu0 %v8316_v49  ;;  %6948 = vmatprep.mubr.msk.f32.mxu1 %vm2093_vm2, %v6733_v58  ;;  %v9827_v49 = vpop.permute.xlu1 %1578  ;;  %v604_v58 = vcvt.s32.f32 %v9370_v47  ;;  %v6739_v47 = vsel %vm1146_vm15, 1.0, %v13215_v16  ;;  %vm1149_vm15 = vcmp.eq.s32.totalorder %v8958_v33, %v9646_v43 }
 0x1da   : > { %13277 = vst [vmem:[#allocation67_spill] sm:$0xff] %v9811_v6  ;;  %v8320_v60 = vpack.c.bf16 %v9808_v40, %v9811_v6  ;;  %13279 = vst [vmem:[#allocation69_spill] sm:$0xff] %v9827_v49 }
 0x1db   : > { %3616 = vperm.xlu1 %8496, %v588_v50  }
 0x1dc   : > { %v9824_v2 = vpop.f32.mrb[30].mxu0  ;;  %8321 = vmatprep.subr.bf16.mxu0 %v8320_v60  ;;  %6949 = vmatmul.mubr.msk.f32.gmra.mrb[120].mxu1 %vm1139_vm12, %v13216_v25 }
 0x1dd   : > { %13278 = vst [vmem:[#allocation68_spill] sm:$0xff] %v9824_v2  ;;  %v9829_v11 = vpop.f32.mrb[31].mxu0  ;;  %8323 = vmatpush3.bf16.msra.mxu0 %v8320_v60  ;;  %6950 = vmatprep.mubr.msk.f32.mxu1 %vm2093_vm2, %v6735_v24  ;;  %v9841_v60 = vpop.permute.xlu0 %1029  ;;  %v13281_v24 = vld [vmem:[#allocation9_spill] sm:$0xff] }
 0x1de   : > { %13280 = vst [vmem:[#allocation70_spill] sm:$0xff] %v9829_v11  ;;  %v8324_v44 = vpack.c.bf16 %v9824_v2, %v9829_v11  ;;  %v9847_v9 = vpop.permute.xlu1 %1026  ;;  %vm1621_vm6 = vcmp.eq.s32.totalorder %v8958_v33, %v13281_v24  ;;  %v13301_v24 = vld [vmem:[#allocation20_spill] sm:$0xff] }
 0x1df   : > { %3696 = vperm.xlu1 %8496, %v604_v58  }
 0x1e0   : > { %8325 = vmatprep.subr.bf16.mxu0 %v8324_v44  ;;  %6951 = vmatmul.mubr.msk.f32.gmra.mrb[122].mxu1 %vm1141_vm14, %v13216_v25 }
 0x1e1   : > { %8327 = vmatpush3.bf16.msra.mxu0 %v8324_v44  ;;  %6952 = vmatprep.mubr.msk.f32.mxu1 %vm2093_vm2, %v6737_v59  ;;  %v9870_v58 = vpop.permute.xlu0 %1032  ;;  %v13284_v44 = vld [vmem:[#allocation11_spill] sm:$0xff]  ;;  %v13285_v59 = vld [vmem:[#allocation12_spill] sm:$0xff] }
 0x1e2   : > { %v9868_v50 = vpop.permute.xlu1 %1587  ;;  %vm13131_vm12 = vcmp.eq.s32.totalorder %v8958_v33, %v13284_v44  ;;  %vm13132_vm14 = vcmp.eq.s32.totalorder %v8958_v33, %v13285_v59  ;;  %v6747_v59 = vsel %vm1154_vm3, 1.0, %v13215_v16  ;;  %vm1153_vm3 = vcmp.eq.s32.totalorder %v8958_v33, %v9798_v53 }
 0x1e3   : > { %13282 = vst [vmem:[#allocation71_spill] sm:$0xff] %v9868_v50  ;;  %8498 = vset.pattern.permute.xlu1 %v13204_v23  ;;  %v6743_v23 = vsel %vm1150_vm9, 1.0, %v13215_v16  ;;  %vm1151_vm9 = vcmp.eq.s32.totalorder %v8958_v33, %v9681_v45 }
 0x1e4   : > { %7769 = vmatmul.mubr.msk.f32.vlgmr.msra.gmra.mrb[32].mxu0 %vm1620_vm1, %v13216_v25  ;;  %6953 = vmatmul.mubr.msk.f32.gmra.mrb[124].mxu1 %vm1143_vm0, %v13216_v25 }
 0x1e5   : > { %7771 = vmatprep.mubr.msk.f32.mxu0 %vm1621_vm6, %v13216_v25  ;;  %6954 = vmatprep.mubr.msk.f32.mxu1 %vm2093_vm2, %v6739_v47  ;;  %v9892_v5 = vpop.permute.xlu0 %1575  ;;  %v6745_v47 = vsel %vm1152_vm13, 1.0, %v13215_v16  ;;  %vm1156_vm13 = vcmp.eq.s32.totalorder %v8963_v37, %v9822_v41 }
 0x1e6   : > { %13283 = vst [vmem:[#allocation72_spill] sm:$0xff] %v9892_v5  ;;  %v9905_v12 = vpop.permute.xlu1 %1590 }
 0x1e7   : > { %13286 = vst [vmem:[#allocation73_spill] sm:$0xff] %v9905_v12 }
 0x1e8   : > { %7772 = vmatmul.mubr.msk.f32.gmra.mrb[34].mxu0 %vm13129_vm8, %v13216_v25  ;;  %6955 = vmatmul.mubr.msk.f32.gmra.mrb[126].mxu1 %vm1145_vm7, %v13216_v25  ;;  %vm12797_vm7 = vcmp.eq.s32.totalorder %v8958_v33, %v13289_v7 }
 0x1e9   : > { %7774 = vmatprep.mubr.msk.f32.mxu0 %vm13130_vm10, %v13216_v25  ;;  %6956 = vmatprep.mubr.msk.f32.mxu1 %vm2093_vm2, %v6741_v8  ;;  %v13287_v8 = vld [vmem:[#allocation13_spill] sm:$0xff]  ;;  %v9928_v43 = vpop.permute.xlu0 %1581 }
 0x1ea   : > { %vm13133_vm0 = vcmp.eq.s32.totalorder %v8958_v33, %v13287_v8  ;;  %13290 = vst [vmem:[#allocation75_spill] sm:$0xff] %v9928_v43  ;;  %v9938_v3 = vpop.permute.xlu1 %1593  ;;  %v13293_v8 = vld [vmem:[#allocation16_spill] sm:$0xff] }
 0x1eb   : > { %13291 = vst [vmem:[#allocation76_spill] sm:$0xff] %v9938_v3 }
 0x1ec   : > { %7775 = vmatmul.mubr.msk.f32.gmra.mrb[36].mxu0 %vm13131_vm12, %v13216_v25  ;;  %6957 = vmatmul.mubr.msk.f32.gmra.mrb[128].mxu1 %vm1147_vm11, %v13216_v25  ;;  %vm12789_vm11 = vcmp.eq.s32.totalorder %v8958_v33, %v9450_v21  ;;  %v13297_v21 = vld [vmem:[#allocation18_spill] sm:$0xff] }
 0x1ed   : > { %7777 = vmatprep.mubr.msk.f32.mxu0 %vm13132_vm14, %v13216_v25  ;;  %6958 = vmatprep.mubr.msk.f32.mxu1 %vm2093_vm2, %v6743_v23  ;;  %v9961_v7 = vpop.permute.xlu0 %1584 }
 0x1ee   : > { %13294 = vst [vmem:[#allocation78_spill] sm:$0xff] %v9961_v7 }
 0x1ef   : > { %v9917_v44 = vpop.f32.mrb[24].mxu1 }
 0x1f0   : > { %13288 = vst [vmem:[#allocation74_spill] sm:$0xff] %v9917_v44  ;;  %7778 = vmatmul.mubr.msk.f32.gmra.mrb[38].mxu0 %vm13133_vm0, %v13216_v25  ;;  %v2354_v23 = vpop.f32.mrb[25].mxu1  ;;  %6959 = vmatmul.mubr.msk.f32.gmra.mrb[130].mxu1 %vm1149_vm15, %v13216_v25  ;;  %vm12790_vm15 = vcmp.eq.s32.totalorder %v8958_v33, %v13293_v8 }
 0x1f1   : > { %7780 = vmatprep.mubr.msk.f32.mxu0 %vm12797_vm7, %v13216_v25  ;;  %6960 = vmatprep.mubr.msk.f32.mxu1 %vm2093_vm2, %v6745_v47  ;;  %v6749_v47 = vsel %vm1156_vm13, 1.0, %v13215_v16  ;;  %vm1155_vm13 = vcmp.eq.s32.totalorder %v8958_v33, %v9822_v41  ;;  %v9999_v41 = vpop.permute.xlu0 %1599 }
 0x1f2   : > { %13300 = vst [vmem:[#allocation82_spill] sm:$0xff] %v9999_v41 }
 0x1f3   : > { %v9942_v23 = vpop.f32.mrb[26].mxu1 }
 0x1f4   : > { %13292 = vst [vmem:[#allocation77_spill] sm:$0xff] %v9942_v23  ;;  %7781 = vmatmul.mubr.msk.f32.gmra.mrb[40].mxu0 %vm12789_vm11, %v13216_v25  ;;  %v2359_v45 = vpop.f32.mrb[27].mxu1  ;;  %6961 = vmatmul.mubr.msk.f32.gmra.mrb[132].mxu1 %vm1151_vm9, %v13216_v25  ;;  %vm12794_vm11 = vcmp.eq.s32.totalorder %v8958_v33, %v9466_v28  ;;  %vm1158_vm9 = vcmp.eq.s32.totalorder %v8963_v37, %v9804_v15  ;;  %v13299_v28 = vld [vmem:[#allocation19_spill] sm:$0xff] }
 0x1f5   : > { %7783 = vmatprep.mubr.msk.f32.mxu0 %vm12790_vm15, %v13216_v25  ;;  %6962 = vmatprep.mubr.msk.f32.mxu1 %vm2093_vm2, %v6747_v59  ;;  %vm12805_vm15 = vcmp.eq.s32.totalorder %v8958_v33, %v9485_v34  ;;  %v9976_v59 = vpop.permute.xlu1 %1596  ;;  %v6751_v8 = vsel %vm1158_vm9, 1.0, %v13215_v16  ;;  %vm12811_vm7 = vcmp.eq.s32.totalorder %v8958_v33, %v13299_v28  ;;  %vm1157_vm9 = vcmp.eq.s32.totalorder %v8958_v33, %v9804_v15  ;;  %v10030_v28 = vpop.permute.xlu0 %1605 }
 0x1f6   : > { %13296 = vst [vmem:[#allocation80_spill] sm:$0xff] %v9976_v59  ;;  %13304 = vst [vmem:[#allocation84_spill] sm:$0xff] %v10030_v28 }
 0x1f7   : > { %v9965_v45 = vpop.f32.mrb[28].mxu1 }
 0x1f8   : > { %13295 = vst [vmem:[#allocation79_spill] sm:$0xff] %v9965_v45  ;;  %7784 = vmatmul.mubr.msk.f32.gmra.mrb[42].mxu0 %vm12794_vm11, %v13216_v25  ;;  %v2364_v53 = vpop.f32.mrb[29].mxu1  ;;  %6963 = vmatmul.mubr.msk.f32.gmra.mrb[134].mxu1 %vm1153_vm3, %v13216_v25  ;;  %vm12801_vm11 = vcmp.eq.s32.totalorder %v8958_v33, %v13297_v21  ;;  %vm1160_vm3 = vcmp.eq.s32.totalorder %v8963_v37, %v9847_v9 }
 0x1f9   : > { %7786 = vmatprep.mubr.msk.f32.mxu0 %vm12805_vm15, %v13216_v25  ;;  %6964 = vmatprep.mubr.msk.f32.mxu1 %vm2093_vm2, %v6749_v47  ;;  %v1036_v47 = vpop.permute.xlu1 %1035  ;;  %vm12809_vm15 = vcmp.eq.s32.totalorder %v8958_v33, %v13303_v20 }
 0x1fb   : > { %v9988_v53 = vpop.f32.mrb[30].mxu1 }
 0x1fc   : > { %13298 = vst [vmem:[#allocation81_spill] sm:$0xff] %v9988_v53  ;;  %v2369_v34 = vpop.f32.mrb[31].mxu1  ;;  %7787 = vmatmul.mubr.msk.f32.gmra.mrb[44].mxu0 %vm12801_vm11, %v13216_v25  ;;  %6965 = vmatmul.mubr.msk.f32.gmra.mrb[136].mxu1 %vm1155_vm13, %v13216_v25  ;;  %vm12807_vm11 = vcmp.eq.s32.totalorder %v8958_v33, %v13301_v24  ;;  %vm1162_vm13 = vcmp.eq.s32.totalorder %v8963_v37, %v9841_v60  ;;  %v13306_v24 = vld [vmem:[#allocation22_spill] sm:$0xff] }
 0x1fd   : > { %7789 = vmatprep.mubr.msk.f32.mxu0 %vm12811_vm7, %v13216_v25  ;;  %6966 = vmatprep.mubr.msk.f32.mxu1 %vm2093_vm2, %v6751_v8  ;;  %v6753_v34 = vsel %vm1160_vm3, 1.0, %v13215_v16  ;;  %vm1159_vm3 = vcmp.eq.s32.totalorder %v8958_v33, %v9847_v9  ;;  %v6755_v8 = vsel %vm1162_vm13, 1.0, %v13215_v16  ;;  %v10045_v9 = vpop.permute.xlu1 %1602  ;;  %vm1161_vm13 = vcmp.eq.s32.totalorder %v8958_v33, %v9841_v60  ;;  %v10067_v60 = vpop.permute.xlu0 %1608 }
 0x1fe   : > { %13307 = vst [vmem:[#allocation86_spill] sm:$0xff] %v10045_v9  ;;  %vm12818_vm7 = vcmp.eq.s32.totalorder %v8958_v33, %v9520_v31  ;;  %13309 = vst [vmem:[#allocation88_spill] sm:$0xff] %v10067_v60  ;;  %v13310_v31 = vld [vmem:[#allocation23_spill] sm:$0xff] }
 0x1ff   : > { %v10011_v21 = vpop.f32.mrb[32].mxu1 }
 0x200   : > { %13302 = vst [vmem:[#allocation83_spill] sm:$0xff] %v10011_v21  ;;  %7790 = vmatmul.mubr.msk.f32.gmra.mrb[46].mxu0 %vm12807_vm11, %v13216_v25  ;;  %v2374_v15 = vpop.f32.mrb[33].mxu1  ;;  %6967 = vmatmul.mubr.msk.f32.gmra.mrb[138].mxu1 %vm1157_vm9, %v13216_v25  ;;  %vm12812_vm11 = vcmp.eq.s32.totalorder %v8958_v33, %v9501_v55  ;;  %vm1164_vm9 = vcmp.eq.s32.totalorder %v8963_v37, %v9870_v58 }
 0x201   : > { %7792 = vmatprep.mubr.msk.f32.mxu0 %vm12809_vm15, %v13216_v25  ;;  %6968 = vmatprep.mubr.msk.f32.mxu1 %vm2093_vm2, %v6753_v34  ;;  %vm12819_vm15 = vcmp.eq.s32.totalorder %v8958_v33, %v13306_v24  ;;  %v1039_v24 = vpop.permute.xlu1 %1038 }
 0x203   : > { %v10034_v15 = vpop.f32.mrb[34].mxu1 }
 0x204   : > { %13305 = vst [vmem:[#allocation85_spill] sm:$0xff] %v10034_v15  ;;  %v2379_v20 = vpop.f32.mrb[35].mxu1  ;;  %7793 = vmatmul.mubr.msk.f32.gmra.mrb[48].mxu0 %vm12812_vm11, %v13216_v25  ;;  %6969 = vmatmul.mubr.msk.f32.gmra.mrb[140].mxu1 %vm1159_vm3, %v13216_v25  ;;  %vm1166_vm3 = vcmp.eq.s32.totalorder %v8963_v37, %v1036_v47  ;;  %vm12822_vm11 = vcmp.eq.s32.totalorder %v8958_v33, %v9536_v39 }
 0x205   : > { %7795 = vmatprep.mubr.msk.f32.mxu0 %vm12819_vm15, %v13216_v25  ;;  %6970 = vmatprep.mubr.msk.f32.mxu1 %vm2093_vm2, %v6755_v8  ;;  %v6757_v20 = vsel %vm1164_vm9, 1.0, %v13215_v16  ;;  %vm1163_vm9 = vcmp.eq.s32.totalorder %v8958_v33, %v9870_v58  ;;  %v6759_v55 = vsel %vm1166_vm3, 1.0, %v13215_v16  ;;  %vm12824_vm15 = vcmp.eq.s32.totalorder %v8958_v33, %v9339_v46  ;;  %v1042_v58 = vpop.permute.xlu0 %1041 }
 0x206   : > { %vm1165_vm3 = vcmp.eq.s32.totalorder %v8958_v33, %v1036_v47 }
 0x207   : > { %v10057_v34 = vpop.f32.mrb[36].mxu1 }
 0x208   : > { %13308 = vst [vmem:[#allocation87_spill] sm:$0xff] %v10057_v34  ;;  %7796 = vmatmul.mubr.msk.f32.gmra.mrb[50].mxu0 %vm12818_vm7, %v13216_v25  ;;  %v2384_v8 = vpop.f32.mrb[37].mxu1  ;;  %6971 = vmatmul.mubr.msk.f32.gmra.mrb[142].mxu1 %vm1161_vm13, %v13216_v25  ;;  %vm12823_vm7 = vcmp.eq.s32.totalorder %v8958_v33, %v13310_v31  ;;  %vm1168_vm13 = vcmp.eq.s32.totalorder %v8963_v37, %v1039_v24 }
 0x209   : > { %7798 = vmatprep.mubr.msk.f32.mxu0 %vm12822_vm11, %v13216_v25  ;;  %6972 = vmatprep.mubr.msk.f32.mxu1 %vm2093_vm2, %v6757_v20  ;;  %v6761_v20 = vsel %vm1168_vm13, 1.0, %v13215_v16  ;;  %vm12825_vm11 = vcmp.eq.s32.totalorder %v8958_v33, %v9359_v26  ;;  %vm1167_vm13 = vcmp.eq.s32.totalorder %v8958_v33, %v1039_v24 }
 0x20b   : > { %v10079_v8 = vpop.f32.mrb[38].mxu1 }
 0x20c   : > { %13311 = vst [vmem:[#allocation89_spill] sm:$0xff] %v10079_v8  ;;  %v2389_v39 = vpop.f32.mrb[39].mxu1  ;;  %7799 = vmatmul.mubr.msk.f32.gmra.mrb[52].mxu0 %vm12823_vm7, %v13216_v25  ;;  %6973 = vmatmul.mubr.msk.f32.gmra.mrb[144].mxu1 %vm1163_vm9, %v13216_v25  ;;  %vm1170_vm7 = vcmp.eq.s32.totalorder %v8963_v37, %v1042_v58  ;;  %vm12826_vm9 = vcmp.eq.s32.totalorder %v8958_v33, %v9381_v63 }
 0x20d   : > { %7801 = vmatprep.mubr.msk.f32.mxu0 %vm12824_vm15, %v13216_v25  ;;  %6974 = vmatprep.mubr.msk.f32.mxu1 %vm2093_vm2, %v6759_v55  ;;  %v6763_v37 = vsel %vm1170_vm7, 1.0, %v13215_v16  ;;  %vm1644_vm15 = vcmp.eq.s32.totalorder %v8958_v33, %v9555_v10  ;;  %vm1169_vm7 = vcmp.eq.s32.totalorder %v8958_v33, %v1042_v58 }
 0x20f   : > { %v10098_v39 = vpop.f32.mrb[40].mxu1 }
 0x210   : > { %13312 = vst [vmem:[#allocation90_spill] sm:$0xff] %v10098_v39  ;;  %7802 = vmatmul.mubr.msk.f32.gmra.mrb[54].mxu0 %vm12825_vm11, %v13216_v25  ;;  %v2394_v55 = vpop.f32.mrb[41].mxu1  ;;  %6975 = vmatmul.mubr.msk.f32.gmra.mrb[146].mxu1 %vm1165_vm3, %v13216_v25  ;;  %vm1645_vm11 = vcmp.eq.s32.totalorder %v8958_v33, %v9417_v17  ;;  %vm1646_vm3 = vcmp.eq.s32.totalorder %v8958_v33, %v9571_v61 }
 0x211   : > { %7804 = vmatprep.mubr.msk.f32.mxu0 %vm12826_vm9, %v13216_v25  ;;  %6976 = vmatprep.mubr.msk.f32.mxu1 %vm2093_vm2, %v6761_v20  ;;  %vm12827_vm9 = vcmp.eq.s32.totalorder %v8958_v33, %v9590_v14 }
 0x213   : > { %v10117_v47 = vpop.f32.mrb[42].mxu1 }
 0x214   : > { %13313 = vst [vmem:[#allocation91_spill] sm:$0xff] %v10117_v47  ;;  %v2399_v55 = vpop.f32.mrb[43].mxu1  ;;  %7805 = vmatmul.mubr.msk.f32.gmra.mrb[56].mxu0 %vm1644_vm15, %v13216_v25  ;;  %6977 = vmatmul.mubr.msk.f32.gmra.mrb[148].mxu1 %vm1167_vm13, %v13216_v25  ;;  %vm12828_vm13 = vcmp.eq.s32.totalorder %v8958_v33, %v9471_v1 }
 0x215   : > { %7807 = vmatprep.mubr.msk.f32.mxu0 %vm1645_vm11, %v13216_v25  ;;  %6978 = vmatprep.mubr.msk.f32.mxu1 %vm2093_vm2, %v6763_v37  ;;  %vm12829_vm2 = vcmp.eq.s32.totalorder %v8958_v33, %v9453_v48 }
 0x217   : > { %v10134_v16 = vpop.f32.mrb[44].mxu1 }
 0x218   : > { %13314 = vst [vmem:[#allocation92_spill] sm:$0xff] %v10134_v16  ;;  %7808 = vmatmul.mubr.msk.f32.gmra.mrb[58].mxu0 %vm1646_vm3, %v13216_v25  ;;  %v2404_v24 = vpop.f32.mrb[45].mxu1  ;;  %6979 = vmatmul.mubr.msk.f32.gmra.mrb[150].mxu1 %vm1169_vm7, %v13216_v25  ;;  %vm12831_vm7 = vcmp.eq.s32.totalorder %v8958_v33, %v9488_v52 }
 0x219   : > { %7810 = vmatprep.mubr.msk.f32.mxu0 %vm12827_vm9, %v13216_v25  ;;  %vm12830_vm9 = vcmp.eq.s32.totalorder %v8958_v33, %v9506_v51 }
 0x21b   : > { %v10149_v58 = vpop.f32.mrb[46].mxu1 }
 0x21c   : > { %13315 = vst [vmem:[#allocation93_spill] sm:$0xff] %v10149_v58  ;;  %v2409_v20 = vpop.f32.mrb[47].mxu1  ;;  %7811 = vmatmul.mubr.msk.f32.gmra.mrb[60].mxu0 %vm12829_vm2, %v13216_v25  ;;  %vm12834_vm2 = vcmp.eq.s32.totalorder %v8958_v33, %v9541_v36  ;;  %v10203_v36 = vpop.permute.xlu1 %1611 }
 0x21d   : > { %7813 = vmatprep.mubr.msk.f32.mxu0 %vm12828_vm13, %v13216_v25  ;;  %vm12837_vm13 = vcmp.eq.s32.totalorder %v8958_v33, %v9606_v56  ;;  %13319 = vst [vmem:[#allocation97_spill] sm:$0xff] %v10203_v36 }
 0x21f   : > { %v10163_v37 = vpop.f32.mrb[48].mxu1 }
 0x220   : > { %13316 = vst [vmem:[#allocation94_spill] sm:$0xff] %v10163_v37  ;;  %7814 = vmatmul.mubr.msk.f32.gmra.mrb[62].mxu0 %vm12831_vm7, %v13216_v25  ;;  %v2414_v55 = vpop.f32.mrb[49].mxu1  ;;  %vm12840_vm7 = vcmp.eq.s32.totalorder %v8958_v33, %v9641_v18 }
 0x221   : > { %7816 = vmatprep.mubr.msk.f32.mxu0 %vm12830_vm9, %v13216_v25  ;;  %vm12841_vm9 = vcmp.eq.s32.totalorder %v8958_v33, %v9625_v38 }
 0x223   : > { %v10177_v24 = vpop.f32.mrb[50].mxu1 }
 0x224   : > { %13317 = vst [vmem:[#allocation95_spill] sm:$0xff] %v10177_v24  ;;  %v2419_v20 = vpop.f32.mrb[51].mxu1  ;;  %7817 = vmatmul.mubr.msk.f32.gmra.mrb[64].mxu0 %vm12837_vm13, %v13216_v25  ;;  %vm12844_vm13 = vcmp.eq.s32.totalorder %v8958_v33, %v9593_v54 }
 0x225   : > { %7819 = vmatprep.mubr.msk.f32.mxu0 %vm12834_vm2, %v13216_v25  ;;  %vm12847_vm2 = vcmp.eq.s32.totalorder %v8958_v33, %v9576_v30  ;;  %v10229_v30 = vpop.permute.xlu1 %1614 }
 0x226   : > { %13322 = vst [vmem:[#allocation100_spill] sm:$0xff] %v10229_v30 }
 0x227   : > { %v10191_v55 = vpop.f32.mrb[52].mxu1 }
 0x228   : > { %13318 = vst [vmem:[#allocation96_spill] sm:$0xff] %v10191_v55  ;;  %7820 = vmatmul.mubr.msk.f32.gmra.mrb[66].mxu0 %vm12841_vm9, %v13216_v25  ;;  %v2424_v20 = vpop.f32.mrb[53].mxu1  ;;  %vm12850_vm9 = vcmp.eq.s32.totalorder %v8958_v33, %v9628_v32 }
 0x229   : > { %7822 = vmatprep.mubr.msk.f32.mxu0 %vm12840_vm7, %v13216_v25  ;;  %vm12853_vm7 = vcmp.eq.s32.totalorder %v8958_v33, %v9611_v22 }
 0x22b   : > { %v10207_v56 = vpop.f32.mrb[54].mxu1 }
 0x22c   : > { %13320 = vst [vmem:[#allocation98_spill] sm:$0xff] %v10207_v56  ;;  %v2429_v51 = vpop.f32.mrb[55].mxu1  ;;  %7823 = vmatmul.mubr.msk.f32.gmra.mrb[68].mxu0 %vm12847_vm2, %v13216_v25  ;;  %vm12854_vm2 = vcmp.eq.s32.totalorder %v8958_v33, %v9663_v0 }
 0x22d   : > { %7825 = vmatprep.mubr.msk.f32.mxu0 %vm12844_vm13, %v13216_v25  ;;  %vm12857_vm13 = vcmp.eq.s32.totalorder %v8958_v33, %v9660_v42 }
 0x22f   : > { %v10221_v20 = vpop.f32.mrb[56].mxu1 }
 0x230   : > { %13321 = vst [vmem:[#allocation99_spill] sm:$0xff] %v10221_v20  ;;  %7826 = vmatmul.mubr.msk.f32.gmra.mrb[70].mxu0 %vm12853_vm7, %v13216_v25  ;;  %v2434_v51 = vpop.f32.mrb[57].mxu1  ;;  %vm12860_vm7 = vcmp.eq.s32.totalorder %v8958_v33, %v9695_v19 }
 0x231   : > { %7828 = vmatprep.mubr.msk.f32.mxu0 %vm12850_vm9, %v13216_v25  ;;  %v10249_v51 = vpop.permute.xlu1 %1617  ;;  %vm12863_vm9 = vcmp.eq.s32.totalorder %v8958_v33, %v9676_v29 }
 0x232   : > { %13324 = vst [vmem:[#allocation102_spill] sm:$0xff] %v10249_v51 }
 0x233   : > { %v10237_v54 = vpop.f32.mrb[58].mxu1 }
 0x234   : > { %13323 = vst [vmem:[#allocation101_spill] sm:$0xff] %v10237_v54  ;;  %v2439_v18 = vpop.f32.mrb[59].mxu1  ;;  %7829 = vmatmul.mubr.msk.f32.gmra.mrb[72].mxu0 %vm12857_vm13, %v13216_v25  ;;  %vm12871_vm13 = vcmp.eq.s32.totalorder %v8958_v33, %v9722_v13  ;;  %v10297_v13 = vpop.permute.xlu0 %3386 }
 0x235   : > { %7831 = vmatprep.mubr.msk.f32.mxu0 %vm12854_vm2, %v13216_v25  ;;  %vm12864_vm2 = vcmp.eq.s32.totalorder %v8958_v33, %v9698_v35 }
 0x237   : > { %v10253_v32 = vpop.f32.mrb[60].mxu1 }
 0x238   : > { %13325 = vst [vmem:[#allocation103_spill] sm:$0xff] %v10253_v32  ;;  %v2444_v18 = vpop.f32.mrb[61].mxu1  ;;  %7832 = vmatmul.mubr.msk.f32.gmra.mrb[74].mxu0 %vm12863_vm9, %v13216_v25  ;;  %vm12872_vm9 = vcmp.eq.s32.totalorder %v8958_v33, %v9775_v57 }
 0x239   : > { %7834 = vmatprep.mubr.msk.f32.mxu0 %vm12860_vm7, %v13216_v25  ;;  %v10275_v18 = vpop.permute.xlu1 %3466  ;;  %vm12877_vm7 = vcmp.eq.s32.totalorder %v8958_v33, %v9750_v27  ;;  %v10317_v27 = vpop.permute.xlu0 %3471 }
 0x23a   : > { %13327 = vst [vmem:[#allocation105_spill] sm:$0xff] %v10275_v18  ;;  %13331 = vst [vmem:[#allocation109_spill] sm:$0xff] %v10317_v27 }
 0x23b   : > { %v10267_v0 = vpop.f32.mrb[62].mxu1 }
 0x23c   : > { %13326 = vst [vmem:[#allocation104_spill] sm:$0xff] %v10267_v0  ;;  %v2449_v42 = vpop.f32.mrb[63].mxu1  ;;  %7835 = vmatmul.mubr.msk.f32.gmra.mrb[76].mxu0 %vm12864_vm2, %v13216_v25  ;;  %vm12883_vm2 = vcmp.eq.s32.totalorder %v8958_v33, %v9892_v5 }
 0x23d   : > { %7837 = vmatprep.mubr.msk.f32.mxu0 %vm12871_vm13, %v13216_v25  ;;  %v10299_v35 = vpop.permute.xlu1 %3391  ;;  %vm12880_vm13 = vcmp.eq.s32.totalorder %v8958_v33, %v9827_v49 }
 0x23f   : > { %v10283_v19 = vpop.f32.mrb[64].mxu1 }
 0x240   : > { %13328 = vst [vmem:[#allocation106_spill] sm:$0xff] %v10283_v19  ;;  %v2454_v42 = vpop.f32.mrb[65].mxu1  ;;  %7838 = vmatmul.mubr.msk.f32.gmra.mrb[78].mxu0 %vm12877_vm7, %v13216_v25  ;;  %vm12888_vm7 = vcmp.eq.s32.totalorder %v8958_v33, %v9961_v7 }
 0x241   : > { %7840 = vmatprep.mubr.msk.f32.mxu0 %vm12872_vm9, %v13216_v25  ;;  %vm12891_vm9 = vcmp.eq.s32.totalorder %v8958_v33, %v9928_v43  ;;  %v10325_v5 = vpop.permute.xlu1 %3546  ;;  %v10341_v43 = vpop.permute.xlu0 %3551 }
 0x242   : > { %13332 = vst [vmem:[#allocation110_spill] sm:$0xff] %v10325_v5  ;;  %13334 = vst [vmem:[#allocation112_spill] sm:$0xff] %v10341_v43 }
 0x243   : > { %v10301_v29 = vpop.f32.mrb[66].mxu1 }
 0x244   : > { %13329 = vst [vmem:[#allocation107_spill] sm:$0xff] %v10301_v29  ;;  %v2459_v42 = vpop.f32.mrb[67].mxu1  ;;  %7841 = vmatmul.mubr.msk.f32.gmra.mrb[80].mxu0 %vm12883_vm2, %v13216_v25  ;;  %vm12892_vm2 = vcmp.eq.s32.totalorder %v8958_v33, %v9905_v12 }
 0x245   : > { %7843 = vmatprep.mubr.msk.f32.mxu0 %vm12880_vm13, %v13216_v25  ;;  %vm12897_vm13 = vcmp.eq.s32.totalorder %v8958_v33, %v9868_v50  ;;  %v10347_v7 = vpop.permute.xlu1 %3396  ;;  %v10365_v12 = vpop.permute.xlu0 %3476 }
 0x246   : > { %13336 = vst [vmem:[#allocation114_spill] sm:$0xff] %v10365_v12 }
 0x247   : > { %v10315_v57 = vpop.f32.mrb[68].mxu1 }
 0x248   : > { %13330 = vst [vmem:[#allocation108_spill] sm:$0xff] %v10315_v57  ;;  %v2464_v42 = vpop.f32.mrb[69].mxu1  ;;  %7844 = vmatmul.mubr.msk.f32.gmra.mrb[82].mxu0 %vm12891_vm9, %v13216_v25  ;;  %vm12900_vm9 = vcmp.eq.s32.totalorder %v8958_v33, %v9976_v59 }
 0x249   : > { %7846 = vmatprep.mubr.msk.f32.mxu0 %vm12888_vm7, %v13216_v25  ;;  %vm12903_vm7 = vcmp.eq.s32.totalorder %v8958_v33, %v9938_v3 }
 0x24b   : > { %v10333_v49 = vpop.f32.mrb[70].mxu1 }
 0x24c   : > { %13333 = vst [vmem:[#allocation111_spill] sm:$0xff] %v10333_v49  ;;  %v2469_v42 = vpop.f32.mrb[71].mxu1  ;;  %7847 = vmatmul.mubr.msk.f32.gmra.mrb[84].mxu0 %vm12897_vm13, %v13216_v25  ;;  %vm12911_vm13 = vcmp.eq.s32.totalorder %v8958_v33, %v10045_v9 }
 0x24d   : > { %7849 = vmatprep.mubr.msk.f32.mxu0 %vm12892_vm2, %v13216_v25  ;;  %vm12906_vm2 = vcmp.eq.s32.totalorder %v8958_v33, %v9999_v41 }
 0x24f   : > { %v10351_v22 = vpop.f32.mrb[72].mxu1 }
 0x250   : > { %13335 = vst [vmem:[#allocation113_spill] sm:$0xff] %v10351_v22  ;;  %v2474_v42 = vpop.f32.mrb[73].mxu1  ;;  %7850 = vmatmul.mubr.msk.f32.gmra.mrb[86].mxu0 %vm12903_vm7, %v13216_v25  ;;  %vm12912_vm7 = vcmp.eq.s32.totalorder %v8958_v33, %v10067_v60 }
 0x251   : > { %7852 = vmatprep.mubr.msk.f32.mxu0 %vm12900_vm9, %v13216_v25  ;;  %v10371_v42 = vpop.permute.xlu1 %3626  ;;  %vm1678_vm9 = vcmp.eq.s32.totalorder %v8958_v33, %v10030_v28 }
 0x252   : > { %13338 = vst [vmem:[#allocation116_spill] sm:$0xff] %v10371_v42 }
 0x253   : > { %v10367_v50 = vpop.f32.mrb[74].mxu1 }
 0x254   : > { %13337 = vst [vmem:[#allocation115_spill] sm:$0xff] %v10367_v50  ;;  %v2479_v38 = vpop.f32.mrb[75].mxu1  ;;  %7853 = vmatmul.mubr.msk.f32.gmra.mrb[88].mxu0 %vm12906_vm2, %v13216_v25  ;;  %vm1680_vm2 = vcmp.eq.s32.totalorder %v8958_v33, %v10203_v36 }
 0x255   : > { %7855 = vmatprep.mubr.msk.f32.mxu0 %vm12911_vm13, %v13216_v25  ;;  %v10393_v38 = vpop.permute.xlu0 %3401  ;;  %v10399_v9 = vpop.permute.xlu1 %3481  ;;  %vm1681_vm13 = vcmp.eq.s32.totalorder %v8958_v33, %v10229_v30 }
 0x256   : > { %13340 = vst [vmem:[#allocation118_spill] sm:$0xff] %v10399_v9 }
 0x257   : > { %v10383_v59 = vpop.f32.mrb[76].mxu1 }
 0x258   : > { %13339 = vst [vmem:[#allocation117_spill] sm:$0xff] %v10383_v59  ;;  %v2484_v3 = vpop.f32.mrb[77].mxu1  ;;  %7856 = vmatmul.mubr.msk.f32.gmra.mrb[90].mxu0 %vm1678_vm9, %v13216_v25 }
 0x259   : > { %7858 = vmatprep.mubr.msk.f32.mxu0 %vm12912_vm7, %v13216_v25  ;;  %vm1682_vm7 = vcmp.eq.s32.totalorder %v8958_v33, %v10249_v51  ;;  %v10415_v60 = vpop.permute.xlu0 %3631  ;;  %v10419_v52 = vpop.permute.xlu1 %3556 }
 0x25a   : > { %13342 = vst [vmem:[#allocation120_spill] sm:$0xff] %v10415_v60  ;;  %13344 = vst [vmem:[#allocation122_spill] sm:$0xff] %v10419_v52 }
 0x25b   : > { %v10401_v41 = vpop.f32.mrb[78].mxu1 }
 0x25c   : > { %13341 = vst [vmem:[#allocation119_spill] sm:$0xff] %v10401_v41  ;;  %v2489_v3 = vpop.f32.mrb[79].mxu1  ;;  %7859 = vmatmul.mubr.msk.f32.gmra.mrb[92].mxu0 %vm1680_vm2, %v13216_v25 }
 0x25d   : > { %7861 = vmatprep.mubr.msk.f32.mxu0 %vm1681_vm13, %v13216_v25  ;;  %v10427_v30 = vpop.permute.xlu0 %3561  ;;  %v10429_v48 = vpop.permute.xlu1 %3406 }
 0x25e   : > { %13346 = vst [vmem:[#allocation124_spill] sm:$0xff] %v10427_v30  ;;  %13347 = vst [vmem:[#allocation125_spill] sm:$0xff] %v10429_v48 }
 0x25f   : > { %v10417_v28 = vpop.f32.mrb[80].mxu1 }
 0x260   : > { %13343 = vst [vmem:[#allocation121_spill] sm:$0xff] %v10417_v28  ;;  %v2494_v3 = vpop.f32.mrb[81].mxu1  ;;  %7862 = vmatmul.mubr.msk.f32.gmra.mrb[94].mxu0 %vm1682_vm7, %v13216_v25 }
 0x261   : > { %v10433_v17 = vpop.permute.xlu0 %3486  ;;  %v10437_v3 = vpop.permute.xlu1 %3636 }
 0x262   : > { %13349 = vst [vmem:[#allocation127_spill] sm:$0xff] %v10433_v17  ;;  %13351 = vst [vmem:[#allocation129_spill] sm:$0xff] %v10437_v3 }
 0x263   : > { %v10425_v36 = vpop.f32.mrb[82].mxu1 }
 0x264   : > { %13345 = vst [vmem:[#allocation123_spill] sm:$0xff] %v10425_v36  ;;  %v2499_v1 = vpop.f32.mrb[83].mxu1 }
 0x265   : > { %v10441_v46 = vpop.permute.xlu0 %3411  ;;  %v10443_v1 = vpop.permute.xlu1 %3491 }
 0x266   : > { %13353 = vst [vmem:[#allocation131_spill] sm:$0xff] %v10443_v1 }
 0x267   : > { %v10431_v14 = vpop.f32.mrb[84].mxu1 }
 0x268   : > { %13348 = vst [vmem:[#allocation126_spill] sm:$0xff] %v10431_v14  ;;  %v2504_v61 = vpop.f32.mrb[85].mxu1 }
 0x269   : > { %v10447_v25 = vpop.permute.xlu0 %3641  ;;  %v10451_v2 = vpop.permute.xlu1 %3566 }
 0x26a   : > { %13355 = vst [vmem:[#allocation133_spill] sm:$0xff] %v10447_v25  ;;  %13357 = vst [vmem:[#allocation135_spill] sm:$0xff] %v10451_v2 }
 0x26b   : > { %v10435_v10 = vpop.f32.mrb[86].mxu1 }
 0x26c   : > { %13350 = vst [vmem:[#allocation128_spill] sm:$0xff] %v10435_v10  ;;  %v2509_v63 = vpop.f32.mrb[87].mxu1 }
 0x26d   : > { %v10455_v6 = vpop.permute.xlu0 %3571 }
 0x26e   : > { %13359 = vst [vmem:[#allocation137_spill] sm:$0xff] %v10455_v6 }
 0x26f   : > { %v10439_v26 = vpop.f32.mrb[88].mxu1 }
 0x270   : > { %13352 = vst [vmem:[#allocation130_spill] sm:$0xff] %v10439_v26  ;;  %v2514_v51 = vpop.f32.mrb[89].mxu1 }
 0x271   : > { %v10457_v51 = vpop.permute.xlu1 %3416 }
 0x272   : > { %13360 = vst [vmem:[#allocation138_spill] sm:$0xff] %v10457_v51 }
 0x273   : > { %v10445_v31 = vpop.f32.mrb[90].mxu1 }
 0x274   : > { %13354 = vst [vmem:[#allocation132_spill] sm:$0xff] %v10445_v31  ;;  %v2519_v33 = vpop.f32.mrb[91].mxu1 }
 0x275   : > { %v464_v33 = vld [vmem:[%s12733_s8] sm:$0xff]  ;;  %v10471_v42 = vpop.permute.xlu1 %3646 }
 0x276   : > { %v8328_v25 = vpack.c.bf16 %v465_v4, %v464_v33  ;;  %13364 = vst [vmem:[#allocation142_spill] sm:$0xff] %v10471_v42 }
 0x277   : > { %v10449_v61 = vpop.f32.mrb[92].mxu1 }
 0x278   : > { %13356 = vst [vmem:[#allocation134_spill] sm:$0xff] %v10449_v61  ;;  %v2524_v11 = vpop.f32.mrb[93].mxu1  ;;  %8329 = vmatprep.subr.bf16.mxu0 %v8328_v25  ;;  %8377 = vmatprep.subr.bf16.mxu1 %v8328_v25 }
 0x279   : > { %v10467_v11 = vpop.permute.xlu0 %3496  ;;  %8331 = vmatpush3.bf16.msra.mxu0 %v8328_v25  ;;  %8379 = vmatpush3.bf16.msra.mxu1 %v8328_v25  ;;  %v10477_v30 = vpop.permute.xlu1 %3501 }
 0x27a   : > { %13362 = vst [vmem:[#allocation140_spill] sm:$0xff] %v10467_v11  ;;  %13367 = vst [vmem:[#allocation145_spill] sm:$0xff] %v10477_v30 }
 0x27b   : > { %v10453_v40 = vpop.f32.mrb[94].mxu1 }
 0x27c   : > { %13358 = vst [vmem:[#allocation136_spill] sm:$0xff] %v10453_v40  ;;  %v2529_v63 = vpop.f32.mrb[95].mxu1 }
 0x27d   : > { %v10475_v52 = vpop.permute.xlu0 %3421 }
 0x27e   : > { %13366 = vst [vmem:[#allocation144_spill] sm:$0xff] %v10475_v52 }
 0x27f   : > { %v10459_v62 = vpop.f32.mrb[96].mxu1 }
 0x280   : > { %13361 = vst [vmem:[#allocation139_spill] sm:$0xff] %v10459_v62  ;;  %v2534_v3 = vpop.f32.mrb[97].mxu1 }
 0x281   : > { %v10481_v33 = vpop.permute.xlu0 %3651 }
 0x282   : > { %13369 = vst [vmem:[#allocation147_spill] sm:$0xff] %v10481_v33  ;;  %v466_v33 = vld [vmem:[%s12733_s8 + $0x10] sm:$0xff] }
 0x283   : > { %v10469_v63 = vpop.f32.mrb[98].mxu1 }
 0x284   : > { %13363 = vst [vmem:[#allocation141_spill] sm:$0xff] %v10469_v63  ;;  %v2539_v60 = vpop.f32.mrb[99].mxu1  ;;  %v10485_v63 = vpop.permute.xlu1 %3576 }
 0x285   : > { %13371 = vst [vmem:[#allocation149_spill] sm:$0xff] %v10485_v63  ;;  %v10489_v42 = vpop.permute.xlu0 %3581 }
 0x286   : > { %13373 = vst [vmem:[#allocation151_spill] sm:$0xff] %v10489_v42 }
 0x287   : > { %v10473_v2 = vpop.f32.mrb[100].mxu1 }
 0x288   : > { %13365 = vst [vmem:[#allocation143_spill] sm:$0xff] %v10473_v2  ;;  %v2544_v6 = vpop.f32.mrb[101].mxu1 }
 0x289   : > { %v10491_v6 = vpop.permute.xlu1 %3426  ;;  %v10495_v61 = vpop.permute.xlu0 %3506 }
 0x28a   : > { %13374 = vst [vmem:[#allocation152_spill] sm:$0xff] %v10491_v6  ;;  %13376 = vst [vmem:[#allocation154_spill] sm:$0xff] %v10495_v61 }
 0x28b   : > { %v10479_v3 = vpop.f32.mrb[102].mxu1 }
 0x28c   : > { %13368 = vst [vmem:[#allocation146_spill] sm:$0xff] %v10479_v3  ;;  %v2549_v4 = vpop.f32.mrb[103].mxu1 }
 0x28f   : > { %v10483_v62 = vpop.f32.mrb[104].mxu1 }
 0x290   : > { %13370 = vst [vmem:[#allocation148_spill] sm:$0xff] %v10483_v62  ;;  %v2554_v25 = vpop.f32.mrb[105].mxu1  ;;  %v10510_v62 = vpop.permute.xlu0 %3431 }
 0x291   : > { %v467_v25 = vld [vmem:[%s12733_s8 + $0x18] sm:$0xff]  ;;  %13381 = vst [vmem:[#allocation158_spill] sm:$0xff] %v10510_v62 }
 0x292   : > { %v8332_v42 = vpack.c.bf16 %v467_v25, %v466_v33 }
 0x293   : > { %v10487_v5 = vpop.f32.mrb[106].mxu1 }
 0x294   : > { %13372 = vst [vmem:[#allocation150_spill] sm:$0xff] %v10487_v5  ;;  %v2559_v60 = vpop.f32.mrb[107].mxu1  ;;  %8333 = vmatprep.subr.bf16.mxu0 %v8332_v42  ;;  %8381 = vmatprep.subr.bf16.mxu1 %v8332_v42  ;;  %v10516_v26 = vpop.permute.xlu0 %3661 }
 0x295   : > { %v10505_v60 = vpop.permute.xlu1 %3656  ;;  %8335 = vmatpush3.bf16.msra.mxu0 %v8332_v42  ;;  %8383 = vmatpush3.bf16.msra.mxu1 %v8332_v42  ;;  %13384 = vst [vmem:[#allocation161_spill] sm:$0xff] %v10516_v26 }
 0x296   : > { %13378 = vst [vmem:[#allocation156_spill] sm:$0xff] %v10505_v60 }
 0x297   : > { %v10493_v2 = vpop.f32.mrb[108].mxu1 }
 0x298   : > { %13375 = vst [vmem:[#allocation153_spill] sm:$0xff] %v10493_v2  ;;  %v2564_v43 = vpop.f32.mrb[109].mxu1 }
 0x299   : > { %v10512_v5 = vpop.permute.xlu1 %3511 }
 0x29a   : > { %13382 = vst [vmem:[#allocation159_spill] sm:$0xff] %v10512_v5 }
 0x29b   : > { %v10497_v4 = vpop.f32.mrb[110].mxu1 }
 0x29c   : > { %13377 = vst [vmem:[#allocation155_spill] sm:$0xff] %v10497_v4  ;;  %v2569_v63 = vpop.f32.mrb[111].mxu1  ;;  %v13380_v4 = vld [vmem:[#allocation2_spill] sm:$0xff] }
 0x29d   : > { %8337 = vmatprep.subr.bf16.mxu0 %v13380_v4  ;;  %v10520_v33 = vpop.permute.xlu1 %3586 }
 0x29e   : > { %13386 = vst [vmem:[#allocation163_spill] sm:$0xff] %v10520_v33 }
 0x29f   : > { %v10507_v2 = vpop.f32.mrb[112].mxu1 }
 0x2a0   : > { %13379 = vst [vmem:[#allocation157_spill] sm:$0xff] %v10507_v2  ;;  %v2574_v43 = vpop.f32.mrb[113].mxu1 }
 0x2a1   : > { %v10524_v43 = vpop.permute.xlu0 %3591  ;;  %v10526_v4 = vpop.permute.xlu1 %3436 }
 0x2a2   : > { %13388 = vst [vmem:[#allocation165_spill] sm:$0xff] %v10524_v43  ;;  %13389 = vst [vmem:[#allocation166_spill] sm:$0xff] %v10526_v4 }
 0x2a3   : > { %v10514_v3 = vpop.f32.mrb[114].mxu1 }
 0x2a4   : > { %13383 = vst [vmem:[#allocation160_spill] sm:$0xff] %v10514_v3  ;;  %v2579_v40 = vpop.f32.mrb[115].mxu1 }
 0x2a5   : > { %v10530_v14 = vpop.permute.xlu0 %3516  ;;  %v10534_v26 = vpop.permute.xlu1 %3666 }
 0x2a6   : > { %13391 = vst [vmem:[#allocation168_spill] sm:$0xff] %v10530_v14  ;;  %13393 = vst [vmem:[#allocation170_spill] sm:$0xff] %v10534_v26 }
 0x2a7   : > { %v10518_v63 = vpop.f32.mrb[116].mxu1 }
 0x2a8   : > { %13385 = vst [vmem:[#allocation162_spill] sm:$0xff] %v10518_v63  ;;  %v2584_v25 = vpop.f32.mrb[117].mxu1 }
 0x2a9   : > { %v10540_v43 = vpop.permute.xlu1 %3521 }
 0x2aa   : > { %13396 = vst [vmem:[#allocation173_spill] sm:$0xff] %v10540_v43 }
 0x2ab   : > { %v10522_v60 = vpop.f32.mrb[118].mxu1 }
 0x2ac   : > { %13387 = vst [vmem:[#allocation164_spill] sm:$0xff] %v10522_v60  ;;  %v2589_v42 = vpop.f32.mrb[119].mxu1 }
 0x2ad   : > { %v10538_v42 = vpop.permute.xlu0 %3441 }
 0x2ae   : > { %13395 = vst [vmem:[#allocation172_spill] sm:$0xff] %v10538_v42 }
 0x2af   : > { %v10528_v2 = vpop.f32.mrb[120].mxu1 }
 0x2b0   : > { %13390 = vst [vmem:[#allocation167_spill] sm:$0xff] %v10528_v2  ;;  %v2594_v31 = vpop.f32.mrb[121].mxu1 }
 0x2b1   : > { %v10550_v36 = vpop.permute.xlu0 %3671 }
 0x2b2   : > { %13399 = vst [vmem:[#allocation176_spill] sm:$0xff] %v10550_v36 }
 0x2b3   : > { %v10532_v40 = vpop.f32.mrb[122].mxu1 }
 0x2b4   : > { %13392 = vst [vmem:[#allocation169_spill] sm:$0xff] %v10532_v40  ;;  %v2599_v63 = vpop.f32.mrb[123].mxu1 }
 0x2b5   : > { %v10566_v6 = vpop.permute.xlu0 %3601 }
 0x2b6   : > { %13403 = vst [vmem:[#allocation180_spill] sm:$0xff] %v10566_v6 }
 0x2b7   : > { %v7770_v3 = vpop.f32.mrb[32].mxu0  ;;  %v10536_v33 = vpop.f32.mrb[124].mxu1 }
 0x2b8   : > { %13394 = vst [vmem:[#allocation171_spill] sm:$0xff] %v10536_v33  ;;  %v3001_v25 = vpop.f32.mrb[33].mxu0  ;;  %v2604_v60 = vpop.f32.mrb[125].mxu1 }
 0x2b9   : > { %v10552_v33 = vpop.permute.xlu1 %3596 }
 0x2ba   : > { %13400 = vst [vmem:[#allocation177_spill] sm:$0xff] %v10552_v33 }
 0x2bb   : > { %v7773_v10 = vpop.f32.mrb[34].mxu0  ;;  %v10542_v4 = vpop.f32.mrb[126].mxu1 }
 0x2bc   : > { %13397 = vst [vmem:[#allocation174_spill] sm:$0xff] %v10542_v4  ;;  %v3011_v31 = vpop.f32.mrb[35].mxu0  ;;  %v2609_v2 = vpop.f32.mrb[127].mxu1 }
 0x2bf   : > { %v10544_v14 = vpop.f32.mrb[36].mxu0  ;;  %v10546_v40 = vpop.f32.mrb[128].mxu1 }
 0x2c0   : > { %13398 = vst [vmem:[#allocation175_spill] sm:$0xff] %v10546_v40  ;;  %v10548_v26 = vpop.f32.mrb[37].mxu0  ;;  %v2614_v63 = vpop.f32.mrb[129].mxu1 }
 0x2c1   : > { %v10568_v63 = vpop.permute.xlu1 %3446 }
 0x2c2   : > { %13404 = vst [vmem:[#allocation181_spill] sm:$0xff] %v10568_v63 }
 0x2c3   : > { %v10554_v60 = vpop.f32.mrb[38].mxu0  ;;  %v10556_v42 = vpop.f32.mrb[130].mxu1 }
 0x2c4   : > { %13401 = vst [vmem:[#allocation178_spill] sm:$0xff] %v10556_v42  ;;  %v10558_v43 = vpop.f32.mrb[39].mxu0  ;;  %v2619_v4 = vpop.f32.mrb[131].mxu1 }
 0x2c5   : > { %v10593_v63 = vpop.permute.xlu1 %3676 }
 0x2c6   : > { %13411 = vst [vmem:[#allocation188_spill] sm:$0xff] %v10593_v63 }
 0x2c7   : > { %v10560_v28 = vpop.f32.mrb[40].mxu0  ;;  %v10562_v2 = vpop.f32.mrb[132].mxu1 }
 0x2c8   : > { %13402 = vst [vmem:[#allocation179_spill] sm:$0xff] %v10562_v2  ;;  %v10564_v61 = vpop.f32.mrb[41].mxu0  ;;  %v2624_v40 = vpop.f32.mrb[133].mxu1 }
 0x2c9   : > { %v10585_v40 = vld [vmem:[%s12732_s7] ss:$0 sm:$0xff] }
 0x2ca   : > { %v10589_v6 = vadd.f32 %v10585_v40, %v9942_v23  ;;  %v10612_v63 = vadd.f32 %v10585_v40, %v9988_v53  ;;  %v10633_v53 = vadd.f32 %v10585_v40, %v10098_v39  ;;  %v10653_v39 = vadd.f32 %v10585_v40, %v10221_v20 }
 0x2cb   : > { %v10570_v36 = vpop.f32.mrb[42].mxu0  ;;  %v10572_v33 = vpop.f32.mrb[134].mxu1 }
 0x2cc   : > { %13405 = vst [vmem:[#allocation182_spill] sm:$0xff] %v10572_v33  ;;  %v10574_v5 = vpop.f32.mrb[43].mxu0  ;;  %v2629_v42 = vpop.f32.mrb[135].mxu1  ;;  %13409 = vst [vmem:[#allocation186_spill] sm:$0xff] %v10589_v6 }
 0x2cd   : > { %v10591_v33 = vpop.permute.xlu0 %3526  ;;  %v10597_v42 = vadd.f32 %v10585_v40, %v9917_v44  ;;  %13417 = vst [vmem:[#allocation194_spill] sm:$0xff] %v10612_v63  ;;  %v10616_v44 = vadd.f32 %v10585_v40, %v10011_v21  ;;  %13419 = vst [vmem:[#allocation196_spill] sm:$0xff] %v10633_v53  ;;  %v10637_v21 = vadd.f32 %v10585_v40, %v10237_v54 }
 0x2ce   : > { %13410 = vst [vmem:[#allocation187_spill] sm:$0xff] %v10591_v33  ;;  %13423 = vst [vmem:[#allocation200_spill] sm:$0xff] %v10653_v39  ;;  %v10659_v54 = vadd.f32 %v10585_v40, %v10163_v37  ;;  %v10671_v37 = vadd.f32 %v10585_v40, %v10191_v55 }
 0x2cf   : > { %v10576_v62 = vpop.f32.mrb[44].mxu0  ;;  %v10578_v4 = vpop.f32.mrb[136].mxu1  ;;  %13412 = vst [vmem:[#allocation189_spill] sm:$0xff] %v10597_v42  ;;  %13420 = vst [vmem:[#allocation197_spill] sm:$0xff] %v10637_v21  ;;  %v3022_v55 = vadd.f32 %v10548_v26, %v10616_v44 }
 0x2d0   : > { %13406 = vst [vmem:[#allocation183_spill] sm:$0xff] %v10576_v62  ;;  %13407 = vst [vmem:[#allocation184_spill] sm:$0xff] %v10578_v4  ;;  %v10580_v41 = vpop.f32.mrb[45].mxu0  ;;  %v2634_v2 = vpop.f32.mrb[137].mxu1  ;;  %v3007_v62 = vadd.f32 %v7770_v3, %v10589_v6  ;;  %v10625_v3 = vadd.f32 %v10585_v40, %v10057_v34  ;;  %v10649_v34 = vadd.f32 %v10585_v40, %v10149_v58 }
 0x2d1   : > { %13408 = vst [vmem:[#allocation185_spill] sm:$0xff] %v10580_v41  ;;  %v10605_v41 = vadd.f32 %v10585_v40, %v9965_v45  ;;  %v3002_v45 = vadd.f32 %v3001_v25, %v10597_v42  ;;  %v10645_v25 = vadd.f32 %v10585_v40, %v10134_v16  ;;  %13425 = vst [vmem:[#allocation202_spill] sm:$0xff] %v10659_v54 }
 0x2d2   : > { %13418 = vst [vmem:[#allocation195_spill] sm:$0xff] %v10625_v3  ;;  %13422 = vst [vmem:[#allocation199_spill] sm:$0xff] %v10649_v34  ;;  %v3017_v6 = vadd.f32 %v7773_v10, %v10612_v63  ;;  %v10665_v58 = vadd.f32 %v10585_v40, %v10177_v24  ;;  %v10675_v10 = vadd.f32 %v10585_v40, %v10207_v56 }
 0x2d3   : > { %v10599_v4 = vpop.f32.mrb[46].mxu0  ;;  %v10601_v2 = vpop.f32.mrb[138].mxu1  ;;  %13415 = vst [vmem:[#allocation192_spill] sm:$0xff] %v10605_v41  ;;  %13421 = vst [vmem:[#allocation198_spill] sm:$0xff] %v10645_v25  ;;  %v3320_v20 = vmax.f32 %v3002_v45, 0.0 }
 0x2d4   : > { %13413 = vst [vmem:[#allocation190_spill] sm:$0xff] %v10599_v4  ;;  %13414 = vst [vmem:[#allocation191_spill] sm:$0xff] %v10601_v2  ;;  %v10608_v23 = vpop.f32.mrb[47].mxu0  ;;  %v2639_v59 = vpop.f32.mrb[139].mxu1  ;;  %v10620_v2 = vadd.f32 %v10585_v40, %v10034_v15  ;;  %v10641_v15 = vadd.f32 %v10585_v40, %v10117_v47  ;;  %v3321_v47 = vmax.f32 %v3007_v62, 0.0  ;;  %v3012_v4 = vadd.f32 %v3011_v31, %v10605_v41 }
 0x2d5   : > { %13416 = vst [vmem:[#allocation193_spill] sm:$0xff] %v10608_v23  ;;  %v10629_v59 = vadd.f32 %v10585_v40, %v10079_v8  ;;  %13426 = vst [vmem:[#allocation203_spill] sm:$0xff] %v10665_v58  ;;  %v10679_v62 = vadd.f32 %v10585_v40, %v10267_v0  ;;  %v3323_v41 = vmax.f32 %v3017_v6, 0.0 }
 0x2d6   : > { %13427 = vst [vmem:[#allocation204_spill] sm:$0xff] %v10671_v37  ;;  %13428 = vst [vmem:[#allocation205_spill] sm:$0xff] %v10675_v10  ;;  %v3027_v31 = vadd.f32 %v10544_v14, %v10620_v2  ;;  %v3705_v0 = vmul.f32 %v10299_v35, %v3321_v47  ;;  %v10707_v47 = vadd.f32 %v10585_v40, %v10301_v29 }
 0x2d7   : > { %v7794_v8 = vpop.f32.mrb[48].mxu0  ;;  %v10655_v42 = vpop.f32.mrb[140].mxu1  ;;  %13429 = vst [vmem:[#allocation206_spill] sm:$0xff] %v10679_v62 }
 0x2d8   : > { %13424 = vst [vmem:[#allocation201_spill] sm:$0xff] %v10655_v42  ;;  %v3087_v16 = vadd.f32 %v7794_v8, %v10637_v21  ;;  %v3081_v33 = vpop.f32.mrb[49].mxu0  ;;  %v2644_v23 = vpop.f32.mrb[141].mxu1 }
 0x2d9   : > { %v3082_v42 = vadd.f32 %v3081_v33, %v10653_v39  ;;  %v10681_v23 = vpop.permute.xlu0 %3451  ;;  %v10683_v8 = vpop.permute.xlu1 %3531  ;;  %v10687_v33 = vadd.f32 %v10585_v40, %v10253_v32 }
 0x2da   : > { %13430 = vst [vmem:[#allocation207_spill] sm:$0xff] %v10681_v23  ;;  %13431 = vst [vmem:[#allocation208_spill] sm:$0xff] %v10683_v8  ;;  %v3337_v45 = vmax.f32 %v3087_v16, 0.0  ;;  %v3704_v8 = vmul.f32 %v10297_v13, %v3320_v20  ;;  %v3322_v23 = vmax.f32 %v3012_v4, 0.0 }
 0x2db   : > { %13432 = vst [vmem:[#allocation209_spill] sm:$0xff] %v10687_v33  ;;  %v3336_v56 = vmax.f32 %v3082_v42, 0.0  ;;  %v7797_v24 = vpop.f32.mrb[50].mxu0  ;;  %v10693_v39 = vpop.f32.mrb[142].mxu1  ;;  %v10703_v42 = vadd.f32 %v10585_v40, %v10283_v19  ;;  %v3037_v19 = vadd.f32 %v10554_v60, %v10629_v59  ;;  %v10731_v60 = vadd.f32 %v10585_v40, %v10333_v49 }
 0x2dc   : > { %13433 = vst [vmem:[#allocation210_spill] sm:$0xff] %v10693_v39  ;;  %v3721_v21 = vmul.f32 %v10317_v27, %v3337_v45  ;;  %v3097_v16 = vadd.f32 %v7797_v24, %v10679_v62  ;;  %v3091_v63 = vpop.f32.mrb[51].mxu0  ;;  %v2649_v32 = vpop.f32.mrb[143].mxu1  ;;  %v3325_v45 = vmax.f32 %v3027_v31, 0.0  ;;  %v3706_v31 = vmul.f32 %v10347_v7, %v3322_v23 }
 0x2dd   : > { %v3720_v14 = vmul.f32 %v10275_v18, %v3336_v56  ;;  %v3092_v26 = vadd.f32 %v3091_v63, %v10687_v33  ;;  %13434 = vst [vmem:[#allocation211_spill] sm:$0xff] %v10703_v42  ;;  %v3324_v32 = vmax.f32 %v3022_v55, 0.0  ;;  %v3707_v63 = vmul.f32 %v10393_v38, %v3323_v41  ;;  %13437 = vst [vmem:[#allocation214_spill] sm:$0xff] %v10731_v60 }
 0x2de   : > { %v10709_v6 = vadd.f32 %v3721_v21, %v3705_v0  ;;  %v3339_v24 = vmax.f32 %v3097_v16, 0.0  ;;  %v3032_v55 = vadd.f32 %v10558_v43, %v10625_v3  ;;  %v10727_v41 = vadd.f32 %v10585_v40, %v10315_v57 }
 0x2df   : > { %v10711_v62 = vadd.f32 %v3720_v14, %v3704_v8  ;;  %v3338_v20 = vmax.f32 %v3092_v26, 0.0  ;;  %v7800_v4 = vpop.f32.mrb[52].mxu0  ;;  %v10713_v56 = vpop.f32.mrb[144].mxu1  ;;  %v3709_v43 = vmul.f32 %v10441_v46, %v3325_v45  ;;  %v3047_v49 = vadd.f32 %v10560_v28, %v10641_v15 }
 0x2e0   : > { %13435 = vst [vmem:[#allocation212_spill] sm:$0xff] %v10713_v56  ;;  %v3723_v33 = vmul.f32 %v10399_v9, %v3339_v24  ;;  %v3107_v29 = vadd.f32 %v7800_v4, %v10707_v47  ;;  %v3101_v21 = vpop.f32.mrb[53].mxu0  ;;  %v2654_v0 = vpop.f32.mrb[145].mxu1  ;;  %13436 = vst [vmem:[#allocation213_spill] sm:$0xff] %v10727_v41  ;;  %v3326_v3 = vmax.f32 %v3032_v55, 0.0  ;;  %v3042_v45 = vadd.f32 %v10564_v61, %v10633_v53  ;;  %v13457_v53 = vld [vmem:[#allocation121_spill] sm:$0xff] }
 0x2e1   : > { %v3722_v8 = vmul.f32 %v10365_v12, %v3338_v20  ;;  %v3102_v16 = vadd.f32 %v3101_v21, %v10703_v42  ;;  %v10733_v14 = vpop.permute.xlu0 %3681  ;;  %v10735_v26 = vpop.permute.xlu1 %3606  ;;  %v3708_v20 = vmul.f32 %v10429_v48, %v3324_v32  ;;  %v3327_v42 = vmax.f32 %v3037_v19, 0.0 }
 0x2e2   : > { %13438 = vst [vmem:[#allocation215_spill] sm:$0xff] %v10733_v14  ;;  %13439 = vst [vmem:[#allocation216_spill] sm:$0xff] %v10735_v26  ;;  %v10737_v23 = vadd.f32 %v3723_v33, %v3707_v63  ;;  %v3341_v24 = vmax.f32 %v3107_v29, 0.0  ;;  %v10755_v19 = vadd.f32 %v10585_v40, %v10351_v22  ;;  %v10759_v28 = vadd.f32 %v10585_v40, %v10367_v50 }
 0x2e3   : > { %v10741_v4 = vadd.f32 %v3722_v8, %v3706_v31  ;;  %v3340_v21 = vmax.f32 %v3102_v16, 0.0  ;;  %v7803_v0 = vpop.f32.mrb[54].mxu0  ;;  %v10743_v57 = vpop.f32.mrb[146].mxu1  ;;  %v3057_v55 = vadd.f32 %v10570_v36, %v10649_v34  ;;  %v3052_v61 = vadd.f32 %v10574_v5, %v10645_v25  ;;  %v13446_v25 = vld [vmem:[#allocation119_spill] sm:$0xff] }
 0x2e4   : > { %13440 = vst [vmem:[#allocation217_spill] sm:$0xff] %v10743_v57  ;;  %v3725_v12 = vmul.f32 %v10443_v1, %v3341_v24  ;;  %v3117_v33 = vadd.f32 %v7803_v0, %v10731_v60  ;;  %v3111_v63 = vpop.f32.mrb[55].mxu0  ;;  %v2659_v29 = vpop.f32.mrb[147].mxu1  ;;  %13441 = vst [vmem:[#allocation218_spill] sm:$0xff] %v10755_v19  ;;  %v3329_v22 = vmax.f32 %v3047_v49, 0.0  ;;  %v3710_v36 = vmul.f32 %v10457_v51, %v3326_v3  ;;  %v13476_v1 = vld [vmem:[#allocation132_spill] sm:$0xff] }
 0x2e5   : > { %v3724_v32 = vmul.f32 %v10433_v17, %v3340_v21  ;;  %v3112_v31 = vadd.f32 %v3111_v63, %v10727_v41  ;;  %13442 = vst [vmem:[#allocation219_spill] sm:$0xff] %v10759_v28  ;;  %v3711_v29 = vmul.f32 %v10475_v52, %v3327_v42  ;;  %v3328_v34 = vmax.f32 %v3042_v45, 0.0  ;;  %v10785_v42 = vpop.permute.xlu0 %3611 }
 0x2e6   : > { %v10761_v8 = vadd.f32 %v3725_v12, %v3709_v43  ;;  %v3343_v16 = vmax.f32 %v3117_v33, 0.0  ;;  %v10783_v49 = vadd.f32 %v10585_v40, %v13446_v25  ;;  %13448 = vst [vmem:[#allocation223_spill] sm:$0xff] %v10785_v42  ;;  %v3331_v45 = vmax.f32 %v3057_v55, 0.0  ;;  %v13452_v25 = vld [vmem:[#allocation183_spill] sm:$0xff] }
 0x2e7   : > { %v10767_v24 = vadd.f32 %v3724_v32, %v3708_v20  ;;  %v3342_v21 = vmax.f32 %v3112_v31, 0.0  ;;  %v7806_v0 = vpop.f32.mrb[56].mxu0  ;;  %v10769_v63 = vpop.f32.mrb[148].mxu1  ;;  %v13444_v32 = vld [vmem:[#allocation117_spill] sm:$0xff] }
 0x2e8   : > { %13443 = vst [vmem:[#allocation220_spill] sm:$0xff] %v10769_v63  ;;  %v3727_v50 = vmul.f32 %v10477_v30, %v3343_v16  ;;  %v3127_v12 = vadd.f32 %v7806_v0, %v10759_v28  ;;  %v3121_v43 = vpop.f32.mrb[57].mxu0  ;;  %v2664_v33 = vpop.f32.mrb[149].mxu1  ;;  %v10779_v31 = vadd.f32 %v10585_v40, %v13444_v32  ;;  %13447 = vst [vmem:[#allocation222_spill] sm:$0xff] %v10783_v49  ;;  %v13451_v32 = vld [vmem:[#allocation158_spill] sm:$0xff]  ;;  %v13453_v30 = vld [vmem:[#allocation159_spill] sm:$0xff] }
 0x2e9   : > { %v3726_v5 = vmul.f32 %v10467_v11, %v3342_v21  ;;  %v3122_v20 = vadd.f32 %v3121_v43, %v10755_v19  ;;  %v10787_v16 = vpop.permute.xlu1 %3456  ;;  %v3330_v33 = vmax.f32 %v3052_v61, 0.0  ;;  %v3713_v51 = vmul.f32 %v13451_v32, %v3329_v22  ;;  %v13455_v61 = vld [vmem:[#allocation185_spill] sm:$0xff] }
 0x2ea   : > { %13445 = vst [vmem:[#allocation221_spill] sm:$0xff] %v10779_v31  ;;  %13449 = vst [vmem:[#allocation224_spill] sm:$0xff] %v10787_v16  ;;  %v10789_v0 = vadd.f32 %v3727_v50, %v3711_v29  ;;  %v3345_v3 = vmax.f32 %v3127_v12, 0.0  ;;  %v3067_v28 = vadd.f32 %v13452_v25, %v10665_v58  ;;  %v13454_v12 = vld [vmem:[#allocation152_spill] sm:$0xff]  ;;  %v10807_v22 = vadd.f32 %v10585_v40, %v13457_v53  ;;  %v13459_v25 = vld [vmem:[#allocation123_spill] sm:$0xff] }
 0x2eb   : > { %v10791_v21 = vadd.f32 %v3726_v5, %v3710_v36  ;;  %v3344_v43 = vmax.f32 %v3122_v20, 0.0  ;;  %v7809_v19 = vpop.f32.mrb[58].mxu0  ;;  %v10793_v11 = vpop.f32.mrb[150].mxu1  ;;  %v3712_v55 = vmul.f32 %v13454_v12, %v3328_v34  ;;  %v3062_v36 = vadd.f32 %v13455_v61, %v10659_v54  ;;  %v13456_v5 = vld [vmem:[#allocation154_spill] sm:$0xff]  ;;  %v13465_v58 = vld [vmem:[#allocation173_spill] sm:$0xff] }
 0x2ec   : > { %13450 = vst [vmem:[#allocation225_spill] sm:$0xff] %v10793_v11  ;;  %v3729_v52 = vmul.f32 %v13453_v30, %v3345_v3  ;;  %v3137_v41 = vadd.f32 %v7809_v19, %v10783_v49  ;;  %v3131_v50 = vpop.f32.mrb[59].mxu0  ;;  %v2669_v29 = vpop.f32.mrb[151].mxu1  ;;  %13458 = vst [vmem:[#allocation183_spill] sm:$0xff] %v10807_v22  ;;  %v10811_v3 = vadd.f32 %v10585_v40, %v13459_v25  ;;  %v13461_v49 = vld [vmem:[#allocation172_spill] sm:$0xff]  ;;  %v13462_v12 = vld [vmem:[#allocation166_spill] sm:$0xff] }
 0x2ed   : > { %v3728_v20 = vmul.f32 %v13456_v5, %v3344_v43  ;;  %v3132_v17 = vadd.f32 %v3131_v50, %v10779_v31  ;;  %v3715_v34 = vmul.f32 %v13461_v49, %v3331_v45  ;;  %v3714_v30 = vmul.f32 %v13462_v12, %v3330_v33  ;;  %v10819_v50 = vpop.permute.xlu0 %3536  ;;  %v13464_v53 = vld [vmem:[#allocation190_spill] sm:$0xff]  ;;  %v13467_v33 = vld [vmem:[#allocation193_spill] sm:$0xff]  ;;  %v13469_v49 = vld [vmem:[#allocation128_spill] sm:$0xff] }
 0x2ee   : > { %13460 = vst [vmem:[#allocation185_spill] sm:$0xff] %v10811_v3  ;;  %v10813_v19 = vadd.f32 %v3729_v52, %v3713_v51  ;;  %v3347_v29 = vmax.f32 %v3137_v41, 0.0  ;;  %13463 = vst [vmem:[#allocation226_spill] sm:$0xff] %v10819_v50  ;;  %v3333_v31 = vmax.f32 %v3067_v28, 0.0  ;;  %v3077_v54 = vadd.f32 %v13464_v53, %v10675_v10  ;;  %v10825_v41 = vpop.permute.xlu1 %3686  ;;  %v13474_v32 = vld [vmem:[#allocation181_spill] sm:$0xff] }
 0x2ef   : > { %v10817_v61 = vadd.f32 %v3728_v20, %v3712_v55  ;;  %v3346_v43 = vmax.f32 %v3132_v17, 0.0  ;;  %v7812_v5 = vpop.f32.mrb[60].mxu0  ;;  %13466 = vst [vmem:[#allocation190_spill] sm:$0xff] %v10825_v41  ;;  %v3332_v45 = vmax.f32 %v3062_v36, 0.0  ;;  %v3072_v55 = vadd.f32 %v13467_v33, %v10671_v37  ;;  %v13468_v20 = vld [vmem:[#allocation168_spill] sm:$0xff]  ;;  %v13472_v33 = vld [vmem:[#allocation207_spill] sm:$0xff] }
 0x2f0   : > { %v3731_v25 = vmul.f32 %v13465_v58, %v3347_v29  ;;  %v3147_v52 = vadd.f32 %v7812_v5, %v10811_v3  ;;  %v3141_v51 = vpop.f32.mrb[61].mxu0  ;;  %v10833_v28 = vadd.f32 %v10585_v40, %v13469_v49  ;;  %v13470_v58 = vld [vmem:[#allocation126_spill] sm:$0xff]  ;;  %v3717_v37 = vmul.f32 %v13472_v33, %v3333_v31 }
 0x2f1   : > { %v3730_v17 = vmul.f32 %v13468_v20, %v3346_v43  ;;  %v3142_v12 = vadd.f32 %v3141_v51, %v10807_v22  ;;  %v10839_v5 = vadd.f32 %v10585_v40, %v13470_v58  ;;  %v3335_v43 = vmax.f32 %v3077_v54, 0.0  ;;  %v13473_v20 = vld [vmem:[#allocation208_spill] sm:$0xff] }
 0x2f2   : > { %v10835_v53 = vadd.f32 %v3731_v25, %v3715_v34  ;;  %v3349_v29 = vmax.f32 %v3147_v52, 0.0  ;;  %v3716_v25 = vmul.f32 %v13474_v32, %v3332_v45  ;;  %v3334_v34 = vmax.f32 %v3072_v55, 0.0  ;;  %v13475_v52 = vld [vmem:[#allocation187_spill] sm:$0xff] }
 0x2f3   : > { %13471 = vst [vmem:[#allocation193_spill] sm:$0xff] %v10839_v5  ;;  %v10841_v3 = vadd.f32 %v3730_v17, %v3714_v30  ;;  %v3348_v36 = vmax.f32 %v3142_v12, 0.0  ;;  %v7815_v10 = vpop.f32.mrb[62].mxu0  ;;  %v10851_v30 = vadd.f32 %v10585_v40, %v13476_v1  ;;  %v10853_v12 = vpop.permute.xlu0 %3461  ;;  %v13479_v17 = vld [vmem:[#allocation130_spill] sm:$0xff] }
 0x2f4   : > { %v3733_v51 = vmul.f32 %v13473_v20, %v3349_v29  ;;  %v3157_v22 = vadd.f32 %v7815_v10, %v10833_v28  ;;  %v3151_v49 = vpop.f32.mrb[63].mxu0  ;;  %13478 = vst [vmem:[#allocation208_spill] sm:$0xff] %v10853_v12  ;;  %v10859_v10 = vadd.f32 %v10585_v40, %v13479_v17  ;;  %v10861_v29 = vpop.permute.xlu1 %3541  ;;  %v13481_v17 = vld [vmem:[#allocation136_spill] sm:$0xff] }
 0x2f5   : > { %v3732_v60 = vmul.f32 %v13475_v52, %v3348_v36  ;;  %v3152_v58 = vadd.f32 %v3151_v49, %v10839_v5  ;;  %13477 = vst [vmem:[#allocation207_spill] sm:$0xff] %v10851_v30  ;;  %v3719_v49 = vmul.f32 %v10853_v12, %v3335_v43  ;;  %v10873_v32 = vadd.f32 %v10585_v40, %v13481_v17 }
 0x2f6   : > { %v10855_v31 = vadd.f32 %v3733_v51, %v3717_v37  ;;  %v3351_v54 = vmax.f32 %v3157_v22, 0.0  ;;  %13480 = vst [vmem:[#allocation227_spill] sm:$0xff] %v10859_v10  ;;  %v3718_v37 = vmul.f32 %v10787_v16, %v3334_v34  ;;  %v13485_v34 = vld [vmem:[#allocation112_spill] sm:$0xff] }
 0x2f7   : > { %v10863_v45 = vadd.f32 %v3732_v60, %v3716_v25  ;;  %v3350_v55 = vmax.f32 %v3152_v58, 0.0  ;;  %v7818_v36 = vpop.f32.mrb[64].mxu0  ;;  %13482 = vst [vmem:[#allocation228_spill] sm:$0xff] %v10873_v32  ;;  %v13483_v25 = vld [vmem:[#allocation134_spill] sm:$0xff] }
 0x2f8   : > { %v3735_v1 = vmul.f32 %v10861_v29, %v3351_v54  ;;  %v3167_v5 = vadd.f32 %v7818_v36, %v10851_v30  ;;  %v3161_v52 = vpop.f32.mrb[65].mxu0  ;;  %v10879_v43 = vadd.f32 %v10585_v40, %v13483_v25 }
 0x2f9   : > { %v3734_v22 = vmul.f32 %v10819_v50, %v3350_v55  ;;  %v3162_v51 = vadd.f32 %v3161_v52, %v10859_v10  ;;  %v13486_v10 = vld [vmem:[#allocation110_spill] sm:$0xff] }
 0x2fa   : > { %v10875_v60 = vadd.f32 %v3735_v1, %v3719_v49  ;;  %v3353_v58 = vmax.f32 %v3167_v5, 0.0  ;;  %13484 = vst [vmem:[#allocation229_spill] sm:$0xff] %v10879_v43  ;;  %v13487_v1 = vld [vmem:[#allocation141_spill] sm:$0xff] }
 0x2fb   : > { %v10881_v54 = vadd.f32 %v3734_v22, %v3718_v37  ;;  %v3352_v36 = vmax.f32 %v3162_v51, 0.0  ;;  %v7821_v30 = vpop.f32.mrb[66].mxu0  ;;  %v10889_v5 = vadd.f32 %v10585_v40, %v13487_v1  ;;  %v13489_v22 = vld [vmem:[#allocation139_spill] sm:$0xff]  ;;  %v13492_v1 = vld [vmem:[#allocation122_spill] sm:$0xff] }
 0x2fc   : > { %v3737_v16 = vmul.f32 %v13485_v34, %v3353_v58  ;;  %v3177_v55 = vadd.f32 %v7821_v30, %v10873_v32  ;;  %v3171_v52 = vpop.f32.mrb[67].mxu0  ;;  %v10896_v51 = vadd.f32 %v10585_v40, %v13489_v22 }
 0x2fd   : > { %v3736_v50 = vmul.f32 %v13486_v10, %v3352_v36  ;;  %v3172_v17 = vadd.f32 %v3171_v52, %v10879_v43  ;;  %13488 = vst [vmem:[#allocation230_spill] sm:$0xff] %v10889_v5  ;;  %v13491_v36 = vld [vmem:[#allocation124_spill] sm:$0xff] }
 0x2fe   : > { %v10892_v49 = vadd.f32 %v10709_v6, %v3737_v16  ;;  %v3355_v37 = vmax.f32 %v3177_v55, 0.0  ;;  %13490 = vst [vmem:[#allocation231_spill] sm:$0xff] %v10896_v51  ;;  %v13493_v16 = vld [vmem:[#allocation146_spill] sm:$0xff] }
 0x2ff   : > { %v10899_v58 = vadd.f32 %v10711_v62, %v3736_v50  ;;  %v3354_v30 = vmax.f32 %v3172_v17, 0.0  ;;  %v7824_v25 = vpop.f32.mrb[68].mxu0  ;;  %v10907_v55 = vadd.f32 %v10585_v40, %v13493_v16  ;;  %v13495_v50 = vld [vmem:[#allocation143_spill] sm:$0xff] }
 0x300   : > { %v3739_v10 = vmul.f32 %v13491_v36, %v3355_v37  ;;  %v3187_v52 = vadd.f32 %v7824_v25, %v10889_v5  ;;  %v3181_v43 = vpop.f32.mrb[69].mxu0  ;;  %v10914_v17 = vadd.f32 %v10585_v40, %v13495_v50  ;;  %v13498_v16 = vld [vmem:[#allocation135_spill] sm:$0xff] }
 0x301   : > { %v3738_v32 = vmul.f32 %v13492_v1, %v3354_v30  ;;  %v3182_v6 = vadd.f32 %v3181_v43, %v10896_v51  ;;  %13494 = vst [vmem:[#allocation232_spill] sm:$0xff] %v10907_v55  ;;  %v13497_v30 = vld [vmem:[#allocation137_spill] sm:$0xff] }
 0x302   : > { %v10910_v22 = vadd.f32 %v10737_v23, %v3739_v10  ;;  %v3357_v62 = vmax.f32 %v3187_v52, 0.0  ;;  %13496 = vst [vmem:[#allocation233_spill] sm:$0xff] %v10914_v17  ;;  %v13499_v10 = vld [vmem:[#allocation150_spill] sm:$0xff] }
 0x303   : > { %v10917_v37 = vadd.f32 %v10741_v4, %v3738_v32  ;;  %v3356_v25 = vmax.f32 %v3182_v6, 0.0  ;;  %v7827_v5 = vpop.f32.mrb[70].mxu0  ;;  %v10925_v52 = vadd.f32 %v10585_v40, %v13499_v10  ;;  %v13501_v32 = vld [vmem:[#allocation148_spill] sm:$0xff]  ;;  %v13504_v10 = vld [vmem:[#allocation149_spill] sm:$0xff] }
 0x304   : > { %v3741_v1 = vmul.f32 %v13497_v30, %v3357_v62  ;;  %v3197_v43 = vadd.f32 %v7827_v5, %v10907_v55  ;;  %v3191_v51 = vpop.f32.mrb[71].mxu0  ;;  %v10932_v6 = vadd.f32 %v10585_v40, %v13501_v32 }
 0x305   : > { %v3740_v36 = vmul.f32 %v13498_v16, %v3356_v25  ;;  %v3192_v23 = vadd.f32 %v3191_v51, %v10914_v17  ;;  %13500 = vst [vmem:[#allocation234_spill] sm:$0xff] %v10925_v52  ;;  %v13503_v25 = vld [vmem:[#allocation151_spill] sm:$0xff] }
 0x306   : > { %v10928_v50 = vadd.f32 %v10761_v8, %v3741_v1  ;;  %v3359_v4 = vmax.f32 %v3197_v43, 0.0  ;;  %13502 = vst [vmem:[#allocation235_spill] sm:$0xff] %v10932_v6  ;;  %v13505_v1 = vld [vmem:[#allocation155_spill] sm:$0xff] }
 0x307   : > { %v10935_v62 = vadd.f32 %v10767_v24, %v3740_v36  ;;  %v3358_v5 = vmax.f32 %v3192_v23, 0.0  ;;  %v7830_v55 = vpop.f32.mrb[72].mxu0  ;;  %v10943_v43 = vadd.f32 %v10585_v40, %v13505_v1  ;;  %v13507_v36 = vld [vmem:[#allocation153_spill] sm:$0xff]  ;;  %v13510_v1 = vld [vmem:[#allocation163_spill] sm:$0xff] }
 0x308   : > { %v3743_v16 = vmul.f32 %v13503_v25, %v3359_v4  ;;  %v3207_v51 = vadd.f32 %v7830_v55, %v10925_v52  ;;  %v3201_v17 = vpop.f32.mrb[73].mxu0  ;;  %v10950_v23 = vadd.f32 %v10585_v40, %v13507_v36 }
 0x309   : > { %v3742_v30 = vmul.f32 %v13504_v10, %v3358_v5  ;;  %v3202_v8 = vadd.f32 %v3201_v17, %v10932_v6  ;;  %13506 = vst [vmem:[#allocation236_spill] sm:$0xff] %v10943_v43  ;;  %v13509_v5 = vld [vmem:[#allocation165_spill] sm:$0xff] }
 0x30a   : > { %v10946_v32 = vadd.f32 %v10789_v0, %v3743_v16  ;;  %v3361_v24 = vmax.f32 %v3207_v51, 0.0  ;;  %13508 = vst [vmem:[#allocation237_spill] sm:$0xff] %v10950_v23  ;;  %v13511_v16 = vld [vmem:[#allocation160_spill] sm:$0xff] }
 0x30b   : > { %v10953_v4 = vadd.f32 %v10791_v21, %v3742_v30  ;;  %v3360_v55 = vmax.f32 %v3202_v8, 0.0  ;;  %v7833_v52 = vpop.f32.mrb[74].mxu0  ;;  %v10961_v51 = vadd.f32 %v10585_v40, %v13511_v16  ;;  %v13513_v30 = vld [vmem:[#allocation157_spill] sm:$0xff]  ;;  %v10975_v16 = vpop.permute.xlu0 %3691 }
 0x30c   : > { %v3745_v10 = vmul.f32 %v13509_v5, %v3361_v24  ;;  %v3217_v17 = vadd.f32 %v7833_v52, %v10943_v43  ;;  %v3211_v6 = vpop.f32.mrb[75].mxu0  ;;  %v10968_v8 = vadd.f32 %v10585_v40, %v13513_v30  ;;  %13516 = vst [vmem:[#allocation240_spill] sm:$0xff] %v10975_v16  ;;  %v13517_v5 = vld [vmem:[#allocation177_spill] sm:$0xff] }
 0x30d   : > { %v3744_v25 = vmul.f32 %v13510_v1, %v3360_v55  ;;  %v3212_v0 = vadd.f32 %v3211_v6, %v10950_v23  ;;  %13512 = vst [vmem:[#allocation238_spill] sm:$0xff] %v10961_v51  ;;  %v13515_v55 = vld [vmem:[#allocation180_spill] sm:$0xff] }
 0x30e   : > { %v10964_v36 = vadd.f32 %v10813_v19, %v3745_v10  ;;  %v3363_v21 = vmax.f32 %v3217_v17, 0.0  ;;  %13514 = vst [vmem:[#allocation239_spill] sm:$0xff] %v10968_v8  ;;  %v13518_v17 = vld [vmem:[#allocation164_spill] sm:$0xff] }
 0x30f   : > { %v10971_v24 = vadd.f32 %v10817_v61, %v3744_v25  ;;  %v3362_v52 = vmax.f32 %v3212_v0, 0.0  ;;  %v7836_v43 = vpop.f32.mrb[76].mxu0  ;;  %v10981_v30 = vadd.f32 %v10585_v40, %v13518_v17  ;;  %v13520_v0 = vld [vmem:[#allocation162_spill] sm:$0xff] }
 0x310   : > { %v3747_v1 = vmul.f32 %v13515_v55, %v3363_v21  ;;  %v3227_v6 = vadd.f32 %v7836_v43, %v10961_v51  ;;  %v3221_v23 = vpop.f32.mrb[77].mxu0  ;;  %v10988_v21 = vadd.f32 %v10585_v40, %v13520_v0 }
 0x311   : > { %v3746_v19 = vmul.f32 %v13517_v5, %v3362_v52  ;;  %v3222_v10 = vadd.f32 %v3221_v23, %v10968_v8  ;;  %13519 = vst [vmem:[#allocation241_spill] sm:$0xff] %v10981_v30 }
 0x312   : > { %v10984_v61 = vadd.f32 %v10835_v53, %v3747_v1  ;;  %v3365_v25 = vmax.f32 %v3227_v6, 0.0  ;;  %13521 = vst [vmem:[#allocation242_spill] sm:$0xff] %v10988_v21  ;;  %v13522_v1 = vld [vmem:[#allocation169_spill] sm:$0xff] }
 0x313   : > { %v10991_v43 = vadd.f32 %v10841_v3, %v3746_v19  ;;  %v3364_v51 = vmax.f32 %v3222_v10, 0.0  ;;  %v7839_v55 = vpop.f32.mrb[78].mxu0  ;;  %v10999_v6 = vadd.f32 %v10585_v40, %v13522_v1  ;;  %v11004_v19 = vpop.permute.xlu0 %3621  ;;  %v13525_v10 = vld [vmem:[#allocation167_spill] sm:$0xff] }
 0x314   : > { %v3749_v52 = vmul.f32 %v10785_v42, %v3365_v25  ;;  %v3237_v23 = vadd.f32 %v7839_v55, %v10981_v30  ;;  %v3231_v8 = vpop.f32.mrb[79].mxu0  ;;  %13524 = vst [vmem:[#allocation244_spill] sm:$0xff] %v11004_v19  ;;  %v11008_v25 = vadd.f32 %v10585_v40, %v13525_v10  ;;  %v13528_v30 = vld [vmem:[#allocation174_spill] sm:$0xff] }
 0x315   : > { %v3748_v17 = vmul.f32 %v10735_v26, %v3364_v51  ;;  %v3232_v53 = vadd.f32 %v3231_v8, %v10988_v21  ;;  %13523 = vst [vmem:[#allocation243_spill] sm:$0xff] %v10999_v6  ;;  %v11013_v8 = vpop.permute.xlu1 %3616  ;;  %v11021_v10 = vadd.f32 %v10585_v40, %v13528_v30  ;;  %v13533_v30 = vld [vmem:[#allocation116_spill] sm:$0xff] }
 0x316   : > { %v11002_v0 = vadd.f32 %v10855_v31, %v3749_v52  ;;  %v3367_v3 = vmax.f32 %v3237_v23, 0.0  ;;  %13526 = vst [vmem:[#allocation245_spill] sm:$0xff] %v11008_v25  ;;  %13527 = vst [vmem:[#allocation246_spill] sm:$0xff] %v11013_v8 }
 0x317   : > { %v11011_v55 = vadd.f32 %v10863_v45, %v3748_v17  ;;  %v3366_v51 = vmax.f32 %v3232_v53, 0.0  ;;  %v7842_v26 = vpop.f32.mrb[80].mxu0  ;;  %13529 = vst [vmem:[#allocation247_spill] sm:$0xff] %v11021_v10  ;;  %v13530_v53 = vld [vmem:[#allocation171_spill] sm:$0xff] }
 0x318   : > { %v3751_v1 = vmul.f32 %v11004_v19, %v3367_v3  ;;  %v3247_v21 = vadd.f32 %v7842_v26, %v10999_v6  ;;  %v3241_v31 = vpop.f32.mrb[81].mxu0  ;;  %v11028_v42 = vadd.f32 %v10585_v40, %v13530_v53 }
 0x319   : > { %v3750_v52 = vmul.f32 %v11013_v8, %v3366_v51  ;;  %v3242_v23 = vadd.f32 %v3241_v31, %v11008_v25  ;;  %v13532_v51 = vld [vmem:[#allocation120_spill] sm:$0xff] }
 0x31a   : > { %v11024_v45 = vadd.f32 %v10875_v60, %v3751_v1  ;;  %v3369_v17 = vmax.f32 %v3247_v21, 0.0  ;;  %13531 = vst [vmem:[#allocation248_spill] sm:$0xff] %v11028_v42  ;;  %v13534_v1 = vld [vmem:[#allocation178_spill] sm:$0xff] }
 0x31b   : > { %v11031_v3 = vadd.f32 %v10881_v54, %v3750_v52  ;;  %v3368_v26 = vmax.f32 %v3242_v23, 0.0  ;;  %v7845_v6 = vpop.f32.mrb[82].mxu0  ;;  %v11039_v21 = vadd.f32 %v10585_v40, %v13534_v1  ;;  %v13535_v54 = vld [vmem:[#allocation175_spill] sm:$0xff] }
 0x31c   : > { %v3753_v8 = vmul.f32 %v13532_v51, %v3369_v17  ;;  %v3257_v31 = vadd.f32 %v7845_v6, %v11021_v10  ;;  %v3251_v25 = vpop.f32.mrb[83].mxu0  ;;  %v11044_v52 = vadd.f32 %v10585_v40, %v13535_v54  ;;  %v13537_v10 = vld [vmem:[#allocation133_spill] sm:$0xff] }
 0x31d   : > { %v3752_v19 = vmul.f32 %v13533_v30, %v3368_v26  ;;  %v3252_v60 = vadd.f32 %v3251_v25, %v11028_v42  ;;  %v13538_v42 = vld [vmem:[#allocation129_spill] sm:$0xff] }
 0x31e   : > { %v3801_v53 = vadd.f32 %v10892_v49, %v3753_v8  ;;  %v3371_v5 = vmax.f32 %v3257_v31, 0.0  ;;  %13536 = vst [vmem:[#allocation249_spill] sm:$0xff] %v11044_v52  ;;  %v13539_v49 = vld [vmem:[#allocation182_spill] sm:$0xff] }
 0x31f   : > { %v3800_v23 = vadd.f32 %v10899_v58, %v3752_v19  ;;  %v3370_v17 = vmax.f32 %v3252_v60, 0.0  ;;  %v7848_v6 = vpop.f32.mrb[84].mxu0  ;;  %v11054_v8 = vadd.f32 %v10585_v40, %v13539_v49  ;;  %v13540_v19 = vld [vmem:[#allocation179_spill] sm:$0xff] }
 0x320   : > { %v3755_v51 = vmul.f32 %v13537_v10, %v3371_v5  ;;  %v3267_v26 = vadd.f32 %v7848_v6, %v11039_v21  ;;  %v3261_v25 = vpop.f32.mrb[85].mxu0  ;;  %v11060_v5 = vadd.f32 %v10585_v40, %v13540_v19 }
 0x321   : > { %v3754_v30 = vmul.f32 %v13538_v42, %v3370_v17  ;;  %v3262_v1 = vadd.f32 %v3261_v25, %v11044_v52  ;;  %7872 = vmatprep.mubr.msk.f32.mxu0 %vm2741_vm4, %v3800_v23  ;;  %v13542_v25 = vld [vmem:[#allocation2_spill] sm:$0xff]  ;;  %v13543_v23 = vld [vmem:[#allocation147_spill] sm:$0xff] }
 0x322   : > { %v3803_v31 = vadd.f32 %v10910_v22, %v3755_v51  ;;  %v3373_v58 = vmax.f32 %v3267_v26, 0.0  ;;  %7873 = vmatmul.mubr.msk.f32.vlgmr.msra.gmra.mrb[96].mxu0 %vm2741_vm4, %v3801_v53  ;;  %13541 = vst [vmem:[#allocation250_spill] sm:$0xff] %v11060_v5  ;;  %v13544_v42 = vld [vmem:[#allocation3_spill] sm:$0xff]  ;;  %v13545_v22 = vld [vmem:[#allocation142_spill] sm:$0xff] }
 0x323   : > { %v3802_v60 = vadd.f32 %v10917_v37, %v3754_v30  ;;  %v3372_v17 = vmax.f32 %v3262_v1, 0.0  ;;  %v7851_v6 = vpop.f32.mrb[86].mxu0  ;;  %8339 = vmatpush3.bf16.msra.mxu0 %v13542_v25  ;;  %v13546_v26 = vld [vmem:[#allocation191_spill] sm:$0xff] }
 0x324   : > { %v3757_v54 = vmul.f32 %v13543_v23, %v3373_v58  ;;  %v3277_v49 = vadd.f32 %v7851_v6, %v11054_v8  ;;  %v3271_v52 = vpop.f32.mrb[87].mxu0  ;;  %8341 = vmatprep.subr.bf16.mxu0 %v13544_v42  ;;  %v11072_v37 = vadd.f32 %v10585_v40, %v13546_v26  ;;  %v13547_v58 = vld [vmem:[#allocation184_spill] sm:$0xff] }
 0x325   : > { %v3756_v51 = vmul.f32 %v13545_v22, %v3372_v17  ;;  %v3272_v53 = vadd.f32 %v3271_v52, %v11060_v5  ;;  %7875 = vmatprep.mubr.msk.f32.mxu0 %vm2741_vm4, %v3802_v60  ;;  %v11078_v6 = vadd.f32 %v10585_v40, %v13547_v58  ;;  %v13549_v52 = vld [vmem:[#allocation161_spill] sm:$0xff]  ;;  %v13550_v22 = vld [vmem:[#allocation156_spill] sm:$0xff] }
 0x326   : > { %v3805_v30 = vadd.f32 %v10928_v50, %v3757_v54  ;;  %v3375_v1 = vmax.f32 %v3277_v49, 0.0  ;;  %7876 = vmatmul.mubr.msk.f32.gmra.mrb[98].mxu0 %vm2741_vm4, %v3803_v31  ;;  %v11089_v49 = vadd.f32 %v10585_v40, %v10693_v39  ;;  %v13554_v39 = vld [vmem:[#allocation170_spill] sm:$0xff] }
 0x327   : > { %13548 = vst [vmem:[#allocation2_spill] sm:$0xff] %v11078_v6  ;;  %v3804_v25 = vadd.f32 %v10935_v62, %v3756_v51  ;;  %v3374_v17 = vmax.f32 %v3272_v53, 0.0  ;;  %v7854_v19 = vpop.f32.mrb[88].mxu0  ;;  %8343 = vmatpush3.bf16.msra.mxu0 %v13544_v42  ;;  %v13551_v42 = vld [vmem:[#allocation201_spill] sm:$0xff] }
 0x328   : > { %v3759_v60 = vmul.f32 %v13549_v52, %v3375_v1  ;;  %v3287_v26 = vadd.f32 %v7854_v19, %v11072_v37  ;;  %v3281_v5 = vpop.f32.mrb[89].mxu0  ;;  %v11095_v51 = vadd.f32 %v10585_v40, %v13551_v42 }
 0x329   : > { %v3758_v50 = vmul.f32 %v13550_v22, %v3374_v17  ;;  %v3282_v54 = vadd.f32 %v3281_v5, %v11078_v6  ;;  %7878 = vmatprep.mubr.msk.f32.mxu0 %vm2741_vm4, %v3804_v25  ;;  %v13553_v5 = vld [vmem:[#allocation176_spill] sm:$0xff] }
 0x32a   : > { %v3807_v62 = vadd.f32 %v10946_v32, %v3759_v60  ;;  %v3377_v31 = vmax.f32 %v3287_v26, 0.0  ;;  %7879 = vmatmul.mubr.msk.f32.gmra.mrb[100].mxu0 %vm2741_vm4, %v3805_v30  ;;  %13552 = vst [vmem:[#allocation3_spill] sm:$0xff] %v11095_v51  ;;  %v11105_v26 = vadd.f32 %v10585_v40, %v10743_v57  ;;  %v11111_v60 = vadd.f32 %v10585_v40, %v10713_v56 }
 0x32b   : > { %v3806_v19 = vadd.f32 %v10953_v4, %v3758_v50  ;;  %v3376_v53 = vmax.f32 %v3282_v54, 0.0  ;;  %v7857_v1 = vpop.f32.mrb[90].mxu0 }
 0x32c   : > { %v3761_v17 = vmul.f32 %v13553_v5, %v3377_v31  ;;  %v3297_v25 = vadd.f32 %v7857_v1, %v11089_v49  ;;  %v3291_v58 = vpop.f32.mrb[91].mxu0  ;;  %13555 = vst [vmem:[#allocation251_spill] sm:$0xff] %v11105_v26  ;;  %13556 = vst [vmem:[#allocation252_spill] sm:$0xff] %v11111_v60  ;;  %v11118_v1 = vadd.f32 %v10585_v40, %v10793_v11 }
 0x32d   : > { %v3760_v6 = vmul.f32 %v13554_v39, %v3376_v53  ;;  %v3292_v32 = vadd.f32 %v3291_v58, %v11095_v51  ;;  %7881 = vmatprep.mubr.msk.f32.mxu0 %vm2741_vm4, %v3806_v19 }
 0x32e   : > { %v3809_v30 = vadd.f32 %v10964_v36, %v3761_v17  ;;  %v3379_v4 = vmax.f32 %v3297_v25, 0.0  ;;  %7882 = vmatmul.mubr.msk.f32.gmra.mrb[102].mxu0 %vm2741_vm4, %v3807_v62  ;;  %13557 = vst [vmem:[#allocation253_spill] sm:$0xff] %v11118_v1  ;;  %v13558_v36 = vld [vmem:[#allocation188_spill] sm:$0xff] }
 0x32f   : > { %v3808_v50 = vadd.f32 %v10971_v24, %v3760_v6  ;;  %v3378_v54 = vmax.f32 %v3292_v32, 0.0  ;;  %v7860_v31 = vpop.f32.mrb[92].mxu0  ;;  %v11127_v6 = vadd.f32 %v10585_v40, %v10769_v63  ;;  %v11137_v40 = vpop.permute.xlu0 %3701 }
 0x330   : > { %v3763_v58 = vmul.f32 %v10733_v14, %v3379_v4  ;;  %v3307_v19 = vadd.f32 %v7860_v31, %v11105_v26  ;;  %v3301_v53 = vpop.f32.mrb[93].mxu0  ;;  %13560 = vst [vmem:[#allocation255_spill] sm:$0xff] %v11137_v40 }
 0x331   : > { %v3762_v17 = vmul.f32 %v13558_v36, %v3378_v54  ;;  %v3302_v62 = vadd.f32 %v3301_v53, %v11111_v60  ;;  %7884 = vmatprep.mubr.msk.f32.mxu0 %vm2741_vm4, %v3808_v50  ;;  %13559 = vst [vmem:[#allocation254_spill] sm:$0xff] %v11127_v6  ;;  %v13715_v36 = vld [vmem:[#allocation200_spill] sm:$0xff] }
 0x332   : > { %v3811_v25 = vadd.f32 %v10984_v61, %v3763_v58  ;;  %v3381_v24 = vmax.f32 %v3307_v19, 0.0  ;;  %7885 = vmatmul.mubr.msk.f32.gmra.mrb[104].mxu0 %vm2741_vm4, %v3809_v30 }
 0x333   : > { %v3810_v32 = vadd.f32 %v10991_v43, %v3762_v17  ;;  %v3380_v4 = vmax.f32 %v3302_v62, 0.0  ;;  %v7863_v31 = vpop.f32.mrb[94].mxu0  ;;  %v11140_v17 = vpop.permute.xlu1 %3696 }
 0x334   : > { %v3765_v11 = vmul.f32 %v10975_v16, %v3381_v24  ;;  %v3317_v54 = vadd.f32 %v7863_v31, %v11118_v1  ;;  %v3311_v53 = vpop.f32.mrb[95].mxu0  ;;  %13561 = vst [vmem:[#allocation256_spill] sm:$0xff] %v11140_v17  ;;  %v13714_v16 = vld [vmem:[#allocation192_spill] sm:$0xff] }
 0x335   : > { %v3764_v50 = vmul.f32 %v10825_v41, %v3380_v4  ;;  %v3312_v61 = vadd.f32 %v3311_v53, %v11127_v6  ;;  %7887 = vmatprep.mubr.msk.f32.mxu0 %vm2741_vm4, %v3810_v32 }
 0x336   : > { %v3813_v30 = vadd.f32 %v11002_v0, %v3765_v11  ;;  %v3383_v58 = vmax.f32 %v3317_v54, 0.0  ;;  %7888 = vmatmul.mubr.msk.f32.gmra.mrb[106].mxu0 %vm2741_vm4, %v3811_v25  ;;  %v6619_v25 = vld [vmem:[%s12734_s9] ss:$0 sm:$0xff] }
 0x337   : > { %v3812_v43 = vadd.f32 %v11011_v55, %v3764_v50  ;;  %v3382_v19 = vmax.f32 %v3312_v61, 0.0 }
 0x338   : > { %v3767_v62 = vmul.f32 %v11137_v40, %v3383_v58  ;;  %v13713_v40 = vld [vmem:[#allocation197_spill] sm:$0xff] }
 0x339   : > { %v3766_v24 = vmul.f32 %v11140_v17, %v3382_v19  ;;  %7890 = vmatprep.mubr.msk.f32.mxu0 %vm2741_vm4, %v3812_v43 }
 0x33a   : > { %v3815_v32 = vadd.f32 %v11024_v45, %v3767_v62  ;;  %7891 = vmatmul.mubr.msk.f32.gmra.mrb[108].mxu0 %vm2741_vm4, %v3813_v30 }
 0x33b   : > { %v3814_v11 = vadd.f32 %v11031_v3, %v3766_v24 }
 0x33d   : > { %7893 = vmatprep.mubr.msk.f32.mxu0 %vm2741_vm4, %v3814_v11 }
 0x33e   : > { %7894 = vmatmul.mubr.msk.f32.gmra.mrb[110].mxu0 %vm2741_vm4, %v3815_v32 }
 0x3f5   : > { %v7874_v0 = vpop.f32.mrb[96].mxu0 }
 0x3f6   : > { %4027 = vrot.lane.b32.xlu0 %v7874_v0, %s8549_s24  ;;  %v3930_v55 = vpop.f32.mrb[97].mxu0  ;;  %v13562_v0 = vld [vmem:[#allocation51_spill] sm:$0xff] }
 0x3f7   : > { %4025 = vrot.lane.b32.xlu1 %v3930_v55, %s8549_s24 }
 0x3f9   : > { %v7877_v45 = vpop.f32.mrb[98].mxu0 }
 0x3fa   : > { %v3940_v4 = vpop.f32.mrb[99].mxu0 }
 0x3fb   : > { %4089 = vrot.lane.b32.xlu1 %v6619_v25, %s8549_s24  ;;  %4029 = vrot.lane.b32.xlu0 %v3940_v4, %s8549_s24  ;;  %v13563_v25 = vld [vmem:[#allocation52_spill] sm:$0xff] }
 0x3fd   : > { %v7880_v3 = vpop.f32.mrb[100].mxu0 }
 0x3fe   : > { %v3950_v31 = vpop.f32.mrb[101].mxu0 }
 0x3ff   : > { %4031 = vrot.lane.b32.xlu1 %v7877_v45, %s8549_s24  ;;  %4033 = vrot.lane.b32.xlu0 %v3950_v31, %s8549_s24  ;;  %v13565_v31 = vld [vmem:[#allocation55_spill] sm:$0xff] }
 0x401   : > { %v7883_v54 = vpop.f32.mrb[102].mxu0 }
 0x402   : > { %v3960_v53 = vpop.f32.mrb[103].mxu0 }
 0x403   : > { %4035 = vrot.lane.b32.xlu1 %v7880_v3, %s8549_s24  ;;  %4037 = vrot.lane.b32.xlu0 %v3960_v53, %s8549_s24 }
 0x405   : > { %v7886_v50 = vpop.f32.mrb[104].mxu0 }
 0x406   : > { %v3970_v61 = vpop.f32.mrb[105].mxu0 }
 0x407   : > { %4039 = vrot.lane.b32.xlu1 %v7883_v54, %s8549_s24  ;;  %4041 = vrot.lane.b32.xlu0 %v3970_v61, %s8549_s24 }
 0x409   : > { %v7889_v30 = vpop.f32.mrb[106].mxu0 }
 0x40a   : > { %v3980_v58 = vpop.f32.mrb[107].mxu0 }
 0x40b   : > { %4043 = vrot.lane.b32.xlu1 %v7886_v50, %s8549_s24  ;;  %4045 = vrot.lane.b32.xlu0 %v3980_v58, %s8549_s24 }
 0x40d   : > { %v7892_v43 = vpop.f32.mrb[108].mxu0 }
 0x40e   : > { %v3990_v19 = vpop.f32.mrb[109].mxu0 }
 0x40f   : > { %4047 = vrot.lane.b32.xlu1 %v7889_v30, %s8549_s24  ;;  %4049 = vrot.lane.b32.xlu0 %v3990_v19, %s8549_s24 }
 0x411   : > { %v7895_v62 = vpop.f32.mrb[110].mxu0 }
 0x412   : > { %v4000_v24 = vpop.f32.mrb[111].mxu0 }
 0x413   : > { %4051 = vrot.lane.b32.xlu1 %v7892_v43, %s8549_s24  ;;  %4053 = vrot.lane.b32.xlu0 %v4000_v24, %s8549_s24 }
 0x417   : > { %4055 = vrot.lane.b32.xlu1 %v7895_v62, %s8549_s24  ;;  %v13566_v62 = vld [vmem:[#allocation53_spill] sm:$0xff] }
 0x468   : > { %v4028_v32 = vpop.permute.xlu0 %4027 }
 0x469   : > { %v4026_v11 = vpop.permute.xlu1 %4025  ;;  %v4074_v55 = vadd.f32 %v13562_v0, %v4028_v32  ;;  %v13567_v32 = vld [vmem:[#allocation57_spill] sm:$0xff] }
 0x46a   : > { %v4073_v45 = vadd.f32 %v4026_v11, %v13563_v25 }
 0x46d   : > { %v11172_v4 = vpop.permute.xlu1 %4089  ;;  %v4030_v3 = vpop.permute.xlu0 %4029 }
 0x46e   : > { %13564 = vst [vmem:[#allocation51_spill] sm:$0xff] %v11172_v4  ;;  %v4075_v54 = vadd.f32 %v4030_v3, %v13565_v31  ;;  %v4093_v53 = vadd.f32 %v11172_v4, %v4074_v55  ;;  %v4092_v50 = vadd.f32 %v11172_v4, %v4073_v45 }
 0x470   : > { %v4094_v61 = vadd.f32 %v11172_v4, %v4075_v54  ;;  %v4109_v30 = vmax.f32 %v4093_v53, 0.0  ;;  %v4108_v58 = vmax.f32 %v4092_v50, 0.0  ;;  %v13568_v54 = vld [vmem:[#allocation56_spill] sm:$0xff] }
 0x471   : > { %v4032_v43 = vpop.permute.xlu1 %4031  ;;  %v4034_v19 = vpop.permute.xlu0 %4033  ;;  %v13569_v50 = vld [vmem:[#allocation60_spill] sm:$0xff] }
 0x472   : > { %v4076_v24 = vadd.f32 %v13566_v62, %v4032_v43  ;;  %v4077_v0 = vadd.f32 %v4034_v19, %v13567_v32  ;;  %4142 = vrot.lane.b32.xlu1 %v4109_v30, %s8550_s27  ;;  %4140 = vrot.lane.b32.xlu0 %v4108_v58, %s8550_s27  ;;  %v4110_v11 = vmax.f32 %v4094_v61, 0.0 }
 0x474   : > { %v4095_v55 = vadd.f32 %v11172_v4, %v4076_v24  ;;  %v4096_v25 = vadd.f32 %v11172_v4, %v4077_v0  ;;  %v13570_v24 = vld [vmem:[#allocation59_spill] sm:$0xff] }
 0x475   : > { %v4036_v45 = vpop.permute.xlu1 %4035  ;;  %v4038_v3 = vpop.permute.xlu0 %4037  ;;  %v13571_v0 = vld [vmem:[#allocation63_spill] sm:$0xff] }
 0x476   : > { %v4111_v31 = vmax.f32 %v4095_v55, 0.0  ;;  %v4078_v53 = vadd.f32 %v13568_v54, %v4036_v45  ;;  %v4079_v63 = vadd.f32 %v4038_v3, %v13569_v50  ;;  %4144 = vrot.lane.b32.xlu0 %v4110_v11, %s8550_s27  ;;  %v4112_v43 = vmax.f32 %v4096_v25, 0.0  ;;  %v13573_v50 = vld [vmem:[#allocation65_spill] sm:$0xff] }
 0x478   : > { %v4097_v19 = vadd.f32 %v11172_v4, %v4078_v53  ;;  %v4098_v30 = vadd.f32 %v11172_v4, %v4079_v63  ;;  %4146 = vrot.lane.b32.xlu1 %v4111_v31, %s8550_s27  ;;  %v13572_v31 = vld [vmem:[#allocation61_spill] sm:$0xff] }
 0x479   : > { %v4040_v61 = vpop.permute.xlu1 %4039  ;;  %v4042_v58 = vpop.permute.xlu0 %4041 }
 0x47a   : > { %v4113_v62 = vmax.f32 %v4097_v19, 0.0  ;;  %v4080_v32 = vadd.f32 %v13570_v24, %v4040_v61  ;;  %v4081_v55 = vadd.f32 %v4042_v58, %v13571_v0  ;;  %4148 = vrot.lane.b32.xlu0 %v4112_v43, %s8550_s27  ;;  %v4114_v45 = vmax.f32 %v4098_v30, 0.0 }
 0x47c   : > { %v4099_v3 = vadd.f32 %v11172_v4, %v4080_v32  ;;  %v4100_v11 = vadd.f32 %v11172_v4, %v4081_v55  ;;  %4150 = vrot.lane.b32.xlu1 %v4113_v62, %s8550_s27  ;;  %v13574_v62 = vld [vmem:[#allocation64_spill] sm:$0xff]  ;;  %v13575_v55 = vld [vmem:[#allocation67_spill] sm:$0xff] }
 0x47d   : > { %v4044_v25 = vpop.permute.xlu1 %4043  ;;  %v4046_v63 = vpop.permute.xlu0 %4045 }
 0x47e   : > { %v4115_v54 = vmax.f32 %v4099_v3, 0.0  ;;  %v4082_v53 = vadd.f32 %v13572_v31, %v4044_v25  ;;  %v4083_v19 = vadd.f32 %v4046_v63, %v13573_v50  ;;  %4152 = vrot.lane.b32.xlu0 %v4114_v45, %s8550_s27  ;;  %v4116_v61 = vmax.f32 %v4100_v11, 0.0 }
 0x480   : > { %v4101_v58 = vadd.f32 %v11172_v4, %v4082_v53  ;;  %v4102_v43 = vadd.f32 %v11172_v4, %v4083_v19  ;;  %4154 = vrot.lane.b32.xlu1 %v4115_v54, %s8550_s27  ;;  %v13576_v54 = vld [vmem:[#allocation66_spill] sm:$0xff] }
 0x481   : > { %v4048_v30 = vpop.permute.xlu1 %4047  ;;  %v4050_v24 = vpop.permute.xlu0 %4049  ;;  %v13577_v19 = vld [vmem:[#allocation70_spill] sm:$0xff] }
 0x482   : > { %v4117_v32 = vmax.f32 %v4101_v58, 0.0  ;;  %v4084_v0 = vadd.f32 %v13574_v62, %v4048_v30  ;;  %v4085_v3 = vadd.f32 %v4050_v24, %v13575_v55  ;;  %4156 = vrot.lane.b32.xlu0 %v4116_v61, %s8550_s27  ;;  %v4118_v25 = vmax.f32 %v4102_v43, 0.0 }
 0x484   : > { %v4103_v63 = vadd.f32 %v11172_v4, %v4084_v0  ;;  %v4104_v45 = vadd.f32 %v11172_v4, %v4085_v3  ;;  %4158 = vrot.lane.b32.xlu1 %v4117_v32, %s8550_s27  ;;  %v13578_v0 = vld [vmem:[#allocation68_spill] sm:$0xff] }
 0x485   : > { %v4052_v11 = vpop.permute.xlu1 %4051  ;;  %v4054_v31 = vpop.permute.xlu0 %4053 }
 0x486   : > { %v4119_v53 = vmax.f32 %v4103_v63, 0.0  ;;  %v4086_v50 = vadd.f32 %v13576_v54, %v4052_v11  ;;  %v4087_v58 = vadd.f32 %v4054_v31, %v13577_v19  ;;  %4160 = vrot.lane.b32.xlu0 %v4118_v25, %s8550_s27  ;;  %v4120_v30 = vmax.f32 %v4104_v45, 0.0 }
 0x488   : > { %v4105_v24 = vadd.f32 %v11172_v4, %v4086_v50  ;;  %v4106_v61 = vadd.f32 %v11172_v4, %v4087_v58  ;;  %4162 = vrot.lane.b32.xlu1 %v4119_v53, %s8550_s27 }
 0x489   : > { %v4056_v43 = vpop.permute.xlu1 %4055 }
 0x48a   : > { %v4121_v62 = vmax.f32 %v4105_v24, 0.0  ;;  %v4088_v32 = vadd.f32 %v13578_v0, %v4056_v43  ;;  %4164 = vrot.lane.b32.xlu0 %v4120_v30, %s8550_s27  ;;  %v4122_v55 = vmax.f32 %v4106_v61, 0.0 }
 0x48c   : > { %v4107_v3 = vadd.f32 %v11172_v4, %v4088_v32  ;;  %4166 = vrot.lane.b32.xlu1 %v4121_v62, %s8550_s27 }
 0x48e   : > { %v4123_v63 = vmax.f32 %v4107_v3, 0.0  ;;  %4168 = vrot.lane.b32.xlu0 %v4122_v55, %s8550_s27  ;;  %v13579_v55 = vmov 1.0   ;;  %v13580_v3 = vld [vmem:[#allocation4_spill] sm:$0xff] }
 0x490   : > { %4170 = vrot.lane.b32.xlu1 %v4123_v63, %s8550_s27 }
 0x4e4   : > { %v4143_v25 = vpop.permute.xlu1 %4142  ;;  %v4141_v45 = vpop.permute.xlu0 %4140 }
 0x4e5   : > { %7904 = vmatprep.mubr.msk.f32.mxu0 %vm2741_vm4, %v4141_v45 }
 0x4e6   : > { %7905 = vmatmul.mubr.msk.f32.vlgmr.msra.gmra.mrb[112].mxu0 %vm2741_vm4, %v4143_v25 }
 0x4e8   : > { %v4145_v11 = vpop.permute.xlu0 %4144 }
 0x4e9   : > { %7907 = vmatprep.mubr.msk.f32.mxu0 %vm2741_vm4, %v4145_v11 }
 0x4ea   : > { %v4147_v31 = vpop.permute.xlu1 %4146 }
 0x4eb   : > { %7908 = vmatmul.mubr.msk.f32.gmra.mrb[114].mxu0 %vm2741_vm4, %v4147_v31 }
 0x4ec   : > { %v4149_v53 = vpop.permute.xlu0 %4148 }
 0x4ed   : > { %7910 = vmatprep.mubr.msk.f32.mxu0 %vm2741_vm4, %v4149_v53 }
 0x4ee   : > { %v4151_v54 = vpop.permute.xlu1 %4150 }
 0x4ef   : > { %7911 = vmatmul.mubr.msk.f32.gmra.mrb[116].mxu0 %vm2741_vm4, %v4151_v54 }
 0x4f0   : > { %v4153_v50 = vpop.permute.xlu0 %4152 }
 0x4f1   : > { %7913 = vmatprep.mubr.msk.f32.mxu0 %vm2741_vm4, %v4153_v50 }
 0x4f2   : > { %v4155_v19 = vpop.permute.xlu1 %4154 }
 0x4f3   : > { %7914 = vmatmul.mubr.msk.f32.gmra.mrb[118].mxu0 %vm2741_vm4, %v4155_v19 }
 0x4f4   : > { %v4157_v58 = vpop.permute.xlu0 %4156 }
 0x4f5   : > { %7916 = vmatprep.mubr.msk.f32.mxu0 %vm2741_vm4, %v4157_v58 }
 0x4f6   : > { %v4159_v30 = vpop.permute.xlu1 %4158 }
 0x4f7   : > { %7917 = vmatmul.mubr.msk.f32.gmra.mrb[120].mxu0 %vm2741_vm4, %v4159_v30 }
 0x4f8   : > { %v4161_v24 = vpop.permute.xlu0 %4160 }
 0x4f9   : > { %7919 = vmatprep.mubr.msk.f32.mxu0 %vm2741_vm4, %v4161_v24 }
 0x4fa   : > { %v4163_v61 = vpop.permute.xlu1 %4162 }
 0x4fb   : > { %7920 = vmatmul.mubr.msk.f32.gmra.mrb[122].mxu0 %vm2741_vm4, %v4163_v61 }
 0x4fc   : > { %v4165_v43 = vpop.permute.xlu0 %4164 }
 0x4fd   : > { %7922 = vmatprep.mubr.msk.f32.mxu0 %vm2741_vm4, %v4165_v43 }
 0x4fe   : > { %v4167_v62 = vpop.permute.xlu1 %4166 }
 0x4ff   : > { %7923 = vmatmul.mubr.msk.f32.gmra.mrb[124].mxu0 %vm2741_vm4, %v4167_v62 }
 0x500   : > { %v4169_v0 = vpop.permute.xlu0 %4168 }
 0x501   : > { %7925 = vmatprep.mubr.msk.f32.mxu0 %vm2741_vm4, %v4169_v0 }
 0x502   : > { %v4171_v32 = vpop.permute.xlu1 %4170 }
 0x503   : > { %7926 = vmatmul.mubr.msk.f32.gmra.mrb[126].mxu0 %vm2741_vm4, %v4171_v32 }
 0x504   : > { %7960 = vmatprep.mubr.msk.f32.mxu0 %vm1619_vm5, %v13579_v55 }
 0x5b9   : > { %v11240_v25 = vpop.f32.mrb[112].mxu0 }
 0x5ba   : > { %13582 = vst [vmem:[#allocation52_spill] sm:$0xff] %v11240_v25  ;;  %v11242_v45 = vpop.f32.mrb[113].mxu0 }
 0x5bb   : > { %13583 = vst [vmem:[#allocation55_spill] sm:$0xff] %v11242_v45  ;;  %v8344_v11 = vpack.c.bf16 %v11240_v25, %v11242_v45  ;;  %v13712_v25 = vld [vmem:[#allocation194_spill] sm:$0xff] }
 0x5bd   : > { %8345 = vmatprep.subr.bf16.mxu0 %v8344_v11 }
 0x5be   : > { %v11246_v31 = vpop.f32.mrb[114].mxu0  ;;  %8347 = vmatpush3.bf16.msra.mxu0 %v8344_v11 }
 0x5bf   : > { %13584 = vst [vmem:[#allocation53_spill] sm:$0xff] %v11246_v31  ;;  %v11248_v53 = vpop.f32.mrb[115].mxu0 }
 0x5c0   : > { %13585 = vst [vmem:[#allocation57_spill] sm:$0xff] %v11248_v53  ;;  %v8348_v54 = vpack.c.bf16 %v11246_v31, %v11248_v53  ;;  %v13711_v53 = vld [vmem:[#allocation189_spill] sm:$0xff] }
 0x5c2   : > { %v11252_v50 = vpop.f32.mrb[116].mxu0  ;;  %8349 = vmatprep.subr.bf16.mxu0 %v8348_v54 }
 0x5c3   : > { %13586 = vst [vmem:[#allocation56_spill] sm:$0xff] %v11252_v50  ;;  %v11254_v19 = vpop.f32.mrb[117].mxu0  ;;  %8351 = vmatpush3.bf16.msra.mxu0 %v8348_v54 }
 0x5c4   : > { %13587 = vst [vmem:[#allocation60_spill] sm:$0xff] %v11254_v19  ;;  %v8352_v58 = vpack.c.bf16 %v11252_v50, %v11254_v19 }
 0x5c6   : > { %v11258_v30 = vpop.f32.mrb[118].mxu0  ;;  %8353 = vmatprep.subr.bf16.mxu0 %v8352_v58 }
 0x5c7   : > { %13588 = vst [vmem:[#allocation59_spill] sm:$0xff] %v11258_v30  ;;  %v11260_v24 = vpop.f32.mrb[119].mxu0  ;;  %8355 = vmatpush3.bf16.msra.mxu0 %v8352_v58 }
 0x5c8   : > { %13589 = vst [vmem:[#allocation63_spill] sm:$0xff] %v11260_v24  ;;  %v8356_v61 = vpack.c.bf16 %v11258_v30, %v11260_v24 }
 0x5ca   : > { %v11264_v43 = vpop.f32.mrb[120].mxu0  ;;  %8357 = vmatprep.subr.bf16.mxu0 %v8356_v61 }
 0x5cb   : > { %13590 = vst [vmem:[#allocation61_spill] sm:$0xff] %v11264_v43  ;;  %v11266_v62 = vpop.f32.mrb[121].mxu0  ;;  %8359 = vmatpush3.bf16.msra.mxu0 %v8356_v61 }
 0x5cc   : > { %13591 = vst [vmem:[#allocation65_spill] sm:$0xff] %v11266_v62  ;;  %v8360_v0 = vpack.c.bf16 %v11264_v43, %v11266_v62 }
 0x5ce   : > { %v11270_v32 = vpop.f32.mrb[122].mxu0  ;;  %8361 = vmatprep.subr.bf16.mxu0 %v8360_v0 }
 0x5cf   : > { %13592 = vst [vmem:[#allocation64_spill] sm:$0xff] %v11270_v32  ;;  %v11272_v11 = vpop.f32.mrb[123].mxu0  ;;  %8363 = vmatpush3.bf16.msra.mxu0 %v8360_v0 }
 0x5d0   : > { %13593 = vst [vmem:[#allocation67_spill] sm:$0xff] %v11272_v11  ;;  %v8364_v54 = vpack.c.bf16 %v11270_v32, %v11272_v11  ;;  %v13611_v11 = vld [vmem:[#allocation33_spill] sm:$0xff] }
 0x5d2   : > { %v11276_v58 = vpop.f32.mrb[124].mxu0  ;;  %8365 = vmatprep.subr.bf16.mxu0 %v8364_v54 }
 0x5d3   : > { %13594 = vst [vmem:[#allocation66_spill] sm:$0xff] %v11276_v58  ;;  %v11278_v56 = vpop.f32.mrb[125].mxu0  ;;  %8367 = vmatpush3.bf16.msra.mxu0 %v8364_v54  ;;  %v13613_v54 = vld [vmem:[#allocation35_spill] sm:$0xff] }
 0x5d4   : > { %13595 = vst [vmem:[#allocation70_spill] sm:$0xff] %v11278_v56  ;;  %v8368_v61 = vpack.c.bf16 %v11276_v58, %v11278_v56  ;;  %v13605_v56 = vld [vmem:[#allocation14_spill] sm:$0xff] }
 0x5d6   : > { %v11282_v57 = vpop.f32.mrb[126].mxu0  ;;  %8369 = vmatprep.subr.bf16.mxu0 %v8368_v61 }
 0x5d7   : > { %13596 = vst [vmem:[#allocation68_spill] sm:$0xff] %v11282_v57  ;;  %v11284_v42 = vpop.f32.mrb[127].mxu0  ;;  %8371 = vmatpush3.bf16.msra.mxu0 %v8368_v61  ;;  %v13607_v61 = vld [vmem:[#allocation31_spill] sm:$0xff] }
 0x5d8   : > { %13597 = vst [vmem:[#allocation7_spill] sm:$0xff] %v11284_v42  ;;  %v8372_v0 = vpack.c.bf16 %v11282_v57, %v11284_v42 }
 0x5da   : > { %8373 = vmatprep.subr.bf16.mxu0 %v8372_v0 }
 0x5db   : > { %8375 = vmatpush3.bf16.msra.mxu0 %v8372_v0  ;;  %v13609_v0 = vld [vmem:[#allocation16_spill] sm:$0xff] }
 0x5de   : > { %7961 = vmatmul.mubr.msk.f32.vlgmr.msra.gmra.mrb[128].mxu0 %vm1620_vm1, %v13579_v55 }
 0x5df   : > { %7963 = vmatprep.mubr.msk.f32.mxu0 %vm1621_vm6, %v13579_v55 }
 0x5e2   : > { %7964 = vmatmul.mubr.msk.f32.gmra.mrb[130].mxu0 %vm13129_vm8, %v13579_v55  ;;  %vm13606_vm8 = vcmp.eq.s32.totalorder %v13580_v3, %v13605_v56  ;;  %v13615_v56 = vld [vmem:[#allocation18_spill] sm:$0xff] }
 0x5e3   : > { %7966 = vmatprep.mubr.msk.f32.mxu0 %vm13130_vm10, %v13579_v55  ;;  %vm13608_vm10 = vcmp.eq.s32.totalorder %v13580_v3, %v13607_v61  ;;  %v13617_v61 = vld [vmem:[#allocation19_spill] sm:$0xff] }
 0x5e6   : > { %7967 = vmatmul.mubr.msk.f32.gmra.mrb[132].mxu0 %vm13131_vm12, %v13579_v55  ;;  %vm13610_vm12 = vcmp.eq.s32.totalorder %v13580_v3, %v13609_v0  ;;  %v13619_v0 = vld [vmem:[#allocation20_spill] sm:$0xff] }
 0x5e7   : > { %7969 = vmatprep.mubr.msk.f32.mxu0 %vm13132_vm14, %v13579_v55  ;;  %vm13612_vm14 = vcmp.eq.s32.totalorder %v13580_v3, %v13611_v11  ;;  %v13621_v11 = vld [vmem:[#allocation21_spill] sm:$0xff] }
 0x5ea   : > { %7970 = vmatmul.mubr.msk.f32.gmra.mrb[134].mxu0 %vm13133_vm0, %v13579_v55  ;;  %vm13614_vm0 = vcmp.eq.s32.totalorder %v13580_v3, %v13613_v54  ;;  %v13623_v54 = vld [vmem:[#allocation37_spill] sm:$0xff] }
 0x5eb   : > { %7972 = vmatprep.mubr.msk.f32.mxu0 %vm13606_vm8, %v13579_v55  ;;  %vm13616_vm8 = vcmp.eq.s32.totalorder %v13580_v3, %v13615_v56  ;;  %v13625_v56 = vld [vmem:[#allocation22_spill] sm:$0xff] }
 0x5ee   : > { %7973 = vmatmul.mubr.msk.f32.gmra.mrb[136].mxu0 %vm13608_vm10, %v13579_v55  ;;  %vm13618_vm10 = vcmp.eq.s32.totalorder %v13580_v3, %v13617_v61  ;;  %v13627_v61 = vld [vmem:[#allocation39_spill] sm:$0xff] }
 0x5ef   : > { %7975 = vmatprep.mubr.msk.f32.mxu0 %vm13610_vm12, %v13579_v55  ;;  %vm13620_vm12 = vcmp.eq.s32.totalorder %v13580_v3, %v13619_v0  ;;  %v13629_v0 = vld [vmem:[#allocation40_spill] sm:$0xff] }
 0x5f2   : > { %7976 = vmatmul.mubr.msk.f32.gmra.mrb[138].mxu0 %vm13612_vm14, %v13579_v55  ;;  %vm13622_vm14 = vcmp.eq.s32.totalorder %v13580_v3, %v13621_v11  ;;  %v13631_v11 = vld [vmem:[#allocation23_spill] sm:$0xff] }
 0x5f3   : > { %7978 = vmatprep.mubr.msk.f32.mxu0 %vm13614_vm0, %v13579_v55  ;;  %vm13624_vm0 = vcmp.eq.s32.totalorder %v13580_v3, %v13623_v54  ;;  %v13633_v54 = vld [vmem:[#allocation24_spill] sm:$0xff] }
 0x5f6   : > { %7979 = vmatmul.mubr.msk.f32.gmra.mrb[140].mxu0 %vm13616_vm8, %v13579_v55  ;;  %vm13626_vm8 = vcmp.eq.s32.totalorder %v13580_v3, %v13625_v56  ;;  %v13635_v56 = vld [vmem:[#allocation25_spill] sm:$0xff] }
 0x5f7   : > { %7981 = vmatprep.mubr.msk.f32.mxu0 %vm13618_vm10, %v13579_v55  ;;  %vm13628_vm10 = vcmp.eq.s32.totalorder %v13580_v3, %v13627_v61  ;;  %v13637_v61 = vld [vmem:[#allocation26_spill] sm:$0xff] }
 0x5fa   : > { %7982 = vmatmul.mubr.msk.f32.gmra.mrb[142].mxu0 %vm13620_vm12, %v13579_v55  ;;  %vm13630_vm12 = vcmp.eq.s32.totalorder %v13580_v3, %v13629_v0  ;;  %v13646_v0 = vld [vmem:[#allocation34_spill] sm:$0xff] }
 0x5fb   : > { %7984 = vmatprep.mubr.msk.f32.mxu0 %vm13622_vm14, %v13579_v55  ;;  %vm13632_vm14 = vcmp.eq.s32.totalorder %v13580_v3, %v13631_v11  ;;  %v13648_v11 = vld [vmem:[#allocation36_spill] sm:$0xff] }
 0x5fe   : > { %7985 = vmatmul.mubr.msk.f32.gmra.mrb[144].mxu0 %vm13624_vm0, %v13579_v55  ;;  %vm13634_vm0 = vcmp.eq.s32.totalorder %v13580_v3, %v13633_v54  ;;  %v13650_v54 = vld [vmem:[#allocation38_spill] sm:$0xff] }
 0x5ff   : > { %7987 = vmatprep.mubr.msk.f32.mxu0 %vm13626_vm8, %v13579_v55  ;;  %vm13636_vm8 = vcmp.eq.s32.totalorder %v13580_v3, %v13635_v56  ;;  %v13642_v56 = vld [vmem:[#allocation8_spill] sm:$0xff] }
 0x602   : > { %7988 = vmatmul.mubr.msk.f32.gmra.mrb[146].mxu0 %vm13628_vm10, %v13579_v55  ;;  %vm13638_vm10 = vcmp.eq.s32.totalorder %v13580_v3, %v13637_v61  ;;  %v13644_v61 = vld [vmem:[#allocation32_spill] sm:$0xff] }
 0x603   : > { %7990 = vmatprep.mubr.msk.f32.mxu0 %vm13630_vm12, %v13579_v55  ;;  %vm13643_vm12 = vcmp.eq.s32.totalorder %v13580_v3, %v13642_v56  ;;  %v13652_v56 = vld [vmem:[#allocation10_spill] sm:$0xff] }
 0x606   : > { %7991 = vmatmul.mubr.msk.f32.gmra.mrb[148].mxu0 %vm13632_vm14, %v13579_v55  ;;  %vm13645_vm14 = vcmp.eq.s32.totalorder %v13580_v3, %v13644_v61  ;;  %v13654_v61 = vld [vmem:[#allocation41_spill] sm:$0xff] }
 0x607   : > { %7993 = vmatprep.mubr.msk.f32.mxu0 %vm13634_vm0, %v13579_v55  ;;  %vm13647_vm0 = vcmp.eq.s32.totalorder %v13580_v3, %v13646_v0  ;;  %v13656_v0 = vld [vmem:[#allocation45_spill] sm:$0xff] }
 0x60a   : > { %7994 = vmatmul.mubr.msk.f32.gmra.mrb[150].mxu0 %vm13636_vm8, %v13579_v55  ;;  %vm13649_vm8 = vcmp.eq.s32.totalorder %v13580_v3, %v13648_v11  ;;  %v13658_v11 = vld [vmem:[#allocation15_spill] sm:$0xff] }
 0x60b   : > { %7996 = vmatprep.mubr.msk.f32.mxu0 %vm13638_vm10, %v13579_v55  ;;  %vm13651_vm10 = vcmp.eq.s32.totalorder %v13580_v3, %v13650_v54  ;;  %v13660_v54 = vld [vmem:[#allocation42_spill] sm:$0xff] }
 0x60e   : > { %7997 = vmatmul.mubr.msk.f32.gmra.mrb[152].mxu0 %vm1644_vm15, %v13579_v55 }
 0x60f   : > { %7999 = vmatprep.mubr.msk.f32.mxu0 %vm1645_vm11, %v13579_v55 }
 0x612   : > { %8000 = vmatmul.mubr.msk.f32.gmra.mrb[154].mxu0 %vm1646_vm3, %v13579_v55 }
 0x613   : > { %8002 = vmatprep.mubr.msk.f32.mxu0 %vm13643_vm12, %v13579_v55  ;;  %vm13653_vm12 = vcmp.eq.s32.totalorder %v13580_v3, %v13652_v56  ;;  %v13662_v56 = vld [vmem:[#allocation43_spill] sm:$0xff] }
 0x616   : > { %8003 = vmatmul.mubr.msk.f32.gmra.mrb[156].mxu0 %vm13645_vm14, %v13579_v55  ;;  %vm13655_vm14 = vcmp.eq.s32.totalorder %v13580_v3, %v13654_v61  ;;  %v13664_v61 = vld [vmem:[#allocation44_spill] sm:$0xff] }
 0x617   : > { %8005 = vmatprep.mubr.msk.f32.mxu0 %vm13647_vm0, %v13579_v55  ;;  %vm13657_vm0 = vcmp.eq.s32.totalorder %v13580_v3, %v13656_v0  ;;  %v13666_v0 = vld [vmem:[#allocation46_spill] sm:$0xff] }
 0x61a   : > { %8006 = vmatmul.mubr.msk.f32.gmra.mrb[158].mxu0 %vm13649_vm8, %v13579_v55  ;;  %vm13659_vm8 = vcmp.eq.s32.totalorder %v13580_v3, %v13658_v11  ;;  %v13668_v11 = vld [vmem:[#allocation17_spill] sm:$0xff] }
 0x61b   : > { %8008 = vmatprep.mubr.msk.f32.mxu0 %vm13651_vm10, %v13579_v55  ;;  %vm13661_vm10 = vcmp.eq.s32.totalorder %v13580_v3, %v13660_v54  ;;  %v13670_v54 = vld [vmem:[#allocation47_spill] sm:$0xff] }
 0x61e   : > { %8009 = vmatmul.mubr.msk.f32.gmra.mrb[160].mxu0 %vm13653_vm12, %v13579_v55  ;;  %vm13663_vm12 = vcmp.eq.s32.totalorder %v13580_v3, %v13662_v56  ;;  %v13672_v56 = vld [vmem:[#allocation48_spill] sm:$0xff] }
 0x61f   : > { %8011 = vmatprep.mubr.msk.f32.mxu0 %vm13655_vm14, %v13579_v55  ;;  %vm13665_vm14 = vcmp.eq.s32.totalorder %v13580_v3, %v13664_v61  ;;  %v13674_v61 = vld [vmem:[#allocation49_spill] sm:$0xff] }
 0x622   : > { %8012 = vmatmul.mubr.msk.f32.gmra.mrb[162].mxu0 %vm13657_vm0, %v13579_v55  ;;  %vm13667_vm0 = vcmp.eq.s32.totalorder %v13580_v3, %v13666_v0  ;;  %v13676_v0 = vld [vmem:[#allocation50_spill] sm:$0xff] }
 0x623   : > { %8014 = vmatprep.mubr.msk.f32.mxu0 %vm13659_vm8, %v13579_v55  ;;  %vm13669_vm8 = vcmp.eq.s32.totalorder %v13580_v3, %v13668_v11  ;;  %v13678_v11 = vld [vmem:[#allocation54_spill] sm:$0xff] }
 0x626   : > { %8015 = vmatmul.mubr.msk.f32.gmra.mrb[164].mxu0 %vm13661_vm10, %v13579_v55  ;;  %vm13671_vm10 = vcmp.eq.s32.totalorder %v13580_v3, %v13670_v54  ;;  %v13680_v54 = vld [vmem:[#allocation58_spill] sm:$0xff] }
 0x627   : > { %8017 = vmatprep.mubr.msk.f32.mxu0 %vm13663_vm12, %v13579_v55  ;;  %vm13673_vm12 = vcmp.eq.s32.totalorder %v13580_v3, %v13672_v56  ;;  %v13682_v56 = vld [vmem:[#allocation62_spill] sm:$0xff] }
 0x62a   : > { %8018 = vmatmul.mubr.msk.f32.gmra.mrb[166].mxu0 %vm13665_vm14, %v13579_v55  ;;  %vm13675_vm14 = vcmp.eq.s32.totalorder %v13580_v3, %v13674_v61  ;;  %v13684_v61 = vld [vmem:[#allocation72_spill] sm:$0xff] }
 0x62b   : > { %8020 = vmatprep.mubr.msk.f32.mxu0 %vm13667_vm0, %v13579_v55  ;;  %vm13677_vm0 = vcmp.eq.s32.totalorder %v13580_v3, %v13676_v0  ;;  %v13686_v0 = vld [vmem:[#allocation69_spill] sm:$0xff] }
 0x62e   : > { %8021 = vmatmul.mubr.msk.f32.gmra.mrb[168].mxu0 %vm13669_vm8, %v13579_v55  ;;  %vm13679_vm8 = vcmp.eq.s32.totalorder %v13580_v3, %v13678_v11  ;;  %v13688_v11 = vld [vmem:[#allocation75_spill] sm:$0xff] }
 0x62f   : > { %8023 = vmatprep.mubr.msk.f32.mxu0 %vm13671_vm10, %v13579_v55  ;;  %vm13681_vm10 = vcmp.eq.s32.totalorder %v13580_v3, %v13680_v54  ;;  %v13690_v54 = vld [vmem:[#allocation78_spill] sm:$0xff] }
 0x632   : > { %8024 = vmatmul.mubr.msk.f32.gmra.mrb[170].mxu0 %vm13673_vm12, %v13579_v55  ;;  %vm13683_vm12 = vcmp.eq.s32.totalorder %v13580_v3, %v13682_v56  ;;  %v13692_v56 = vld [vmem:[#allocation71_spill] sm:$0xff] }
 0x633   : > { %8026 = vmatprep.mubr.msk.f32.mxu0 %vm13675_vm14, %v13579_v55  ;;  %vm13685_vm14 = vcmp.eq.s32.totalorder %v13580_v3, %v13684_v61  ;;  %v13694_v61 = vld [vmem:[#allocation73_spill] sm:$0xff] }
 0x636   : > { %8027 = vmatmul.mubr.msk.f32.gmra.mrb[172].mxu0 %vm13677_vm0, %v13579_v55  ;;  %vm13687_vm0 = vcmp.eq.s32.totalorder %v13580_v3, %v13686_v0  ;;  %v13696_v0 = vld [vmem:[#allocation76_spill] sm:$0xff] }
 0x637   : > { %8029 = vmatprep.mubr.msk.f32.mxu0 %vm13679_vm8, %v13579_v55  ;;  %vm13689_vm8 = vcmp.eq.s32.totalorder %v13580_v3, %v13688_v11  ;;  %v13698_v11 = vld [vmem:[#allocation80_spill] sm:$0xff] }
 0x63a   : > { %8030 = vmatmul.mubr.msk.f32.gmra.mrb[174].mxu0 %vm13681_vm10, %v13579_v55  ;;  %vm13691_vm10 = vcmp.eq.s32.totalorder %v13580_v3, %v13690_v54  ;;  %v13700_v54 = vld [vmem:[#allocation82_spill] sm:$0xff] }
 0x63b   : > { %8032 = vmatprep.mubr.msk.f32.mxu0 %vm13683_vm12, %v13579_v55  ;;  %vm13693_vm12 = vcmp.eq.s32.totalorder %v13580_v3, %v13692_v56  ;;  %v13702_v56 = vld [vmem:[#allocation86_spill] sm:$0xff] }
 0x63e   : > { %8033 = vmatmul.mubr.msk.f32.gmra.mrb[176].mxu0 %vm13685_vm14, %v13579_v55  ;;  %vm13695_vm14 = vcmp.eq.s32.totalorder %v13580_v3, %v13694_v61 }
 0x63f   : > { %8035 = vmatprep.mubr.msk.f32.mxu0 %vm13687_vm0, %v13579_v55  ;;  %vm13697_vm0 = vcmp.eq.s32.totalorder %v13580_v3, %v13696_v0  ;;  %v13705_v0 = vld [vmem:[#allocation88_spill] sm:$0xff] }
 0x642   : > { %8036 = vmatmul.mubr.msk.f32.gmra.mrb[178].mxu0 %vm13689_vm8, %v13579_v55  ;;  %vm13699_vm8 = vcmp.eq.s32.totalorder %v13580_v3, %v13698_v11 }
 0x643   : > { %8038 = vmatprep.mubr.msk.f32.mxu0 %vm13691_vm10, %v13579_v55  ;;  %vm13701_vm10 = vcmp.eq.s32.totalorder %v13580_v3, %v13700_v54 }
 0x646   : > { %8039 = vmatmul.mubr.msk.f32.gmra.mrb[180].mxu0 %vm13693_vm12, %v13579_v55  ;;  %vm13703_vm12 = vcmp.eq.s32.totalorder %v13580_v3, %v13702_v56 }
 0x647   : > { %8041 = vmatprep.mubr.msk.f32.mxu0 %vm13695_vm14, %v13579_v55  ;;  %vm13706_vm14 = vcmp.eq.s32.totalorder %v13580_v3, %v13705_v0  ;;  %v13710_v3 = vld [vmem:[#allocation186_spill] sm:$0xff] }
 0x64a   : > { %8042 = vmatmul.mubr.msk.f32.gmra.mrb[182].mxu0 %vm13697_vm0, %v13579_v55 }
 0x64b   : > { %8044 = vmatprep.mubr.msk.f32.mxu0 %vm13699_vm8, %v13579_v55 }
 0x64e   : > { %8045 = vmatmul.mubr.msk.f32.gmra.mrb[184].mxu0 %vm13701_vm10, %v13579_v55 }
 0x64f   : > { %8047 = vmatprep.mubr.msk.f32.mxu0 %vm13703_vm12, %v13579_v55 }
 0x652   : > { %8048 = vmatmul.mubr.msk.f32.gmra.mrb[186].mxu0 %vm1678_vm9, %v13579_v55 }
 0x653   : > { %8050 = vmatprep.mubr.msk.f32.mxu0 %vm13706_vm14, %v13579_v55 }
 0x656   : > { %8051 = vmatmul.mubr.msk.f32.gmra.mrb[188].mxu0 %vm1680_vm2, %v13579_v55 }
 0x657   : > { %8053 = vmatprep.mubr.msk.f32.mxu0 %vm1681_vm13, %v13579_v55 }
 0x65a   : > { %8054 = vmatmul.mubr.msk.f32.gmra.mrb[190].mxu0 %vm1682_vm7, %v13579_v55 }
 0x65b   : > { %8152 = vmatprep.mubr.msk.f32.mxu0 %vm1619_vm5, %v13579_v55 }
 0x6b1   : > { %v7962_v0 = vpop.f32.mrb[128].mxu0 }
 0x6b2   : > { %v4415_v61 = vpop.f32.mrb[129].mxu0  ;;  %v4421_v55 = vadd.f32 %v7962_v0, %v13710_v3 }
 0x6b3   : > { %v4416_v31 = vadd.f32 %v4415_v61, %v13711_v53 }
 0x6b4   : > { %v4735_v45 = vmax.f32 %v4421_v55, 0.0 }
 0x6b5   : > { %v7965_v42 = vpop.f32.mrb[130].mxu0  ;;  %v4734_v1 = vmax.f32 %v4416_v31, 0.0 }
 0x6b6   : > { %v4425_v11 = vpop.f32.mrb[131].mxu0  ;;  %v4431_v17 = vadd.f32 %v7965_v42, %v13712_v25  ;;  %v4799_v53 = vmul.f32 %v4735_v45, %v10299_v35  ;;  %v13716_v25 = vld [vmem:[#allocation206_spill] sm:$0xff] }
 0x6b7   : > { %v4426_v60 = vadd.f32 %v4425_v11, %v13714_v16  ;;  %v4798_v31 = vmul.f32 %v4734_v1, %v10297_v13 }
 0x6b8   : > { %v4737_v55 = vmax.f32 %v4431_v17, 0.0 }
 0x6b9   : > { %v7968_v57 = vpop.f32.mrb[132].mxu0  ;;  %v4736_v16 = vmax.f32 %v4426_v60, 0.0 }
 0x6ba   : > { %v4435_v58 = vpop.f32.mrb[133].mxu0  ;;  %v4441_v51 = vadd.f32 %v7968_v57, %v10620_v2 }
 0x6bb   : > { %v4436_v3 = vadd.f32 %v4435_v58, %v10616_v44  ;;  %v4800_v61 = vmul.f32 %v4736_v16, %v10347_v7 }
 0x6bc   : > { %v4739_v2 = vmax.f32 %v4441_v51, 0.0 }
 0x6bd   : > { %v7971_v32 = vpop.f32.mrb[134].mxu0 }
 0x6be   : > { %v4445_v62 = vpop.f32.mrb[135].mxu0 }
 0x6c1   : > { %v7974_v54 = vpop.f32.mrb[136].mxu0 }
 0x6c2   : > { %v4455_v43 = vpop.f32.mrb[137].mxu0  ;;  %v4461_v16 = vadd.f32 %v7974_v54, %v10641_v15 }
 0x6c5   : > { %v11544_v24 = vpop.f32.mrb[138].mxu0 }
 0x6c6   : > { %v11546_v30 = vpop.f32.mrb[139].mxu0 }
 0x6c9   : > { %v11548_v56 = vpop.f32.mrb[140].mxu0 }
 0x6ca   : > { %v11550_v19 = vpop.f32.mrb[141].mxu0 }
 0x6cd   : > { %v11552_v63 = vpop.f32.mrb[142].mxu0 }
 0x6ce   : > { %v11555_v50 = vpop.f32.mrb[143].mxu0 }
 0x6d1   : > { %v7986_v4 = vpop.f32.mrb[144].mxu0 }
 0x6d2   : > { %v4501_v6 = vadd.f32 %v7986_v4, %v13713_v40  ;;  %v4495_v41 = vpop.f32.mrb[145].mxu0 }
 0x6d3   : > { %v4496_v26 = vadd.f32 %v4495_v41, %v13715_v36  ;;  %v13717_v36 = vld [vmem:[#allocation209_spill] sm:$0xff] }
 0x6d4   : > { %v4751_v14 = vmax.f32 %v4501_v6, 0.0 }
 0x6d5   : > { %v4750_v0 = vmax.f32 %v4496_v26, 0.0  ;;  %v7989_v39 = vpop.f32.mrb[146].mxu0  ;;  %v4738_v26 = vmax.f32 %v4436_v3, 0.0  ;;  %v13720_v3 = vld [vmem:[#allocation211_spill] sm:$0xff] }
 0x6d6   : > { %v4815_v42 = vmul.f32 %v4751_v14, %v10317_v27  ;;  %v4511_v40 = vadd.f32 %v7989_v39, %v13716_v25  ;;  %v4505_v4 = vpop.f32.mrb[147].mxu0  ;;  %v4801_v14 = vmul.f32 %v4737_v55, %v10393_v38  ;;  %v4451_v39 = vadd.f32 %v7971_v32, %v10629_v59  ;;  %v13755_v27 = vld [vmem:[#allocation226_spill] sm:$0xff] }
 0x6d7   : > { %v4814_v41 = vmul.f32 %v4750_v0, %v10275_v18  ;;  %v4506_v6 = vadd.f32 %v4505_v4, %v13717_v36  ;;  %v13718_v0 = vld [vmem:[#allocation195_spill] sm:$0xff]  ;;  %v4803_v55 = vmul.f32 %v4739_v2, %v10441_v46  ;;  %v4802_v59 = vmul.f32 %v4738_v26, %v10429_v48  ;;  %v13725_v2 = vld [vmem:[#allocation213_spill] sm:$0xff] }
 0x6d8   : > { %v11570_v57 = vadd.f32 %v4815_v42, %v4799_v53  ;;  %v4753_v44 = vmax.f32 %v4511_v40, 0.0  ;;  %v4446_v53 = vadd.f32 %v4445_v62, %v13718_v0  ;;  %v13719_v42 = vld [vmem:[#allocation114_spill] sm:$0xff]  ;;  %v13721_v36 = vld [vmem:[#allocation131_spill] sm:$0xff] }
 0x6d9   : > { %v11572_v11 = vadd.f32 %v4814_v41, %v4798_v31  ;;  %v4752_v17 = vmax.f32 %v4506_v6, 0.0  ;;  %v7992_v45 = vpop.f32.mrb[148].mxu0  ;;  %v4741_v41 = vmax.f32 %v4451_v39, 0.0  ;;  %v13722_v6 = vld [vmem:[#allocation214_spill] sm:$0xff]  ;;  %v13751_v18 = vld [vmem:[#allocation187_spill] sm:$0xff] }
 0x6da   : > { %v4817_v1 = vmul.f32 %v4753_v44, %v10399_v9  ;;  %v4521_v60 = vadd.f32 %v7992_v45, %v10707_v47  ;;  %v4515_v58 = vpop.f32.mrb[149].mxu0  ;;  %v4740_v45 = vmax.f32 %v4446_v53, 0.0  ;;  %v13728_v53 = vld [vmem:[#allocation144_spill] sm:$0xff] }
 0x6db   : > { %v4816_v51 = vmul.f32 %v4752_v17, %v13719_v42  ;;  %v4516_v25 = vadd.f32 %v4515_v58, %v13720_v3  ;;  %v13727_v3 = vld [vmem:[#allocation198_spill] sm:$0xff] }
 0x6dc   : > { %v11582_v40 = vadd.f32 %v4817_v1, %v4801_v14  ;;  %v4755_v4 = vmax.f32 %v4521_v60, 0.0  ;;  %v13723_v14 = vld [vmem:[#allocation196_spill] sm:$0xff]  ;;  %v13724_v60 = vld [vmem:[#allocation127_spill] sm:$0xff]  ;;  %v4466_v15 = vadd.f32 %v11546_v30, %v13727_v3  ;;  %v13737_v42 = vld [vmem:[#allocation222_spill] sm:$0xff] }
 0x6dd   : > { %v11586_v32 = vadd.f32 %v4816_v51, %v4800_v61  ;;  %v4754_v31 = vmax.f32 %v4516_v25, 0.0  ;;  %v7995_v47 = vpop.f32.mrb[150].mxu0  ;;  %v4456_v1 = vadd.f32 %v4455_v43, %v13723_v14  ;;  %v13726_v51 = vld [vmem:[#allocation199_spill] sm:$0xff]  ;;  %v4743_v43 = vmax.f32 %v4461_v16, 0.0 }
 0x6de   : > { %v4819_v62 = vmul.f32 %v4755_v4, %v13721_v36  ;;  %v4531_v44 = vadd.f32 %v7995_v47, %v13722_v6  ;;  %v4525_v17 = vpop.f32.mrb[151].mxu0  ;;  %v4471_v39 = vadd.f32 %v11544_v24, %v13726_v51  ;;  %v4805_v47 = vmul.f32 %v4741_v41, %v13728_v53  ;;  %v13729_v6 = vld [vmem:[#allocation145_spill] sm:$0xff]  ;;  %v13730_v14 = vld [vmem:[#allocation219_spill] sm:$0xff]  ;;  %v13733_v51 = vld [vmem:[#allocation218_spill] sm:$0xff] }
 0x6df   : > { %v4818_v58 = vmul.f32 %v4754_v31, %v13724_v60  ;;  %v4526_v0 = vadd.f32 %v4525_v17, %v13725_v2  ;;  %v4742_v2 = vmax.f32 %v4456_v1, 0.0  ;;  %v13732_v60 = vld [vmem:[#allocation140_spill] sm:$0xff] }
 0x6e0   : > { %v11594_v26 = vadd.f32 %v4819_v62, %v4803_v55  ;;  %v4757_v61 = vmax.f32 %v4531_v44, 0.0  ;;  %v13731_v62 = vld [vmem:[#allocation138_spill] sm:$0xff] }
 0x6e1   : > { %v11600_v54 = vadd.f32 %v4818_v58, %v4802_v59  ;;  %v4756_v25 = vmax.f32 %v4526_v0, 0.0  ;;  %v7998_v4 = vpop.f32.mrb[152].mxu0  ;;  %v4804_v44 = vmul.f32 %v4740_v45, %v13731_v62  ;;  %v4745_v58 = vmax.f32 %v4471_v39, 0.0  ;;  %v13736_v45 = vld [vmem:[#allocation159_spill] sm:$0xff] }
 0x6e2   : > { %v4821_v31 = vmul.f32 %v4757_v61, %v13729_v6  ;;  %v4541_v17 = vadd.f32 %v7998_v4, %v13730_v14  ;;  %v4535_v55 = vpop.f32.mrb[153].mxu0  ;;  %v4744_v0 = vmax.f32 %v4466_v15, 0.0  ;;  %v13734_v61 = vld [vmem:[#allocation158_spill] sm:$0xff]  ;;  %v13735_v4 = vld [vmem:[#allocation203_spill] sm:$0xff] }
 0x6e3   : > { %v4820_v24 = vmul.f32 %v4756_v25, %v13732_v60  ;;  %v4536_v36 = vadd.f32 %v4535_v55, %v13733_v51  ;;  %v4807_v6 = vmul.f32 %v4743_v43, %v13734_v61  ;;  %v4481_v14 = vadd.f32 %v11548_v56, %v13735_v4  ;;  %v13738_v55 = vld [vmem:[#allocation152_spill] sm:$0xff]  ;;  %v13740_v15 = vld [vmem:[#allocation154_spill] sm:$0xff]  ;;  %v13756_v62 = vld [vmem:[#allocation227_spill] sm:$0xff] }
 0x6e4   : > { %v11608_v30 = vadd.f32 %v4821_v31, %v4805_v47  ;;  %v4759_v59 = vmax.f32 %v4541_v17, 0.0  ;;  %v4806_v47 = vmul.f32 %v4742_v2, %v13738_v55  ;;  %v13739_v31 = vld [vmem:[#allocation202_spill] sm:$0xff]  ;;  %v13742_v51 = vld [vmem:[#allocation172_spill] sm:$0xff]  ;;  %v13744_v2 = vld [vmem:[#allocation205_spill] sm:$0xff] }
 0x6e5   : > { %v11610_v3 = vadd.f32 %v4820_v24, %v4804_v44  ;;  %v4758_v41 = vmax.f32 %v4536_v36, 0.0  ;;  %v8001_v16 = vpop.f32.mrb[154].mxu0  ;;  %v4476_v39 = vadd.f32 %v11550_v19, %v13739_v31  ;;  %v13741_v44 = vld [vmem:[#allocation221_spill] sm:$0xff]  ;;  %v4809_v61 = vmul.f32 %v4745_v58, %v13742_v51  ;;  %v13743_v56 = vld [vmem:[#allocation166_spill] sm:$0xff]  ;;  %v13748_v58 = vld [vmem:[#allocation168_spill] sm:$0xff] }
 0x6e6   : > { %v4823_v1 = vmul.f32 %v4759_v59, %v13736_v45  ;;  %v4551_v25 = vadd.f32 %v8001_v16, %v13737_v42  ;;  %v4545_v60 = vpop.f32.mrb[155].mxu0  ;;  %v4808_v4 = vmul.f32 %v4744_v0, %v13743_v56  ;;  %v4747_v45 = vmax.f32 %v4481_v14, 0.0  ;;  %v13745_v19 = vld [vmem:[#allocation173_spill] sm:$0xff]  ;;  %v13749_v0 = vld [vmem:[#allocation183_spill] sm:$0xff] }
 0x6e7   : > { %v4822_v17 = vmul.f32 %v4758_v41, %v13740_v15  ;;  %v4546_v36 = vadd.f32 %v4545_v60, %v13741_v44  ;;  %v4491_v55 = vadd.f32 %v11552_v63, %v13744_v2  ;;  %v13746_v41 = vld [vmem:[#allocation185_spill] sm:$0xff] }
 0x6e8   : > { %v11622_v24 = vadd.f32 %v4823_v1, %v4807_v6  ;;  %v4761_v43 = vmax.f32 %v4551_v25, 0.0  ;;  %v4746_v6 = vmax.f32 %v4476_v39, 0.0  ;;  %v13747_v1 = vld [vmem:[#allocation204_spill] sm:$0xff] }
 0x6e9   : > { %v11626_v59 = vadd.f32 %v4822_v17, %v4806_v47  ;;  %v4760_v42 = vmax.f32 %v4546_v36, 0.0  ;;  %v8004_v16 = vpop.f32.mrb[156].mxu0  ;;  %v4486_v25 = vadd.f32 %v11555_v50, %v13747_v1  ;;  %v4749_v2 = vmax.f32 %v4491_v55, 0.0  ;;  %v13750_v50 = vld [vmem:[#allocation181_spill] sm:$0xff] }
 0x6ea   : > { %v4825_v31 = vmul.f32 %v4761_v43, %v13745_v19  ;;  %v4561_v15 = vadd.f32 %v8004_v16, %v13746_v41  ;;  %v4555_v60 = vpop.f32.mrb[157].mxu0  ;;  %v4811_v43 = vmul.f32 %v4747_v45, %v13472_v33  ;;  %v4810_v1 = vmul.f32 %v4746_v6, %v13750_v50  ;;  %v13754_v6 = vld [vmem:[#allocation224_spill] sm:$0xff] }
 0x6eb   : > { %v4824_v44 = vmul.f32 %v4760_v42, %v13748_v58  ;;  %v4556_v47 = vadd.f32 %v4555_v60, %v13749_v0  ;;  %v4748_v42 = vmax.f32 %v4486_v25, 0.0  ;;  %v4813_v55 = vmul.f32 %v4749_v2, %v10853_v12  ;;  %v13759_v12 = vld [vmem:[#allocation229_spill] sm:$0xff] }
 0x6ec   : > { %v11636_v17 = vadd.f32 %v4825_v31, %v4809_v61  ;;  %v4763_v36 = vmax.f32 %v4561_v15, 0.0  ;;  %v13752_v61 = vld [vmem:[#allocation193_spill] sm:$0xff] }
 0x6ed   : > { %v11638_v14 = vadd.f32 %v4824_v44, %v4808_v4  ;;  %v4762_v9 = vmax.f32 %v4556_v47, 0.0  ;;  %v8007_v63 = vpop.f32.mrb[158].mxu0  ;;  %v4812_v25 = vmul.f32 %v4748_v42, %v13754_v6  ;;  %v13763_v6 = vld [vmem:[#allocation231_spill] sm:$0xff] }
 0x6ee   : > { %v4827_v16 = vmul.f32 %v4763_v36, %v13473_v20  ;;  %v4571_v39 = vadd.f32 %v8007_v63, %v10833_v28  ;;  %v4565_v41 = vpop.f32.mrb[159].mxu0  ;;  %v13753_v28 = vld [vmem:[#allocation207_spill] sm:$0xff] }
 0x6ef   : > { %v4826_v60 = vmul.f32 %v4762_v9, %v13751_v18  ;;  %v4566_v31 = vadd.f32 %v4565_v41, %v13752_v61  ;;  %v13757_v61 = vld [vmem:[#allocation228_spill] sm:$0xff] }
 0x6f0   : > { %v11646_v15 = vadd.f32 %v4827_v16, %v4811_v43  ;;  %v4765_v4 = vmax.f32 %v4571_v39, 0.0 }
 0x6f1   : > { %v11648_v44 = vadd.f32 %v4826_v60, %v4810_v1  ;;  %v4764_v0 = vmax.f32 %v4566_v31, 0.0  ;;  %v8010_v45 = vpop.f32.mrb[160].mxu0 }
 0x6f2   : > { %v4829_v47 = vmul.f32 %v4765_v4, %v10861_v29  ;;  %v4581_v36 = vadd.f32 %v8010_v45, %v13753_v28  ;;  %v4575_v63 = vpop.f32.mrb[161].mxu0  ;;  %v13758_v45 = vld [vmem:[#allocation110_spill] sm:$0xff] }
 0x6f3   : > { %v4828_v9 = vmul.f32 %v4764_v0, %v13755_v27  ;;  %v4576_v41 = vadd.f32 %v4575_v63, %v13756_v62  ;;  %v13760_v63 = vld [vmem:[#allocation124_spill] sm:$0xff] }
 0x6f4   : > { %v11656_v43 = vadd.f32 %v4829_v47, %v4813_v55  ;;  %v4767_v16 = vmax.f32 %v4581_v36, 0.0 }
 0x6f5   : > { %v11658_v39 = vadd.f32 %v4828_v9, %v4812_v25  ;;  %v4766_v1 = vmax.f32 %v4576_v41, 0.0  ;;  %v8013_v60 = vpop.f32.mrb[162].mxu0  ;;  %v13761_v9 = vld [vmem:[#allocation230_spill] sm:$0xff] }
 0x6f6   : > { %v4831_v2 = vmul.f32 %v4767_v16, %v13485_v34  ;;  %v4591_v31 = vadd.f32 %v8013_v60, %v13757_v61  ;;  %v4585_v4 = vpop.f32.mrb[163].mxu0  ;;  %v13762_v60 = vld [vmem:[#allocation122_spill] sm:$0xff] }
 0x6f7   : > { %v4830_v28 = vmul.f32 %v4766_v1, %v13758_v45  ;;  %v4586_v42 = vadd.f32 %v4585_v4, %v13759_v12  ;;  %v13764_v4 = vld [vmem:[#allocation137_spill] sm:$0xff] }
 0x6f8   : > { %v11665_v0 = vadd.f32 %v11570_v57, %v4831_v2  ;;  %v4769_v62 = vmax.f32 %v4591_v31, 0.0  ;;  %v13767_v45 = vld [vmem:[#allocation233_spill] sm:$0xff] }
 0x6f9   : > { %v11668_v55 = vadd.f32 %v11572_v11, %v4830_v28  ;;  %v4768_v47 = vmax.f32 %v4586_v42, 0.0  ;;  %v8016_v36 = vpop.f32.mrb[164].mxu0  ;;  %v13765_v42 = vld [vmem:[#allocation232_spill] sm:$0xff] }
 0x6fa   : > { %v4833_v25 = vmul.f32 %v4769_v62, %v13760_v63  ;;  %v4601_v41 = vadd.f32 %v8016_v36, %v13761_v9  ;;  %v4595_v16 = vpop.f32.mrb[165].mxu0  ;;  %v13766_v36 = vld [vmem:[#allocation135_spill] sm:$0xff] }
 0x6fb   : > { %v4832_v61 = vmul.f32 %v4768_v47, %v13762_v60  ;;  %v4596_v1 = vadd.f32 %v4595_v16, %v13763_v6  ;;  %v13768_v16 = vld [vmem:[#allocation151_spill] sm:$0xff] }
 0x6fc   : > { %v11675_v12 = vadd.f32 %v11582_v40, %v4833_v25  ;;  %v4771_v57 = vmax.f32 %v4601_v41, 0.0  ;;  %v13771_v60 = vld [vmem:[#allocation235_spill] sm:$0xff] }
 0x6fd   : > { %v11678_v2 = vadd.f32 %v11586_v32, %v4832_v61  ;;  %v4770_v11 = vmax.f32 %v4596_v1, 0.0  ;;  %v8019_v31 = vpop.f32.mrb[166].mxu0  ;;  %v13769_v1 = vld [vmem:[#allocation234_spill] sm:$0xff] }
 0x6fe   : > { %v4835_v28 = vmul.f32 %v4771_v57, %v13764_v4  ;;  %v4611_v62 = vadd.f32 %v8019_v31, %v13765_v42  ;;  %v4605_v63 = vpop.f32.mrb[167].mxu0  ;;  %v13770_v31 = vld [vmem:[#allocation149_spill] sm:$0xff] }
 0x6ff   : > { %v4834_v9 = vmul.f32 %v4770_v11, %v13766_v36  ;;  %v4606_v47 = vadd.f32 %v4605_v63, %v13767_v45  ;;  %v13775_v36 = vld [vmem:[#allocation237_spill] sm:$0xff] }
 0x700   : > { %v11685_v6 = vadd.f32 %v11594_v26, %v4835_v28  ;;  %v4773_v40 = vmax.f32 %v4611_v62, 0.0  ;;  %v13772_v62 = vld [vmem:[#allocation165_spill] sm:$0xff] }
 0x701   : > { %v11688_v25 = vadd.f32 %v11600_v54, %v4834_v9  ;;  %v4772_v32 = vmax.f32 %v4606_v47, 0.0  ;;  %v8022_v41 = vpop.f32.mrb[168].mxu0  ;;  %v13773_v47 = vld [vmem:[#allocation236_spill] sm:$0xff] }
 0x702   : > { %v4837_v61 = vmul.f32 %v4773_v40, %v13768_v16  ;;  %v4621_v57 = vadd.f32 %v8022_v41, %v13769_v1  ;;  %v4615_v4 = vpop.f32.mrb[169].mxu0  ;;  %v13774_v41 = vld [vmem:[#allocation163_spill] sm:$0xff] }
 0x703   : > { %v4836_v42 = vmul.f32 %v4772_v32, %v13770_v31  ;;  %v4616_v11 = vadd.f32 %v4615_v4, %v13771_v60  ;;  %v13779_v31 = vld [vmem:[#allocation239_spill] sm:$0xff] }
 0x704   : > { %v11695_v45 = vadd.f32 %v11608_v30, %v4837_v61  ;;  %v4775_v26 = vmax.f32 %v4621_v57, 0.0  ;;  %v13776_v57 = vld [vmem:[#allocation180_spill] sm:$0xff] }
 0x705   : > { %v11698_v63 = vadd.f32 %v11610_v3, %v4836_v42  ;;  %v4774_v54 = vmax.f32 %v4616_v11, 0.0  ;;  %v8025_v28 = vpop.f32.mrb[170].mxu0  ;;  %v13777_v11 = vld [vmem:[#allocation238_spill] sm:$0xff] }
 0x706   : > { %v4839_v9 = vmul.f32 %v4775_v26, %v13772_v62  ;;  %v4631_v40 = vadd.f32 %v8025_v28, %v13773_v47  ;;  %v4625_v16 = vpop.f32.mrb[171].mxu0  ;;  %v13778_v28 = vld [vmem:[#allocation177_spill] sm:$0xff] }
 0x707   : > { %v4838_v1 = vmul.f32 %v4774_v54, %v13774_v41  ;;  %v4626_v32 = vadd.f32 %v4625_v16, %v13775_v36 }
 0x708   : > { %v11705_v60 = vadd.f32 %v11622_v24, %v4839_v9  ;;  %v4777_v30 = vmax.f32 %v4631_v40, 0.0  ;;  %v13780_v40 = vld [vmem:[#allocation223_spill] sm:$0xff] }
 0x709   : > { %v11708_v4 = vadd.f32 %v11626_v59, %v4838_v1  ;;  %v4776_v3 = vmax.f32 %v4626_v32, 0.0  ;;  %v8028_v61 = vpop.f32.mrb[172].mxu0  ;;  %v13781_v32 = vld [vmem:[#allocation241_spill] sm:$0xff] }
 0x70a   : > { %v4841_v42 = vmul.f32 %v4777_v30, %v13776_v57  ;;  %v4641_v26 = vadd.f32 %v8028_v61, %v13777_v11  ;;  %v4635_v62 = vpop.f32.mrb[173].mxu0  ;;  %v13782_v61 = vld [vmem:[#allocation216_spill] sm:$0xff]  ;;  %v13783_v57 = vld [vmem:[#allocation242_spill] sm:$0xff] }
 0x70b   : > { %v4840_v47 = vmul.f32 %v4776_v3, %v13778_v28  ;;  %v4636_v54 = vadd.f32 %v4635_v62, %v13779_v31  ;;  %v13787_v28 = vld [vmem:[#allocation245_spill] sm:$0xff] }
 0x70c   : > { %v11715_v36 = vadd.f32 %v11636_v17, %v4841_v42  ;;  %v4779_v24 = vmax.f32 %v4641_v26, 0.0  ;;  %v13784_v26 = vld [vmem:[#allocation244_spill] sm:$0xff] }
 0x70d   : > { %v11718_v16 = vadd.f32 %v11638_v14, %v4840_v47  ;;  %v4778_v59 = vmax.f32 %v4636_v54, 0.0  ;;  %v8031_v9 = vpop.f32.mrb[174].mxu0  ;;  %v13785_v54 = vld [vmem:[#allocation243_spill] sm:$0xff] }
 0x70e   : > { %v4843_v1 = vmul.f32 %v4779_v24, %v13780_v40  ;;  %v4651_v30 = vadd.f32 %v8031_v9, %v13781_v32  ;;  %v4645_v41 = vpop.f32.mrb[175].mxu0  ;;  %v13786_v9 = vld [vmem:[#allocation246_spill] sm:$0xff] }
 0x70f   : > { %v4842_v11 = vmul.f32 %v4778_v59, %v13782_v61  ;;  %v4646_v3 = vadd.f32 %v4645_v41, %v13783_v57  ;;  %v13791_v61 = vld [vmem:[#allocation248_spill] sm:$0xff] }
 0x710   : > { %v11725_v31 = vadd.f32 %v11646_v15, %v4843_v1  ;;  %v4781_v17 = vmax.f32 %v4651_v30, 0.0  ;;  %v13788_v30 = vld [vmem:[#allocation120_spill] sm:$0xff] }
 0x711   : > { %v11728_v62 = vadd.f32 %v11648_v44, %v4842_v11  ;;  %v4780_v14 = vmax.f32 %v4646_v3, 0.0  ;;  %v8034_v42 = vpop.f32.mrb[176].mxu0  ;;  %v13789_v3 = vld [vmem:[#allocation247_spill] sm:$0xff] }
 0x712   : > { %v4845_v47 = vmul.f32 %v4781_v17, %v13784_v26  ;;  %v4661_v24 = vadd.f32 %v8034_v42, %v13785_v54  ;;  %v4655_v40 = vpop.f32.mrb[177].mxu0  ;;  %v13790_v42 = vld [vmem:[#allocation116_spill] sm:$0xff] }
 0x713   : > { %v4844_v32 = vmul.f32 %v4780_v14, %v13786_v9  ;;  %v4656_v59 = vadd.f32 %v4655_v40, %v13787_v28 }
 0x714   : > { %v11735_v41 = vadd.f32 %v11656_v43, %v4845_v47  ;;  %v4783_v15 = vmax.f32 %v4661_v24, 0.0 }
 0x715   : > { %v11738_v57 = vadd.f32 %v11658_v39, %v4844_v32  ;;  %v4782_v44 = vmax.f32 %v4656_v59, 0.0  ;;  %v8037_v1 = vpop.f32.mrb[178].mxu0 }
 0x716   : > { %v4847_v11 = vmul.f32 %v4783_v15, %v13788_v30  ;;  %v4671_v17 = vadd.f32 %v8037_v1, %v13789_v3  ;;  %v4665_v26 = vpop.f32.mrb[179].mxu0  ;;  %v13792_v15 = vld [vmem:[#allocation129_spill] sm:$0xff] }
 0x717   : > { %v4846_v54 = vmul.f32 %v4782_v44, %v13790_v42  ;;  %v4666_v14 = vadd.f32 %v4665_v26, %v13791_v61  ;;  %v13793_v1 = vld [vmem:[#allocation249_spill] sm:$0xff] }
 0x718   : > { %v4895_v28 = vadd.f32 %v11665_v0, %v4847_v11  ;;  %v4785_v40 = vmax.f32 %v4671_v17, 0.0 }
 0x719   : > { %v4894_v43 = vadd.f32 %v11668_v55, %v4846_v54  ;;  %v4784_v47 = vmax.f32 %v4666_v14, 0.0  ;;  %v8040_v24 = vpop.f32.mrb[180].mxu0  ;;  %v13794_v54 = vld [vmem:[#allocation142_spill] sm:$0xff] }
 0x71a   : > { %v4849_v39 = vmul.f32 %v4785_v40, %v13537_v10  ;;  %v4681_v32 = vadd.f32 %v8040_v24, %v11039_v21  ;;  %v4675_v59 = vpop.f32.mrb[181].mxu0  ;;  %v13795_v40 = vld [vmem:[#allocation250_spill] sm:$0xff] }
 0x71b   : > { %v4848_v30 = vmul.f32 %v4784_v47, %v13792_v15  ;;  %v4676_v3 = vadd.f32 %v4675_v59, %v13793_v1  ;;  %8064 = vmatprep.mubr.msk.f32.mxu1 %vm2741_vm4, %v4894_v43  ;;  %v13796_v59 = vld [vmem:[#allocation2_spill] sm:$0xff] }
 0x71c   : > { %v4897_v61 = vadd.f32 %v11675_v12, %v4849_v39  ;;  %v4787_v26 = vmax.f32 %v4681_v32, 0.0  ;;  %8065 = vmatmul.mubr.msk.f32.vlgmr.msra.gmra.mrb[152].mxu1 %vm2741_vm4, %v4895_v28 }
 0x71d   : > { %v4896_v0 = vadd.f32 %v11678_v2, %v4848_v30  ;;  %v4786_v55 = vmax.f32 %v4676_v3, 0.0  ;;  %v8043_v44 = vpop.f32.mrb[182].mxu0 }
 0x71e   : > { %v4851_v11 = vmul.f32 %v4787_v26, %v13543_v23  ;;  %v4691_v21 = vadd.f32 %v8043_v44, %v11054_v8  ;;  %v4685_v17 = vpop.f32.mrb[183].mxu0  ;;  %v13797_v44 = vld [vmem:[#allocation170_spill] sm:$0xff] }
 0x71f   : > { %v4850_v14 = vmul.f32 %v4786_v55, %v13794_v54  ;;  %v4686_v47 = vadd.f32 %v4685_v17, %v13795_v40  ;;  %8067 = vmatprep.mubr.msk.f32.mxu1 %vm2741_vm4, %v4896_v0 }
 0x720   : > { %v4899_v12 = vadd.f32 %v11685_v6, %v4851_v11  ;;  %v4789_v43 = vmax.f32 %v4691_v21, 0.0  ;;  %8068 = vmatmul.mubr.msk.f32.gmra.mrb[154].mxu1 %vm2741_vm4, %v4897_v61  ;;  %v13798_v21 = vld [vmem:[#allocation3_spill] sm:$0xff] }
 0x721   : > { %v4898_v2 = vadd.f32 %v11688_v25, %v4850_v14  ;;  %v4788_v30 = vmax.f32 %v4686_v47, 0.0  ;;  %v8046_v28 = vpop.f32.mrb[184].mxu0 }
 0x722   : > { %v4853_v24 = vmul.f32 %v4789_v43, %v13549_v52  ;;  %v4701_v8 = vadd.f32 %v8046_v28, %v11072_v37  ;;  %v4695_v39 = vpop.f32.mrb[185].mxu0  ;;  %v13801_v28 = vld [vmem:[#allocation188_spill] sm:$0xff] }
 0x723   : > { %v4852_v32 = vmul.f32 %v4788_v30, %v13550_v22  ;;  %v4696_v1 = vadd.f32 %v4695_v39, %v13796_v59  ;;  %8070 = vmatprep.mubr.msk.f32.mxu1 %vm2741_vm4, %v4898_v2  ;;  %v13800_v2 = vld [vmem:[#allocation251_spill] sm:$0xff] }
 0x724   : > { %v4901_v6 = vadd.f32 %v11695_v45, %v4853_v24  ;;  %v4791_v3 = vmax.f32 %v4701_v8, 0.0  ;;  %8071 = vmatmul.mubr.msk.f32.gmra.mrb[156].mxu1 %vm2741_vm4, %v4899_v12  ;;  %v13799_v12 = vld [vmem:[#allocation215_spill] sm:$0xff]  ;;  %v13802_v8 = vld [vmem:[#allocation252_spill] sm:$0xff] }
 0x725   : > { %v4900_v25 = vadd.f32 %v11698_v63, %v4852_v32  ;;  %v4790_v61 = vmax.f32 %v4696_v1, 0.0  ;;  %v8049_v26 = vpop.f32.mrb[186].mxu0 }
 0x726   : > { %v4855_v0 = vmul.f32 %v4791_v3, %v13553_v5  ;;  %v4711_v37 = vadd.f32 %v8049_v26, %v11089_v49  ;;  %v4705_v55 = vpop.f32.mrb[187].mxu0 }
 0x727   : > { %v4854_v11 = vmul.f32 %v4790_v61, %v13797_v44  ;;  %v4706_v17 = vadd.f32 %v4705_v55, %v13798_v21  ;;  %8073 = vmatprep.mubr.msk.f32.mxu1 %vm2741_vm4, %v4900_v25  ;;  %v13804_v25 = vld [vmem:[#allocation253_spill] sm:$0xff]  ;;  %v13806_v55 = vld [vmem:[#allocation254_spill] sm:$0xff] }
 0x728   : > { %v4903_v45 = vadd.f32 %v11705_v60, %v4855_v0  ;;  %v4793_v14 = vmax.f32 %v4711_v37, 0.0  ;;  %8074 = vmatmul.mubr.msk.f32.gmra.mrb[158].mxu1 %vm2741_vm4, %v4901_v6  ;;  %v13803_v6 = vld [vmem:[#allocation240_spill] sm:$0xff]  ;;  %v13805_v0 = vld [vmem:[#allocation190_spill] sm:$0xff] }
 0x729   : > { %v4902_v63 = vadd.f32 %v11708_v4, %v4854_v11  ;;  %v4792_v40 = vmax.f32 %v4706_v17, 0.0  ;;  %v8052_v47 = vpop.f32.mrb[188].mxu0 }
 0x72a   : > { %v4857_v43 = vmul.f32 %v4793_v14, %v13799_v12  ;;  %v4721_v49 = vadd.f32 %v8052_v47, %v13800_v2  ;;  %v4715_v30 = vpop.f32.mrb[189].mxu0 }
 0x72b   : > { %v4856_v24 = vmul.f32 %v4792_v40, %v13801_v28  ;;  %v4716_v39 = vadd.f32 %v4715_v30, %v13802_v8  ;;  %8076 = vmatprep.mubr.msk.f32.mxu1 %vm2741_vm4, %v4902_v63  ;;  %v13808_v63 = vld [vmem:[#allocation256_spill] sm:$0xff] }
 0x72c   : > { %v4905_v60 = vadd.f32 %v11715_v36, %v4857_v43  ;;  %v4795_v32 = vmax.f32 %v4721_v49, 0.0  ;;  %8077 = vmatmul.mubr.msk.f32.gmra.mrb[160].mxu1 %vm2741_vm4, %v4903_v45  ;;  %v13807_v45 = vld [vmem:[#allocation255_spill] sm:$0xff] }
 0x72d   : > { %v4904_v4 = vadd.f32 %v11718_v16, %v4856_v24  ;;  %v4794_v59 = vmax.f32 %v4716_v39, 0.0  ;;  %v8055_v1 = vpop.f32.mrb[190].mxu0 }
 0x72e   : > { %v4859_v3 = vmul.f32 %v4795_v32, %v13803_v6  ;;  %v4731_v61 = vadd.f32 %v8055_v1, %v13804_v25  ;;  %v4725_v26 = vpop.f32.mrb[191].mxu0  ;;  %v474_v25 = vld [vmem:[%s12735_s10] sm:$0xff] }
 0x72f   : > { %v4858_v37 = vmul.f32 %v4794_v59, %v13805_v0  ;;  %v4726_v11 = vadd.f32 %v4725_v26, %v13806_v55  ;;  %8079 = vmatprep.mubr.msk.f32.mxu1 %vm2741_vm4, %v4904_v4  ;;  %v477_v55 = vld [vmem:[%s12735_s10 + $0x18] sm:$0xff] }
 0x730   : > { %v4907_v36 = vadd.f32 %v11725_v31, %v4859_v3  ;;  %v4797_v21 = vmax.f32 %v4731_v61, 0.0  ;;  %8080 = vmatmul.mubr.msk.f32.gmra.mrb[162].mxu1 %vm2741_vm4, %v4905_v60  ;;  %v475_v61 = vld [vmem:[%s12735_s10 + $0x8] sm:$0xff] }
 0x731   : > { %v4906_v16 = vadd.f32 %v11728_v62, %v4858_v37  ;;  %v4796_v17 = vmax.f32 %v4726_v11, 0.0  ;;  %v8384_v26 = vpack.c.bf16 %v475_v61, %v474_v25  ;;  %v476_v37 = vld [vmem:[%s12735_s10 + $0x10] sm:$0xff] }
 0x732   : > { %v4861_v14 = vmul.f32 %v4797_v21, %v13807_v45  ;;  %v8388_v11 = vpack.c.bf16 %v477_v55, %v476_v37  ;;  %v13809_v21 = vld [vmem:[#allocation52_spill] sm:$0xff] }
 0x733   : > { %v4860_v40 = vmul.f32 %v4796_v17, %v13808_v63  ;;  %8082 = vmatprep.mubr.msk.f32.mxu1 %vm2741_vm4, %v4906_v16  ;;  %8385 = vmatprep.subr.bf16.mxu1 %v8384_v26  ;;  %v13815_v61 = vld [vmem:[#allocation60_spill] sm:$0xff] }
 0x734   : > { %v4909_v47 = vadd.f32 %v11735_v41, %v4861_v14  ;;  %8083 = vmatmul.mubr.msk.f32.gmra.mrb[164].mxu1 %vm2741_vm4, %v4907_v36  ;;  %v13810_v14 = vld [vmem:[#allocation55_spill] sm:$0xff] }
 0x735   : > { %v4908_v43 = vadd.f32 %v11738_v57, %v4860_v40  ;;  %8387 = vmatpush3.bf16.msra.mxu1 %v8384_v26 }
 0x736   : > { %8389 = vmatprep.subr.bf16.mxu1 %v8388_v11 }
 0x737   : > { %8085 = vmatprep.mubr.msk.f32.mxu1 %vm2741_vm4, %v4908_v43 }
 0x738   : > { %8086 = vmatmul.mubr.msk.f32.gmra.mrb[166].mxu1 %vm2741_vm4, %v4909_v47  ;;  %v13811_v47 = vld [vmem:[#allocation51_spill] sm:$0xff] }
 0x739   : > { %8391 = vmatpush3.bf16.msra.mxu1 %v8388_v11 }
 0x7ef   : > { %v8066_v31 = vpop.f32.mrb[152].mxu1 }
 0x7f0   : > { %5121 = vrot.lane.b32.xlu1 %v8066_v31, %s8549_s24  ;;  %v5024_v62 = vpop.f32.mrb[153].mxu1 }
 0x7f1   : > { %5119 = vrot.lane.b32.xlu0 %v5024_v62, %s8549_s24 }
 0x7f3   : > { %v8069_v2 = vpop.f32.mrb[154].mxu1 }
 0x7f4   : > { %5125 = vrot.lane.b32.xlu1 %v8069_v2, %s8549_s24  ;;  %v5034_v49 = vpop.f32.mrb[155].mxu1 }
 0x7f5   : > { %5123 = vrot.lane.b32.xlu0 %v5034_v49, %s8549_s24  ;;  %v13812_v49 = vld [vmem:[#allocation53_spill] sm:$0xff] }
 0x7f7   : > { %v8072_v41 = vpop.f32.mrb[156].mxu1 }
 0x7f8   : > { %5129 = vrot.lane.b32.xlu1 %v8072_v41, %s8549_s24  ;;  %v5044_v57 = vpop.f32.mrb[157].mxu1 }
 0x7f9   : > { %5127 = vrot.lane.b32.xlu0 %v5044_v57, %s8549_s24 }
 0x7fb   : > { %v8075_v30 = vpop.f32.mrb[158].mxu1 }
 0x7fc   : > { %5133 = vrot.lane.b32.xlu1 %v8075_v30, %s8549_s24  ;;  %v5054_v24 = vpop.f32.mrb[159].mxu1 }
 0x7fd   : > { %5131 = vrot.lane.b32.xlu0 %v5054_v24, %s8549_s24  ;;  %v13813_v24 = vld [vmem:[#allocation57_spill] sm:$0xff] }
 0x7ff   : > { %v8078_v8 = vpop.f32.mrb[160].mxu1 }
 0x800   : > { %5137 = vrot.lane.b32.xlu1 %v8078_v8, %s8549_s24  ;;  %v5064_v39 = vpop.f32.mrb[161].mxu1 }
 0x801   : > { %5135 = vrot.lane.b32.xlu0 %v5064_v39, %s8549_s24 }
 0x803   : > { %v8081_v60 = vpop.f32.mrb[162].mxu1 }
 0x804   : > { %5141 = vrot.lane.b32.xlu1 %v8081_v60, %s8549_s24  ;;  %v5074_v32 = vpop.f32.mrb[163].mxu1 }
 0x805   : > { %5139 = vrot.lane.b32.xlu0 %v5074_v32, %s8549_s24 }
 0x807   : > { %v8084_v4 = vpop.f32.mrb[164].mxu1 }
 0x808   : > { %5145 = vrot.lane.b32.xlu1 %v8084_v4, %s8549_s24  ;;  %v5084_v59 = vpop.f32.mrb[165].mxu1 }
 0x809   : > { %5143 = vrot.lane.b32.xlu0 %v5084_v59, %s8549_s24  ;;  %v13814_v59 = vld [vmem:[#allocation56_spill] sm:$0xff] }
 0x80b   : > { %v8087_v1 = vpop.f32.mrb[166].mxu1 }
 0x80c   : > { %5149 = vrot.lane.b32.xlu1 %v8087_v1, %s8549_s24  ;;  %v5094_v3 = vpop.f32.mrb[167].mxu1 }
 0x80d   : > { %5147 = vrot.lane.b32.xlu0 %v5094_v3, %s8549_s24 }
 0x862   : > { %v5122_v36 = vpop.permute.xlu1 %5121 }
 0x863   : > { %v5168_v16 = vadd.f32 %v13809_v21, %v5122_v36  ;;  %v5120_v17 = vpop.permute.xlu0 %5119  ;;  %v13816_v21 = vld [vmem:[#allocation59_spill] sm:$0xff] }
 0x864   : > { %v5167_v40 = vadd.f32 %v5120_v17, %v13810_v14 }
 0x865   : > { %v5184_v43 = vadd.f32 %v5168_v16, %v13811_v47 }
 0x866   : > { %v5183_v31 = vadd.f32 %v5167_v40, %v13811_v47  ;;  %v5126_v62 = vpop.permute.xlu1 %5125  ;;  %v13817_v40 = vld [vmem:[#allocation63_spill] sm:$0xff] }
 0x867   : > { %v5200_v2 = vmax.f32 %v5184_v43, 0.0  ;;  %v5170_v41 = vadd.f32 %v13812_v49, %v5126_v62  ;;  %v5124_v57 = vpop.permute.xlu0 %5123 }
 0x868   : > { %v5199_v30 = vmax.f32 %v5183_v31, 0.0  ;;  %v5169_v8 = vadd.f32 %v5124_v57, %v13813_v24 }
 0x869   : > { %v5186_v39 = vadd.f32 %v5170_v41, %v13811_v47  ;;  %5233 = vrot.lane.b32.xlu1 %v5200_v2, %s8550_s27  ;;  %v13818_v41 = vld [vmem:[#allocation61_spill] sm:$0xff] }
 0x86a   : > { %v5185_v60 = vadd.f32 %v5169_v8, %v13811_v47  ;;  %v5130_v32 = vpop.permute.xlu1 %5129  ;;  %5231 = vrot.lane.b32.xlu0 %v5199_v30, %s8550_s27  ;;  %v13819_v8 = vld [vmem:[#allocation65_spill] sm:$0xff] }
 0x86b   : > { %v5202_v4 = vmax.f32 %v5186_v39, 0.0  ;;  %v5172_v1 = vadd.f32 %v13814_v59, %v5130_v32  ;;  %v5128_v3 = vpop.permute.xlu0 %5127 }
 0x86c   : > { %v5201_v25 = vmax.f32 %v5185_v60, 0.0  ;;  %v5171_v26 = vadd.f32 %v5128_v3, %v13815_v61 }
 0x86d   : > { %v5188_v37 = vadd.f32 %v5172_v1, %v13811_v47  ;;  %5237 = vrot.lane.b32.xlu1 %v5202_v4, %s8550_s27  ;;  %v13820_v1 = vld [vmem:[#allocation64_spill] sm:$0xff] }
 0x86e   : > { %v5187_v55 = vadd.f32 %v5171_v26, %v13811_v47  ;;  %v5134_v11 = vpop.permute.xlu1 %5133  ;;  %5235 = vrot.lane.b32.xlu0 %v5201_v25, %s8550_s27  ;;  %v13821_v26 = vld [vmem:[#allocation67_spill] sm:$0xff] }
 0x86f   : > { %v5204_v36 = vmax.f32 %v5188_v37, 0.0  ;;  %v5174_v16 = vadd.f32 %v13816_v21, %v5134_v11  ;;  %v5132_v17 = vpop.permute.xlu0 %5131 }
 0x870   : > { %v5203_v14 = vmax.f32 %v5187_v55, 0.0  ;;  %v5173_v43 = vadd.f32 %v5132_v17, %v13817_v40 }
 0x871   : > { %v5190_v31 = vadd.f32 %v5174_v16, %v13811_v47  ;;  %5241 = vrot.lane.b32.xlu1 %v5204_v36, %s8550_s27  ;;  %v13822_v16 = vld [vmem:[#allocation66_spill] sm:$0xff] }
 0x872   : > { %v5189_v62 = vadd.f32 %v5173_v43, %v13811_v47  ;;  %v5138_v2 = vpop.permute.xlu1 %5137  ;;  %5239 = vrot.lane.b32.xlu0 %v5203_v14, %s8550_s27  ;;  %v13823_v43 = vld [vmem:[#allocation70_spill] sm:$0xff] }
 0x873   : > { %v5206_v49 = vmax.f32 %v5190_v31, 0.0  ;;  %v5176_v57 = vadd.f32 %v13818_v41, %v5138_v2  ;;  %v5136_v30 = vpop.permute.xlu0 %5135 }
 0x874   : > { %v5205_v24 = vmax.f32 %v5189_v62, 0.0  ;;  %v5175_v39 = vadd.f32 %v5136_v30, %v13819_v8 }
 0x875   : > { %v5192_v60 = vadd.f32 %v5176_v57, %v13811_v47  ;;  %5245 = vrot.lane.b32.xlu1 %v5206_v49, %s8550_s27  ;;  %v13824_v57 = vld [vmem:[#allocation68_spill] sm:$0xff] }
 0x876   : > { %v5191_v32 = vadd.f32 %v5175_v39, %v13811_v47  ;;  %v5142_v4 = vpop.permute.xlu1 %5141  ;;  %5243 = vrot.lane.b32.xlu0 %v5205_v24, %s8550_s27  ;;  %v13825_v39 = vld [vmem:[#allocation7_spill] sm:$0xff] }
 0x877   : > { %v5208_v59 = vmax.f32 %v5192_v60, 0.0  ;;  %v5178_v3 = vadd.f32 %v13820_v1, %v5142_v4  ;;  %v5140_v25 = vpop.permute.xlu0 %5139 }
 0x878   : > { %v5207_v61 = vmax.f32 %v5191_v32, 0.0  ;;  %v5177_v37 = vadd.f32 %v5140_v25, %v13821_v26  ;;  %v13827_v25 = vld [vmem:[#allocation74_spill] sm:$0xff]  ;;  %v13829_v26 = vld [vmem:[#allocation79_spill] sm:$0xff] }
 0x879   : > { %v5194_v55 = vadd.f32 %v5178_v3, %v13811_v47  ;;  %5249 = vrot.lane.b32.xlu1 %v5208_v59, %s8550_s27  ;;  %v13826_v3 = vld [vmem:[#allocation77_spill] sm:$0xff] }
 0x87a   : > { %v5193_v11 = vadd.f32 %v5177_v37, %v13811_v47  ;;  %v5146_v36 = vpop.permute.xlu1 %5145  ;;  %5247 = vrot.lane.b32.xlu0 %v5207_v61, %s8550_s27  ;;  %v13828_v61 = vld [vmem:[#allocation81_spill] sm:$0xff]  ;;  %v13831_v37 = vld [vmem:[#allocation83_spill] sm:$0xff] }
 0x87b   : > { %v5210_v21 = vmax.f32 %v5194_v55, 0.0  ;;  %v5180_v17 = vadd.f32 %v13822_v16, %v5146_v36  ;;  %v5144_v14 = vpop.permute.xlu0 %5143  ;;  %v13832_v55 = vld [vmem:[#allocation89_spill] sm:$0xff]  ;;  %v13834_v36 = vld [vmem:[#allocation91_spill] sm:$0xff] }
 0x87c   : > { %v5209_v40 = vmax.f32 %v5193_v11, 0.0  ;;  %v5179_v31 = vadd.f32 %v5144_v14, %v13823_v43  ;;  %v13833_v11 = vld [vmem:[#allocation87_spill] sm:$0xff]  ;;  %v13836_v16 = vld [vmem:[#allocation93_spill] sm:$0xff]  ;;  %v13840_v43 = vld [vmem:[#allocation98_spill] sm:$0xff] }
 0x87d   : > { %v5196_v62 = vadd.f32 %v5180_v17, %v13811_v47  ;;  %5253 = vrot.lane.b32.xlu1 %v5210_v21, %s8550_s27  ;;  %v13835_v21 = vld [vmem:[#allocation90_spill] sm:$0xff]  ;;  %v13837_v17 = vld [vmem:[#allocation92_spill] sm:$0xff]  ;;  %v13838_v14 = vld [vmem:[#allocation95_spill] sm:$0xff] }
 0x87e   : > { %v5195_v2 = vadd.f32 %v5179_v31, %v13811_v47  ;;  %v5150_v49 = vpop.permute.xlu1 %5149  ;;  %5251 = vrot.lane.b32.xlu0 %v5209_v40, %s8550_s27  ;;  %v13839_v40 = vld [vmem:[#allocation94_spill] sm:$0xff]  ;;  %v13841_v31 = vld [vmem:[#allocation96_spill] sm:$0xff] }
 0x87f   : > { %v5212_v41 = vmax.f32 %v5196_v62, 0.0  ;;  %v5182_v30 = vadd.f32 %v13824_v57, %v5150_v49  ;;  %v5148_v24 = vpop.permute.xlu0 %5147  ;;  %v13842_v62 = vld [vmem:[#allocation101_spill] sm:$0xff]  ;;  %v13844_v49 = vld [vmem:[#allocation104_spill] sm:$0xff]  ;;  %v13846_v57 = vld [vmem:[#allocation107_spill] sm:$0xff] }
 0x880   : > { %v5211_v8 = vmax.f32 %v5195_v2, 0.0  ;;  %v5181_v60 = vadd.f32 %v5148_v24, %v13825_v39  ;;  %v13843_v2 = vld [vmem:[#allocation99_spill] sm:$0xff] }
 0x881   : > { %v5198_v32 = vadd.f32 %v5182_v30, %v13811_v47  ;;  %5257 = vrot.lane.b32.xlu1 %v5212_v41, %s8550_s27  ;;  %v13845_v41 = vld [vmem:[#allocation103_spill] sm:$0xff]  ;;  %v13847_v30 = vld [vmem:[#allocation106_spill] sm:$0xff] }
 0x882   : > { %v5197_v4 = vadd.f32 %v5181_v60, %v13811_v47  ;;  %5255 = vrot.lane.b32.xlu0 %v5211_v8, %s8550_s27  ;;  %v13830_v47 = vld [vmem:[#allocation85_spill] sm:$0xff]  ;;  %v13848_v24 = vld [vmem:[#allocation111_spill] sm:$0xff]  ;;  %v13849_v8 = vld [vmem:[#allocation108_spill] sm:$0xff] }
 0x883   : > { %v5214_v59 = vmax.f32 %v5198_v32, 0.0  ;;  %v13850_v39 = vld [vmem:[#allocation115_spill] sm:$0xff]  ;;  %v13851_v60 = vld [vmem:[#allocation113_spill] sm:$0xff] }
 0x884   : > { %v5213_v1 = vmax.f32 %v5197_v4, 0.0  ;;  %v13852_v32 = vld [vmem:[#allocation119_spill] sm:$0xff]  ;;  %v13853_v4 = vld [vmem:[#allocation117_spill] sm:$0xff] }
 0x885   : > { %5261 = vrot.lane.b32.xlu1 %v5214_v59, %s8550_s27  ;;  %v13854_v59 = vld [vmem:[#allocation123_spill] sm:$0xff] }
 0x886   : > { %5259 = vrot.lane.b32.xlu0 %v5213_v1, %s8550_s27  ;;  %v13855_v1 = vld [vmem:[#allocation121_spill] sm:$0xff] }
 0x889   : > { %5891 = vrot.lane.b32.xlu1 %v13826_v3, %s8550_s27  ;;  %v13856_v3 = vld [vmem:[#allocation128_spill] sm:$0xff] }
 0x88a   : > { %5889 = vrot.lane.b32.xlu0 %v13827_v25, %s8550_s27  ;;  %v13857_v25 = vld [vmem:[#allocation126_spill] sm:$0xff] }
 0x88d   : > { %5895 = vrot.lane.b32.xlu1 %v13828_v61, %s8550_s27  ;;  %v13858_v61 = vld [vmem:[#allocation132_spill] sm:$0xff] }
 0x88e   : > { %5893 = vrot.lane.b32.xlu0 %v13829_v26, %s8550_s27  ;;  %v13859_v26 = vld [vmem:[#allocation130_spill] sm:$0xff] }
 0x891   : > { %5899 = vrot.lane.b32.xlu1 %v13830_v47, %s8550_s27  ;;  %v13860_v47 = vld [vmem:[#allocation136_spill] sm:$0xff] }
 0x892   : > { %5897 = vrot.lane.b32.xlu0 %v13831_v37, %s8550_s27  ;;  %v13861_v37 = vld [vmem:[#allocation134_spill] sm:$0xff] }
 0x895   : > { %5903 = vrot.lane.b32.xlu1 %v13832_v55, %s8550_s27  ;;  %v13862_v55 = vld [vmem:[#allocation141_spill] sm:$0xff] }
 0x896   : > { %5901 = vrot.lane.b32.xlu0 %v13833_v11, %s8550_s27  ;;  %v13863_v11 = vld [vmem:[#allocation139_spill] sm:$0xff] }
 0x899   : > { %5907 = vrot.lane.b32.xlu1 %v13834_v36, %s8550_s27  ;;  %v13864_v36 = vld [vmem:[#allocation146_spill] sm:$0xff] }
 0x89a   : > { %5905 = vrot.lane.b32.xlu0 %v13835_v21, %s8550_s27  ;;  %v13865_v21 = vld [vmem:[#allocation143_spill] sm:$0xff] }
 0x89d   : > { %5911 = vrot.lane.b32.xlu1 %v13836_v16, %s8550_s27  ;;  %v13866_v16 = vld [vmem:[#allocation150_spill] sm:$0xff] }
 0x89e   : > { %5909 = vrot.lane.b32.xlu0 %v13837_v17, %s8550_s27  ;;  %v13867_v17 = vld [vmem:[#allocation148_spill] sm:$0xff] }
 0x8a1   : > { %5915 = vrot.lane.b32.xlu1 %v13838_v14, %s8550_s27 }
 0x8a2   : > { %5913 = vrot.lane.b32.xlu0 %v13839_v40, %s8550_s27 }
 0x8a5   : > { %5919 = vrot.lane.b32.xlu1 %v13840_v43, %s8550_s27  ;;  %v13868_v43 = vld [vmem:[#allocation155_spill] sm:$0xff] }
 0x8a6   : > { %5917 = vrot.lane.b32.xlu0 %v13841_v31, %s8550_s27  ;;  %v13869_v31 = vld [vmem:[#allocation153_spill] sm:$0xff] }
 0x8a9   : > { %5923 = vrot.lane.b32.xlu1 %v13842_v62, %s8550_s27 }
 0x8aa   : > { %5921 = vrot.lane.b32.xlu0 %v13843_v2, %s8550_s27 }
 0x8ad   : > { %5927 = vrot.lane.b32.xlu1 %v13844_v49, %s8550_s27  ;;  %v13870_v49 = vld [vmem:[#allocation160_spill] sm:$0xff] }
 0x8ae   : > { %5925 = vrot.lane.b32.xlu0 %v13845_v41, %s8550_s27  ;;  %v13871_v41 = vld [vmem:[#allocation157_spill] sm:$0xff] }
 0x8b1   : > { %5931 = vrot.lane.b32.xlu1 %v13846_v57, %s8550_s27 }
 0x8b2   : > { %5929 = vrot.lane.b32.xlu0 %v13847_v30, %s8550_s27 }
 0x8b5   : > { %5935 = vrot.lane.b32.xlu1 %v13848_v24, %s8550_s27  ;;  %v13872_v24 = vld [vmem:[#allocation164_spill] sm:$0xff] }
 0x8b6   : > { %5933 = vrot.lane.b32.xlu0 %v13849_v8, %s8550_s27  ;;  %v13873_v8 = vld [vmem:[#allocation162_spill] sm:$0xff] }
 0x8b9   : > { %5939 = vrot.lane.b32.xlu1 %v13850_v39, %s8550_s27 }
 0x8ba   : > { %5937 = vrot.lane.b32.xlu0 %v13851_v60, %s8550_s27 }
 0x8bd   : > { %5943 = vrot.lane.b32.xlu1 %v13852_v32, %s8550_s27  ;;  %v13874_v32 = vld [vmem:[#allocation169_spill] sm:$0xff] }
 0x8be   : > { %5941 = vrot.lane.b32.xlu0 %v13853_v4, %s8550_s27  ;;  %v13875_v4 = vld [vmem:[#allocation167_spill] sm:$0xff] }
 0x8c1   : > { %5947 = vrot.lane.b32.xlu1 %v13854_v59, %s8550_s27 }
 0x8c2   : > { %5945 = vrot.lane.b32.xlu0 %v13855_v1, %s8550_s27 }
 0x8c5   : > { %5951 = vrot.lane.b32.xlu1 %v13856_v3, %s8550_s27  ;;  %v13876_v3 = vld [vmem:[#allocation174_spill] sm:$0xff] }
 0x8c6   : > { %5949 = vrot.lane.b32.xlu0 %v13857_v25, %s8550_s27  ;;  %v13877_v25 = vld [vmem:[#allocation171_spill] sm:$0xff] }
 0x8c9   : > { %5955 = vrot.lane.b32.xlu1 %v13858_v61, %s8550_s27 }
 0x8ca   : > { %5953 = vrot.lane.b32.xlu0 %v13859_v26, %s8550_s27 }
 0x8cd   : > { %5959 = vrot.lane.b32.xlu1 %v13860_v47, %s8550_s27  ;;  %v13878_v47 = vld [vmem:[#allocation178_spill] sm:$0xff] }
 0x8ce   : > { %5957 = vrot.lane.b32.xlu0 %v13861_v37, %s8550_s27  ;;  %v13879_v37 = vld [vmem:[#allocation175_spill] sm:$0xff] }
 0x8d1   : > { %5963 = vrot.lane.b32.xlu1 %v13862_v55, %s8550_s27 }
 0x8d2   : > { %5961 = vrot.lane.b32.xlu0 %v13863_v11, %s8550_s27 }
 0x8d5   : > { %5967 = vrot.lane.b32.xlu1 %v13864_v36, %s8550_s27  ;;  %v13880_v36 = vld [vmem:[#allocation182_spill] sm:$0xff] }
 0x8d6   : > { %5965 = vrot.lane.b32.xlu0 %v13865_v21, %s8550_s27  ;;  %v13881_v21 = vld [vmem:[#allocation179_spill] sm:$0xff] }
 0x8d9   : > { %5971 = vrot.lane.b32.xlu1 %v13866_v16, %s8550_s27 }
 0x8da   : > { %5969 = vrot.lane.b32.xlu0 %v13867_v17, %s8550_s27 }
 0x8db   : > { %v5234_v14 = vpop.permute.xlu1 %5233 }
 0x8dc   : > { %v5232_v40 = vpop.permute.xlu0 %5231 }
 0x8dd   : > { %5975 = vrot.lane.b32.xlu1 %v13868_v43, %s8550_s27  ;;  %8096 = vmatprep.mubr.msk.f32.mxu1 %vm2741_vm4, %v5232_v40  ;;  %v13883_v40 = vld [vmem:[#allocation184_spill] sm:$0xff]  ;;  %v13884_v43 = vmov 1.0  }
 0x8de   : > { %5973 = vrot.lane.b32.xlu0 %v13869_v31, %s8550_s27  ;;  %8097 = vmatmul.mubr.msk.f32.vlgmr.msra.gmra.mrb[168].mxu1 %vm2741_vm4, %v5234_v14  ;;  %v13882_v14 = vld [vmem:[#allocation191_spill] sm:$0xff]  ;;  %v13885_v31 = vld [vmem:[#allocation4_spill] sm:$0xff] }
 0x8df   : > { %v5238_v62 = vpop.permute.xlu1 %5237 }
 0x8e0   : > { %v5236_v2 = vpop.permute.xlu0 %5235 }
 0x8e1   : > { %5979 = vrot.lane.b32.xlu1 %v13870_v49, %s8550_s27  ;;  %8099 = vmatprep.mubr.msk.f32.mxu1 %vm2741_vm4, %v5236_v2  ;;  %v13887_v2 = vld [vmem:[#allocation210_spill] sm:$0xff]  ;;  %v13888_v49 = vld [vmem:[#allocation201_spill] sm:$0xff] }
 0x8e2   : > { %5977 = vrot.lane.b32.xlu0 %v13871_v41, %s8550_s27  ;;  %8100 = vmatmul.mubr.msk.f32.gmra.mrb[170].mxu1 %vm2741_vm4, %v5238_v62  ;;  %v13889_v41 = vld [vmem:[#allocation217_spill] sm:$0xff] }
 0x8e3   : > { %v5242_v57 = vpop.permute.xlu1 %5241 }
 0x8e4   : > { %v5240_v30 = vpop.permute.xlu0 %5239 }
 0x8e5   : > { %5983 = vrot.lane.b32.xlu1 %v13872_v24, %s8550_s27  ;;  %8102 = vmatprep.mubr.msk.f32.mxu1 %vm2741_vm4, %v5240_v30  ;;  %v13891_v30 = vld [vmem:[#allocation225_spill] sm:$0xff]  ;;  %v13892_v24 = vld [vmem:[#allocation220_spill] sm:$0xff] }
 0x8e6   : > { %5981 = vrot.lane.b32.xlu0 %v13873_v8, %s8550_s27  ;;  %8103 = vmatmul.mubr.msk.f32.gmra.mrb[172].mxu1 %vm2741_vm4, %v5242_v57  ;;  %v13890_v57 = vld [vmem:[#allocation212_spill] sm:$0xff] }
 0x8e7   : > { %v5246_v39 = vpop.permute.xlu1 %5245 }
 0x8e8   : > { %v5244_v60 = vpop.permute.xlu0 %5243 }
 0x8e9   : > { %5987 = vrot.lane.b32.xlu1 %v13874_v32, %s8550_s27  ;;  %8105 = vmatprep.mubr.msk.f32.mxu1 %vm2741_vm4, %v5244_v60 }
 0x8ea   : > { %5985 = vrot.lane.b32.xlu0 %v13875_v4, %s8550_s27  ;;  %8106 = vmatmul.mubr.msk.f32.gmra.mrb[174].mxu1 %vm2741_vm4, %v5246_v39 }
 0x8eb   : > { %v5250_v59 = vpop.permute.xlu1 %5249 }
 0x8ec   : > { %v5248_v1 = vpop.permute.xlu0 %5247 }
 0x8ed   : > { %5991 = vrot.lane.b32.xlu1 %v13876_v3, %s8550_s27  ;;  %8108 = vmatprep.mubr.msk.f32.mxu1 %vm2741_vm4, %v5248_v1 }
 0x8ee   : > { %5989 = vrot.lane.b32.xlu0 %v13877_v25, %s8550_s27  ;;  %8109 = vmatmul.mubr.msk.f32.gmra.mrb[176].mxu1 %vm2741_vm4, %v5250_v59 }
 0x8ef   : > { %v5254_v61 = vpop.permute.xlu1 %5253 }
 0x8f0   : > { %v5252_v26 = vpop.permute.xlu0 %5251 }
 0x8f1   : > { %5995 = vrot.lane.b32.xlu1 %v13878_v47, %s8550_s27  ;;  %8111 = vmatprep.mubr.msk.f32.mxu1 %vm2741_vm4, %v5252_v26 }
 0x8f2   : > { %5993 = vrot.lane.b32.xlu0 %v13879_v37, %s8550_s27  ;;  %8112 = vmatmul.mubr.msk.f32.gmra.mrb[178].mxu1 %vm2741_vm4, %v5254_v61 }
 0x8f3   : > { %v5258_v55 = vpop.permute.xlu1 %5257 }
 0x8f4   : > { %v5256_v11 = vpop.permute.xlu0 %5255 }
 0x8f5   : > { %5999 = vrot.lane.b32.xlu1 %v13880_v36, %s8550_s27  ;;  %8114 = vmatprep.mubr.msk.f32.mxu1 %vm2741_vm4, %v5256_v11 }
 0x8f6   : > { %5997 = vrot.lane.b32.xlu0 %v13881_v21, %s8550_s27  ;;  %8115 = vmatmul.mubr.msk.f32.gmra.mrb[180].mxu1 %vm2741_vm4, %v5258_v55 }
 0x8f7   : > { %v5262_v17 = vpop.permute.xlu1 %5261 }
 0x8f8   : > { %v5260_v16 = vpop.permute.xlu0 %5259 }
 0x8f9   : > { %6003 = vrot.lane.b32.xlu1 %v13882_v14, %s8550_s27  ;;  %8117 = vmatprep.mubr.msk.f32.mxu1 %vm2741_vm4, %v5260_v16 }
 0x8fa   : > { %6001 = vrot.lane.b32.xlu0 %v13883_v40, %s8550_s27  ;;  %8118 = vmatmul.mubr.msk.f32.gmra.mrb[182].mxu1 %vm2741_vm4, %v5262_v17 }
 0x8fb   : > { %8191 = vmatprep.mubr.msk.f32.mxu1 %vm1645_vm11, %v13884_v43 }
 0x8fd   : > { %6007 = vrot.lane.b32.xlu1 %v13887_v2, %s8550_s27 }
 0x8fe   : > { %6005 = vrot.lane.b32.xlu0 %v13888_v49, %s8550_s27 }
 0x901   : > { %6011 = vrot.lane.b32.xlu1 %v13889_v41, %s8550_s27  ;;  %v13930_v41 = vld [vmem:[#allocation13_spill] sm:$0xff] }
 0x902   : > { %6009 = vrot.lane.b32.xlu0 %v13890_v57, %s8550_s27  ;;  %vm13931_vm14 = vcmp.eq.s32.totalorder %v13885_v31, %v13930_v41  ;;  %v13932_v57 = vld [vmem:[#allocation10_spill] sm:$0xff] }
 0x903   : > { %v13954_v41 = vld [vmem:[#allocation18_spill] sm:$0xff] }
 0x905   : > { %6015 = vrot.lane.b32.xlu1 %v13891_v30, %s8550_s27  ;;  %v13934_v30 = vld [vmem:[#allocation14_spill] sm:$0xff] }
 0x906   : > { %6013 = vrot.lane.b32.xlu0 %v13892_v24, %s8550_s27  ;;  %v13912_v24 = vld [vmem:[#allocation8_spill] sm:$0xff] }
 0x907   : > { %vm13913_vm5 = vcmp.eq.s32.totalorder %v13885_v31, %v13912_v24  ;;  %v13936_v24 = vld [vmem:[#allocation41_spill] sm:$0xff] }
 0x9b1   : > { %v12026_v8 = vpop.f32.mrb[168].mxu1 }
 0x9b2   : > { %13893 = vst [vmem:[#allocation186_spill] sm:$0xff] %v12026_v8  ;;  %v12028_v39 = vpop.f32.mrb[169].mxu1 }
 0x9b3   : > { %13894 = vst [vmem:[#allocation189_spill] sm:$0xff] %v12028_v39  ;;  %v8392_v60 = vpack.c.bf16 %v12026_v8, %v12028_v39 }
 0x9b5   : > { %v12032_v32 = vpop.f32.mrb[170].mxu1  ;;  %8393 = vmatprep.subr.bf16.mxu0 %v8392_v60  ;;  %8424 = vmatprep.subr.bf16.mxu1 %v8392_v60 }
 0x9b6   : > { %13895 = vst [vmem:[#allocation194_spill] sm:$0xff] %v12032_v32  ;;  %v12034_v4 = vpop.f32.mrb[171].mxu1  ;;  %8395 = vmatpush3.bf16.msra.mxu0 %v8392_v60  ;;  %8432 = vmatpush3.bf16.msra.mxu1 %v8392_v60  ;;  %v13914_v60 = vld [vmem:[#allocation28_spill] sm:$0xff] }
 0x9b7   : > { %13896 = vst [vmem:[#allocation197_spill] sm:$0xff] %v12034_v4  ;;  %v8396_v59 = vpack.c.bf16 %v12032_v32, %v12034_v4  ;;  %vm13915_vm11 = vcmp.eq.s32.totalorder %v13885_v31, %v13914_v60  ;;  %v13938_v60 = vld [vmem:[#allocation31_spill] sm:$0xff] }
 0x9b9   : > { %v12038_v1 = vpop.f32.mrb[172].mxu1  ;;  %8397 = vmatprep.subr.bf16.mxu0 %v8396_v59  ;;  %8425 = vmatprep.subr.bf16.mxu1 %v8396_v59 }
 0x9ba   : > { %13897 = vst [vmem:[#allocation192_spill] sm:$0xff] %v12038_v1  ;;  %v12040_v3 = vpop.f32.mrb[173].mxu1  ;;  %8399 = vmatpush3.bf16.msra.mxu0 %v8396_v59  ;;  %8433 = vmatpush3.bf16.msra.mxu1 %v8396_v59  ;;  %v13916_v59 = vld [vmem:[#allocation32_spill] sm:$0xff] }
 0x9bb   : > { %13898 = vst [vmem:[#allocation200_spill] sm:$0xff] %v12040_v3  ;;  %v8400_v25 = vpack.c.bf16 %v12038_v1, %v12040_v3 }
 0x9bd   : > { %v12044_v61 = vpop.f32.mrb[174].mxu1  ;;  %8401 = vmatprep.subr.bf16.mxu0 %v8400_v25  ;;  %8426 = vmatprep.subr.bf16.mxu1 %v8400_v25 }
 0x9be   : > { %13899 = vst [vmem:[#allocation206_spill] sm:$0xff] %v12044_v61  ;;  %v12046_v26 = vpop.f32.mrb[175].mxu1  ;;  %8403 = vmatpush3.bf16.msra.mxu0 %v8400_v25  ;;  %8434 = vmatpush3.bf16.msra.mxu1 %v8400_v25  ;;  %v13918_v25 = vld [vmem:[#allocation30_spill] sm:$0xff] }
 0x9bf   : > { %13900 = vst [vmem:[#allocation209_spill] sm:$0xff] %v12046_v26  ;;  %v8404_v47 = vpack.c.bf16 %v12044_v61, %v12046_v26 }
 0x9c1   : > { %v12050_v37 = vpop.f32.mrb[176].mxu1  ;;  %8405 = vmatprep.subr.bf16.mxu0 %v8404_v47  ;;  %8427 = vmatprep.subr.bf16.mxu1 %v8404_v47 }
 0x9c2   : > { %13901 = vst [vmem:[#allocation195_spill] sm:$0xff] %v12050_v37  ;;  %v12052_v55 = vpop.f32.mrb[177].mxu1  ;;  %8407 = vmatpush3.bf16.msra.mxu0 %v8404_v47  ;;  %8435 = vmatpush3.bf16.msra.mxu1 %v8404_v47  ;;  %v13920_v47 = vld [vmem:[#allocation34_spill] sm:$0xff] }
 0x9c3   : > { %13902 = vst [vmem:[#allocation211_spill] sm:$0xff] %v12052_v55  ;;  %v8408_v11 = vpack.c.bf16 %v12050_v37, %v12052_v55 }
 0x9c5   : > { %v12056_v36 = vpop.f32.mrb[178].mxu1  ;;  %8409 = vmatprep.subr.bf16.mxu0 %v8408_v11  ;;  %8428 = vmatprep.subr.bf16.mxu1 %v8408_v11 }
 0x9c6   : > { %13903 = vst [vmem:[#allocation214_spill] sm:$0xff] %v12056_v36  ;;  %v12058_v21 = vpop.f32.mrb[179].mxu1  ;;  %8411 = vmatpush3.bf16.msra.mxu0 %v8408_v11  ;;  %8436 = vmatpush3.bf16.msra.mxu1 %v8408_v11  ;;  %v13922_v11 = vld [vmem:[#allocation11_spill] sm:$0xff] }
 0x9c7   : > { %13904 = vst [vmem:[#allocation196_spill] sm:$0xff] %v12058_v21  ;;  %v8412_v16 = vpack.c.bf16 %v12056_v36, %v12058_v21  ;;  %vm13923_vm0 = vcmp.eq.s32.totalorder %v13885_v31, %v13922_v11  ;;  %v13946_v11 = vld [vmem:[#allocation33_spill] sm:$0xff] }
 0x9c9   : > { %v12062_v17 = vpop.f32.mrb[180].mxu1  ;;  %8413 = vmatprep.subr.bf16.mxu0 %v8412_v16  ;;  %8429 = vmatprep.subr.bf16.mxu1 %v8412_v16 }
 0x9ca   : > { %13905 = vst [vmem:[#allocation213_spill] sm:$0xff] %v12062_v17  ;;  %v12064_v14 = vpop.f32.mrb[181].mxu1  ;;  %8415 = vmatpush3.bf16.msra.mxu0 %v8412_v16  ;;  %8437 = vmatpush3.bf16.msra.mxu1 %v8412_v16  ;;  %v13924_v16 = vld [vmem:[#allocation36_spill] sm:$0xff] }
 0x9cb   : > { %13906 = vst [vmem:[#allocation199_spill] sm:$0xff] %v12064_v14  ;;  %v8416_v40 = vpack.c.bf16 %v12062_v17, %v12064_v14  ;;  %vm13925_vm8 = vcmp.eq.s32.totalorder %v13885_v31, %v13924_v16  ;;  %v13948_v16 = vld [vmem:[#allocation42_spill] sm:$0xff] }
 0x9cd   : > { %v12068_v62 = vpop.f32.mrb[182].mxu1  ;;  %8417 = vmatprep.subr.bf16.mxu0 %v8416_v40  ;;  %8430 = vmatprep.subr.bf16.mxu1 %v8416_v40 }
 0x9ce   : > { %13907 = vst [vmem:[#allocation198_spill] sm:$0xff] %v12068_v62  ;;  %v12070_v2 = vpop.f32.mrb[183].mxu1  ;;  %8419 = vmatpush3.bf16.msra.mxu0 %v8416_v40  ;;  %8438 = vmatpush3.bf16.msra.mxu1 %v8416_v40  ;;  %v13926_v40 = vld [vmem:[#allocation12_spill] sm:$0xff] }
 0x9cf   : > { %13908 = vst [vmem:[#allocation219_spill] sm:$0xff] %v12070_v2  ;;  %v8420_v49 = vpack.c.bf16 %v12068_v62, %v12070_v2  ;;  %vm13927_vm10 = vcmp.eq.s32.totalorder %v13885_v31, %v13926_v40  ;;  %v13950_v40 = vld [vmem:[#allocation35_spill] sm:$0xff] }
 0x9d1   : > { %8421 = vmatprep.subr.bf16.mxu0 %v8420_v49  ;;  %8431 = vmatprep.subr.bf16.mxu1 %v8420_v49 }
 0x9d2   : > { %8423 = vmatpush3.bf16.msra.mxu0 %v8420_v49  ;;  %8439 = vmatpush3.bf16.msra.mxu1 %v8420_v49  ;;  %v13928_v49 = vld [vmem:[#allocation38_spill] sm:$0xff] }
 0x9d3   : > { %vm13929_vm12 = vcmp.eq.s32.totalorder %v13885_v31, %v13928_v49  ;;  %v13952_v49 = vld [vmem:[#allocation43_spill] sm:$0xff] }
 0x9d5   : > { %8153 = vmatmul.mubr.msk.f32.vlgmr.msra.gmra.mrb[192].mxu0 %vm1620_vm1, %v13884_v43  ;;  %8192 = vmatmul.mubr.msk.f32.vlgmr.msra.gmra.mrb[184].mxu1 %vm1646_vm3, %v13884_v43  ;;  %vm13917_vm1 = vcmp.eq.s32.totalorder %v13885_v31, %v13916_v59  ;;  %vm13919_vm3 = vcmp.eq.s32.totalorder %v13885_v31, %v13918_v25  ;;  %v13940_v59 = vld [vmem:[#allocation45_spill] sm:$0xff]  ;;  %v13942_v25 = vld [vmem:[#allocation16_spill] sm:$0xff] }
 0x9d6   : > { %8155 = vmatprep.mubr.msk.f32.mxu0 %vm1621_vm6, %v13884_v43  ;;  %8194 = vmatprep.mubr.msk.f32.mxu1 %vm13913_vm5, %v13884_v43  ;;  %vm13921_vm6 = vcmp.eq.s32.totalorder %v13885_v31, %v13920_v47  ;;  %vm13933_vm5 = vcmp.eq.s32.totalorder %v13885_v31, %v13932_v57  ;;  %v13944_v47 = vld [vmem:[#allocation15_spill] sm:$0xff]  ;;  %v13956_v57 = vld [vmem:[#allocation44_spill] sm:$0xff] }
 0x9d9   : > { %8156 = vmatmul.mubr.msk.f32.gmra.mrb[194].mxu0 %vm13915_vm11, %v13884_v43  ;;  %8195 = vmatmul.mubr.msk.f32.gmra.mrb[186].mxu1 %vm13917_vm1, %v13884_v43  ;;  %vm13935_vm11 = vcmp.eq.s32.totalorder %v13885_v31, %v13934_v30  ;;  %vm13937_vm1 = vcmp.eq.s32.totalorder %v13885_v31, %v13936_v24  ;;  %v13958_v30 = vld [vmem:[#allocation19_spill] sm:$0xff]  ;;  %v13960_v24 = vld [vmem:[#allocation46_spill] sm:$0xff] }
 0x9da   : > { %8158 = vmatprep.mubr.msk.f32.mxu0 %vm13919_vm3, %v13884_v43  ;;  %8197 = vmatprep.mubr.msk.f32.mxu1 %vm13921_vm6, %v13884_v43  ;;  %vm13939_vm3 = vcmp.eq.s32.totalorder %v13885_v31, %v13938_v60  ;;  %vm13941_vm6 = vcmp.eq.s32.totalorder %v13885_v31, %v13940_v59  ;;  %v13962_v60 = vld [vmem:[#allocation20_spill] sm:$0xff]  ;;  %v13964_v59 = vld [vmem:[#allocation17_spill] sm:$0xff] }
 0x9dd   : > { %8159 = vmatmul.mubr.msk.f32.gmra.mrb[196].mxu0 %vm13923_vm0, %v13884_v43  ;;  %8198 = vmatmul.mubr.msk.f32.gmra.mrb[188].mxu1 %vm13925_vm8, %v13884_v43  ;;  %vm13943_vm0 = vcmp.eq.s32.totalorder %v13885_v31, %v13942_v25  ;;  %vm13945_vm8 = vcmp.eq.s32.totalorder %v13885_v31, %v13944_v47  ;;  %v13966_v25 = vld [vmem:[#allocation21_spill] sm:$0xff]  ;;  %v13968_v47 = vld [vmem:[#allocation47_spill] sm:$0xff] }
 0x9de   : > { %8161 = vmatprep.mubr.msk.f32.mxu0 %vm13927_vm10, %v13884_v43  ;;  %8200 = vmatprep.mubr.msk.f32.mxu1 %vm13929_vm12, %v13884_v43  ;;  %vm13947_vm10 = vcmp.eq.s32.totalorder %v13885_v31, %v13946_v11  ;;  %vm13949_vm12 = vcmp.eq.s32.totalorder %v13885_v31, %v13948_v16  ;;  %v13970_v11 = vld [vmem:[#allocation37_spill] sm:$0xff]  ;;  %v13972_v16 = vld [vmem:[#allocation48_spill] sm:$0xff] }
 0x9e1   : > { %8162 = vmatmul.mubr.msk.f32.gmra.mrb[198].mxu0 %vm13931_vm14, %v13884_v43  ;;  %8201 = vmatmul.mubr.msk.f32.gmra.mrb[190].mxu1 %vm13933_vm5, %v13884_v43  ;;  %vm13951_vm14 = vcmp.eq.s32.totalorder %v13885_v31, %v13950_v40  ;;  %vm13953_vm5 = vcmp.eq.s32.totalorder %v13885_v31, %v13952_v49  ;;  %v13974_v40 = vld [vmem:[#allocation22_spill] sm:$0xff]  ;;  %v13976_v49 = vld [vmem:[#allocation49_spill] sm:$0xff] }
 0x9e2   : > { %8164 = vmatprep.mubr.msk.f32.mxu0 %vm13935_vm11, %v13884_v43  ;;  %8203 = vmatprep.mubr.msk.f32.mxu1 %vm13937_vm1, %v13884_v43  ;;  %vm13955_vm11 = vcmp.eq.s32.totalorder %v13885_v31, %v13954_v41  ;;  %vm13957_vm1 = vcmp.eq.s32.totalorder %v13885_v31, %v13956_v57  ;;  %v13978_v41 = vld [vmem:[#allocation39_spill] sm:$0xff]  ;;  %v13980_v57 = vld [vmem:[#allocation50_spill] sm:$0xff] }
 0x9e5   : > { %8165 = vmatmul.mubr.msk.f32.gmra.mrb[200].mxu0 %vm13939_vm3, %v13884_v43  ;;  %8204 = vmatmul.mubr.msk.f32.gmra.mrb[192].mxu1 %vm13941_vm6, %v13884_v43  ;;  %vm13959_vm3 = vcmp.eq.s32.totalorder %v13885_v31, %v13958_v30  ;;  %vm13961_vm6 = vcmp.eq.s32.totalorder %v13885_v31, %v13960_v24  ;;  %v13982_v30 = vld [vmem:[#allocation40_spill] sm:$0xff]  ;;  %v13984_v24 = vld [vmem:[#allocation54_spill] sm:$0xff] }
 0x9e6   : > { %8167 = vmatprep.mubr.msk.f32.mxu0 %vm13943_vm0, %v13884_v43  ;;  %8206 = vmatprep.mubr.msk.f32.mxu1 %vm13945_vm8, %v13884_v43  ;;  %vm13963_vm0 = vcmp.eq.s32.totalorder %v13885_v31, %v13962_v60  ;;  %vm13965_vm8 = vcmp.eq.s32.totalorder %v13885_v31, %v13964_v59  ;;  %v13986_v60 = vld [vmem:[#allocation23_spill] sm:$0xff]  ;;  %v13988_v59 = vld [vmem:[#allocation58_spill] sm:$0xff] }
 0x9e9   : > { %8168 = vmatmul.mubr.msk.f32.gmra.mrb[202].mxu0 %vm13947_vm10, %v13884_v43  ;;  %8207 = vmatmul.mubr.msk.f32.gmra.mrb[194].mxu1 %vm13949_vm12, %v13884_v43  ;;  %vm13967_vm10 = vcmp.eq.s32.totalorder %v13885_v31, %v13966_v25  ;;  %vm13969_vm12 = vcmp.eq.s32.totalorder %v13885_v31, %v13968_v47  ;;  %v13990_v25 = vld [vmem:[#allocation24_spill] sm:$0xff]  ;;  %v13992_v47 = vld [vmem:[#allocation62_spill] sm:$0xff] }
 0x9ea   : > { %8170 = vmatprep.mubr.msk.f32.mxu0 %vm13951_vm14, %v13884_v43  ;;  %8209 = vmatprep.mubr.msk.f32.mxu1 %vm13953_vm5, %v13884_v43  ;;  %vm13971_vm14 = vcmp.eq.s32.totalorder %v13885_v31, %v13970_v11  ;;  %vm13973_vm5 = vcmp.eq.s32.totalorder %v13885_v31, %v13972_v16  ;;  %v13994_v11 = vld [vmem:[#allocation25_spill] sm:$0xff]  ;;  %v13996_v16 = vld [vmem:[#allocation72_spill] sm:$0xff] }
 0x9ed   : > { %8171 = vmatmul.mubr.msk.f32.gmra.mrb[204].mxu0 %vm13955_vm11, %v13884_v43  ;;  %8210 = vmatmul.mubr.msk.f32.gmra.mrb[196].mxu1 %vm13957_vm1, %v13884_v43  ;;  %vm13975_vm11 = vcmp.eq.s32.totalorder %v13885_v31, %v13974_v40  ;;  %vm13977_vm1 = vcmp.eq.s32.totalorder %v13885_v31, %v13976_v49  ;;  %v13998_v40 = vld [vmem:[#allocation26_spill] sm:$0xff]  ;;  %v14000_v49 = vld [vmem:[#allocation69_spill] sm:$0xff] }
 0x9ee   : > { %8173 = vmatprep.mubr.msk.f32.mxu0 %vm13959_vm3, %v13884_v43  ;;  %8212 = vmatprep.mubr.msk.f32.mxu1 %vm13961_vm6, %v13884_v43  ;;  %vm13979_vm3 = vcmp.eq.s32.totalorder %v13885_v31, %v13978_v41  ;;  %vm13981_vm6 = vcmp.eq.s32.totalorder %v13885_v31, %v13980_v57  ;;  %v14003_v57 = vld [vmem:[#allocation75_spill] sm:$0xff]  ;;  %v14020_v41 = vld [vmem:[#allocation88_spill] sm:$0xff] }
 0x9f1   : > { %8174 = vmatmul.mubr.msk.f32.gmra.mrb[206].mxu0 %vm13963_vm0, %v13884_v43  ;;  %8213 = vmatmul.mubr.msk.f32.gmra.mrb[198].mxu1 %vm13965_vm8, %v13884_v43  ;;  %vm13983_vm0 = vcmp.eq.s32.totalorder %v13885_v31, %v13982_v30  ;;  %vm13985_vm8 = vcmp.eq.s32.totalorder %v13885_v31, %v13984_v24  ;;  %v14005_v30 = vld [vmem:[#allocation78_spill] sm:$0xff]  ;;  %v14007_v24 = vld [vmem:[#allocation71_spill] sm:$0xff] }
 0x9f2   : > { %8176 = vmatprep.mubr.msk.f32.mxu0 %vm13967_vm10, %v13884_v43  ;;  %8215 = vmatprep.mubr.msk.f32.mxu1 %vm13969_vm12, %v13884_v43  ;;  %vm13987_vm10 = vcmp.eq.s32.totalorder %v13885_v31, %v13986_v60  ;;  %vm13989_vm12 = vcmp.eq.s32.totalorder %v13885_v31, %v13988_v59  ;;  %v14009_v60 = vld [vmem:[#allocation73_spill] sm:$0xff]  ;;  %v14011_v59 = vld [vmem:[#allocation76_spill] sm:$0xff] }
 0x9f5   : > { %8177 = vmatmul.mubr.msk.f32.gmra.mrb[208].mxu0 %vm13971_vm14, %v13884_v43  ;;  %8216 = vmatmul.mubr.msk.f32.gmra.mrb[200].mxu1 %vm13973_vm5, %v13884_v43  ;;  %vm13991_vm14 = vcmp.eq.s32.totalorder %v13885_v31, %v13990_v25  ;;  %vm13993_vm5 = vcmp.eq.s32.totalorder %v13885_v31, %v13992_v47  ;;  %v14013_v25 = vld [vmem:[#allocation80_spill] sm:$0xff]  ;;  %v14015_v47 = vld [vmem:[#allocation82_spill] sm:$0xff] }
 0x9f6   : > { %8179 = vmatprep.mubr.msk.f32.mxu0 %vm13975_vm11, %v13884_v43  ;;  %8218 = vmatprep.mubr.msk.f32.mxu1 %vm13977_vm1, %v13884_v43  ;;  %vm13995_vm11 = vcmp.eq.s32.totalorder %v13885_v31, %v13994_v11  ;;  %vm13997_vm1 = vcmp.eq.s32.totalorder %v13885_v31, %v13996_v16  ;;  %v14017_v11 = vld [vmem:[#allocation86_spill] sm:$0xff]  ;;  %v607_v16 = vld [vmem:[%s12302_s21 + $0x8] sm:$0xff] }
 0x9f7   : > { %6344 = vperm.xlu1 %8498, %v607_v16   ;;  %v613_v16 = vld [vmem:[%s12302_s21 + $0x38] sm:$0xff] }
 0x9f9   : > { %8180 = vmatmul.mubr.msk.f32.gmra.mrb[210].mxu0 %vm13979_vm3, %v13884_v43  ;;  %8219 = vmatmul.mubr.msk.f32.gmra.mrb[202].mxu1 %vm13981_vm6, %v13884_v43  ;;  %vm13999_vm3 = vcmp.eq.s32.totalorder %v13885_v31, %v13998_v40  ;;  %vm14001_vm6 = vcmp.eq.s32.totalorder %v13885_v31, %v14000_v49  ;;  %v606_v40 = vld [vmem:[%s12302_s21] sm:$0xff]  ;;  %v615_v49 = vld [vmem:[%s12302_s21 + $0x48] sm:$0xff] }
 0x9fa   : > { %8182 = vmatprep.mubr.msk.f32.mxu0 %vm13983_vm0, %v13884_v43  ;;  %8221 = vmatprep.mubr.msk.f32.mxu1 %vm13985_vm8, %v13884_v43  ;;  %vm14004_vm0 = vcmp.eq.s32.totalorder %v13885_v31, %v14003_v57  ;;  %vm14006_vm8 = vcmp.eq.s32.totalorder %v13885_v31, %v14005_v30  ;;  %v608_v57 = vld [vmem:[%s12302_s21 + $0x10] sm:$0xff]  ;;  %v609_v30 = vld [vmem:[%s12302_s21 + $0x18] sm:$0xff] }
 0x9fb   : > { %6339 = vperm.xlu0 %8497, %v606_v40   ;;  %6349 = vperm.xlu1 %8498, %v608_v57   ;;  %v614_v40 = vld [vmem:[%s12302_s21 + $0x40] sm:$0xff]  ;;  %v617_v57 = vld [vmem:[%s12302_s21 + $0x58] sm:$0xff] }
 0x9fd   : > { %8183 = vmatmul.mubr.msk.f32.gmra.mrb[212].mxu0 %vm13987_vm10, %v13884_v43  ;;  %8222 = vmatmul.mubr.msk.f32.gmra.mrb[204].mxu1 %vm13989_vm12, %v13884_v43  ;;  %vm14008_vm10 = vcmp.eq.s32.totalorder %v13885_v31, %v14007_v24  ;;  %vm14010_vm12 = vcmp.eq.s32.totalorder %v13885_v31, %v14009_v60  ;;  %v619_v24 = vld [vmem:[%s12302_s21 + $0x68] sm:$0xff]  ;;  %v620_v60 = vld [vmem:[%s12302_s21 + $0x70] sm:$0xff] }
 0x9fe   : > { %8185 = vmatprep.mubr.msk.f32.mxu0 %vm13991_vm14, %v13884_v43  ;;  %8224 = vmatprep.mubr.msk.f32.mxu1 %vm13993_vm5, %v13884_v43  ;;  %vm14014_vm14 = vcmp.eq.s32.totalorder %v13885_v31, %v14013_v25  ;;  %vm14016_vm5 = vcmp.eq.s32.totalorder %v13885_v31, %v14015_v47  ;;  %v611_v25 = vld [vmem:[%s12302_s21 + $0x28] sm:$0xff] }
 0x9ff   : > { %6354 = vperm.xlu0 %8497, %v609_v30   ;;  %v12340_v30 = vpop.permute.xlu1 %5891 }
 0xa01   : > { %8186 = vmatmul.mubr.msk.f32.gmra.mrb[214].mxu0 %vm13995_vm11, %v13884_v43  ;;  %8225 = vmatmul.mubr.msk.f32.gmra.mrb[206].mxu1 %vm13997_vm1, %v13884_v43  ;;  %vm14018_vm11 = vcmp.eq.s32.totalorder %v13885_v31, %v14017_v11  ;;  %vm14021_vm1 = vcmp.eq.s32.totalorder %v13885_v31, %v14020_v41  ;;  %v612_v11 = vld [vmem:[%s12302_s21 + $0x30] sm:$0xff] }
 0xa02   : > { %8188 = vmatprep.mubr.msk.f32.mxu0 %vm13999_vm3, %v13884_v43  ;;  %8227 = vmatprep.mubr.msk.f32.mxu1 %vm14001_vm6, %v13884_v43  ;;  %v616_v41 = vld [vmem:[%s12302_s21 + $0x50] sm:$0xff] }
 0xa03   : > { %6364 = vperm.xlu0 %8497, %v611_v25   ;;  %v12348_v25 = vpop.permute.xlu1 %5895 }
 0xa05   : > { %8189 = vmatmul.mubr.msk.f32.gmra.mrb[216].mxu0 %vm1644_vm15, %v13884_v43  ;;  %8228 = vmatmul.mubr.msk.f32.gmra.mrb[208].mxu1 %vm14004_vm0, %v13884_v43  ;;  %vm14012_vm15 = vcmp.eq.s32.totalorder %v13885_v31, %v14011_v59  ;;  %v610_v59 = vld [vmem:[%s12302_s21 + $0x20] sm:$0xff]  ;;  %v12342_v31 = vpop.permute.xlu0 %5889 }
 0xa06   : > { %8230 = vmatprep.mubr.msk.f32.mxu1 %vm14006_vm8, %v13884_v43  ;;  %6359 = vperm.xlu1 %8498, %v610_v59   ;;  %v621_v59 = vld [vmem:[%s12302_s21 + $0x78] sm:$0xff] }
 0xa07   : > { %6374 = vperm.xlu0 %8497, %v613_v16  }
 0xa09   : > { %8231 = vmatmul.mubr.msk.f32.gmra.mrb[210].mxu1 %vm14008_vm10, %v13884_v43  ;;  %v12350_v47 = vpop.permute.xlu0 %5893 }
 0xa0a   : > { %8233 = vmatprep.mubr.msk.f32.mxu1 %vm14010_vm12, %v13884_v43  ;;  %6369 = vperm.xlu1 %8498, %v612_v11   ;;  %v12352_v11 = vpop.permute.xlu1 %5899 }
 0xa0b   : > { %6384 = vperm.xlu0 %8497, %v615_v49  }
 0xa0d   : > { %8234 = vmatmul.mubr.msk.f32.gmra.mrb[212].mxu1 %vm14012_vm15, %v13884_v43  ;;  %v12354_v16 = vpop.permute.xlu0 %5897 }
 0xa0e   : > { %8236 = vmatprep.mubr.msk.f32.mxu1 %vm14014_vm14, %v13884_v43  ;;  %6379 = vperm.xlu1 %8498, %v614_v40   ;;  %v12356_v40 = vpop.permute.xlu1 %5903 }
 0xa0f   : > { %6394 = vperm.xlu0 %8497, %v617_v57  }
 0xa11   : > { %8237 = vmatmul.mubr.msk.f32.gmra.mrb[214].mxu1 %vm14016_vm5, %v13884_v43  ;;  %v12358_v49 = vpop.permute.xlu0 %5901 }
 0xa12   : > { %8239 = vmatprep.mubr.msk.f32.mxu1 %vm14018_vm11, %v13884_v43  ;;  %6389 = vperm.xlu1 %8498, %v616_v41   ;;  %v12360_v41 = vpop.permute.xlu1 %5907 }
 0xa13   : > { %6404 = vperm.xlu0 %8497, %v619_v24   ;;  %14025 = vst [vmem:[#allocation218_spill] sm:$0xff] %v12360_v41 }
 0xa15   : > { %8240 = vmatmul.mubr.msk.f32.gmra.mrb[216].mxu1 %vm1678_vm9, %v13884_v43  ;;  %v12362_v57 = vpop.permute.xlu0 %5905 }
 0xa16   : > { %8242 = vmatprep.mubr.msk.f32.mxu1 %vm14021_vm1, %v13884_v43  ;;  %14026 = vst [vmem:[#allocation203_spill] sm:$0xff] %v12362_v57 }
 0xa17   : > { %6414 = vperm.xlu0 %8497, %v621_v59  }
 0xa19   : > { %8243 = vmatmul.mubr.msk.f32.gmra.mrb[218].mxu1 %vm1680_vm2, %v13884_v43  ;;  %v12366_v24 = vpop.permute.xlu0 %5909 }
 0xa1a   : > { %8245 = vmatprep.mubr.msk.f32.mxu1 %vm1681_vm13, %v13884_v43 }
 0xa1d   : > { %8246 = vmatmul.mubr.msk.f32.gmra.mrb[220].mxu1 %vm1682_vm7, %v13884_v43  ;;  %v618_v43 = vld [vmem:[%s12302_s21 + $0x60] sm:$0xff] }
 0xa1e   : > { %6399 = vperm.xlu1 %8498, %v618_v43   ;;  %v12364_v43 = vpop.permute.xlu1 %5911 }
 0xa22   : > { %6409 = vperm.xlu1 %8498, %v620_v60   ;;  %v12368_v62 = vpop.permute.xlu1 %5915  ;;  %v12370_v60 = vpop.permute.xlu0 %5913 }
 0xa26   : > { %v12372_v59 = vpop.permute.xlu1 %5919  ;;  %v12374_v2 = vpop.permute.xlu0 %5917 }
 0xa27   : > { %14027 = vst [vmem:[#allocation222_spill] sm:$0xff] %v12372_v59  ;;  %14028 = vst [vmem:[#allocation202_spill] sm:$0xff] %v12374_v2 }
 0xa2a   : > { %v12376_v17 = vpop.permute.xlu1 %5923  ;;  %v12378_v14 = vpop.permute.xlu0 %5921 }
 0xa2b   : > { %14029 = vst [vmem:[#allocation221_spill] sm:$0xff] %v12376_v17  ;;  %14030 = vst [vmem:[#allocation172_spill] sm:$0xff] %v12378_v14 }
 0xa2e   : > { %v12380_v36 = vpop.permute.xlu1 %5927  ;;  %v12382_v21 = vpop.permute.xlu0 %5925 }
 0xa2f   : > { %14031 = vst [vmem:[#allocation166_spill] sm:$0xff] %v12380_v36  ;;  %14032 = vst [vmem:[#allocation205_spill] sm:$0xff] %v12382_v21 }
 0xa32   : > { %v12384_v37 = vpop.permute.xlu1 %5931  ;;  %v12386_v55 = vpop.permute.xlu0 %5929 }
 0xa33   : > { %14033 = vst [vmem:[#allocation173_spill] sm:$0xff] %v12384_v37  ;;  %14034 = vst [vmem:[#allocation185_spill] sm:$0xff] %v12386_v55 }
 0xa36   : > { %v12388_v61 = vpop.permute.xlu1 %5935  ;;  %v12390_v26 = vpop.permute.xlu0 %5933 }
 0xa37   : > { %14035 = vst [vmem:[#allocation204_spill] sm:$0xff] %v12388_v61  ;;  %14036 = vst [vmem:[#allocation168_spill] sm:$0xff] %v12390_v26 }
 0xa3a   : > { %v12392_v1 = vpop.permute.xlu1 %5939  ;;  %v12394_v3 = vpop.permute.xlu0 %5937 }
 0xa3b   : > { %14037 = vst [vmem:[#allocation183_spill] sm:$0xff] %v12392_v1  ;;  %14038 = vst [vmem:[#allocation181_spill] sm:$0xff] %v12394_v3 }
 0xa3e   : > { %v5944_v32 = vpop.permute.xlu1 %5943  ;;  %v5942_v4 = vpop.permute.xlu0 %5941 }
 0xa42   : > { %v5948_v39 = vpop.permute.xlu1 %5947  ;;  %v5946_v8 = vpop.permute.xlu0 %5945 }
 0xa46   : > { %v5952_v63 = vpop.permute.xlu1 %5951  ;;  %v12396_v45 = vpop.permute.xlu0 %5949 }
 0xa4a   : > { %v12398_v0 = vpop.permute.xlu1 %5955  ;;  %v12400_v6 = vpop.permute.xlu0 %5953 }
 0xa4e   : > { %v12402_v28 = vpop.permute.xlu1 %5959  ;;  %v12404_v12 = vpop.permute.xlu0 %5957 }
 0xa4f   : > { %14039 = vst [vmem:[#allocation187_spill] sm:$0xff] %v12402_v28  ;;  %14040 = vst [vmem:[#allocation193_spill] sm:$0xff] %v12404_v12 }
 0xa52   : > { %v12406_v44 = vpop.permute.xlu1 %5963  ;;  %v12408_v5 = vpop.permute.xlu0 %5961 }
 0xa53   : > { %14041 = vst [vmem:[#allocation207_spill] sm:$0xff] %v12406_v44  ;;  %14042 = vst [vmem:[#allocation227_spill] sm:$0xff] %v12408_v5 }
 0xa56   : > { %v12410_v22 = vpop.permute.xlu1 %5967  ;;  %v12412_v52 = vpop.permute.xlu0 %5965 }
 0xa57   : > { %14043 = vst [vmem:[#allocation228_spill] sm:$0xff] %v12410_v22  ;;  %14044 = vst [vmem:[#allocation229_spill] sm:$0xff] %v12412_v52 }
 0xa5a   : > { %v12414_v54 = vpop.permute.xlu1 %5971  ;;  %v12416_v23 = vpop.permute.xlu0 %5969 }
 0xa5b   : > { %14045 = vst [vmem:[#allocation230_spill] sm:$0xff] %v12414_v54  ;;  %14046 = vst [vmem:[#allocation231_spill] sm:$0xff] %v12416_v23 }
 0xa5e   : > { %v12418_v15 = vpop.permute.xlu1 %5975  ;;  %v12420_v10 = vpop.permute.xlu0 %5973 }
 0xa5f   : > { %14047 = vst [vmem:[#allocation232_spill] sm:$0xff] %v12418_v15  ;;  %14048 = vst [vmem:[#allocation233_spill] sm:$0xff] %v12420_v10 }
 0xa62   : > { %v12422_v21 = vpop.permute.xlu1 %5979  ;;  %v12424_v22 = vpop.permute.xlu0 %5977 }
 0xa63   : > { %14049 = vst [vmem:[#allocation234_spill] sm:$0xff] %v12422_v21  ;;  %14050 = vst [vmem:[#allocation235_spill] sm:$0xff] %v12424_v22 }
 0xa66   : > { %v12426_v17 = vpop.permute.xlu1 %5983  ;;  %v12428_v41 = vpop.permute.xlu0 %5981 }
 0xa67   : > { %14051 = vst [vmem:[#allocation236_spill] sm:$0xff] %v12426_v17  ;;  %14052 = vst [vmem:[#allocation237_spill] sm:$0xff] %v12428_v41 }
 0xaa8   : > { %v8154_v3 = vpop.f32.mrb[192].mxu0  ;;  %v8193_v1 = vpop.f32.mrb[184].mxu1 }
 0xaa9   : > { %v5506_v42 = vpop.f32.mrb[193].mxu0  ;;  %v5636_v26 = vpop.f32.mrb[185].mxu1  ;;  %v6082_v21 = vmul.f32 %v8154_v3, %v12340_v30  ;;  %v6108_v28 = vmul.f32 %v8193_v1, %v5944_v32 }
 0xaaa   : > { %v6081_v2 = vmul.f32 %v12342_v31, %v5506_v42  ;;  %v6107_v34 = vmul.f32 %v5942_v4, %v5636_v26  ;;  %v12449_v4 = vpop.permute.xlu1 %5987 }
 0xaab   : > { %v12440_v41 = vmul.f32 %v6082_v21, %v10299_v35  ;;  %v6172_v3 = vmul.f32 %v6108_v28, %v13745_v19 }
 0xaac   : > { %v8157_v61 = vpop.f32.mrb[194].mxu0  ;;  %v8196_v9 = vpop.f32.mrb[186].mxu1  ;;  %v12445_v30 = vmul.f32 %v6081_v2, %v10297_v13  ;;  %v6171_v42 = vmul.f32 %v6107_v34, %v13748_v58 }
 0xaad   : > { %v5516_v55 = vpop.f32.mrb[195].mxu0  ;;  %v5646_v37 = vpop.f32.mrb[187].mxu1  ;;  %v6084_v53 = vmul.f32 %v8157_v61, %v12348_v25  ;;  %v6110_v59 = vmul.f32 %v8196_v9, %v5948_v39 }
 0xaae   : > { %v12451_v9 = vpop.permute.xlu0 %5985  ;;  %v6109_v39 = vmul.f32 %v5946_v8, %v5646_v37 }
 0xaaf   : > { %v12454_v35 = vmul.f32 %v6084_v53, %v10393_v38  ;;  %v6174_v19 = vmul.f32 %v6110_v59, %v13473_v20 }
 0xab0   : > { %v8160_v52 = vpop.f32.mrb[196].mxu0  ;;  %v8199_v54 = vpop.f32.mrb[188].mxu1 }
 0xab1   : > { %v5526_v36 = vpop.f32.mrb[197].mxu0  ;;  %v5656_v23 = vpop.f32.mrb[189].mxu1  ;;  %v6086_v13 = vmul.f32 %v8160_v52, %v12352_v11  ;;  %v6112_v28 = vmul.f32 %v8199_v54, %v5952_v63  ;;  %v6173_v54 = vmul.f32 %v6109_v39, %v13751_v18  ;;  %v14056_v18 = vld [vmem:[#allocation226_spill] sm:$0xff] }
 0xab2   : > { %v6085_v61 = vmul.f32 %v12354_v16, %v5526_v36  ;;  %v6111_v38 = vmul.f32 %v12396_v45, %v5656_v23  ;;  %v14060_v11 = vld [vmem:[#allocation202_spill] sm:$0xff] }
 0xab3   : > { %v12478_v63 = vmul.f32 %v6086_v13, %v10441_v46  ;;  %v14066_v39 = vld [vmem:[#allocation110_spill] sm:$0xff] }
 0xab4   : > { %v8163_v14 = vpop.f32.mrb[198].mxu0  ;;  %v8202_v57 = vpop.f32.mrb[190].mxu1  ;;  %v6175_v2 = vmul.f32 %v6111_v38, %v14056_v18 }
 0xab5   : > { %v5536_v15 = vpop.f32.mrb[199].mxu0  ;;  %v5666_v10 = vpop.f32.mrb[191].mxu1  ;;  %v6088_v20 = vmul.f32 %v8163_v14, %v12356_v40  ;;  %v6114_v52 = vmul.f32 %v8202_v57, %v12398_v0  ;;  %v14061_v57 = vld [vmem:[#allocation138_spill] sm:$0xff] }
 0xab6   : > { %v6087_v23 = vmul.f32 %v12358_v49, %v5536_v15  ;;  %v6113_v36 = vmul.f32 %v12400_v6, %v5666_v10  ;;  %v14059_v10 = vld [vmem:[#allocation112_spill] sm:$0xff]  ;;  %v12501_v40 = vpop.permute.xlu1 %5991  ;;  %v12503_v49 = vpop.permute.xlu0 %5989 }
 0xab8   : > { %v12430_v5 = vpop.f32.mrb[200].mxu0  ;;  %v12432_v44 = vpop.f32.mrb[192].mxu1 }
 0xab9   : > { %14053 = vst [vmem:[#allocation238_spill] sm:$0xff] %v12430_v5  ;;  %14054 = vst [vmem:[#allocation239_spill] sm:$0xff] %v12432_v44  ;;  %v12435_v12 = vpop.f32.mrb[201].mxu0  ;;  %v5676_v22 = vpop.f32.mrb[193].mxu1 }
 0xabc   : > { %v8169_v27 = vpop.f32.mrb[202].mxu0  ;;  %v8208_v17 = vpop.f32.mrb[194].mxu1 }
 0xabd   : > { %v6092_v5 = vmul.f32 %v8169_v27, %v12364_v43  ;;  %v5556_v44 = vpop.f32.mrb[203].mxu0  ;;  %v5686_v48 = vpop.f32.mrb[195].mxu1  ;;  %v6083_v27 = vmul.f32 %v12350_v47, %v5516_v55  ;;  %v6176_v55 = vmul.f32 %v6112_v28, %v10861_v29  ;;  %v14058_v29 = vld [vmem:[#allocation144_spill] sm:$0xff]  ;;  %v12506_v43 = vmul.f32 %v6087_v23, %v14061_v57  ;;  %v14068_v28 = vld [vmem:[#allocation227_spill] sm:$0xff] }
 0xabe   : > { %v6091_v32 = vmul.f32 %v12366_v24, %v5556_v44  ;;  %v12495_v47 = vmul.f32 %v6088_v20, %v14058_v29  ;;  %v14062_v24 = vld [vmem:[#allocation187_spill] sm:$0xff]  ;;  %v14080_v57 = vld [vmem:[#allocation180_spill] sm:$0xff] }
 0xabf   : > { %v6156_v1 = vmul.f32 %v6092_v5, %v13742_v51 }
 0xac0   : > { %v6155_v34 = vmul.f32 %v6091_v32, %v13743_v56  ;;  %v8172_v58 = vpop.f32.mrb[204].mxu0  ;;  %v12461_v44 = vpop.f32.mrb[196].mxu1  ;;  %v12472_v56 = vmul.f32 %v6083_v27, %v10347_v7  ;;  %v14055_v7 = vld [vmem:[#allocation125_spill] sm:$0xff]  ;;  %v14065_v32 = vld [vmem:[#allocation208_spill] sm:$0xff]  ;;  %v14071_v20 = vld [vmem:[#allocation238_spill] sm:$0xff] }
 0xac1   : > { %v6220_v53 = vadd.f32 %v6172_v3, %v6156_v1  ;;  %v6094_v26 = vmul.f32 %v8172_v58, %v12368_v62  ;;  %v5566_v8 = vpop.f32.mrb[205].mxu0  ;;  %v12466_v37 = vpop.f32.mrb[197].mxu1  ;;  %v12486_v62 = vmul.f32 %v6085_v61, %v14055_v7  ;;  %v14064_v3 = vld [vmem:[#allocation193_spill] sm:$0xff]  ;;  %v6177_v1 = vmul.f32 %v6113_v36, %v14066_v39  ;;  %v14069_v58 = vld [vmem:[#allocation224_spill] sm:$0xff]  ;;  %v14074_v36 = vld [vmem:[#allocation203_spill] sm:$0xff] }
 0xac2   : > { %v6219_v5 = vadd.f32 %v6171_v42, %v6155_v34  ;;  %v6093_v51 = vmul.f32 %v12370_v60, %v5566_v8  ;;  %v14063_v60 = vld [vmem:[#allocation239_spill] sm:$0xff]  ;;  %v6115_v42 = vmul.f32 %v14064_v3, %v5676_v22  ;;  %v6117_v34 = vmul.f32 %v14068_v28, %v5686_v48  ;;  %v14070_v8 = vld [vmem:[#allocation218_spill] sm:$0xff]  ;;  %v14073_v22 = vld [vmem:[#allocation232_spill] sm:$0xff] }
 0xac3   : > { %v6158_v45 = vmul.f32 %v6094_v26, %v13472_v33  ;;  %v14057_v33 = vld [vmem:[#allocation222_spill] sm:$0xff]  ;;  %v6116_v59 = vmul.f32 %v14063_v60, %v14062_v24  ;;  %v14075_v7 = vld [vmem:[#allocation172_spill] sm:$0xff]  ;;  %v14081_v60 = vld [vmem:[#allocation137_spill] sm:$0xff] }
 0xac4   : > { %v6157_v0 = vmul.f32 %v6093_v51, %v13750_v50  ;;  %v8175_v21 = vpop.f32.mrb[206].mxu0  ;;  %v12483_v14 = vpop.f32.mrb[198].mxu1  ;;  %v6178_v50 = vmul.f32 %v6114_v52, %v14059_v10  ;;  %v12518_v52 = vmul.f32 %v14071_v20, %v14070_v8  ;;  %v14078_v10 = vld [vmem:[#allocation122_spill] sm:$0xff]  ;;  %v14084_v39 = vld [vmem:[#allocation177_spill] sm:$0xff] }
 0xac5   : > { %v12489_v15 = vadd.f32 %v6174_v19, %v6158_v45  ;;  %v6096_v31 = vmul.f32 %v8175_v21, %v14057_v33  ;;  %v5576_v46 = vpop.f32.mrb[207].mxu0  ;;  %v12492_v25 = vpop.f32.mrb[199].mxu1  ;;  %v14067_v19 = vld [vmem:[#allocation207_spill] sm:$0xff]  ;;  %v14076_v33 = vld [vmem:[#allocation233_spill] sm:$0xff] }
 0xac6   : > { %v12498_v6 = vadd.f32 %v6173_v54, %v6157_v0  ;;  %v6095_v16 = vmul.f32 %v14060_v11, %v5576_v46  ;;  %v6118_v13 = vmul.f32 %v8208_v17, %v14067_v19  ;;  %v14072_v54 = vld [vmem:[#allocation221_spill] sm:$0xff]  ;;  %v12524_v17 = vmul.f32 %v14074_v36, %v12435_v12  ;;  %v14077_v46 = vld [vmem:[#allocation124_spill] sm:$0xff]  ;;  %v12552_v36 = vpop.permute.xlu0 %5993 }
 0xac7   : > { %v6160_v27 = vmul.f32 %v6096_v31, %v14065_v32  ;;  %v6180_v29 = vmul.f32 %v6116_v59, %v14077_v46  ;;  %v6179_v11 = vmul.f32 %v6115_v42, %v14078_v10  ;;  %v14082_v32 = vld [vmem:[#allocation135_spill] sm:$0xff]  ;;  %v14083_v12 = vld [vmem:[#allocation105_spill] sm:$0xff]  ;;  %v14085_v42 = vld [vmem:[#allocation166_spill] sm:$0xff] }
 0xac8   : > { %v6159_v61 = vmul.f32 %v6095_v16, %v14069_v58  ;;  %v8178_v38 = vpop.f32.mrb[208].mxu0  ;;  %v8217_v26 = vpop.f32.mrb[200].mxu1  ;;  %v12533_v3 = vmul.f32 %v6118_v13, %v14081_v60  ;;  %v14093_v10 = vld [vmem:[#allocation114_spill] sm:$0xff] }
 0xac9   : > { %v6224_v51 = vadd.f32 %v6176_v55, %v6160_v27  ;;  %v6098_v23 = vmul.f32 %v8178_v38, %v14072_v54  ;;  %v6124_v45 = vmul.f32 %v8217_v26, %v14073_v22  ;;  %v5586_v0 = vpop.f32.mrb[209].mxu0  ;;  %v5716_v21 = vpop.f32.mrb[201].mxu1  ;;  %v14079_v55 = vld [vmem:[#allocation109_spill] sm:$0xff]  ;;  %v12536_v27 = vmul.f32 %v6117_v34, %v14082_v32  ;;  %v14086_v26 = vld [vmem:[#allocation234_spill] sm:$0xff] }
 0xaca   : > { %v6223_v48 = vadd.f32 %v6175_v2, %v6159_v61  ;;  %v6097_v18 = vmul.f32 %v14075_v7, %v5586_v0  ;;  %v6123_v31 = vmul.f32 %v14076_v33, %v5716_v21  ;;  %v12550_v21 = vpop.permute.xlu1 %5995  ;;  %v14090_v7 = vld [vmem:[#allocation118_spill] sm:$0xff]  ;;  %v14091_v33 = vld [vmem:[#allocation223_spill] sm:$0xff] }
 0xacb   : > { %v6162_v16 = vmul.f32 %v6098_v23, %v14079_v55  ;;  %v6188_v24 = vmul.f32 %v6124_v45, %v14080_v57  ;;  %v14087_v23 = vld [vmem:[#allocation205_spill] sm:$0xff]  ;;  %v14088_v45 = vld [vmem:[#allocation235_spill] sm:$0xff] }
 0xacc   : > { %v6161_v2 = vmul.f32 %v6097_v18, %v14083_v12  ;;  %v6187_v19 = vmul.f32 %v6123_v31, %v14084_v39  ;;  %v8181_v28 = vpop.f32.mrb[210].mxu0  ;;  %v8220_v58 = vpop.f32.mrb[202].mxu1 }
 0xacd   : > { %v6210_v59 = vadd.f32 %v6162_v16, %v12440_v41  ;;  %v12541_v61 = vadd.f32 %v6220_v53, %v6188_v24  ;;  %v6100_v38 = vmul.f32 %v8181_v28, %v14085_v42  ;;  %v6126_v8 = vmul.f32 %v8220_v58, %v14086_v26  ;;  %v5596_v20 = vpop.f32.mrb[211].mxu0  ;;  %v5726_v13 = vpop.f32.mrb[203].mxu1  ;;  %v14089_v41 = vld [vmem:[#allocation228_spill] sm:$0xff]  ;;  %v14097_v42 = vld [vmem:[#allocation185_spill] sm:$0xff] }
 0xace   : > { %v6209_v54 = vadd.f32 %v6161_v2, %v12445_v30  ;;  %v12546_v34 = vadd.f32 %v6219_v5, %v6187_v19  ;;  %v6099_v22 = vmul.f32 %v14087_v23, %v5596_v20  ;;  %v6125_v0 = vmul.f32 %v14088_v45, %v5726_v13  ;;  %v14092_v30 = vld [vmem:[#allocation229_spill] sm:$0xff]  ;;  %v14094_v16 = vld [vmem:[#allocation216_spill] sm:$0xff]  ;;  %v14100_v20 = vld [vmem:[#allocation131_spill] sm:$0xff] }
 0xacf   : > { %v6120_v53 = vmul.f32 %v12461_v44, %v14089_v41  ;;  %v6164_v18 = vmul.f32 %v6100_v38, %v14090_v7  ;;  %v6190_v31 = vmul.f32 %v6126_v8, %v14091_v33  ;;  %v6226_v46 = vadd.f32 %v6210_v59, %v6178_v50  ;;  %v14095_v44 = vld [vmem:[#allocation173_spill] sm:$0xff]  ;;  %v14096_v19 = vld [vmem:[#allocation236_spill] sm:$0xff]  ;;  %v14099_v8 = vld [vmem:[#allocation151_spill] sm:$0xff] }
 0xad0   : > { %v6119_v5 = vmul.f32 %v14092_v30, %v12466_v37  ;;  %v6163_v55 = vmul.f32 %v6099_v22, %v14093_v10  ;;  %v6189_v57 = vmul.f32 %v6125_v0, %v14094_v16  ;;  %v8184_v24 = vpop.f32.mrb[212].mxu0  ;;  %v8223_v60 = vpop.f32.mrb[204].mxu1  ;;  %v6225_v32 = vadd.f32 %v6209_v54, %v6177_v1  ;;  %v14098_v26 = vld [vmem:[#allocation237_spill] sm:$0xff]  ;;  %v14101_v13 = vld [vmem:[#allocation244_spill] sm:$0xff]  ;;  %v14103_v0 = vld [vmem:[#allocation127_spill] sm:$0xff] }
 0xad1   : > { %v6212_v12 = vadd.f32 %v6164_v18, %v12454_v35  ;;  %v12564_v2 = vadd.f32 %v12489_v15, %v6190_v31  ;;  %v6102_v39 = vmul.f32 %v8184_v24, %v14095_v44  ;;  %v6128_v28 = vmul.f32 %v8223_v60, %v14096_v19  ;;  %v5606_v50 = vpop.f32.mrb[213].mxu0  ;;  %v5736_v58 = vpop.f32.mrb[205].mxu1  ;;  %v14102_v22 = vld [vmem:[#allocation149_spill] sm:$0xff]  ;;  %v14104_v7 = vld [vmem:[#allocation246_spill] sm:$0xff]  ;;  %v14105_v10 = vld [vmem:[#allocation204_spill] sm:$0xff] }
 0xad2   : > { %v6211_v37 = vadd.f32 %v6163_v55, %v12472_v56  ;;  %v12570_v59 = vadd.f32 %v12498_v6, %v6189_v57  ;;  %v6101_v38 = vmul.f32 %v14097_v42, %v5606_v50  ;;  %v6127_v1 = vmul.f32 %v14098_v26, %v5736_v58  ;;  %v14106_v24 = vld [vmem:[#allocation168_spill] sm:$0xff]  ;;  %v6000_v44 = vpop.permute.xlu1 %5999  ;;  %v14110_v58 = vld [vmem:[#allocation231_spill] sm:$0xff] }
 0xad3   : > { %v6184_v35 = vmul.f32 %v6120_v53, %v14099_v8  ;;  %v6166_v15 = vmul.f32 %v6102_v39, %v14100_v20  ;;  %v6192_v54 = vmul.f32 %v6128_v28, %v14101_v13  ;;  %v6228_v23 = vadd.f32 %v6212_v12, %v6180_v29  ;;  %v14107_v39 = vld [vmem:[#allocation230_spill] sm:$0xff]  ;;  %v14109_v28 = vld [vmem:[#allocation120_spill] sm:$0xff]  ;;  %v14113_v20 = vld [vmem:[#allocation183_spill] sm:$0xff] }
 0xad4   : > { %v6183_v45 = vmul.f32 %v6119_v5, %v14102_v22  ;;  %v6165_v41 = vmul.f32 %v6101_v38, %v14103_v0  ;;  %v6191_v56 = vmul.f32 %v6127_v1, %v14104_v7  ;;  %v8187_v18 = vpop.f32.mrb[214].mxu0  ;;  %v8226_v6 = vpop.f32.mrb[206].mxu1  ;;  %v6227_v33 = vadd.f32 %v6211_v37, %v6179_v11  ;;  %v14112_v42 = vld [vmem:[#allocation116_spill] sm:$0xff]  ;;  %v14114_v0 = vld [vmem:[#allocation181_spill] sm:$0xff] }
 0xad5   : > { %v6214_v31 = vadd.f32 %v6166_v15, %v12478_v63  ;;  %v12581_v30 = vadd.f32 %v6224_v51, %v6192_v54  ;;  %v6104_v53 = vmul.f32 %v8187_v18, %v14105_v10  ;;  %v6130_v55 = vmul.f32 %v8226_v6, %v12449_v4  ;;  %v5616_v16 = vpop.f32.mrb[215].mxu0  ;;  %v5746_v57 = vpop.f32.mrb[207].mxu1  ;;  %v14108_v51 = vld [vmem:[#allocation145_spill] sm:$0xff] }
 0xad6   : > { %v6213_v29 = vadd.f32 %v6165_v41, %v12486_v62  ;;  %v12586_v5 = vadd.f32 %v6223_v48, %v6191_v56  ;;  %v6103_v60 = vmul.f32 %v14106_v24, %v5616_v16  ;;  %v6129_v12 = vmul.f32 %v12451_v9, %v5746_v57  ;;  %v5998_v11 = vpop.permute.xlu0 %5997  ;;  %v14111_v48 = vld [vmem:[#allocation140_spill] sm:$0xff]  ;;  %v14115_v56 = vld [vmem:[#allocation158_spill] sm:$0xff]  ;;  %v14121_v57 = vld [vmem:[#allocation165_spill] sm:$0xff] }
 0xad7   : > { %v6122_v63 = vmul.f32 %v12483_v14, %v14107_v39  ;;  %v6168_v19 = vmul.f32 %v6104_v53, %v14108_v51  ;;  %v6194_v50 = vmul.f32 %v6130_v55, %v14109_v28  ;;  %v6230_v4 = vadd.f32 %v6214_v31, %v12533_v3  ;;  %v14119_v53 = vld [vmem:[#allocation154_spill] sm:$0xff]  ;;  %v6004_v39 = vpop.permute.xlu1 %6003 }
 0xad8   : > { %v6121_v62 = vmul.f32 %v14110_v58, %v12492_v25  ;;  %v6167_v37 = vmul.f32 %v6103_v60, %v14111_v48  ;;  %v6193_v38 = vmul.f32 %v6129_v12, %v14112_v42  ;;  %v8190_v26 = vpop.f32.mrb[216].mxu0  ;;  %v8229_v9 = vpop.f32.mrb[208].mxu1  ;;  %v6229_v1 = vadd.f32 %v6213_v29, %v12536_v27  ;;  %v14116_v27 = vld [vmem:[#allocation159_spill] sm:$0xff]  ;;  %v14124_v42 = vld [vmem:[#allocation142_spill] sm:$0xff] }
 0xad9   : > { %v6216_v8 = vadd.f32 %v6168_v19, %v12495_v47  ;;  %v6242_v14 = vadd.f32 %v6226_v46, %v6194_v50  ;;  %v6106_v15 = vmul.f32 %v8190_v26, %v14113_v20  ;;  %v6132_v13 = vmul.f32 %v8229_v9, %v12501_v40  ;;  %v5626_v54 = vpop.f32.mrb[217].mxu0  ;;  %v5756_v3 = vpop.f32.mrb[209].mxu1  ;;  %v14117_v47 = vld [vmem:[#allocation133_spill] sm:$0xff]  ;;  %v14118_v40 = vld [vmem:[#allocation152_spill] sm:$0xff]  ;;  %v14123_v58 = vld [vmem:[#allocation147_spill] sm:$0xff] }
 0xada   : > { %v6215_v22 = vadd.f32 %v6167_v37, %v12506_v43  ;;  %v6241_v25 = vadd.f32 %v6225_v32, %v6193_v38  ;;  %v6105_v41 = vmul.f32 %v14114_v0, %v5626_v54  ;;  %v6131_v7 = vmul.f32 %v12503_v49, %v5756_v3  ;;  %v14120_v32 = vld [vmem:[#allocation129_spill] sm:$0xff]  ;;  %v6002_v50 = vpop.permute.xlu0 %6001 }
 0xadb   : > { %v6154_v18 = vmul.f32 %v12518_v52, %v14115_v56  ;;  %v6170_v6 = vmul.f32 %v6106_v15, %v14116_v27  ;;  %v6196_v46 = vmul.f32 %v6132_v13, %v14117_v47  ;;  %6275 = vrot.lane.b32.xlu1 %v6242_v14, %s8549_s24  ;;  %v6232_v31 = vadd.f32 %v6216_v8, %v6184_v35  ;;  %v14122_v35 = vld [vmem:[#allocation163_spill] sm:$0xff]  ;;  %v14126_v14 = vld [vmem:[#allocation156_spill] sm:$0xff] }
 0xadc   : > { %v6153_v10 = vmul.f32 %v12524_v17, %v14118_v40  ;;  %v6169_v43 = vmul.f32 %v6105_v41, %v14119_v53  ;;  %v6195_v55 = vmul.f32 %v6131_v7, %v14120_v32  ;;  %v8232_v16 = vpop.f32.mrb[210].mxu1  ;;  %6273 = vrot.lane.b32.xlu0 %v6241_v25, %s8549_s24  ;;  %v6231_v49 = vadd.f32 %v6215_v22, %v6183_v45 }
 0xadd   : > { %v6186_v52 = vmul.f32 %v6122_v63, %v14121_v57  ;;  %v6218_v29 = vadd.f32 %v6170_v6, %v6154_v18  ;;  %v6244_v24 = vadd.f32 %v6228_v23, %v6196_v46  ;;  %v6134_v60 = vmul.f32 %v8232_v16, %v12550_v21  ;;  %v5766_v12 = vpop.f32.mrb[211].mxu1 }
 0xade   : > { %v6185_v51 = vmul.f32 %v6121_v62, %v14122_v35  ;;  %v6217_v19 = vadd.f32 %v6169_v43, %v6153_v10  ;;  %v6243_v17 = vadd.f32 %v6227_v33, %v6195_v55  ;;  %v6133_v28 = vmul.f32 %v12552_v36, %v5766_v12  ;;  %v14125_v33 = vld [vmem:[#allocation161_spill] sm:$0xff]  ;;  %v6008_v36 = vpop.permute.xlu1 %6007  ;;  %v6006_v13 = vpop.permute.xlu0 %6005  ;;  %v14130_v10 = vld [vmem:[#allocation188_spill] sm:$0xff] }
 0xadf   : > { %v6198_v48 = vmul.f32 %v6134_v60, %v14123_v58  ;;  %v6234_v37 = vadd.f32 %v6218_v29, %v6186_v52  ;;  %v14131_v52 = vld [vmem:[#allocation240_spill] sm:$0xff]  ;;  %v14132_v60 = vld [vmem:[#allocation190_spill] sm:$0xff] }
 0xae0   : > { %v6197_v45 = vmul.f32 %v6133_v28, %v14124_v42  ;;  %v8235_v38 = vpop.f32.mrb[212].mxu1  ;;  %6279 = vrot.lane.b32.xlu0 %v6244_v24, %s8549_s24  ;;  %6277 = vrot.lane.b32.xlu1 %v6243_v17, %s8549_s24  ;;  %v6233_v21 = vadd.f32 %v6217_v19, %v6185_v51  ;;  %v14134_v58 = vld [vmem:[#allocation256_spill] sm:$0xff] }
 0xae1   : > { %v6246_v23 = vadd.f32 %v6230_v4, %v6198_v48  ;;  %v6136_v63 = vmul.f32 %v8235_v38, %v6000_v44  ;;  %v5776_v26 = vpop.f32.mrb[213].mxu1  ;;  %v14127_v44 = vld [vmem:[#allocation176_spill] sm:$0xff] }
 0xae2   : > { %v6245_v62 = vadd.f32 %v6229_v1, %v6197_v45  ;;  %v6135_v9 = vmul.f32 %v5998_v11, %v5776_v26  ;;  %v14128_v1 = vld [vmem:[#allocation170_spill] sm:$0xff]  ;;  %v6012_v27 = vpop.permute.xlu1 %6011  ;;  %v6010_v46 = vpop.permute.xlu0 %6009 }
 0xae3   : > { %v6200_v8 = vmul.f32 %v6136_v63, %v14125_v33 }
 0xae4   : > { %v6199_v20 = vmul.f32 %v6135_v9, %v14126_v14  ;;  %v8238_v15 = vpop.f32.mrb[214].mxu1  ;;  %6283 = vrot.lane.b32.xlu0 %v6246_v23, %s8549_s24  ;;  %6281 = vrot.lane.b32.xlu1 %v6245_v62, %s8549_s24 }
 0xae5   : > { %v6248_v54 = vadd.f32 %v6232_v31, %v6200_v8  ;;  %v6138_v3 = vmul.f32 %v8238_v15, %v6004_v39  ;;  %v5786_v22 = vpop.f32.mrb[215].mxu1  ;;  %v14129_v31 = vld [vmem:[#allocation215_spill] sm:$0xff]  ;;  %v14135_v15 = vld [vmem:[#allocation186_spill] sm:$0xff] }
 0xae6   : > { %v6247_v25 = vadd.f32 %v6231_v49, %v6199_v20  ;;  %v6137_v4 = vmul.f32 %v6002_v50, %v5786_v22  ;;  %v6016_v24 = vpop.permute.xlu1 %6015  ;;  %v6014_v35 = vpop.permute.xlu0 %6013 }
 0xae7   : > { %v6202_v0 = vmul.f32 %v6138_v3, %v14127_v44  ;;  %v14136_v3 = vld [vmem:[#allocation189_spill] sm:$0xff] }
 0xae8   : > { %v6201_v11 = vmul.f32 %v6137_v4, %v14128_v1  ;;  %v8241_v41 = vpop.f32.mrb[216].mxu1  ;;  %6287 = vrot.lane.b32.xlu0 %v6248_v54, %s8549_s24  ;;  %6285 = vrot.lane.b32.xlu1 %v6247_v25, %s8549_s24  ;;  %v14137_v1 = vld [vmem:[#allocation197_spill] sm:$0xff] }
 0xae9   : > { %v6250_v7 = vadd.f32 %v6234_v37, %v6202_v0  ;;  %v6140_v56 = vmul.f32 %v8241_v41, %v6008_v36  ;;  %v5796_v18 = vpop.f32.mrb[217].mxu1  ;;  %v14138_v41 = vld [vmem:[#allocation194_spill] sm:$0xff] }
 0xaea   : > { %v6249_v6 = vadd.f32 %v6233_v21, %v6201_v11  ;;  %v6139_v47 = vmul.f32 %v6006_v13, %v5796_v18  ;;  %v6340_v45 = vpop.permute.xlu0 %6339 }
 0xaeb   : > { %v6204_v40 = vmul.f32 %v6140_v56, %v14129_v31  ;;  %v14140_v31 = vld [vmem:[#allocation192_spill] sm:$0xff] }
 0xaec   : > { %v6203_v53 = vmul.f32 %v6139_v47, %v14130_v10  ;;  %v8244_v43 = vpop.f32.mrb[218].mxu1  ;;  %6291 = vrot.lane.b32.xlu0 %v6250_v7, %s8549_s24  ;;  %6289 = vrot.lane.b32.xlu1 %v6249_v6, %s8549_s24  ;;  %v14139_v47 = vld [vmem:[#allocation200_spill] sm:$0xff] }
 0xaed   : > { %v6252_v32 = vadd.f32 %v12541_v61, %v6204_v40  ;;  %v6142_v55 = vmul.f32 %v8244_v43, %v6012_v27  ;;  %v5806_v16 = vpop.f32.mrb[219].mxu1 }
 0xaee   : > { %v6251_v49 = vadd.f32 %v12546_v34, %v6203_v53  ;;  %v6141_v57 = vmul.f32 %v6010_v46, %v5806_v16  ;;  %v14133_v34 = vld [vmem:[#allocation255_spill] sm:$0xff]  ;;  %v6355_v38 = vpop.permute.xlu0 %6354 }
 0xaef   : > { %v6206_v29 = vmul.f32 %v6142_v55, %v14131_v52  ;;  %v14141_v55 = vld [vmem:[#allocation209_spill] sm:$0xff] }
 0xaf0   : > { %v6205_v12 = vmul.f32 %v6141_v57, %v14132_v60  ;;  %v8247_v39 = vpop.f32.mrb[220].mxu1  ;;  %6295 = vrot.lane.b32.xlu0 %v6252_v32, %s8549_s24  ;;  %6293 = vrot.lane.b32.xlu1 %v6251_v49, %s8549_s24  ;;  %v14142_v49 = vld [vmem:[#allocation206_spill] sm:$0xff] }
 0xaf1   : > { %v6254_v51 = vadd.f32 %v12564_v2, %v6206_v29  ;;  %v6144_v19 = vmul.f32 %v8247_v39, %v6016_v24  ;;  %v5816_v61 = vpop.f32.mrb[221].mxu1  ;;  %v6345_v2 = vpop.permute.xlu1 %6344 }
 0xaf2   : > { %v6253_v17 = vadd.f32 %v12570_v59, %v6205_v12  ;;  %v6143_v28 = vmul.f32 %v6014_v35, %v5816_v61  ;;  %v6365_v23 = vpop.permute.xlu0 %6364  ;;  %v14143_v12 = vld [vmem:[#allocation211_spill] sm:$0xff] }
 0xaf3   : > { %v6208_v50 = vmul.f32 %v6144_v19, %v14133_v34  ;;  %v14144_v35 = vld [vmem:[#allocation195_spill] sm:$0xff]  ;;  %v14145_v34 = vld [vmem:[#allocation196_spill] sm:$0xff] }
 0xaf4   : > { %v6207_v48 = vmul.f32 %v6143_v28, %v14134_v58  ;;  %6299 = vrot.lane.b32.xlu0 %v6254_v51, %s8549_s24  ;;  %6297 = vrot.lane.b32.xlu1 %v6253_v17, %s8549_s24  ;;  %v14146_v58 = vld [vmem:[#allocation214_spill] sm:$0xff] }
 0xaf5   : > { %v6256_v37 = vadd.f32 %v12581_v30, %v6208_v50  ;;  %v6350_v59 = vpop.permute.xlu1 %6349 }
 0xaf6   : > { %v6255_v42 = vadd.f32 %v12586_v5, %v6207_v48  ;;  %v6375_v26 = vpop.permute.xlu0 %6374 }
 0xaf8   : > { %6303 = vrot.lane.b32.xlu0 %v6256_v37, %s8549_s24  ;;  %6301 = vrot.lane.b32.xlu1 %v6255_v42, %s8549_s24  ;;  %s12688_s24 = scalar_lea.vmem %s12736_s11, %s8643_s13 }
 0xaf9   : > { %v6360_v21 = vpop.permute.xlu1 %6359 }
 0xafa   : > { %v6385_v9 = vpop.permute.xlu0 %6384 }
 0xafd   : > { %v6370_v63 = vpop.permute.xlu1 %6369 }
 0xafe   : > { %v6395_v8 = vpop.permute.xlu0 %6394 }
 0xb01   : > { %v6380_v62 = vpop.permute.xlu1 %6379 }
 0xb02   : > { %v6405_v30 = vpop.permute.xlu0 %6404 }
 0xb05   : > { %v6390_v33 = vpop.permute.xlu1 %6389 }
 0xb06   : > { %v6415_v5 = vpop.permute.xlu0 %6414 }
 0xb09   : > { %v6400_v36 = vpop.permute.xlu1 %6399 }
 0xb0d   : > { %v6410_v14 = vpop.permute.xlu1 %6409 }
 0xb4d   : > { %v6276_v20 = vpop.permute.xlu1 %6275 }
 0xb4e   : > { %v6322_v13 = vmul.f32 %v14135_v15, %v6276_v20  ;;  %v6274_v54 = vpop.permute.xlu0 %6273  ;;  %v14149_v20 = vld [vmem:[#allocation219_spill] sm:$0xff] }
 0xb4f   : > { %v6321_v22 = vmul.f32 %v6274_v54, %v14136_v3 }
 0xb50   : > { %v6418_v25 = vmul.f32 %v6345_v2, %v6322_v13  ;;  %v14150_v13 = vld [vmem:[#allocation198_spill] sm:$0xff] }
 0xb51   : > { %v6417_v4 = vmul.f32 %v6340_v45, %v6321_v22 }
 0xb52   : > { %6451 = vrot.lane.b32.xlu0 %v6418_v25, %s8550_s27  ;;  %v6278_v44 = vpop.permute.xlu1 %6277  ;;  %v6280_v0 = vpop.permute.xlu0 %6279 }
 0xb53   : > { %v6323_v11 = vmul.f32 %v6278_v44, %v14137_v1  ;;  %v6324_v7 = vmul.f32 %v14138_v41, %v6280_v0  ;;  %6449 = vrot.lane.b32.xlu1 %v6417_v4, %s8550_s27 }
 0xb55   : > { %v6419_v56 = vmul.f32 %v6350_v59, %v6323_v11  ;;  %v6420_v18 = vmul.f32 %v6355_v38, %v6324_v7  ;;  %v14147_v59 = vld [vmem:[#allocation199_spill] sm:$0xff] }
 0xb56   : > { %v6282_v27 = vpop.permute.xlu1 %6281  ;;  %v6284_v6 = vpop.permute.xlu0 %6283 }
 0xb57   : > { %v6325_v46 = vmul.f32 %v6282_v27, %v14139_v47  ;;  %v6326_v40 = vmul.f32 %v14140_v31, %v6284_v6  ;;  %6453 = vrot.lane.b32.xlu1 %v6419_v56, %s8550_s27  ;;  %6455 = vrot.lane.b32.xlu0 %v6420_v18, %s8550_s27 }
 0xb59   : > { %v6421_v10 = vmul.f32 %v6360_v21, %v6325_v46  ;;  %v6422_v53 = vmul.f32 %v6365_v23, %v6326_v40  ;;  %v14148_v21 = vld [vmem:[#allocation213_spill] sm:$0xff] }
 0xb5a   : > { %v6286_v43 = vpop.permute.xlu1 %6285  ;;  %v6288_v32 = vpop.permute.xlu0 %6287 }
 0xb5b   : > { %v6327_v16 = vmul.f32 %v6286_v43, %v14141_v55  ;;  %v6328_v57 = vmul.f32 %v14142_v49, %v6288_v32  ;;  %6457 = vrot.lane.b32.xlu1 %v6421_v10, %s8550_s27  ;;  %6459 = vrot.lane.b32.xlu0 %v6422_v53, %s8550_s27 }
 0xb5d   : > { %v6423_v52 = vmul.f32 %v6370_v63, %v6327_v16  ;;  %v6424_v29 = vmul.f32 %v6375_v26, %v6328_v57 }
 0xb5e   : > { %v6290_v24 = vpop.permute.xlu1 %6289  ;;  %v6292_v60 = vpop.permute.xlu0 %6291 }
 0xb5f   : > { %v6329_v39 = vmul.f32 %v6290_v24, %v14143_v12  ;;  %v6330_v51 = vmul.f32 %v14144_v35, %v6292_v60  ;;  %6461 = vrot.lane.b32.xlu1 %v6423_v52, %s8550_s27  ;;  %6463 = vrot.lane.b32.xlu0 %v6424_v29, %s8550_s27 }
 0xb61   : > { %v6425_v19 = vmul.f32 %v6380_v62, %v6329_v39  ;;  %v6426_v61 = vmul.f32 %v6385_v9, %v6330_v51 }
 0xb62   : > { %v6294_v17 = vpop.permute.xlu1 %6293  ;;  %v6296_v28 = vpop.permute.xlu0 %6295 }
 0xb63   : > { %v6331_v50 = vmul.f32 %v6294_v17, %v14145_v34  ;;  %v6332_v48 = vmul.f32 %v14146_v58, %v6296_v28  ;;  %6465 = vrot.lane.b32.xlu1 %v6425_v19, %s8550_s27  ;;  %6467 = vrot.lane.b32.xlu0 %v6426_v61, %s8550_s27 }
 0xb65   : > { %v6427_v37 = vmul.f32 %v6390_v33, %v6331_v50  ;;  %v6428_v42 = vmul.f32 %v6395_v8, %v6332_v48 }
 0xb66   : > { %v6298_v2 = vpop.permute.xlu1 %6297  ;;  %v6300_v45 = vpop.permute.xlu0 %6299 }
 0xb67   : > { %v6333_v38 = vmul.f32 %v6298_v2, %v14147_v59  ;;  %v6334_v23 = vmul.f32 %v14148_v21, %v6300_v45  ;;  %6469 = vrot.lane.b32.xlu1 %v6427_v37, %s8550_s27  ;;  %6471 = vrot.lane.b32.xlu0 %v6428_v42, %s8550_s27 }
 0xb69   : > { %v6429_v63 = vmul.f32 %v6400_v36, %v6333_v38  ;;  %v6430_v26 = vmul.f32 %v6405_v30, %v6334_v23 }
 0xb6a   : > { %v6302_v62 = vpop.permute.xlu1 %6301  ;;  %v6304_v9 = vpop.permute.xlu0 %6303 }
 0xb6b   : > { %v6335_v15 = vmul.f32 %v6302_v62, %v14149_v20  ;;  %v6336_v33 = vmul.f32 %v14150_v13, %v6304_v9  ;;  %6473 = vrot.lane.b32.xlu1 %v6429_v63, %s8550_s27  ;;  %6475 = vrot.lane.b32.xlu0 %v6430_v26, %s8550_s27 }
 0xb6d   : > { %v6431_v8 = vmul.f32 %v6410_v14, %v6335_v15  ;;  %v6432_v54 = vmul.f32 %v6415_v5, %v6336_v33 }
 0xb6f   : > { %6477 = vrot.lane.b32.xlu1 %v6431_v8, %s8550_s27  ;;  %6479 = vrot.lane.b32.xlu0 %v6432_v54, %s8550_s27 }
 0xbc4   : > { %v6452_v36 = vpop.permute.xlu0 %6451 }
 0xbc5   : > { %6498 = vst.msk [vmem:[%s12688_s24 + $0x8] sm:$0xff] %vm2741_vm4, %v6452_v36  ;;  %v6450_v30 = vpop.permute.xlu1 %6449 }
 0xbc6   : > { %6497 = vst.msk [vmem:[%s12688_s24] sm:$0xff] %vm2741_vm4, %v6450_v30 }
 0xbc9   : > { %v6454_v14 = vpop.permute.xlu1 %6453  ;;  %v6456_v5 = vpop.permute.xlu0 %6455 }
 0xbca   : > { %6499 = vst.msk [vmem:[%s12688_s24 + $0x10] sm:$0xff] %vm2741_vm4, %v6454_v14  ;;  %6500 = vst.msk [vmem:[%s12688_s24 + $0x18] sm:$0xff] %vm2741_vm4, %v6456_v5 }
 0xbcd   : > { %v6458_v3 = vpop.permute.xlu1 %6457  ;;  %v6460_v22 = vpop.permute.xlu0 %6459 }
 0xbce   : > { %6501 = vst.msk [vmem:[%s12688_s24 + $0x20] sm:$0xff] %vm2741_vm4, %v6458_v3  ;;  %6502 = vst.msk [vmem:[%s12688_s24 + $0x28] sm:$0xff] %vm2741_vm4, %v6460_v22 }
 0xbd1   : > { %v6462_v25 = vpop.permute.xlu1 %6461  ;;  %v6464_v4 = vpop.permute.xlu0 %6463 }
 0xbd2   : > { %6503 = vst.msk [vmem:[%s12688_s24 + $0x30] sm:$0xff] %vm2741_vm4, %v6462_v25  ;;  %6504 = vst.msk [vmem:[%s12688_s24 + $0x38] sm:$0xff] %vm2741_vm4, %v6464_v4 }
 0xbd5   : > { %v6466_v44 = vpop.permute.xlu1 %6465  ;;  %v6468_v0 = vpop.permute.xlu0 %6467 }
 0xbd6   : > { %6505 = vst.msk [vmem:[%s12688_s24 + $0x40] sm:$0xff] %vm2741_vm4, %v6466_v44  ;;  %6506 = vst.msk [vmem:[%s12688_s24 + $0x48] sm:$0xff] %vm2741_vm4, %v6468_v0 }
 0xbd9   : > { %v6470_v1 = vpop.permute.xlu1 %6469  ;;  %v6472_v11 = vpop.permute.xlu0 %6471 }
 0xbda   : > { %6507 = vst.msk [vmem:[%s12688_s24 + $0x50] sm:$0xff] %vm2741_vm4, %v6470_v1  ;;  %6508 = vst.msk [vmem:[%s12688_s24 + $0x58] sm:$0xff] %vm2741_vm4, %v6472_v11 }
 0xbdd   : > { %v6474_v41 = vpop.permute.xlu1 %6473  ;;  %v6476_v7 = vpop.permute.xlu0 %6475 }
 0xbde   : > { %6509 = vst.msk [vmem:[%s12688_s24 + $0x60] sm:$0xff] %vm2741_vm4, %v6474_v41  ;;  %6510 = vst.msk [vmem:[%s12688_s24 + $0x68] sm:$0xff] %vm2741_vm4, %v6476_v7 }
 0xbe1   : > { %v6478_v56 = vpop.permute.xlu1 %6477  ;;  %v6480_v18 = vpop.permute.xlu0 %6479 }
 0xbe2   : > { %6511 = vst.msk [vmem:[%s12688_s24 + $0x70] sm:$0xff] %vm2741_vm4, %v6478_v56  ;;  %6512 = vst.msk [vmem:[%s12688_s24 + $0x78] sm:$0xff] %vm2741_vm4, %v6480_v18 }
 0xbe3 PF: > { %s21_s17 = sadd.s32 1, %s8541_s17  }
 0xbe4   : > { %p18_p6 = scmp.ge.s32.totalorder %s21_s17, 4  }
 0xbe6   :  { %20 = sbr.rel (!%p18_p6) target bundleno = 1 (0x1), region = 103 }

</bundles_post_ra>
